<compile_context>
chip_gen: v7x
topology: tpu7x:2x2x1
jax: 0.10.0
libtpu: 0.0.40
codegen_flags: <defaults>
</compile_context>

<pallas_src>
import functools
import math

import jax
import jax.numpy as jnp
import numpy as np
from jax import lax
from jax.experimental import pallas as pl
from jax.experimental.pallas import tpu as pltpu

H = 16
W = 16
HP = H + 2                  # per-image row count including top/bottom pad rows
CHANS = (3, 16, 32, 48)     # conv channel progression 3 -> 16 -> 32 -> 48
D_INT = 8                   # Ultimus intermediate width
N_ULT = 4                   # number of Ultimus blocks
N_CLASSES = 10


# ---------------------------------------------------------------------------
# Fused kernel: convs + GAP + 4x Ultimus + FC, Bt images per grid step
# ---------------------------------------------------------------------------
def fused_net_kernel(x_ref, mask_ref,
                     bw1_ref, s1_ref, sh1_ref,
                     bw2_ref, s2_ref, sh2_ref,
                     bw3_ref, s3_ref, sh3_ref,
                     ppool_ref, pool2_ref,
                     wqkv_ref, bqkv_ref, wo_ref, bo_ref, wf_ref, bf_ref,
                     o_ref,
                     pb1_ref, pb2_ref, pb3_ref):
    # x_ref:    (MP, W*3) f32, MP = Bt*(H+2); per-image pad rows are zero
    # mask_ref: (MP, 1)   f32, 0.0 on per-image pad rows, 1.0 on interior rows
    # bwN_ref:  (3, W*Cin, W*Cout) bf16 banded block-Toeplitz conv weights
    # sN/shN:   (1, W*Cout) f32 folded eval-mode BatchNorm scale/shift
    # ppool:    (Bt, MP) f32 row-pool (1/(H*W) over each image's interior rows)
    # pool2:    (W*48, 48) f32 column-pool (selects channel c from each w block)
    # wqkv:     (4, 48, 24) bqkv: (4, 1, 24)   (q part pre-scaled by 1/sqrt(8))
    # wo:       (4, 8, 48)  bo:   (4, 1, 48)   wf: (48, 10)   bf: (1, 10)
    # o_ref:    (Bt, 10)
    # pbN_ref:  (MP+2, W*Cin) f32 scratch: activation rows at 1..MP, guard
    #           rows 0 and MP+1 (zeroed each step; only contribute to masked
    #           pad output rows).
    mp = pb1_ref.shape[0] - 2
    bt = ppool_ref.shape[0]
    mask = mask_ref[...]                                   # (MP, 1)

    def fill(pbuf, act):
        # Only the 2 guard rows are zeroed; rows 1..MP are fully overwritten.
        pbuf[0:1, :] = jnp.zeros((1, pbuf.shape[1]), pbuf.dtype)
        pbuf[mp + 1:mp + 2, :] = jnp.zeros((1, pbuf.shape[1]), pbuf.dtype)
        pbuf[1:mp + 1, :] = act

    def conv_relu_bn(pbuf, bw_ref, s_ref, sh_ref):
        # out[r] = sum_kh padded_in[r-1+kh] @ bw[kh]; activation operands cast
        # to bf16 (bf16 MXU path), accumulation in f32.
        acc = jnp.dot(pbuf[0:mp, :].astype(jnp.bfloat16), bw_ref[0],
                      preferred_element_type=jnp.float32)
        acc = acc + jnp.dot(pbuf[1:mp + 1, :].astype(jnp.bfloat16), bw_ref[1],
                            preferred_element_type=jnp.float32)
        acc = acc + jnp.dot(pbuf[2:mp + 2, :].astype(jnp.bfloat16), bw_ref[2],
                            preferred_element_type=jnp.float32)
        y = jnp.maximum(acc, 0.0) * s_ref[...] + sh_ref[...]   # ReLU then BN
        return y * mask                                        # re-zero pad rows

    fill(pb1_ref, x_ref[...])
    a1 = conv_relu_bn(pb1_ref, bw1_ref, s1_ref, sh1_ref)       # (MP, W*16)
    fill(pb2_ref, a1)
    a2 = conv_relu_bn(pb2_ref, bw2_ref, s2_ref, sh2_ref)       # (MP, W*32)
    fill(pb3_ref, a2)
    a3 = conv_relu_bn(pb3_ref, bw3_ref, s3_ref, sh3_ref)       # (MP, W*48)

    # Global average pool as two lane-dense matmuls (no reshape relayout).
    zr = jnp.dot(ppool_ref[...], a3, preferred_element_type=jnp.float32)
    z = jnp.dot(zr, pool2_ref[...], preferred_element_type=jnp.float32)  # (Bt, 48)

    for l in range(N_ULT):                                     # 4 Ultimus blocks
        qkv = jnp.dot(z, wqkv_ref[l],
                      preferred_element_type=jnp.float32) + bqkv_ref[l]  # (Bt, 24)
        q = qkv[:, 0:D_INT]                 # already scaled by 1/sqrt(8)
        k = qkv[:, D_INT:2 * D_INT]
        v = qkv[:, 2 * D_INT:3 * D_INT]
        # torch views q/k/v as (bs, 8, 1): scores[b,i,j] = q[b,i]*k[b,j]
        scores = q.reshape(bt, D_INT, 1) * k.reshape(bt, 1, D_INT)
        m = jnp.max(scores, axis=2, keepdims=True)
        e = jnp.exp(scores - m)
        attn = e / jnp.sum(e, axis=2, keepdims=True)           # softmax over dim=2
        out8 = jnp.sum(attn * v.reshape(bt, 1, D_INT), axis=2)  # (Bt, 8)
        z = jnp.dot(out8, wo_ref[l],
                    preferred_element_type=jnp.float32) + bo_ref[l]      # (Bt, 48)

    logits = jnp.dot(z, wf_ref[...],
                     preferred_element_type=jnp.float32) + bf_ref[...]   # (Bt, 10)
    o_ref[...] = logits.astype(o_ref.dtype)


# ---------------------------------------------------------------------------
# Host-side weight preprocessing
# ---------------------------------------------------------------------------
def _band_conv_weight(w_hwio, width):
    """(3,3,Cin,Cout) conv kernel -> (3, width*Cin, width*Cout) banded matrices.

    acc[r] = sum_kh padded_row[r-1+kh] @ bw[kh] reproduces a pad=1 3x3
    cross-correlation on lane-dense (row, w*Cin) activations.
    """
    w = np.asarray(w_hwio, dtype=np.float32)
    _, _, cin, cout = w.shape
    bw = np.zeros((3, width * cin, width * cout), np.float32)
    for kh in range(3):
        for wo_col in range(width):
            for kw in range(3):
                wi = wo_col + kw - 1
                if 0 <= wi < width:
                    bw[kh,
                       wi * cin:(wi + 1) * cin,
                       wo_col * cout:(wo_col + 1) * cout] = w[kh, kw]
    return bw


def pack_params(params):
    """Kernel-ready tensors: bf16 banded conv weights, tiled BN scale/shift,
    fused (scaled) QKV weights, GAP column-pool matrix."""
    kp = {}
    for i, (w, scale, shift) in enumerate(params["convs"], start=1):
        kp[f"bw{i}"] = jnp.asarray(_band_conv_weight(w, W), jnp.bfloat16)
        kp[f"s{i}"] = jnp.tile(scale.reshape(-1), W).reshape(1, -1)
        kp[f"sh{i}"] = jnp.tile(shift.reshape(-1), W).reshape(1, -1)

    inv_sqrt_d = 1.0 / math.sqrt(float(D_INT))
    kp["wqkv"] = jnp.concatenate(
        [params["wq"] * inv_sqrt_d, params["wk"], params["wv"]], axis=-1)
    kp["bqkv"] = jnp.concatenate(
        [params["bq"] * inv_sqrt_d, params["bk"], params["bv"]], axis=-1)
    kp["wo"] = params["wo"]
    kp["bo"] = params["bo"]
    kp["wf"] = params["wf"]
    kp["bf"] = params["bf"]

    c3 = CHANS[3]
    pool2 = np.zeros((W * c3, c3), np.float32)
    for wcol in range(W):
        for c in range(c3):
            pool2[wcol * c3 + c, c] = 1.0
    kp["pool2"] = jnp.asarray(pool2)
    return kp


# ---------------------------------------------------------------------------
# Wrapper: one fused pallas_call for the whole forward pass
# ---------------------------------------------------------------------------
def net_forward(x_nchw, kparams, batch_tile=16):
    # batch_tile=16 fills the v6e/v7x MXU (M=288); use 8 on v5e.  Must be a
    # multiple of 8 when it does not cover the whole (padded) batch.
    B = x_nchw.shape[0]
    bt = B if B <= batch_tile else batch_tile
    b_pad = ((B + bt - 1) // bt) * bt
    grid = b_pad // bt
    mp = bt * HP

    # NCHW -> NHWC -> per-image zero pad rows -> lane-dense (b_pad*HP, W*3)
    x = jnp.transpose(x_nchw, (0, 2, 3, 1)).reshape(B, H, W * CHANS[0])
    x = jnp.pad(x, ((0, b_pad - B), (1, 1), (0, 0)))
    x_p = x.reshape(b_pad * HP, W * CHANS[0])

    # Per-image pad-row mask and GAP row-pool matrix (depend on bt only).
    local = np.arange(mp) % HP
    mask = ((local != 0) & (local != HP - 1)).astype(np.float32).reshape(mp, 1)
    ppool = np.zeros((bt, mp), np.float32)
    for b in range(bt):
        ppool[b, b * HP + 1: b * HP + 1 + H] = 1.0 / float(H * W)
    mask = jnp.asarray(mask)
    ppool = jnp.asarray(ppool)

    def cspec(shape):
        nd = len(shape)
        return pl.BlockSpec(shape, lambda g, _nd=nd: (0,) * _nd)

    in_specs = [
        pl.BlockSpec((mp, W * CHANS[0]), lambda g: (g, 0)),     # x_p
        cspec((mp, 1)),                                          # mask
        cspec((3, W * CHANS[0], W * CHANS[1])),                  # bw1
        cspec((1, W * CHANS[1])),                                # s1
        cspec((1, W * CHANS[1])),                                # sh1
        cspec((3, W * CHANS[1], W * CHANS[2])),                  # bw2
        cspec((1, W * CHANS[2])),                                # s2
        cspec((1, W * CHANS[2])),                                # sh2
        cspec((3, W * CHANS[2], W * CHANS[3])),                  # bw3
        cspec((1, W * CHANS[3])),                                # s3
        cspec((1, W * CHANS[3])),                                # sh3
        cspec((bt, mp)),                                         # ppool
        cspec((W * CHANS[3], CHANS[3])),                         # pool2
        cspec((N_ULT, CHANS[3], 3 * D_INT)),                     # wqkv
        cspec((N_ULT, 1, 3 * D_INT)),                            # bqkv
        cspec((N_ULT, D_INT, CHANS[3])),                         # wo
        cspec((N_ULT, 1, CHANS[3])),                             # bo
        cspec((CHANS[3], N_CLASSES)),                            # wf
        cspec((1, N_CLASSES)),                                   # bf
    ]
    out_specs = pl.BlockSpec((bt, N_CLASSES), lambda g: (g, 0))
    scratch_shapes = [
        pltpu.VMEM((mp + 2, W * CHANS[0]), jnp.float32),
        pltpu.VMEM((mp + 2, W * CHANS[1]), jnp.float32),
        pltpu.VMEM((mp + 2, W * CHANS[2]), jnp.float32),
    ]

    out = pl.pallas_call(
        fused_net_kernel,
        out_shape=jax.ShapeDtypeStruct((b_pad, N_CLASSES), jnp.float32),
        grid=(grid,),
        in_specs=in_specs,
        out_specs=out_specs,
        scratch_shapes=scratch_shapes,
        compiler_params=pltpu.CompilerParams(
            dimension_semantics=("parallel",),
            vmem_limit_bytes=40 * 1024 * 1024),
    )(x_p, mask,
      kparams["bw1"], kparams["s1"], kparams["sh1"],
      kparams["bw2"], kparams["s2"], kparams["sh2"],
      kparams["bw3"], kparams["s3"], kparams["sh3"],
      ppool, kparams["pool2"],
      kparams["wqkv"], kparams["bqkv"], kparams["wo"], kparams["bo"],
      kparams["wf"], kparams["bf"])
    return out[:B]


# ---------------------------------------------------------------------------
# Deterministic parameter init (module-style params) + pure-JAX references
# ---------------------------------------------------------------------------
def init_params(key):
    ks = iter(jax.random.split(key, 32))
    nrm = lambda shape, s: s * jax.random.normal(next(ks), shape, jnp.float32)

    params = {}
    convs = []
    eps = 1e-5
    for i in range(3):
        cin, cout = CHANS[i], CHANS[i + 1]
        w = nrm((3, 3, cin, cout), 0.2)
        gamma = 1.0 + nrm((cout,), 0.1)
        beta = nrm((cout,), 0.1)
        rmean = nrm((cout,), 0.05)
        rvar = 1.0 + 0.1 * jnp.abs(jax.random.normal(next(ks), (cout,), jnp.float32))
        # TODO(synk): BatchNorm uses eval-mode running stats folded into
        # scale/shift; training-mode batch statistics are not reproduced.
        scale = (gamma / jnp.sqrt(rvar + eps)).reshape(1, cout)
        shift = (beta - rmean * gamma / jnp.sqrt(rvar + eps)).reshape(1, cout)
        convs.append((w, scale, shift))
    params["convs"] = convs

    params["wq"] = nrm((N_ULT, 48, 8), 0.15)
    params["bq"] = nrm((N_ULT, 1, 8), 0.05)
    params["wk"] = nrm((N_ULT, 48, 8), 0.15)
    params["bk"] = nrm((N_ULT, 1, 8), 0.05)
    params["wv"] = nrm((N_ULT, 48, 8), 0.15)
    params["bv"] = nrm((N_ULT, 1, 8), 0.05)
    params["wo"] = nrm((N_ULT, 8, 48), 0.15)
    params["bo"] = nrm((N_ULT, 1, 48), 0.05)
    params["wf"] = nrm((48, 10), 0.15)
    params["bf"] = nrm((1, 10), 0.05)
    return params


def reference_forward(x_nchw, params, conv_input_dtype=None):
    """Pure-JAX reference.  conv_input_dtype=jnp.bfloat16 rounds conv operands
    to bf16 (f32 accumulation), matching the kernel's MXU numerics."""
    dot = functools.partial(jnp.dot, precision=lax.Precision.HIGHEST)

    def rnd(a):
        if conv_input_dtype is None:
            return a
        return a.astype(conv_input_dtype).astype(jnp.float32)

    x = jnp.transpose(x_nchw, (0, 2, 3, 1))
    for (w, scale, shift) in params["convs"]:
        y = lax.conv_general_dilated(
            rnd(x), rnd(w), window_strides=(1, 1), padding="SAME",
            dimension_numbers=("NHWC", "HWIO", "NHWC"),
            precision=lax.Precision.HIGHEST)
        y = jnp.maximum(y, 0.0)
        x = y * scale.reshape(1, 1, 1, -1) + shift.reshape(1, 1, 1, -1)
    h = jnp.mean(x, axis=(1, 2))
    for l in range(N_ULT):
        q = dot(h, params["wq"][l]) + params["bq"][l]
        k = dot(h, params["wk"][l]) + params["bk"][l]
        v = dot(h, params["wv"][l]) + params["bv"][l]
        scores = (q[:, :, None] * k[:, None, :]) / jnp.sqrt(float(D_INT))
        attn = jax.nn.softmax(scores, axis=2)
        out8 = jnp.sum(attn * v[:, None, :], axis=2)
        h = dot(out8, params["wo"][l]) + params["bo"][l]
    return dot(h, params["wf"]) + params["bf"]


if __name__ == "__main__":
    key = jax.random.PRNGKey(0)
    pkey, xkey = jax.random.split(key)
    params = init_params(pkey)
    kparams = pack_params(params)

    # PyTorch-style NCHW input (batch=2, channels=3, spatial=16x16).
    x = jax.random.normal(xkey, (2, CHANS[0], H, W), jnp.float32)

    out = net_forward(x, kparams)
    out = jax.block_until_ready(out)
    assert out.shape == (2, N_CLASSES) and out.dtype == jnp.float32

    # 1) Numerics-matched reference (conv operands rounded to bf16, f32
    #    accumulation, exactly like the kernel's MXU path): tight agreement.
    ref_bf16 = reference_forward(x, params, conv_input_dtype=jnp.bfloat16)
    np.testing.assert_allclose(np.asarray(out), np.asarray(ref_bf16),
                               rtol=5e-3, atol=5e-3)

    # 2) Full-f32 reference: the difference is bounded by the documented bf16
    #    rounding of the conv operands (performance-review item #3).
    ref_f32 = reference_forward(x, params)
    np.testing.assert_allclose(np.asarray(out), np.asarray(ref_f32),
                               rtol=1e-1, atol=1e-1)

    print("KERNEL_OK")
</pallas_src>

<mosaic_0001>
module attributes {stable_mosaic.version = 11 : i64} {
  func.func @fused_net_kernel(%arg0: i32, %arg1: memref<36x48xf32, #tpu.memory_space<vmem>>, %arg2: memref<36x1xf32, #tpu.memory_space<vmem>>, %arg3: memref<3x48x256xbf16, #tpu.memory_space<vmem>>, %arg4: memref<1x256xf32, #tpu.memory_space<vmem>>, %arg5: memref<1x256xf32, #tpu.memory_space<vmem>>, %arg6: memref<3x256x512xbf16, #tpu.memory_space<vmem>>, %arg7: memref<1x512xf32, #tpu.memory_space<vmem>>, %arg8: memref<1x512xf32, #tpu.memory_space<vmem>>, %arg9: memref<3x512x768xbf16, #tpu.memory_space<vmem>>, %arg10: memref<1x768xf32, #tpu.memory_space<vmem>>, %arg11: memref<1x768xf32, #tpu.memory_space<vmem>>, %arg12: memref<2x36xf32, #tpu.memory_space<vmem>>, %arg13: memref<768x48xf32, #tpu.memory_space<vmem>>, %arg14: memref<4x48x24xf32, #tpu.memory_space<vmem>>, %arg15: memref<4x1x24xf32, #tpu.memory_space<vmem>>, %arg16: memref<4x8x48xf32, #tpu.memory_space<vmem>>, %arg17: memref<4x1x48xf32, #tpu.memory_space<vmem>>, %arg18: memref<48x10xf32, #tpu.memory_space<vmem>>, %arg19: memref<1x10xf32, #tpu.memory_space<vmem>>, %arg20: memref<2x10xf32, #tpu.memory_space<vmem>>, %arg21: memref<38x48xf32, #tpu.memory_space<vmem>>, %arg22: memref<38x256xf32, #tpu.memory_space<vmem>>, %arg23: memref<38x512xf32, #tpu.memory_space<vmem>>) attributes {dimension_semantics = [#tpu.dimension_semantics<parallel>], iteration_bounds = array<i64: 1>, scalar_prefetch = 0 : i64, scratch_operands = 3 : i64, tpu.core_type = #tpu.core_type<tc>, window_params = [{transform_indices = @transform_0, window_bounds = array<i64: 36, 48>}, {pipeline_mode = #tpu.pipeline_mode<synchronous>, transform_indices = @transform_1, window_bounds = array<i64: 36, 1>}, {pipeline_mode = #tpu.pipeline_mode<synchronous>, transform_indices = @transform_2, window_bounds = array<i64: 3, 48, 256>}, {pipeline_mode = #tpu.pipeline_mode<synchronous>, transform_indices = @transform_3, window_bounds = array<i64: 1, 256>}, {pipeline_mode = #tpu.pipeline_mode<synchronous>, transform_indices = @transform_4, window_bounds = array<i64: 1, 256>}, {pipeline_mode = #tpu.pipeline_mode<synchronous>, transform_indices = @transform_5, window_bounds = array<i64: 3, 256, 512>}, {pipeline_mode = #tpu.pipeline_mode<synchronous>, transform_indices = @transform_6, window_bounds = array<i64: 1, 512>}, {pipeline_mode = #tpu.pipeline_mode<synchronous>, transform_indices = @transform_7, window_bounds = array<i64: 1, 512>}, {pipeline_mode = #tpu.pipeline_mode<synchronous>, transform_indices = @transform_8, window_bounds = array<i64: 3, 512, 768>}, {pipeline_mode = #tpu.pipeline_mode<synchronous>, transform_indices = @transform_9, window_bounds = array<i64: 1, 768>}, {pipeline_mode = #tpu.pipeline_mode<synchronous>, transform_indices = @transform_10, window_bounds = array<i64: 1, 768>}, {pipeline_mode = #tpu.pipeline_mode<synchronous>, transform_indices = @transform_11, window_bounds = array<i64: 2, 36>}, {pipeline_mode = #tpu.pipeline_mode<synchronous>, transform_indices = @transform_12, window_bounds = array<i64: 768, 48>}, {pipeline_mode = #tpu.pipeline_mode<synchronous>, transform_indices = @transform_13, window_bounds = array<i64: 4, 48, 24>}, {pipeline_mode = #tpu.pipeline_mode<synchronous>, transform_indices = @transform_14, window_bounds = array<i64: 4, 1, 24>}, {pipeline_mode = #tpu.pipeline_mode<synchronous>, transform_indices = @transform_15, window_bounds = array<i64: 4, 8, 48>}, {pipeline_mode = #tpu.pipeline_mode<synchronous>, transform_indices = @transform_16, window_bounds = array<i64: 4, 1, 48>}, {pipeline_mode = #tpu.pipeline_mode<synchronous>, transform_indices = @transform_17, window_bounds = array<i64: 48, 10>}, {pipeline_mode = #tpu.pipeline_mode<synchronous>, transform_indices = @transform_18, window_bounds = array<i64: 1, 10>}, {transform_indices = @transform_19, window_bounds = array<i64: 2, 10>}]} {
    %c0 = arith.constant 0 : index
    %c0_0 = arith.constant 0 : index
    %0 = vector.load %arg2[%c0, %c0_0] : memref<36x1xf32, #tpu.memory_space<vmem>>, vector<36x1xf32>
    %c0_1 = arith.constant 0 : index
    %c0_2 = arith.constant 0 : index
    %1 = vector.load %arg1[%c0_1, %c0_2] : memref<36x48xf32, #tpu.memory_space<vmem>>, vector<36x48xf32>
    %cst = arith.constant 0.000000e+00 : f32
    %2 = vector.broadcast %cst : f32 to vector<1x48xf32>
    %c0_3 = arith.constant 0 : index
    %c0_4 = arith.constant 0 : index
    %3 = vector.load %arg21[%c0_3, %c0_4] : memref<38x48xf32, #tpu.memory_space<vmem>>, vector<1x48xf32>
    tpu.vector_store %arg21[%c0_3, %c0_4], %2 {strides = array<i32>} : memref<38x48xf32, #tpu.memory_space<vmem>>, vector<1x48xf32>,
    %cst_5 = arith.constant 0.000000e+00 : f32
    %4 = vector.broadcast %cst_5 : f32 to vector<1x48xf32>
    %c37 = arith.constant 37 : index
    %c0_6 = arith.constant 0 : index
    %5 = vector.load %arg21[%c37, %c0_6] : memref<38x48xf32, #tpu.memory_space<vmem>>, vector<1x48xf32>
    tpu.vector_store %arg21[%c37, %c0_6], %4 {strides = array<i32>} : memref<38x48xf32, #tpu.memory_space<vmem>>, vector<1x48xf32>,
    %c1 = arith.constant 1 : index
    %c0_7 = arith.constant 0 : index
    %6 = vector.load %arg21[%c1, %c0_7] : memref<38x48xf32, #tpu.memory_space<vmem>>, vector<36x48xf32>
    tpu.vector_store %arg21[%c1, %c0_7], %1 {strides = array<i32>} : memref<38x48xf32, #tpu.memory_space<vmem>>, vector<36x48xf32>,
    %c0_8 = arith.constant 0 : index
    %c0_9 = arith.constant 0 : index
    %7 = vector.load %arg21[%c0_8, %c0_9] : memref<38x48xf32, #tpu.memory_space<vmem>>, vector<36x48xf32>
    %8 = arith.truncf %7 : vector<36x48xf32> to vector<36x48xbf16>
    %c0_10 = arith.constant 0 : index
    %c0_11 = arith.constant 0 : index
    %c0_12 = arith.constant 0 : index
    %9 = vector.load %arg3[%c0_10, %c0_11, %c0_12] : memref<3x48x256xbf16, #tpu.memory_space<vmem>>, vector<1x48x256xbf16>
    %10 = vector.shape_cast %9 : vector<1x48x256xbf16> to vector<48x256xbf16>
    %cst_13 = arith.constant dense<0.000000e+00> : vector<36x256xf32>
    %11 = tpu.matmul %8, %10, %cst_13 {dimension_numbers = #tpu.dot_dimension_numbers<[1], [0], [0], [1], [0, 0, 1, 1], [], []>} : vector<36x48xbf16>, vector<48x256xbf16>, vector<36x256xf32> -> vector<36x256xf32>
    %c1_14 = arith.constant 1 : index
    %c0_15 = arith.constant 0 : index
    %12 = vector.load %arg21[%c1_14, %c0_15] : memref<38x48xf32, #tpu.memory_space<vmem>>, vector<36x48xf32>
    %13 = arith.truncf %12 : vector<36x48xf32> to vector<36x48xbf16>
    %c1_16 = arith.constant 1 : index
    %c0_17 = arith.constant 0 : index
    %c0_18 = arith.constant 0 : index
    %14 = vector.load %arg3[%c1_16, %c0_17, %c0_18] : memref<3x48x256xbf16, #tpu.memory_space<vmem>>, vector<1x48x256xbf16>
    %15 = vector.shape_cast %14 : vector<1x48x256xbf16> to vector<48x256xbf16>
    %cst_19 = arith.constant dense<0.000000e+00> : vector<36x256xf32>
    %16 = tpu.matmul %13, %15, %cst_19 {dimension_numbers = #tpu.dot_dimension_numbers<[1], [0], [0], [1], [0, 0, 1, 1], [], []>} : vector<36x48xbf16>, vector<48x256xbf16>, vector<36x256xf32> -> vector<36x256xf32>
    %17 = arith.addf %11, %16 : vector<36x256xf32>
    %c2 = arith.constant 2 : index
    %c0_20 = arith.constant 0 : index
    %18 = vector.load %arg21[%c2, %c0_20] : memref<38x48xf32, #tpu.memory_space<vmem>>, vector<36x48xf32>
    %19 = arith.truncf %18 : vector<36x48xf32> to vector<36x48xbf16>
    %c2_21 = arith.constant 2 : index
    %c0_22 = arith.constant 0 : index
    %c0_23 = arith.constant 0 : index
    %20 = vector.load %arg3[%c2_21, %c0_22, %c0_23] : memref<3x48x256xbf16, #tpu.memory_space<vmem>>, vector<1x48x256xbf16>
    %21 = vector.shape_cast %20 : vector<1x48x256xbf16> to vector<48x256xbf16>
    %cst_24 = arith.constant dense<0.000000e+00> : vector<36x256xf32>
    %22 = tpu.matmul %19, %21, %cst_24 {dimension_numbers = #tpu.dot_dimension_numbers<[1], [0], [0], [1], [0, 0, 1, 1], [], []>} : vector<36x48xbf16>, vector<48x256xbf16>, vector<36x256xf32> -> vector<36x256xf32>
    %23 = arith.addf %17, %22 : vector<36x256xf32>
    %cst_25 = arith.constant 0.000000e+00 : f32
    %24 = vector.broadcast %cst_25 : f32 to vector<36x256xf32>
    %25 = arith.maximumf %23, %24 : vector<36x256xf32>
    %c0_26 = arith.constant 0 : index
    %c0_27 = arith.constant 0 : index
    %26 = vector.load %arg4[%c0_26, %c0_27] : memref<1x256xf32, #tpu.memory_space<vmem>>, vector<1x256xf32>
    %27 = vector.broadcast %26 : vector<1x256xf32> to vector<36x256xf32>
    %28 = arith.mulf %25, %27 : vector<36x256xf32>
    %c0_28 = arith.constant 0 : index
    %c0_29 = arith.constant 0 : index
    %29 = vector.load %arg5[%c0_28, %c0_29] : memref<1x256xf32, #tpu.memory_space<vmem>>, vector<1x256xf32>
    %30 = vector.broadcast %29 : vector<1x256xf32> to vector<36x256xf32>
    %31 = arith.addf %28, %30 : vector<36x256xf32>
    %32 = vector.broadcast %0 : vector<36x1xf32> to vector<36x256xf32>
    %33 = arith.mulf %31, %32 : vector<36x256xf32>
    %cst_30 = arith.constant 0.000000e+00 : f32
    %34 = vector.broadcast %cst_30 : f32 to vector<1x256xf32>
    %c0_31 = arith.constant 0 : index
    %c0_32 = arith.constant 0 : index
    %35 = vector.load %arg22[%c0_31, %c0_32] : memref<38x256xf32, #tpu.memory_space<vmem>>, vector<1x256xf32>
    tpu.vector_store %arg22[%c0_31, %c0_32], %34 {strides = array<i32>} : memref<38x256xf32, #tpu.memory_space<vmem>>, vector<1x256xf32>,
    %cst_33 = arith.constant 0.000000e+00 : f32
    %36 = vector.broadcast %cst_33 : f32 to vector<1x256xf32>
    %c37_34 = arith.constant 37 : index
    %c0_35 = arith.constant 0 : index
    %37 = vector.load %arg22[%c37_34, %c0_35] : memref<38x256xf32, #tpu.memory_space<vmem>>, vector<1x256xf32>
    tpu.vector_store %arg22[%c37_34, %c0_35], %36 {strides = array<i32>} : memref<38x256xf32, #tpu.memory_space<vmem>>, vector<1x256xf32>,
    %c1_36 = arith.constant 1 : index
    %c0_37 = arith.constant 0 : index
    %38 = vector.load %arg22[%c1_36, %c0_37] : memref<38x256xf32, #tpu.memory_space<vmem>>, vector<36x256xf32>
    tpu.vector_store %arg22[%c1_36, %c0_37], %33 {strides = array<i32>} : memref<38x256xf32, #tpu.memory_space<vmem>>, vector<36x256xf32>,
    %c0_38 = arith.constant 0 : index
    %c0_39 = arith.constant 0 : index
    %39 = vector.load %arg22[%c0_38, %c0_39] : memref<38x256xf32, #tpu.memory_space<vmem>>, vector<36x256xf32>
    %40 = arith.truncf %39 : vector<36x256xf32> to vector<36x256xbf16>
    %c0_40 = arith.constant 0 : index
    %c0_41 = arith.constant 0 : index
    %c0_42 = arith.constant 0 : index
    %41 = vector.load %arg6[%c0_40, %c0_41, %c0_42] : memref<3x256x512xbf16, #tpu.memory_space<vmem>>, vector<1x256x512xbf16>
    %42 = vector.shape_cast %41 : vector<1x256x512xbf16> to vector<256x512xbf16>
    %cst_43 = arith.constant dense<0.000000e+00> : vector<36x512xf32>
    %43 = tpu.matmul %40, %42, %cst_43 {dimension_numbers = #tpu.dot_dimension_numbers<[1], [0], [0], [1], [0, 0, 1, 1], [], []>} : vector<36x256xbf16>, vector<256x512xbf16>, vector<36x512xf32> -> vector<36x512xf32>
    %c1_44 = arith.constant 1 : index
    %c0_45 = arith.constant 0 : index
    %44 = vector.load %arg22[%c1_44, %c0_45] : memref<38x256xf32, #tpu.memory_space<vmem>>, vector<36x256xf32>
    %45 = arith.truncf %44 : vector<36x256xf32> to vector<36x256xbf16>
    %c1_46 = arith.constant 1 : index
    %c0_47 = arith.constant 0 : index
    %c0_48 = arith.constant 0 : index
    %46 = vector.load %arg6[%c1_46, %c0_47, %c0_48] : memref<3x256x512xbf16, #tpu.memory_space<vmem>>, vector<1x256x512xbf16>
    %47 = vector.shape_cast %46 : vector<1x256x512xbf16> to vector<256x512xbf16>
    %cst_49 = arith.constant dense<0.000000e+00> : vector<36x512xf32>
    %48 = tpu.matmul %45, %47, %cst_49 {dimension_numbers = #tpu.dot_dimension_numbers<[1], [0], [0], [1], [0, 0, 1, 1], [], []>} : vector<36x256xbf16>, vector<256x512xbf16>, vector<36x512xf32> -> vector<36x512xf32>
    %49 = arith.addf %43, %48 : vector<36x512xf32>
    %c2_50 = arith.constant 2 : index
    %c0_51 = arith.constant 0 : index
    %50 = vector.load %arg22[%c2_50, %c0_51] : memref<38x256xf32, #tpu.memory_space<vmem>>, vector<36x256xf32>
    %51 = arith.truncf %50 : vector<36x256xf32> to vector<36x256xbf16>
    %c2_52 = arith.constant 2 : index
    %c0_53 = arith.constant 0 : index
    %c0_54 = arith.constant 0 : index
    %52 = vector.load %arg6[%c2_52, %c0_53, %c0_54] : memref<3x256x512xbf16, #tpu.memory_space<vmem>>, vector<1x256x512xbf16>
    %53 = vector.shape_cast %52 : vector<1x256x512xbf16> to vector<256x512xbf16>
    %cst_55 = arith.constant dense<0.000000e+00> : vector<36x512xf32>
    %54 = tpu.matmul %51, %53, %cst_55 {dimension_numbers = #tpu.dot_dimension_numbers<[1], [0], [0], [1], [0, 0, 1, 1], [], []>} : vector<36x256xbf16>, vector<256x512xbf16>, vector<36x512xf32> -> vector<36x512xf32>
    %55 = arith.addf %49, %54 : vector<36x512xf32>
    %cst_56 = arith.constant 0.000000e+00 : f32
    %56 = vector.broadcast %cst_56 : f32 to vector<36x512xf32>
    %57 = arith.maximumf %55, %56 : vector<36x512xf32>
    %c0_57 = arith.constant 0 : index
    %c0_58 = arith.constant 0 : index
    %58 = vector.load %arg7[%c0_57, %c0_58] : memref<1x512xf32, #tpu.memory_space<vmem>>, vector<1x512xf32>
    %59 = vector.broadcast %58 : vector<1x512xf32> to vector<36x512xf32>
    %60 = arith.mulf %57, %59 : vector<36x512xf32>
    %c0_59 = arith.constant 0 : index
    %c0_60 = arith.constant 0 : index
    %61 = vector.load %arg8[%c0_59, %c0_60] : memref<1x512xf32, #tpu.memory_space<vmem>>, vector<1x512xf32>
    %62 = vector.broadcast %61 : vector<1x512xf32> to vector<36x512xf32>
    %63 = arith.addf %60, %62 : vector<36x512xf32>
    %64 = vector.broadcast %0 : vector<36x1xf32> to vector<36x512xf32>
    %65 = arith.mulf %63, %64 : vector<36x512xf32>
    %cst_61 = arith.constant 0.000000e+00 : f32
    %66 = vector.broadcast %cst_61 : f32 to vector<1x512xf32>
    %c0_62 = arith.constant 0 : index
    %c0_63 = arith.constant 0 : index
    %67 = vector.load %arg23[%c0_62, %c0_63] : memref<38x512xf32, #tpu.memory_space<vmem>>, vector<1x512xf32>
    tpu.vector_store %arg23[%c0_62, %c0_63], %66 {strides = array<i32>} : memref<38x512xf32, #tpu.memory_space<vmem>>, vector<1x512xf32>,
    %cst_64 = arith.constant 0.000000e+00 : f32
    %68 = vector.broadcast %cst_64 : f32 to vector<1x512xf32>
    %c37_65 = arith.constant 37 : index
    %c0_66 = arith.constant 0 : index
    %69 = vector.load %arg23[%c37_65, %c0_66] : memref<38x512xf32, #tpu.memory_space<vmem>>, vector<1x512xf32>
    tpu.vector_store %arg23[%c37_65, %c0_66], %68 {strides = array<i32>} : memref<38x512xf32, #tpu.memory_space<vmem>>, vector<1x512xf32>,
    %c1_67 = arith.constant 1 : index
    %c0_68 = arith.constant 0 : index
    %70 = vector.load %arg23[%c1_67, %c0_68] : memref<38x512xf32, #tpu.memory_space<vmem>>, vector<36x512xf32>
    tpu.vector_store %arg23[%c1_67, %c0_68], %65 {strides = array<i32>} : memref<38x512xf32, #tpu.memory_space<vmem>>, vector<36x512xf32>,
    %c0_69 = arith.constant 0 : index
    %c0_70 = arith.constant 0 : index
    %71 = vector.load %arg23[%c0_69, %c0_70] : memref<38x512xf32, #tpu.memory_space<vmem>>, vector<36x512xf32>
    %72 = arith.truncf %71 : vector<36x512xf32> to vector<36x512xbf16>
    %c0_71 = arith.constant 0 : index
    %c0_72 = arith.constant 0 : index
    %c0_73 = arith.constant 0 : index
    %73 = vector.load %arg9[%c0_71, %c0_72, %c0_73] : memref<3x512x768xbf16, #tpu.memory_space<vmem>>, vector<1x512x768xbf16>
    %74 = vector.shape_cast %73 : vector<1x512x768xbf16> to vector<512x768xbf16>
    %cst_74 = arith.constant dense<0.000000e+00> : vector<36x768xf32>
    %75 = tpu.matmul %72, %74, %cst_74 {dimension_numbers = #tpu.dot_dimension_numbers<[1], [0], [0], [1], [0, 0, 1, 1], [], []>} : vector<36x512xbf16>, vector<512x768xbf16>, vector<36x768xf32> -> vector<36x768xf32>
    %c1_75 = arith.constant 1 : index
    %c0_76 = arith.constant 0 : index
    %76 = vector.load %arg23[%c1_75, %c0_76] : memref<38x512xf32, #tpu.memory_space<vmem>>, vector<36x512xf32>
    %77 = arith.truncf %76 : vector<36x512xf32> to vector<36x512xbf16>
    %c1_77 = arith.constant 1 : index
    %c0_78 = arith.constant 0 : index
    %c0_79 = arith.constant 0 : index
    %78 = vector.load %arg9[%c1_77, %c0_78, %c0_79] : memref<3x512x768xbf16, #tpu.memory_space<vmem>>, vector<1x512x768xbf16>
    %79 = vector.shape_cast %78 : vector<1x512x768xbf16> to vector<512x768xbf16>
    %cst_80 = arith.constant dense<0.000000e+00> : vector<36x768xf32>
    %80 = tpu.matmul %77, %79, %cst_80 {dimension_numbers = #tpu.dot_dimension_numbers<[1], [0], [0], [1], [0, 0, 1, 1], [], []>} : vector<36x512xbf16>, vector<512x768xbf16>, vector<36x768xf32> -> vector<36x768xf32>
    %81 = arith.addf %75, %80 : vector<36x768xf32>
    %c2_81 = arith.constant 2 : index
    %c0_82 = arith.constant 0 : index
    %82 = vector.load %arg23[%c2_81, %c0_82] : memref<38x512xf32, #tpu.memory_space<vmem>>, vector<36x512xf32>
    %83 = arith.truncf %82 : vector<36x512xf32> to vector<36x512xbf16>
    %c2_83 = arith.constant 2 : index
    %c0_84 = arith.constant 0 : index
    %c0_85 = arith.constant 0 : index
    %84 = vector.load %arg9[%c2_83, %c0_84, %c0_85] : memref<3x512x768xbf16, #tpu.memory_space<vmem>>, vector<1x512x768xbf16>
    %85 = vector.shape_cast %84 : vector<1x512x768xbf16> to vector<512x768xbf16>
    %cst_86 = arith.constant dense<0.000000e+00> : vector<36x768xf32>
    %86 = tpu.matmul %83, %85, %cst_86 {dimension_numbers = #tpu.dot_dimension_numbers<[1], [0], [0], [1], [0, 0, 1, 1], [], []>} : vector<36x512xbf16>, vector<512x768xbf16>, vector<36x768xf32> -> vector<36x768xf32>
    %87 = arith.addf %81, %86 : vector<36x768xf32>
    %cst_87 = arith.constant 0.000000e+00 : f32
    %88 = vector.broadcast %cst_87 : f32 to vector<36x768xf32>
    %89 = arith.maximumf %87, %88 : vector<36x768xf32>
    %c0_88 = arith.constant 0 : index
    %c0_89 = arith.constant 0 : index
    %90 = vector.load %arg10[%c0_88, %c0_89] : memref<1x768xf32, #tpu.memory_space<vmem>>, vector<1x768xf32>
    %91 = vector.broadcast %90 : vector<1x768xf32> to vector<36x768xf32>
    %92 = arith.mulf %89, %91 : vector<36x768xf32>
    %c0_90 = arith.constant 0 : index
    %c0_91 = arith.constant 0 : index
    %93 = vector.load %arg11[%c0_90, %c0_91] : memref<1x768xf32, #tpu.memory_space<vmem>>, vector<1x768xf32>
    %94 = vector.broadcast %93 : vector<1x768xf32> to vector<36x768xf32>
    %95 = arith.addf %92, %94 : vector<36x768xf32>
    %96 = vector.broadcast %0 : vector<36x1xf32> to vector<36x768xf32>
    %97 = arith.mulf %95, %96 : vector<36x768xf32>
    %c0_92 = arith.constant 0 : index
    %c0_93 = arith.constant 0 : index
    %98 = vector.load %arg12[%c0_92, %c0_93] : memref<2x36xf32, #tpu.memory_space<vmem>>, vector<2x36xf32>
    %cst_94 = arith.constant dense<0.000000e+00> : vector<2x768xf32>
    %99 = tpu.matmul %98, %97, %cst_94 {dimension_numbers = #tpu.dot_dimension_numbers<[1], [0], [0], [1], [0, 0, 1, 1], [], []>} : vector<2x36xf32>, vector<36x768xf32>, vector<2x768xf32> -> vector<2x768xf32>
    %c0_95 = arith.constant 0 : index
    %c0_96 = arith.constant 0 : index
    %100 = vector.load %arg13[%c0_95, %c0_96] : memref<768x48xf32, #tpu.memory_space<vmem>>, vector<768x48xf32>
    %cst_97 = arith.constant dense<0.000000e+00> : vector<2x48xf32>
    %101 = tpu.matmul %99, %100, %cst_97 {dimension_numbers = #tpu.dot_dimension_numbers<[1], [0], [0], [1], [0, 0, 1, 1], [], []>} : vector<2x768xf32>, vector<768x48xf32>, vector<2x48xf32> -> vector<2x48xf32>
    %c0_98 = arith.constant 0 : index
    %c0_99 = arith.constant 0 : index
    %c0_100 = arith.constant 0 : index
    %102 = vector.load %arg14[%c0_98, %c0_99, %c0_100] : memref<4x48x24xf32, #tpu.memory_space<vmem>>, vector<1x48x24xf32>
    %103 = vector.shape_cast %102 : vector<1x48x24xf32> to vector<48x24xf32>
    %cst_101 = arith.constant dense<0.000000e+00> : vector<2x24xf32>
    %104 = tpu.matmul %101, %103, %cst_101 {dimension_numbers = #tpu.dot_dimension_numbers<[1], [0], [0], [1], [0, 0, 1, 1], [], []>} : vector<2x48xf32>, vector<48x24xf32>, vector<2x24xf32> -> vector<2x24xf32>
    %c0_102 = arith.constant 0 : index
    %c0_103 = arith.constant 0 : index
    %c0_104 = arith.constant 0 : index
    %105 = vector.load %arg15[%c0_102, %c0_103, %c0_104] : memref<4x1x24xf32, #tpu.memory_space<vmem>>, vector<1x1x24xf32>
    %106 = vector.shape_cast %105 : vector<1x1x24xf32> to vector<1x24xf32>
    %107 = vector.broadcast %106 : vector<1x24xf32> to vector<2x24xf32>
    %108 = arith.addf %104, %107 : vector<2x24xf32>
    %109 = vector.extract_strided_slice %108 {offsets = [0, 0], sizes = [2, 8], strides = [1, 1]} : vector<2x24xf32> to vector<2x8xf32>
    %110 = vector.extract_strided_slice %108 {offsets = [0, 8], sizes = [2, 8], strides = [1, 1]} : vector<2x24xf32> to vector<2x8xf32>
    %111 = vector.extract_strided_slice %108 {offsets = [0, 16], sizes = [2, 8], strides = [1, 1]} : vector<2x24xf32> to vector<2x8xf32>
    %112 = vector.shape_cast %109 : vector<2x8xf32> to vector<2x8x1xf32>
    %113 = vector.shape_cast %110 : vector<2x8xf32> to vector<2x1x8xf32>
    %114 = vector.broadcast %112 : vector<2x8x1xf32> to vector<2x8x8xf32>
    %115 = vector.broadcast %113 : vector<2x1x8xf32> to vector<2x8x8xf32>
    %116 = arith.mulf %114, %115 : vector<2x8x8xf32>
    %cst_105 = arith.constant dense<0xFF800000> : vector<2x8xf32>
    %117 = vector.multi_reduction <maximumf>, %116, %cst_105 [2] : vector<2x8x8xf32> to vector<2x8xf32>
    %118 = vector.shape_cast %117 : vector<2x8xf32> to vector<2x8x1xf32>
    %119 = vector.broadcast %118 : vector<2x8x1xf32> to vector<2x8x8xf32>
    %120 = arith.subf %116, %119 : vector<2x8x8xf32>
    %121 = math.exp %120 : vector<2x8x8xf32>
    %cst_106 = arith.constant dense<0.000000e+00> : vector<2x8xf32>
    %122 = vector.multi_reduction <add>, %121, %cst_106 [2] : vector<2x8x8xf32> to vector<2x8xf32>
    %123 = vector.shape_cast %122 : vector<2x8xf32> to vector<2x8x1xf32>
    %124 = vector.broadcast %123 : vector<2x8x1xf32> to vector<2x8x8xf32>
    %125 = arith.divf %121, %124 : vector<2x8x8xf32>
    %126 = vector.shape_cast %111 : vector<2x8xf32> to vector<2x1x8xf32>
    %127 = vector.broadcast %126 : vector<2x1x8xf32> to vector<2x8x8xf32>
    %128 = arith.mulf %125, %127 : vector<2x8x8xf32>
    %cst_107 = arith.constant dense<0.000000e+00> : vector<2x8xf32>
    %129 = vector.multi_reduction <add>, %128, %cst_107 [2] : vector<2x8x8xf32> to vector<2x8xf32>
    %c0_108 = arith.constant 0 : index
    %c0_109 = arith.constant 0 : index
    %c0_110 = arith.constant 0 : index
    %130 = vector.load %arg16[%c0_108, %c0_109, %c0_110] : memref<4x8x48xf32, #tpu.memory_space<vmem>>, vector<1x8x48xf32>
    %131 = vector.shape_cast %130 : vector<1x8x48xf32> to vector<8x48xf32>
    %cst_111 = arith.constant dense<0.000000e+00> : vector<2x48xf32>
    %132 = tpu.matmul %129, %131, %cst_111 {dimension_numbers = #tpu.dot_dimension_numbers<[1], [0], [0], [1], [0, 0, 1, 1], [], []>} : vector<2x8xf32>, vector<8x48xf32>, vector<2x48xf32> -> vector<2x48xf32>
    %c0_112 = arith.constant 0 : index
    %c0_113 = arith.constant 0 : index
    %c0_114 = arith.constant 0 : index
    %133 = vector.load %arg17[%c0_112, %c0_113, %c0_114] : memref<4x1x48xf32, #tpu.memory_space<vmem>>, vector<1x1x48xf32>
    %134 = vector.shape_cast %133 : vector<1x1x48xf32> to vector<1x48xf32>
    %135 = vector.broadcast %134 : vector<1x48xf32> to vector<2x48xf32>
    %136 = arith.addf %132, %135 : vector<2x48xf32>
    %c1_115 = arith.constant 1 : index
    %c0_116 = arith.constant 0 : index
    %c0_117 = arith.constant 0 : index
    %137 = vector.load %arg14[%c1_115, %c0_116, %c0_117] : memref<4x48x24xf32, #tpu.memory_space<vmem>>, vector<1x48x24xf32>
    %138 = vector.shape_cast %137 : vector<1x48x24xf32> to vector<48x24xf32>
    %cst_118 = arith.constant dense<0.000000e+00> : vector<2x24xf32>
    %139 = tpu.matmul %136, %138, %cst_118 {dimension_numbers = #tpu.dot_dimension_numbers<[1], [0], [0], [1], [0, 0, 1, 1], [], []>} : vector<2x48xf32>, vector<48x24xf32>, vector<2x24xf32> -> vector<2x24xf32>
    %c1_119 = arith.constant 1 : index
    %c0_120 = arith.constant 0 : index
    %c0_121 = arith.constant 0 : index
    %140 = vector.load %arg15[%c1_119, %c0_120, %c0_121] : memref<4x1x24xf32, #tpu.memory_space<vmem>>, vector<1x1x24xf32>
    %141 = vector.shape_cast %140 : vector<1x1x24xf32> to vector<1x24xf32>
    %142 = vector.broadcast %141 : vector<1x24xf32> to vector<2x24xf32>
    %143 = arith.addf %139, %142 : vector<2x24xf32>
    %144 = vector.extract_strided_slice %143 {offsets = [0, 0], sizes = [2, 8], strides = [1, 1]} : vector<2x24xf32> to vector<2x8xf32>
    %145 = vector.extract_strided_slice %143 {offsets = [0, 8], sizes = [2, 8], strides = [1, 1]} : vector<2x24xf32> to vector<2x8xf32>
    %146 = vector.extract_strided_slice %143 {offsets = [0, 16], sizes = [2, 8], strides = [1, 1]} : vector<2x24xf32> to vector<2x8xf32>
    %147 = vector.shape_cast %144 : vector<2x8xf32> to vector<2x8x1xf32>
    %148 = vector.shape_cast %145 : vector<2x8xf32> to vector<2x1x8xf32>
    %149 = vector.broadcast %147 : vector<2x8x1xf32> to vector<2x8x8xf32>
    %150 = vector.broadcast %148 : vector<2x1x8xf32> to vector<2x8x8xf32>
    %151 = arith.mulf %149, %150 : vector<2x8x8xf32>
    %cst_122 = arith.constant dense<0xFF800000> : vector<2x8xf32>
    %152 = vector.multi_reduction <maximumf>, %151, %cst_122 [2] : vector<2x8x8xf32> to vector<2x8xf32>
    %153 = vector.shape_cast %152 : vector<2x8xf32> to vector<2x8x1xf32>
    %154 = vector.broadcast %153 : vector<2x8x1xf32> to vector<2x8x8xf32>
    %155 = arith.subf %151, %154 : vector<2x8x8xf32>
    %156 = math.exp %155 : vector<2x8x8xf32>
    %cst_123 = arith.constant dense<0.000000e+00> : vector<2x8xf32>
    %157 = vector.multi_reduction <add>, %156, %cst_123 [2] : vector<2x8x8xf32> to vector<2x8xf32>
    %158 = vector.shape_cast %157 : vector<2x8xf32> to vector<2x8x1xf32>
    %159 = vector.broadcast %158 : vector<2x8x1xf32> to vector<2x8x8xf32>
    %160 = arith.divf %156, %159 : vector<2x8x8xf32>
    %161 = vector.shape_cast %146 : vector<2x8xf32> to vector<2x1x8xf32>
    %162 = vector.broadcast %161 : vector<2x1x8xf32> to vector<2x8x8xf32>
    %163 = arith.mulf %160, %162 : vector<2x8x8xf32>
    %cst_124 = arith.constant dense<0.000000e+00> : vector<2x8xf32>
    %164 = vector.multi_reduction <add>, %163, %cst_124 [2] : vector<2x8x8xf32> to vector<2x8xf32>
    %c1_125 = arith.constant 1 : index
    %c0_126 = arith.constant 0 : index
    %c0_127 = arith.constant 0 : index
    %165 = vector.load %arg16[%c1_125, %c0_126, %c0_127] : memref<4x8x48xf32, #tpu.memory_space<vmem>>, vector<1x8x48xf32>
    %166 = vector.shape_cast %165 : vector<1x8x48xf32> to vector<8x48xf32>
    %cst_128 = arith.constant dense<0.000000e+00> : vector<2x48xf32>
    %167 = tpu.matmul %164, %166, %cst_128 {dimension_numbers = #tpu.dot_dimension_numbers<[1], [0], [0], [1], [0, 0, 1, 1], [], []>} : vector<2x8xf32>, vector<8x48xf32>, vector<2x48xf32> -> vector<2x48xf32>
    %c1_129 = arith.constant 1 : index
    %c0_130 = arith.constant 0 : index
    %c0_131 = arith.constant 0 : index
    %168 = vector.load %arg17[%c1_129, %c0_130, %c0_131] : memref<4x1x48xf32, #tpu.memory_space<vmem>>, vector<1x1x48xf32>
    %169 = vector.shape_cast %168 : vector<1x1x48xf32> to vector<1x48xf32>
    %170 = vector.broadcast %169 : vector<1x48xf32> to vector<2x48xf32>
    %171 = arith.addf %167, %170 : vector<2x48xf32>
    %c2_132 = arith.constant 2 : index
    %c0_133 = arith.constant 0 : index
    %c0_134 = arith.constant 0 : index
    %172 = vector.load %arg14[%c2_132, %c0_133, %c0_134] : memref<4x48x24xf32, #tpu.memory_space<vmem>>, vector<1x48x24xf32>
    %173 = vector.shape_cast %172 : vector<1x48x24xf32> to vector<48x24xf32>
    %cst_135 = arith.constant dense<0.000000e+00> : vector<2x24xf32>
    %174 = tpu.matmul %171, %173, %cst_135 {dimension_numbers = #tpu.dot_dimension_numbers<[1], [0], [0], [1], [0, 0, 1, 1], [], []>} : vector<2x48xf32>, vector<48x24xf32>, vector<2x24xf32> -> vector<2x24xf32>
    %c2_136 = arith.constant 2 : index
    %c0_137 = arith.constant 0 : index
    %c0_138 = arith.constant 0 : index
    %175 = vector.load %arg15[%c2_136, %c0_137, %c0_138] : memref<4x1x24xf32, #tpu.memory_space<vmem>>, vector<1x1x24xf32>
    %176 = vector.shape_cast %175 : vector<1x1x24xf32> to vector<1x24xf32>
    %177 = vector.broadcast %176 : vector<1x24xf32> to vector<2x24xf32>
    %178 = arith.addf %174, %177 : vector<2x24xf32>
    %179 = vector.extract_strided_slice %178 {offsets = [0, 0], sizes = [2, 8], strides = [1, 1]} : vector<2x24xf32> to vector<2x8xf32>
    %180 = vector.extract_strided_slice %178 {offsets = [0, 8], sizes = [2, 8], strides = [1, 1]} : vector<2x24xf32> to vector<2x8xf32>
    %181 = vector.extract_strided_slice %178 {offsets = [0, 16], sizes = [2, 8], strides = [1, 1]} : vector<2x24xf32> to vector<2x8xf32>
    %182 = vector.shape_cast %179 : vector<2x8xf32> to vector<2x8x1xf32>
    %183 = vector.shape_cast %180 : vector<2x8xf32> to vector<2x1x8xf32>
    %184 = vector.broadcast %182 : vector<2x8x1xf32> to vector<2x8x8xf32>
    %185 = vector.broadcast %183 : vector<2x1x8xf32> to vector<2x8x8xf32>
    %186 = arith.mulf %184, %185 : vector<2x8x8xf32>
    %cst_139 = arith.constant dense<0xFF800000> : vector<2x8xf32>
    %187 = vector.multi_reduction <maximumf>, %186, %cst_139 [2] : vector<2x8x8xf32> to vector<2x8xf32>
    %188 = vector.shape_cast %187 : vector<2x8xf32> to vector<2x8x1xf32>
    %189 = vector.broadcast %188 : vector<2x8x1xf32> to vector<2x8x8xf32>
    %190 = arith.subf %186, %189 : vector<2x8x8xf32>
    %191 = math.exp %190 : vector<2x8x8xf32>
    %cst_140 = arith.constant dense<0.000000e+00> : vector<2x8xf32>
    %192 = vector.multi_reduction <add>, %191, %cst_140 [2] : vector<2x8x8xf32> to vector<2x8xf32>
    %193 = vector.shape_cast %192 : vector<2x8xf32> to vector<2x8x1xf32>
    %194 = vector.broadcast %193 : vector<2x8x1xf32> to vector<2x8x8xf32>
    %195 = arith.divf %191, %194 : vector<2x8x8xf32>
    %196 = vector.shape_cast %181 : vector<2x8xf32> to vector<2x1x8xf32>
    %197 = vector.broadcast %196 : vector<2x1x8xf32> to vector<2x8x8xf32>
    %198 = arith.mulf %195, %197 : vector<2x8x8xf32>
    %cst_141 = arith.constant dense<0.000000e+00> : vector<2x8xf32>
    %199 = vector.multi_reduction <add>, %198, %cst_141 [2] : vector<2x8x8xf32> to vector<2x8xf32>
    %c2_142 = arith.constant 2 : index
    %c0_143 = arith.constant 0 : index
    %c0_144 = arith.constant 0 : index
    %200 = vector.load %arg16[%c2_142, %c0_143, %c0_144] : memref<4x8x48xf32, #tpu.memory_space<vmem>>, vector<1x8x48xf32>
    %201 = vector.shape_cast %200 : vector<1x8x48xf32> to vector<8x48xf32>
    %cst_145 = arith.constant dense<0.000000e+00> : vector<2x48xf32>
    %202 = tpu.matmul %199, %201, %cst_145 {dimension_numbers = #tpu.dot_dimension_numbers<[1], [0], [0], [1], [0, 0, 1, 1], [], []>} : vector<2x8xf32>, vector<8x48xf32>, vector<2x48xf32> -> vector<2x48xf32>
    %c2_146 = arith.constant 2 : index
    %c0_147 = arith.constant 0 : index
    %c0_148 = arith.constant 0 : index
    %203 = vector.load %arg17[%c2_146, %c0_147, %c0_148] : memref<4x1x48xf32, #tpu.memory_space<vmem>>, vector<1x1x48xf32>
    %204 = vector.shape_cast %203 : vector<1x1x48xf32> to vector<1x48xf32>
    %205 = vector.broadcast %204 : vector<1x48xf32> to vector<2x48xf32>
    %206 = arith.addf %202, %205 : vector<2x48xf32>
    %c3 = arith.constant 3 : index
    %c0_149 = arith.constant 0 : index
    %c0_150 = arith.constant 0 : index
    %207 = vector.load %arg14[%c3, %c0_149, %c0_150] : memref<4x48x24xf32, #tpu.memory_space<vmem>>, vector<1x48x24xf32>
    %208 = vector.shape_cast %207 : vector<1x48x24xf32> to vector<48x24xf32>
    %cst_151 = arith.constant dense<0.000000e+00> : vector<2x24xf32>
    %209 = tpu.matmul %206, %208, %cst_151 {dimension_numbers = #tpu.dot_dimension_numbers<[1], [0], [0], [1], [0, 0, 1, 1], [], []>} : vector<2x48xf32>, vector<48x24xf32>, vector<2x24xf32> -> vector<2x24xf32>
    %c3_152 = arith.constant 3 : index
    %c0_153 = arith.constant 0 : index
    %c0_154 = arith.constant 0 : index
    %210 = vector.load %arg15[%c3_152, %c0_153, %c0_154] : memref<4x1x24xf32, #tpu.memory_space<vmem>>, vector<1x1x24xf32>
    %211 = vector.shape_cast %210 : vector<1x1x24xf32> to vector<1x24xf32>
    %212 = vector.broadcast %211 : vector<1x24xf32> to vector<2x24xf32>
    %213 = arith.addf %209, %212 : vector<2x24xf32>
    %214 = vector.extract_strided_slice %213 {offsets = [0, 0], sizes = [2, 8], strides = [1, 1]} : vector<2x24xf32> to vector<2x8xf32>
    %215 = vector.extract_strided_slice %213 {offsets = [0, 8], sizes = [2, 8], strides = [1, 1]} : vector<2x24xf32> to vector<2x8xf32>
    %216 = vector.extract_strided_slice %213 {offsets = [0, 16], sizes = [2, 8], strides = [1, 1]} : vector<2x24xf32> to vector<2x8xf32>
    %217 = vector.shape_cast %214 : vector<2x8xf32> to vector<2x8x1xf32>
    %218 = vector.shape_cast %215 : vector<2x8xf32> to vector<2x1x8xf32>
    %219 = vector.broadcast %217 : vector<2x8x1xf32> to vector<2x8x8xf32>
    %220 = vector.broadcast %218 : vector<2x1x8xf32> to vector<2x8x8xf32>
    %221 = arith.mulf %219, %220 : vector<2x8x8xf32>
    %cst_155 = arith.constant dense<0xFF800000> : vector<2x8xf32>
    %222 = vector.multi_reduction <maximumf>, %221, %cst_155 [2] : vector<2x8x8xf32> to vector<2x8xf32>
    %223 = vector.shape_cast %222 : vector<2x8xf32> to vector<2x8x1xf32>
    %224 = vector.broadcast %223 : vector<2x8x1xf32> to vector<2x8x8xf32>
    %225 = arith.subf %221, %224 : vector<2x8x8xf32>
    %226 = math.exp %225 : vector<2x8x8xf32>
    %cst_156 = arith.constant dense<0.000000e+00> : vector<2x8xf32>
    %227 = vector.multi_reduction <add>, %226, %cst_156 [2] : vector<2x8x8xf32> to vector<2x8xf32>
    %228 = vector.shape_cast %227 : vector<2x8xf32> to vector<2x8x1xf32>
    %229 = vector.broadcast %228 : vector<2x8x1xf32> to vector<2x8x8xf32>
    %230 = arith.divf %226, %229 : vector<2x8x8xf32>
    %231 = vector.shape_cast %216 : vector<2x8xf32> to vector<2x1x8xf32>
    %232 = vector.broadcast %231 : vector<2x1x8xf32> to vector<2x8x8xf32>
    %233 = arith.mulf %230, %232 : vector<2x8x8xf32>
    %cst_157 = arith.constant dense<0.000000e+00> : vector<2x8xf32>
    %234 = vector.multi_reduction <add>, %233, %cst_157 [2] : vector<2x8x8xf32> to vector<2x8xf32>
    %c3_158 = arith.constant 3 : index
    %c0_159 = arith.constant 0 : index
    %c0_160 = arith.constant 0 : index
    %235 = vector.load %arg16[%c3_158, %c0_159, %c0_160] : memref<4x8x48xf32, #tpu.memory_space<vmem>>, vector<1x8x48xf32>
    %236 = vector.shape_cast %235 : vector<1x8x48xf32> to vector<8x48xf32>
    %cst_161 = arith.constant dense<0.000000e+00> : vector<2x48xf32>
    %237 = tpu.matmul %234, %236, %cst_161 {dimension_numbers = #tpu.dot_dimension_numbers<[1], [0], [0], [1], [0, 0, 1, 1], [], []>} : vector<2x8xf32>, vector<8x48xf32>, vector<2x48xf32> -> vector<2x48xf32>
    %c3_162 = arith.constant 3 : index
    %c0_163 = arith.constant 0 : index
    %c0_164 = arith.constant 0 : index
    %238 = vector.load %arg17[%c3_162, %c0_163, %c0_164] : memref<4x1x48xf32, #tpu.memory_space<vmem>>, vector<1x1x48xf32>
    %239 = vector.shape_cast %238 : vector<1x1x48xf32> to vector<1x48xf32>
    %240 = vector.broadcast %239 : vector<1x48xf32> to vector<2x48xf32>
    %241 = arith.addf %237, %240 : vector<2x48xf32>
    %c0_165 = arith.constant 0 : index
    %c0_166 = arith.constant 0 : index
    %242 = vector.load %arg18[%c0_165, %c0_166] : memref<48x10xf32, #tpu.memory_space<vmem>>, vector<48x10xf32>
    %cst_167 = arith.constant dense<0.000000e+00> : vector<2x10xf32>
    %243 = tpu.matmul %241, %242, %cst_167 {dimension_numbers = #tpu.dot_dimension_numbers<[1], [0], [0], [1], [0, 0, 1, 1], [], []>} : vector<2x48xf32>, vector<48x10xf32>, vector<2x10xf32> -> vector<2x10xf32>
    %c0_168 = arith.constant 0 : index
    %c0_169 = arith.constant 0 : index
    %244 = vector.load %arg19[%c0_168, %c0_169] : memref<1x10xf32, #tpu.memory_space<vmem>>, vector<1x10xf32>
    %245 = vector.broadcast %244 : vector<1x10xf32> to vector<2x10xf32>
    %246 = arith.addf %243, %245 : vector<2x10xf32>
    %c0_170 = arith.constant 0 : index
    %c0_171 = arith.constant 0 : index
    %247 = vector.load %arg20[%c0_170, %c0_171] : memref<2x10xf32, #tpu.memory_space<vmem>>, vector<2x10xf32>
    tpu.vector_store %arg20[%c0_170, %c0_171], %246 {strides = array<i32>} : memref<2x10xf32, #tpu.memory_space<vmem>>, vector<2x10xf32>,
    return
  }
  func.func @transform_0(%arg0: i32) -> (i32, i32) {
    %c0_i32 = arith.constant 0 : i32
    %c0_i32_0 = arith.constant 0 : i32
    return %arg0, %c0_i32 : i32, i32
  }
  func.func @transform_1(%arg0: i32) -> (i32, i32) {
    %c0_i32 = arith.constant 0 : i32
    %c0_i32_0 = arith.constant 0 : i32
    %c0_i32_1 = arith.constant 0 : i32
    return %c0_i32, %c0_i32_0 : i32, i32
  }
  func.func @transform_2(%arg0: i32) -> (i32, i32, i32) {
    %c0_i32 = arith.constant 0 : i32
    %c0_i32_0 = arith.constant 0 : i32
    %c0_i32_1 = arith.constant 0 : i32
    %c0_i32_2 = arith.constant 0 : i32
    return %c0_i32, %c0_i32_0, %c0_i32_1 : i32, i32, i32
  }
  func.func @transform_3(%arg0: i32) -> (i32, i32) {
    %c0_i32 = arith.constant 0 : i32
    %c0_i32_0 = arith.constant 0 : i32
    %c0_i32_1 = arith.constant 0 : i32
    return %c0_i32, %c0_i32_0 : i32, i32
  }
  func.func @transform_4(%arg0: i32) -> (i32, i32) {
    %c0_i32 = arith.constant 0 : i32
    %c0_i32_0 = arith.constant 0 : i32
    %c0_i32_1 = arith.constant 0 : i32
    return %c0_i32, %c0_i32_0 : i32, i32
  }
  func.func @transform_5(%arg0: i32) -> (i32, i32, i32) {
    %c0_i32 = arith.constant 0 : i32
    %c0_i32_0 = arith.constant 0 : i32
    %c0_i32_1 = arith.constant 0 : i32
    %c0_i32_2 = arith.constant 0 : i32
    return %c0_i32, %c0_i32_0, %c0_i32_1 : i32, i32, i32
  }
  func.func @transform_6(%arg0: i32) -> (i32, i32) {
    %c0_i32 = arith.constant 0 : i32
    %c0_i32_0 = arith.constant 0 : i32
    %c0_i32_1 = arith.constant 0 : i32
    return %c0_i32, %c0_i32_0 : i32, i32
  }
  func.func @transform_7(%arg0: i32) -> (i32, i32) {
    %c0_i32 = arith.constant 0 : i32
    %c0_i32_0 = arith.constant 0 : i32
    %c0_i32_1 = arith.constant 0 : i32
    return %c0_i32, %c0_i32_0 : i32, i32
  }
  func.func @transform_8(%arg0: i32) -> (i32, i32, i32) {
    %c0_i32 = arith.constant 0 : i32
    %c0_i32_0 = arith.constant 0 : i32
    %c0_i32_1 = arith.constant 0 : i32
    %c0_i32_2 = arith.constant 0 : i32
    return %c0_i32, %c0_i32_0, %c0_i32_1 : i32, i32, i32
  }
  func.func @transform_9(%arg0: i32) -> (i32, i32) {
    %c0_i32 = arith.constant 0 : i32
    %c0_i32_0 = arith.constant 0 : i32
    %c0_i32_1 = arith.constant 0 : i32
    return %c0_i32, %c0_i32_0 : i32, i32
  }
  func.func @transform_10(%arg0: i32) -> (i32, i32) {
    %c0_i32 = arith.constant 0 : i32
    %c0_i32_0 = arith.constant 0 : i32
    %c0_i32_1 = arith.constant 0 : i32
    return %c0_i32, %c0_i32_0 : i32, i32
  }
  func.func @transform_11(%arg0: i32) -> (i32, i32) {
    %c0_i32 = arith.constant 0 : i32
    %c0_i32_0 = arith.constant 0 : i32
    %c0_i32_1 = arith.constant 0 : i32
    return %c0_i32, %c0_i32_0 : i32, i32
  }
  func.func @transform_12(%arg0: i32) -> (i32, i32) {
    %c0_i32 = arith.constant 0 : i32
    %c0_i32_0 = arith.constant 0 : i32
    %c0_i32_1 = arith.constant 0 : i32
    return %c0_i32, %c0_i32_0 : i32, i32
  }
  func.func @transform_13(%arg0: i32) -> (i32, i32, i32) {
    %c0_i32 = arith.constant 0 : i32
    %c0_i32_0 = arith.constant 0 : i32
    %c0_i32_1 = arith.constant 0 : i32
    %c0_i32_2 = arith.constant 0 : i32
    return %c0_i32, %c0_i32_0, %c0_i32_1 : i32, i32, i32
  }
  func.func @transform_14(%arg0: i32) -> (i32, i32, i32) {
    %c0_i32 = arith.constant 0 : i32
    %c0_i32_0 = arith.constant 0 : i32
    %c0_i32_1 = arith.constant 0 : i32
    %c0_i32_2 = arith.constant 0 : i32
    return %c0_i32, %c0_i32_0, %c0_i32_1 : i32, i32, i32
  }
  func.func @transform_15(%arg0: i32) -> (i32, i32, i32) {
    %c0_i32 = arith.constant 0 : i32
    %c0_i32_0 = arith.constant 0 : i32
    %c0_i32_1 = arith.constant 0 : i32
    %c0_i32_2 = arith.constant 0 : i32
    return %c0_i32, %c0_i32_0, %c0_i32_1 : i32, i32, i32
  }
  func.func @transform_16(%arg0: i32) -> (i32, i32, i32) {
    %c0_i32 = arith.constant 0 : i32
    %c0_i32_0 = arith.constant 0 : i32
    %c0_i32_1 = arith.constant 0 : i32
    %c0_i32_2 = arith.constant 0 : i32
    return %c0_i32, %c0_i32_0, %c0_i32_1 : i32, i32, i32
  }
  func.func @transform_17(%arg0: i32) -> (i32, i32) {
    %c0_i32 = arith.constant 0 : i32
    %c0_i32_0 = arith.constant 0 : i32
    %c0_i32_1 = arith.constant 0 : i32
    return %c0_i32, %c0_i32_0 : i32, i32
  }
  func.func @transform_18(%arg0: i32) -> (i32, i32) {
    %c0_i32 = arith.constant 0 : i32
    %c0_i32_0 = arith.constant 0 : i32
    %c0_i32_1 = arith.constant 0 : i32
    return %c0_i32, %c0_i32_0 : i32, i32
  }
  func.func @transform_19(%arg0: i32) -> (i32, i32) {
    %c0_i32 = arith.constant 0 : i32
    %c0_i32_0 = arith.constant 0 : i32
    return %arg0, %c0_i32 : i32, i32
  }
}

</mosaic_0001>

<bundles_post_ra>
// kernel: tpu_custom_call.1
= control target key start
LH: loop header
LB: loop body
LE: loop exit
PB: predicated region body
PF: predicated region fallthrough
CT: control target
= control target key end

     0   :  { %s14143_s0 = inlined_call_operand.hbm [shape: f32[36,48], index: 0, kind: input, shape index: {}]   ;;  %s14144_s1 = inlined_call_operand.vmem [shape: f32[36,1], index: 1, kind: input, shape index: {}]   ;;  %s14145_s2 = inlined_call_operand.hbm [shape: bf16[3,48,256], index: 2, kind: input, shape index: {}]   ;;  %s14146_s3 = inlined_call_operand.hbm [shape: f32[1,256], index: 3, kind: input, shape index: {}]   ;;  %s14147_s4 = inlined_call_operand.hbm [shape: f32[1,256], index: 4, kind: input, shape index: {}]   ;;  %s14148_s5 = inlined_call_operand.hbm [shape: bf16[3,256,512], index: 5, kind: input, shape index: {}]   ;;  %s14149_s6 = inlined_call_operand.hbm [shape: f32[1,512], index: 6, kind: input, shape index: {}]   ;;  %s14150_s7 = inlined_call_operand.hbm [shape: f32[1,512], index: 7, kind: input, shape index: {}]   ;;  %s14151_s8 = inlined_call_operand.hbm [shape: bf16[3,512,768], index: 8, kind: input, shape index: {}]   ;;  %s14152_s9 = inlined_call_operand.hbm [shape: f32[1,768], index: 9, kind: input, shape index: {}]   ;;  %s14153_s10 = inlined_call_operand.hbm [shape: f32[1,768], index: 10, kind: input, shape index: {}]   ;;  %s14154_s11 = inlined_call_operand.hbm [shape: f32[2,36], index: 11, kind: input, shape index: {}]   ;;  %s14155_s12 = inlined_call_operand.vmem [shape: f32[768,48], index: 12, kind: input, shape index: {}]   ;;  %s14156_s13 = inlined_call_operand.vmem [shape: f32[4,48,24], index: 13, kind: input, shape index: {}]   ;;  %s14157_s14 = inlined_call_operand.hbm [shape: f32[4,1,24], index: 14, kind: input, shape index: {}]   ;;  %s14158_s15 = inlined_call_operand.hbm [shape: f32[4,8,48], index: 15, kind: input, shape index: {}]   ;;  %s14159_s16 = inlined_call_operand.hbm [shape: f32[4,1,48], index: 16, kind: input, shape index: {}]   ;;  %s14160_s17 = inlined_call_operand.vmem [shape: f32[48,10], index: 17, kind: input, shape index: {}]   ;;  %s14161_s18 = inlined_call_operand.hbm [shape: f32[1,10], index: 18, kind: input, shape index: {}]   ;;  %s14162_s19 = inlined_call_operand.hbm [shape: f32[2,10], index: 19, kind: output, shape index: {}]  }
   0x1   :  { %14169 = sst [smem:[#allocation39_spill]] %s14143_s0 }
   0x2   :  { %14170 = sst [smem:[#allocation40_spill]] %s14144_s1 }
   0x3   :  { %14171 = sst [smem:[#allocation41_spill]] %s14145_s2 }
   0x4   :  { %14172 = sst [smem:[#allocation42_spill]] %s14146_s3 }
   0x5   :  { %24 = vsyncpa [#allocation6], 0 }
   0x6   :  { %25 = vsyncpa [#allocation9], 0 }
   0x7   :  { %26 = vsyncpa [#allocation12], 0 }
   0x8   :  { %27 = vsyncpa [#allocation15], 0 }
   0x9   :  { %28 = vsyncpa [#allocation18], 0 }
   0xa   :  { %29 = vsyncpa [#allocation21], 0 }
   0xb   :  { %30 = vsyncpa [#allocation24], 0 }
   0xc   :  { %31 = vsyncpa [#allocation27], 0 }
   0xd   :  { %32 = vsyncpa [#allocation7], 0  ;;  %s12525_s0 = smov [#allocation8]   ;;  %s12526_s20 = smov [#allocation11]  }
   0xe   :  { %s52_s30 = sshll.u32 %s12525_s0, 4  ;;  %s75_s21 = sshll.u32 %s12526_s20, 4  ;;  %s53_s30 = int_to_ptr.vmem [resolvable:$true] %s52_s30  ;;  %s76_s21 = int_to_ptr.vmem [resolvable:$true] %s75_s21 }
   0xf   :  { %s14173_s2 = sld [smem:[#allocation41_spill]] }
  0x15   :  { %s12155_s23 = scalar_lea.hbm %s14173_s2, 2304 }
  0x16   :  { %p12156_p0 = scmp.ne.s32.totalorder %s14173_s2, %s12155_s23  ;;  %p12159_p1 = scmp.lt.u32.totalorder %s12155_s23, %s14173_s2 }
  0x18   :  { %p12161_p2 = pnand %p12159_p1, %p12156_p0 }
  0x1a   :  { %12164 = shalt.err (!%p12161_p2)
}
  0x1b   :  { %s12165_s27 = scalar_lea.vmem %s53_s30, 2304  ;;  %p12170_p4 = scmp.lt.s32.totalorder %s53_s30, %s53_s30 }
  0x1c   :  { %p12166_p3 = scmp.ne.s32.totalorder %s53_s30, %s12165_s27  ;;  %p12171_p5 = scmp.lt.s32.totalorder %s12165_s27, %s12165_s27 }
  0x1e   :  { %p12172_p6 = por %p12171_p5, %p12170_p4 }
  0x20   :  { %p12173_p7 = pnand %p12172_p6, %p12166_p3 }
  0x22   :  { %12176 = shalt.err (!%p12173_p7)
}
  0x23   :  { %s14167_s28 = smov 128   ;;  %s12528_s29 = smov 8  }
  0x24   :  { %58 = dma.hbm_to_vmem [thread:$0]  %s14173_s2, 2304, %s53_s30, [#allocation9], %s14167_s28, %s14167_s28, %s12528_s29  }
  0x25   :  { %s12177_s23 = scalar_lea.hbm %s14147_s4, 32 }
  0x26   :  { %p12178_p8 = scmp.ne.s32.totalorder %s14147_s4, %s12177_s23  ;;  %p12181_p9 = scmp.lt.u32.totalorder %s12177_s23, %s14147_s4 }
  0x28   :  { %p12183_p10 = pnand %p12181_p9, %p12178_p8 }
  0x2a   :  { %12186 = shalt.err (!%p12183_p10)
}
  0x2b   :  { %s12187_s27 = scalar_lea.vmem %s76_s21, 32  ;;  %p12192_p12 = scmp.lt.s32.totalorder %s76_s21, %s76_s21 }
  0x2c   :  { %p12188_p11 = scmp.ne.s32.totalorder %s76_s21, %s12187_s27  ;;  %p12193_p13 = scmp.lt.s32.totalorder %s12187_s27, %s12187_s27 }
  0x2e   :  { %p12194_p0 = por %p12193_p13, %p12192_p12 }
  0x30   :  { %p12195_p1 = pnand %p12194_p0, %p12188_p11 }
  0x32   :  { %12198 = shalt.err (!%p12195_p1)
}
  0x33   :  { %78 = dma.hbm_to_vmem [thread:$0]  %s14147_s4, 32, %s76_s21, [#allocation12]  }
  0x34   :  { %s12529_s0 = smov [#allocation14]   ;;  %s12530_s1 = smov [#allocation17]  }
  0x35   :  { %s97_s20 = sshll.u32 %s12529_s0, 4  ;;  %s116_s22 = sshll.u32 %s12530_s1, 4  ;;  %s98_s20 = int_to_ptr.vmem [resolvable:$true] %s97_s20  ;;  %s12681_s22 = int_to_ptr.vmem [resolvable:$true] %s116_s22 }
  0x36   :  { %s12199_s25 = scalar_lea.hbm %s14149_s6, 64 }
  0x37   :  { %p12200_p2 = scmp.ne.s32.totalorder %s14149_s6, %s12199_s25  ;;  %p12203_p3 = scmp.lt.u32.totalorder %s12199_s25, %s14149_s6 }
  0x39   :  { %p12205_p4 = pnand %p12203_p3, %p12200_p2 }
  0x3b   :  { %12208 = shalt.err (!%p12205_p4)
}
  0x3c   :  { %s12209_s4 = scalar_lea.vmem %s98_s20, 64  ;;  %p12214_p6 = scmp.lt.s32.totalorder %s98_s20, %s98_s20 }
  0x3d   :  { %p12210_p5 = scmp.ne.s32.totalorder %s98_s20, %s12209_s4  ;;  %p12215_p7 = scmp.lt.s32.totalorder %s12209_s4, %s12209_s4 }
  0x3f   :  { %p12216_p8 = por %p12215_p7, %p12214_p6 }
  0x41   :  { %p12217_p9 = pnand %p12216_p8, %p12210_p5 }
  0x43   :  { %12220 = shalt.err (!%p12217_p9)
}
  0x44   :  { %100 = dma.hbm_to_vmem [thread:$0]  %s14149_s6, 64, %s98_s20, [#allocation15]  }
  0x45   :  { %s12221_s1 = scalar_lea.hbm %s14151_s8, 73728 }
  0x46   :  { %p12222_p10 = scmp.ne.s32.totalorder %s14151_s8, %s12221_s1  ;;  %p12225_p11 = scmp.lt.u32.totalorder %s12221_s1, %s14151_s8 }
  0x48   :  { %p12227_p12 = pnand %p12225_p11, %p12222_p10 }
  0x4a   :  { %12230 = shalt.err (!%p12227_p12)
}
  0x4b   :  { %s12231_s3 = scalar_lea.vmem %s12681_s22, 73728  ;;  %p12236_p0 = scmp.lt.s32.totalorder %s12681_s22, %s12681_s22 }
  0x4c   :  { %p12232_p13 = scmp.ne.s32.totalorder %s12681_s22, %s12231_s3  ;;  %p12237_p1 = scmp.lt.s32.totalorder %s12231_s3, %s12231_s3 }
  0x4e   :  { %p12238_p2 = por %p12237_p1, %p12236_p0 }
  0x50   :  { %p12239_p3 = pnand %p12238_p2, %p12232_p13 }
  0x52   :  { %12242 = shalt.err (!%p12239_p3)
}
  0x53   :  { %s12531_s6 = smov 384   ;;  %s12532_s20 = smov 24  }
  0x54   :  { %122 = dma.hbm_to_vmem [thread:$0]  %s14151_s8, 73728, %s12681_s22, [#allocation18], %s12531_s6, %s12531_s6, %s12532_s20  }
  0x55   :  { %s12533_s4 = smov [#allocation20]   ;;  %s12534_s30 = smov [#allocation23]  }
  0x56   :  { %s139_s21 = sshll.u32 %s12533_s4, 4  ;;  %s162_s2 = sshll.u32 %s12534_s30, 4  ;;  %s140_s21 = int_to_ptr.vmem [resolvable:$true] %s139_s21  ;;  %s163_s2 = int_to_ptr.vmem [resolvable:$true] %s162_s2 }
  0x57   :  { %s12243_s23 = scalar_lea.hbm %s14153_s10, 96 }
  0x58   :  { %p12244_p4 = scmp.ne.s32.totalorder %s14153_s10, %s12243_s23  ;;  %p12247_p5 = scmp.lt.u32.totalorder %s12243_s23, %s14153_s10 }
  0x5a   :  { %p12249_p6 = pnand %p12247_p5, %p12244_p4 }
  0x5c   :  { %12252 = shalt.err (!%p12249_p6)
}
  0x5d   :  { %s12253_s8 = scalar_lea.vmem %s140_s21, 96  ;;  %p12258_p8 = scmp.lt.s32.totalorder %s140_s21, %s140_s21 }
  0x5e   :  { %p12254_p7 = scmp.ne.s32.totalorder %s140_s21, %s12253_s8  ;;  %p12259_p9 = scmp.lt.s32.totalorder %s12253_s8, %s12253_s8 }
  0x60   :  { %p12260_p10 = por %p12259_p9, %p12258_p8 }
  0x62   :  { %p12261_p11 = pnand %p12260_p10, %p12254_p7 }
  0x64   :  { %12264 = shalt.err (!%p12261_p11)
}
  0x65   :  { %142 = dma.hbm_to_vmem [thread:$0]  %s14153_s10, 96, %s140_s21, [#allocation21]  }
  0x66   :  { %s12265_s27 = scalar_lea.hbm %s14157_s14, 64 }
  0x67   :  { %p12266_p12 = scmp.ne.s32.totalorder %s14157_s14, %s12265_s27  ;;  %p12269_p13 = scmp.lt.u32.totalorder %s12265_s27, %s14157_s14 }
  0x69   :  { %p12271_p0 = pnand %p12269_p13, %p12266_p12 }
  0x6b   :  { %12274 = shalt.err (!%p12271_p0)
}
  0x6c   :  { %s12275_s23 = scalar_lea.vmem %s163_s2, 64  ;;  %p12280_p2 = scmp.lt.s32.totalorder %s163_s2, %s163_s2 }
  0x6d   :  { %p12276_p1 = scmp.ne.s32.totalorder %s163_s2, %s12275_s23  ;;  %p12281_p3 = scmp.lt.s32.totalorder %s12275_s23, %s12275_s23 }
  0x6f   :  { %p12282_p4 = por %p12281_p3, %p12280_p2 }
  0x71   :  { %p12283_p5 = pnand %p12282_p4, %p12276_p1 }
  0x73   :  { %12286 = shalt.err (!%p12283_p5)
}
  0x74   :  { %s12535_s10 = smov 16   ;;  %s12536_s21 = smov 1  }
  0x75   :  { %168 = dma.hbm_to_vmem [thread:$0]  %s14157_s14, 64, %s163_s2, [#allocation24], %s12535_s10, %s12535_s10, %s12536_s21  }
  0x76   :  { %s12537_s25 = smov [#allocation26]   ;;  %s12538_s8 = smov [#allocation5]  }
  0x77   :  { %s186_s3 = sshll.u32 %s12537_s25, 4  ;;  %s38_s22 = sshll.u32 %s12538_s8, 4  ;;  %s187_s3 = int_to_ptr.vmem [resolvable:$true] %s186_s3  ;;  %s12738_s22 = int_to_ptr.vmem [resolvable:$true] %s38_s22 }
  0x78   :  { %s12287_s26 = scalar_lea.hbm %s14159_s16, 64 }
  0x79   :  { %p12288_p6 = scmp.ne.s32.totalorder %s14159_s16, %s12287_s26  ;;  %p12291_p7 = scmp.lt.u32.totalorder %s12287_s26, %s14159_s16 }
  0x7b   :  { %p12293_p8 = pnand %p12291_p7, %p12288_p6 }
  0x7d   :  { %12296 = shalt.err (!%p12293_p8)
}
  0x7e   :  { %s12297_s14 = scalar_lea.vmem %s187_s3, 64  ;;  %p12302_p10 = scmp.lt.s32.totalorder %s187_s3, %s187_s3 }
  0x7f   :  { %p12298_p9 = scmp.ne.s32.totalorder %s187_s3, %s12297_s14  ;;  %p12303_p11 = scmp.lt.s32.totalorder %s12297_s14, %s12297_s14 }
  0x81   :  { %p12304_p12 = por %p12303_p11, %p12302_p10 }
  0x83   :  { %p12305_p13 = pnand %p12304_p12, %p12298_p9 }
  0x85   :  { %12308 = shalt.err (!%p12305_p13)
}
  0x86   :  { %192 = dma.hbm_to_vmem [thread:$0]  %s14159_s16, 64, %s187_s3, [#allocation27], %s12535_s10, %s12535_s10, %s12536_s21  }
  0x87   :  { %s14174_s24 = sld [smem:[#allocation39_spill]] }
  0x8d   :  { %s12309_s25 = scalar_lea.hbm %s14174_s24, 640 }
  0x8e   :  { %p12310_p0 = scmp.ne.s32.totalorder %s14174_s24, %s12309_s25  ;;  %p12313_p1 = scmp.lt.u32.totalorder %s12309_s25, %s14174_s24 }
  0x90   :  { %p12315_p2 = pnand %p12313_p1, %p12310_p0 }
  0x92   :  { %12318 = shalt.err (!%p12315_p2)
}
  0x93   :  { %s12319_s27 = scalar_lea.vmem %s12738_s22, 640  ;;  %p12324_p4 = scmp.lt.s32.totalorder %s12738_s22, %s12738_s22 }
  0x94   :  { %p12320_p3 = scmp.ne.s32.totalorder %s12738_s22, %s12319_s27  ;;  %p12325_p5 = scmp.lt.s32.totalorder %s12319_s27, %s12319_s27 }
  0x96   :  { %p12326_p6 = por %p12325_p5, %p12324_p4 }
  0x98   :  { %p12327_p7 = pnand %p12326_p6, %p12320_p3 }
  0x9a   :  { %12330 = shalt.err (!%p12327_p7)
}
  0x9b   :  { %s14175_s16 = smov 128   ;;  %s12539_s4 = smov [#allocation10]  }
  0x9c   :  { %44 = dma.hbm_to_vmem [thread:$0]  %s14174_s24, 640, %s12738_s22, [#allocation6], %s14175_s16, %s14175_s16, %s12528_s29  }
  0x9d   :  { %s65_s30 = sshll.u32 %s12539_s4, 4  ;;  %s12540_s0 = smov [#allocation13]   ;;  %s66_s30 = int_to_ptr.vmem [resolvable:$true] %s65_s30 }
  0x9e   :  { %s84_s14 = sshll.u32 %s12540_s0, 4  ;;  %s14176_s23 = sld [smem:[#allocation42_spill]]  ;;  %s12774_s14 = int_to_ptr.vmem [resolvable:$true] %s84_s14 }
  0xa4   :  { %s12331_s28 = scalar_lea.hbm %s14176_s23, 32 }
  0xa5   :  { %p12332_p8 = scmp.ne.s32.totalorder %s14176_s23, %s12331_s28  ;;  %p12335_p9 = scmp.lt.u32.totalorder %s12331_s28, %s14176_s23 }
  0xa7   :  { %p12337_p10 = pnand %p12335_p9, %p12332_p8 }
  0xa9   :  { %12340 = shalt.err (!%p12337_p10)
}
  0xaa   :  { %s12341_s22 = scalar_lea.vmem %s66_s30, 32  ;;  %p12346_p12 = scmp.lt.s32.totalorder %s66_s30, %s66_s30 }
  0xab   :  { %p12342_p11 = scmp.ne.s32.totalorder %s66_s30, %s12341_s22  ;;  %p12347_p13 = scmp.lt.s32.totalorder %s12341_s22, %s12341_s22 }
  0xad   :  { %p12348_p0 = por %p12347_p13, %p12346_p12 }
  0xaf   :  { %p12349_p1 = pnand %p12348_p0, %p12342_p11 }
  0xb1   :  { %12352 = shalt.err (!%p12349_p1)
}
  0xb2   :  { %68 = dma.hbm_to_vmem [thread:$0]  %s14176_s23, 32, %s66_s30, [#allocation9]  }
  0xb3   :  { %s12353_s3 = scalar_lea.hbm %s14148_s5, 24576 }
  0xb4   :  { %p12354_p2 = scmp.ne.s32.totalorder %s14148_s5, %s12353_s3  ;;  %p12357_p3 = scmp.lt.u32.totalorder %s12353_s3, %s14148_s5 }
  0xb6   :  { %p12359_p4 = pnand %p12357_p3, %p12354_p2 }
  0xb8   :  { %12362 = shalt.err (!%p12359_p4)
}
  0xb9   :  { %s12363_s28 = scalar_lea.vmem %s12774_s14, 24576  ;;  %p12368_p6 = scmp.lt.s32.totalorder %s12774_s14, %s12774_s14 }
  0xba   :  { %p12364_p5 = scmp.ne.s32.totalorder %s12774_s14, %s12363_s28  ;;  %p12369_p7 = scmp.lt.s32.totalorder %s12363_s28, %s12363_s28 }
  0xbc   :  { %p12370_p8 = por %p12369_p7, %p12368_p6 }
  0xbe   :  { %p12371_p9 = pnand %p12370_p8, %p12364_p5 }
  0xc0   :  { %12374 = shalt.err (!%p12371_p9)
}
  0xc1   :  { %s12541_s30 = smov 256   ;;  %s12542_s8 = smov [#allocation16]  }
  0xc2   :  { %90 = dma.hbm_to_vmem [thread:$0]  %s14148_s5, 24576, %s12774_s14, [#allocation12], %s12541_s30, %s12541_s30, %s12535_s10  }
  0xc3   :  { %s107_s6 = sshll.u32 %s12542_s8, 4  ;;  %s12543_s20 = smov [#allocation19]   ;;  %s108_s6 = int_to_ptr.vmem [resolvable:$true] %s107_s6 }
  0xc4   :  { %s129_s22 = sshll.u32 %s12543_s20, 4  ;;  %s12375_s27 = scalar_lea.hbm %s14150_s7, 64  ;;  %s130_s22 = int_to_ptr.vmem [resolvable:$true] %s129_s22 }
  0xc5   :  { %p12376_p10 = scmp.ne.s32.totalorder %s14150_s7, %s12375_s27  ;;  %p12379_p11 = scmp.lt.u32.totalorder %s12375_s27, %s14150_s7 }
  0xc7   :  { %p12381_p12 = pnand %p12379_p11, %p12376_p10 }
  0xc9   :  { %12384 = shalt.err (!%p12381_p12)
}
  0xca   :  { %s12385_s5 = scalar_lea.vmem %s108_s6, 64  ;;  %p12390_p0 = scmp.lt.s32.totalorder %s108_s6, %s108_s6 }
  0xcb   :  { %p12386_p13 = scmp.ne.s32.totalorder %s108_s6, %s12385_s5  ;;  %p12391_p1 = scmp.lt.s32.totalorder %s12385_s5, %s12385_s5 }
  0xcd   :  { %p12392_p2 = por %p12391_p1, %p12390_p0 }
  0xcf   :  { %p12393_p3 = pnand %p12392_p2, %p12386_p13 }
  0xd1   :  { %12396 = shalt.err (!%p12393_p3)
}
  0xd2   :  { %110 = dma.hbm_to_vmem [thread:$0]  %s14150_s7, 64, %s108_s6, [#allocation15]  }
  0xd3   :  { %s12397_s28 = scalar_lea.hbm %s14152_s9, 96 }
  0xd4   :  { %p12398_p4 = scmp.ne.s32.totalorder %s14152_s9, %s12397_s28  ;;  %p12401_p5 = scmp.lt.u32.totalorder %s12397_s28, %s14152_s9 }
  0xd6   :  { %p12403_p6 = pnand %p12401_p5, %p12398_p4 }
  0xd8   :  { %12406 = shalt.err (!%p12403_p6)
}
  0xd9   :  { %s12407_s20 = scalar_lea.vmem %s130_s22, 96  ;;  %p12412_p8 = scmp.lt.s32.totalorder %s130_s22, %s130_s22 }
  0xda   :  { %p12408_p7 = scmp.ne.s32.totalorder %s130_s22, %s12407_s20  ;;  %p12413_p9 = scmp.lt.s32.totalorder %s12407_s20, %s12407_s20 }
  0xdc   :  { %p12414_p10 = por %p12413_p9, %p12412_p8 }
  0xde   :  { %p12415_p11 = pnand %p12414_p10, %p12408_p7 }
  0xe0   :  { %12418 = shalt.err (!%p12415_p11)
}
  0xe1   :  { %132 = dma.hbm_to_vmem [thread:$0]  %s14152_s9, 96, %s130_s22, [#allocation18]  }
  0xe2   :  { %s12544_s24 = smov [#allocation22]   ;;  %s12545_s27 = smov [#allocation25]  }
  0xe3   :  { %s149_s26 = sshll.u32 %s12544_s24, 4  ;;  %s174_s21 = sshll.u32 %s12545_s27, 4  ;;  %s150_s26 = int_to_ptr.vmem [resolvable:$true] %s149_s26  ;;  %s175_s21 = int_to_ptr.vmem [resolvable:$true] %s174_s21 }
  0xe4   :  { %s12419_s0 = scalar_lea.hbm %s14154_s11, 32 }
  0xe5   :  { %p12420_p12 = scmp.ne.s32.totalorder %s14154_s11, %s12419_s0  ;;  %p12423_p13 = scmp.lt.u32.totalorder %s12419_s0, %s14154_s11 }
  0xe7   :  { %p12425_p0 = pnand %p12423_p13, %p12420_p12 }
  0xe9   :  { %12428 = shalt.err (!%p12425_p0)
}
  0xea   :  { %s12429_s9 = scalar_lea.vmem %s150_s26, 32  ;;  %p12434_p2 = scmp.lt.s32.totalorder %s150_s26, %s150_s26 }
  0xeb   :  { %p12430_p1 = scmp.ne.s32.totalorder %s150_s26, %s12429_s9  ;;  %p12435_p3 = scmp.lt.s32.totalorder %s12429_s9, %s12429_s9 }
  0xed   :  { %p12436_p4 = por %p12435_p3, %p12434_p2 }
  0xef   :  { %p12437_p5 = pnand %p12436_p4, %p12430_p1 }
  0xf1   :  { %12440 = shalt.err (!%p12437_p5)
}
  0xf2   :  { %152 = dma.hbm_to_vmem [thread:$0]  %s14154_s11, 32, %s150_s26, [#allocation21]  }
  0xf3   :  { %s12441_s23 = scalar_lea.hbm %s14158_s15, 512 }
  0xf4   :  { %p12442_p6 = scmp.ne.s32.totalorder %s14158_s15, %s12441_s23  ;;  %p12445_p7 = scmp.lt.u32.totalorder %s12441_s23, %s14158_s15 }
  0xf6   :  { %p12447_p8 = pnand %p12445_p7, %p12442_p6 }
  0xf8   :  { %12450 = shalt.err (!%p12447_p8)
}
  0xf9   :  { %s12451_s6 = scalar_lea.vmem %s175_s21, 512  ;;  %p12456_p10 = scmp.lt.s32.totalorder %s175_s21, %s175_s21 }
  0xfa   :  { %p12452_p9 = scmp.ne.s32.totalorder %s175_s21, %s12451_s6  ;;  %p12457_p11 = scmp.lt.s32.totalorder %s12451_s6, %s12451_s6 }
  0xfc   :  { %p12458_p12 = por %p12457_p11, %p12456_p10 }
  0xfe   :  { %p12459_p13 = pnand %p12458_p12, %p12452_p9 }
 0x100   :  { %12462 = shalt.err (!%p12459_p13)
}
 0x101   :  { %180 = dma.hbm_to_vmem [thread:$0]  %s14158_s15, 512, %s175_s21, [#allocation24], %s14175_s16, %s14175_s16, %s12528_s29  }
 0x102   :  { %s12546_s26 = smov [#allocation28]   ;;  %s12463_s0 = scalar_lea.hbm %s14161_s18, 16 }
 0x103   :  { %s201_s27 = sshll.u32 %s12546_s26, 4  ;;  %p12464_p0 = scmp.ne.s32.totalorder %s14161_s18, %s12463_s0  ;;  %s202_s27 = int_to_ptr.vmem [resolvable:$true] %s201_s27 }
 0x104   :  { %p12467_p1 = scmp.lt.u32.totalorder %s12463_s0, %s14161_s18 }
 0x106   :  { %p12469_p2 = pnand %p12467_p1, %p12464_p0 }
 0x108   :  { %12472 = shalt.err (!%p12469_p2)
}
 0x109   :  { %s12473_s9 = scalar_lea.vmem %s202_s27, 16  ;;  %s12477_s15 = scalar_lea.vmem %s202_s27, 32 }
 0x10a   :  { %p12474_p3 = scmp.ne.s32.totalorder %s202_s27, %s12473_s9  ;;  %p12478_p4 = scmp.lt.s32.totalorder %s202_s27, %s202_s27 }
 0x10b   :  { %p12479_p5 = scmp.lt.s32.totalorder %s12477_s15, %s12473_s9 }
 0x10d   :  { %p12480_p6 = por %p12479_p5, %p12478_p4 }
 0x10f   :  { %p12481_p7 = pnand %p12480_p6, %p12474_p3 }
 0x111   :  { %12484 = shalt.err (!%p12481_p7)
}
 0x112   :  { %204 = dma.hbm_to_vmem [thread:$0]  %s14161_s18, 16, %s202_s27, [#allocation27]  }
 0x113   :  { %12507 = dma.done.wait [#allocation6], 640  }
 0x114   :  { %12508 = vsyncadd [#allocation6], 4294966656 }
 0x115   :  { %12509 = dma.done.wait [#allocation9], 2336  }
 0x116   :  { %12510 = vsyncadd [#allocation9], 4294964960 }
 0x117   :  { %12511 = dma.done.wait [#allocation12], 24608  }
 0x118   :  { %12512 = vsyncadd [#allocation12], 4294942688 }
 0x119   :  { %12513 = dma.done.wait [#allocation15], 128  }
 0x11a   :  { %12514 = vsyncadd [#allocation15], 4294967168 }
 0x11b   :  { %12515 = dma.done.wait [#allocation18], 73824  }
 0x11c   :  { %12516 = vsyncadd [#allocation18], 4294893472 }
 0x11d   :  { %12517 = dma.done.wait [#allocation21], 128  }
 0x11e   :  { %12518 = vsyncadd [#allocation21], 4294967168 }
 0x11f   :  { %12519 = dma.done.wait [#allocation24], 576  }
 0x120   :  { %12520 = vsyncadd [#allocation24], 4294966720 }
 0x121   :  { %12521 = dma.done.wait [#allocation27], 80  }
 0x122   :  { %12522 = vsyncadd [#allocation27], 4294967216  ;;  %vm261_vm0 = vcmask 385024   ;;  %v12547_v0 = vmov 0   ;;  %v12548_v1 = vmov 0.0   ;;  %vm264_vm1 = vcmask 392192  }
 0x123   :  { %371 = vmatprep.mubr.bf16.mxu0 %v12547_v0  ;;  %10938 = vset.pattern.permute.xlu0 %v12547_v0  ;;  %262 = vst.msk [vmem:[#allocation2] sm:$0x1] %vm261_vm0, %v12548_v1  ;;  %263 = vst.msk [vmem:[#allocation2 + $0x25] sm:$0x1] %vm261_vm0, %v12548_v1  ;;  %v10940_v2 = vld [vmem:[#allocation8 + $0x34] ss:$8 sps:$4 sm:$0xff]  }
 0x124   :  { %10939 = vset.pattern.permute.xlu1 %v12547_v0  ;;  %v10942_v3 = vld [vmem:[#allocation8 + $0x30] ss:$8 sps:$4 sm:$0xff]   ;;  %339 = vmatprep.subr.bf16.mxu0 %v10940_v2  ;;  %v10943_v4 = vld [vmem:[#allocation8 + $0x44] ss:$8 sps:$4 sm:$0xff]   ;;  %v10945_v5 = vld [vmem:[#allocation8 + $0x40] ss:$8 sps:$4 sm:$0xff]  }
 0x125   :  { %340 = vmatpush1.bf16.msra.mxu0 %v10942_v3  ;;  %v10946_v6 = vld [vmem:[#allocation8 + $0x54] ss:$8 sps:$4 sm:$0xff]   ;;  %v257_v8 = vld [vmem:[#allocation5 + $0x8] sm:$0xff]  ;;  %v258_v9 = vld [vmem:[#allocation5 + $0x10] sm:$0xff]  ;;  %vm269_vm2 = vcmask 388096   ;;  %s14177_s22 = sld [smem:[#allocation40_spill]] }
 0x126   :  { %341 = vmatprep.subr.bf16.mxu0 %v10943_v4  ;;  %v256_v7 = vld [vmem:[#allocation5] sm:$0xff]  ;;  %266 = vst.msk [vmem:[#allocation2 + $0x9] sm:$0xff] %vm264_vm1, %v257_v8  ;;  %v259_v10 = vld [vmem:[#allocation5 + $0x18] sm:$0xff]  ;;  %v10951_v12 = vld [vmem:[#allocation8 + $0x4] ss:$8 sps:$4 sm:$0xff]   ;;  %vm733_vm4 = vcmask 1040384  }
 0x127   :  { %265 = vst.msk [vmem:[#allocation2 + $0x1] sm:$0xff] %vm264_vm1, %v256_v7  ;;  %v10948_v11 = vld [vmem:[#allocation8 + $0x50] ss:$8 sps:$4 sm:$0xff]   ;;  %267 = vst.msk [vmem:[#allocation2 + $0x11] sm:$0xff] %vm264_vm1, %v258_v9  ;;  %v10949_v16 = vld [vmem:[#allocation8] ss:$8 sps:$4 sm:$0xff]  }
 0x128   :  { %268 = vst.msk [vmem:[#allocation2 + $0x19] sm:$0xff] %vm264_vm1, %v259_v10  ;;  %v260_v13 = vld [vmem:[#allocation5 + $0x20] sm:$0xf]  ;;  %v10954_v18 = vld [vmem:[#allocation8 + $0x14] ss:$8 sps:$4 sm:$0xff]   ;;  %vm1941_vm6 = vcmask 1046528  }
 0x129   :  { %342 = vmatpush1.bf16.msra.mxu0 %v10945_v5  ;;  %270 = vst.msk [vmem:[#allocation2 + $0x21] sm:$0xf] %vm269_vm2, %v260_v13  ;;  %v10952_v21 = vld [vmem:[#allocation8 + $0x10] ss:$8 sps:$4 sm:$0xff]   ;;  %v10957_v22 = vld [vmem:[#allocation8 + $0x24] ss:$8 sps:$4 sm:$0xff]  }
 0x12a   :  { %343 = vmatprep.subr.bf16.mxu0 %v10946_v6  ;;  %v10955_v25 = vld [vmem:[#allocation8 + $0x20] ss:$8 sps:$4 sm:$0xff]   ;;  %v10960_v28 = vld [vmem:[#allocation8 + $0x64] ss:$8 sps:$4 sm:$0xff]   ;;  %v10963_v45 = vld [vmem:[#allocation8 + $0x74] ss:$8 sps:$4 sm:$0xff]  }
 0x12b   :  { %v251_v23 = vld [vmem:[%s14177_s22] sm:$0xff]  ;;  %v253_v26 = vld [vmem:[%s14177_s22 + $0x10] sm:$0xff]  ;;  %v252_v27 = vld [vmem:[%s14177_s22 + $0x8] sm:$0xff]  ;;  %vm925_vm5 = vsmask.f32 7424  ;;  %vm7634_vm8 = vcmask 1043456  }
 0x12c   :  { %681 = vperm.xlu0 %10938, %v251_v23   ;;  %691 = vperm.xlu1 %10939, %v253_v26   ;;  %v255_v30 = vld [vmem:[%s14177_s22 + $0x20] sm:$0xf]  ;;  %v254_v31 = vld [vmem:[%s14177_s22 + $0x18] sm:$0xff]  ;;  %v10969_v33 = vld [vmem:[#allocation13] ss:$16 sps:$4 sm:$0xff]   ;;  %vm7630_vm9 = vcmask 293888  }
 0x12d   :  { %344 = vmatpush1.bf16.msra.mxu0 %v10948_v11  ;;  %v286_v15 = vld [vmem:[#allocation2 + $0x9] sm:$0xff]  ;;  %v10972_v36 = vld [vmem:[#allocation13 + $0x20] ss:$16 sps:$4 sm:$0xff]   ;;  %vm12550_vm10 = vmmov 0   ;;  %vm8307_vm11 = vcmask 130112   ;;  %s12552_s29 = smov 120  }
 0x12e   :  { %v285_v14 = vld [vmem:[#allocation2 + $0x1] sm:$0xff]  ;;  %439 = vmatprep.subr.bf16.mxu0 %v10951_v12  ;;  %v287_v19 = vld [vmem:[#allocation2 + $0x11] sm:$0xff]  ;;  %vm8328_vm12 = vcmask 64512   ;;  %vm8381_vm13 = vcmask 1041409   ;;  %s12553_s0 = smov [#allocation29]   ;;  %vm9387_vm14 = vcmask 74752  }
 0x12f   :  { %v290_v17 = vpack.c.bf16 %v286_v15, %v285_v14  ;;  %v288_v20 = vld [vmem:[#allocation2 + $0x19] sm:$0xff]  ;;  %v272_v39 = vld [vmem:[#allocation2 + $0x8] sm:$0xff]  ;;  %v10975_v40 = vld [vmem:[#allocation13 + $0x40] ss:$16 sps:$4 sm:$0xff]  }
 0x130   :  { %v291_v24 = vpack.c.bf16 %v288_v20, %v287_v19  ;;  %v289_v29 = vld [vmem:[#allocation2 + $0x21] sm:$0xf]  ;;  %v10967_v32 = vld [vmem:[#allocation13 + $0x4] ss:$16 sps:$4 sm:$0xff]   ;;  %686 = vperm.xlu0 %10938, %v252_v27   ;;  %696 = vperm.xlu1 %10939, %v254_v31   ;;  %v273_v47 = vld [vmem:[#allocation2 + $0x10] sm:$0xff] }
 0x131   :  { %9417 = vmatmul.mubr.msk.bf16.vlgmr.msra.gmra.mrb[0].mxu0 %vm264_vm1, %v290_v17  ;;  %v10970_v34 = vld [vmem:[#allocation13 + $0x24] ss:$16 sps:$4 sm:$0xff]   ;;  %1740 = vmatprep.subr.bf16.mxu1 %v10967_v32  ;;  %v292_v35 = vpack.c.bf16 %v289_v29, %v289_v29  ;;  %v271_v38 = vld [vmem:[#allocation2] sm:$0xff] }
 0x132   :  { %440 = vmatpush1.bf16.msra.mxu0 %v10949_v16  ;;  %381 = vmatprep.mubr.bf16.mxu0 %v12547_v0  ;;  %v10973_v37 = vld [vmem:[#allocation13 + $0x44] ss:$16 sps:$4 sm:$0xff]   ;;  %v276_v42 = vpack.c.bf16 %v272_v39, %v271_v38  ;;  %v10981_v43 = vld [vmem:[#allocation13 + $0x60] ss:$16 sps:$4 sm:$0xff]   ;;  %v275_v59 = vld [vmem:[#allocation2 + $0x20] sm:$0xf]  ;;  %v637_v39 = vlaneseq }
 0x133   :  { %441 = vmatprep.subr.bf16.mxu0 %v10954_v18  ;;  %1741 = vmatpush1.bf16.msra.mxu1 %v10969_v33  ;;  %v10976_v41 = vld [vmem:[#allocation13 + $0x64] ss:$16 sps:$4 sm:$0xff]   ;;  %v10987_v50 = vld [vmem:[#allocation13 + $0x80] ss:$16 sps:$4 sm:$0xff]   ;;  %v278_v63 = vpack.c.bf16 %v275_v59, %v275_v59  ;;  %v635_v59 = vld [vmem:[#allocation10] sm:$0x3] }
 0x134   :  { %701 = vperm.xlu0 %10938, %v255_v30   ;;  %1742 = vmatprep.subr.bf16.mxu1 %v10970_v34  ;;  %v10958_v44 = vld [vmem:[#allocation8 + $0x60] ss:$8 sps:$4 sm:$0xff]   ;;  %v10961_v48 = vld [vmem:[#allocation8 + $0x70] ss:$8 sps:$4 sm:$0xff]   ;;  %v10966_v52 = vld [vmem:[#allocation8 + $0x84] ss:$8 sps:$4 sm:$0xff]  }
 0x135   :  { %v10982_v46 = vld [vmem:[#allocation13 + $0x84] ss:$16 sps:$4 sm:$0xff]   ;;  %v10993_v54 = vld [vmem:[#allocation13 + $0xa0] ss:$16 sps:$4 sm:$0xff]   ;;  %vm716_vm3 = vcmp.lt.s32.totalorder %v637_v39, 256  ;;  %vm2544_vm7 = vcmp.lt.s32.totalorder %v637_v39, 512 }
 0x136   :  { %442 = vmatpush1.bf16.msra.mxu0 %v10952_v21  ;;  %v274_v49 = vld [vmem:[#allocation2 + $0x18] sm:$0xff]  ;;  %v10964_v53 = vld [vmem:[#allocation8 + $0x80] ss:$8 sps:$4 sm:$0xff]   ;;  %v10999_v58 = vld [vmem:[#allocation13 + $0xc0] ss:$16 sps:$4 sm:$0xff]  }
 0x137   :  { %443 = vmatprep.subr.bf16.mxu0 %v10957_v22  ;;  %1743 = vmatpush1.bf16.msra.mxu1 %v10972_v36  ;;  %v10988_v51 = vld [vmem:[#allocation13 + $0xa4] ss:$16 sps:$4 sm:$0xff]   ;;  %v277_v55 = vpack.c.bf16 %v274_v49, %v273_v47  ;;  %v11005_v61 = vld [vmem:[#allocation13 + $0xe0] ss:$16 sps:$4 sm:$0xff]  }
 0x138   :  { %1744 = vmatprep.subr.bf16.mxu1 %v10973_v37  ;;  %v10980_v56 = vld [vmem:[#allocation13 + $0x204] ss:$16 sps:$4 sm:$0xff]   ;;  %v11011_v2 = vld [vmem:[#allocation13 + $0x100] ss:$16 sps:$4 sm:$0xff]  }
 0x139   :  { %9418 = vmatmul.mubr.msk.bf16.gmra.mrb[4].mxu0 %vm264_vm1, %v291_v24  ;;  %v10994_v57 = vld [vmem:[#allocation13 + $0xc4] ss:$16 sps:$4 sm:$0xff]   ;;  %v11017_v6 = vld [vmem:[#allocation13 + $0x120] ss:$16 sps:$4 sm:$0xff]  }
 0x13a   :  { %391 = vmatprep.mubr.bf16.mxu0 %v12547_v0  ;;  %444 = vmatpush1.bf16.msra.mxu0 %v10955_v25  ;;  %v11000_v60 = vld [vmem:[#allocation13 + $0xe4] ss:$16 sps:$4 sm:$0xff]   ;;  %v10978_v7 = vld [vmem:[#allocation13 + $0x200] ss:$16 sps:$4 sm:$0xff]  }
 0x13b   :  { %554 = vmatprep.subr.bf16.mxu0 %v10960_v28  ;;  %1745 = vmatpush1.bf16.msra.mxu1 %v10975_v40  ;;  %v11006_v62 = vld [vmem:[#allocation13 + $0x104] ss:$16 sps:$4 sm:$0xff]   ;;  %v10984_v12 = vld [vmem:[#allocation13 + $0x220] ss:$16 sps:$4 sm:$0xff]  }
 0x13c   :  { %1746 = vmatprep.subr.bf16.mxu1 %v10976_v41  ;;  %v500_v3 = vld [vmem:[#allocation2 + $0x2] sm:$0xff]  ;;  %v501_v4 = vld [vmem:[#allocation2 + $0xa] sm:$0xff]  ;;  %v502_v10 = vld [vmem:[#allocation2 + $0x12] sm:$0xff]  ;;  %718 = vst.msk [vmem:[#allocation3] ss:$8 sm:$0x3] %vm716_vm3, %v12548_v1 }
 0x13d   :  { %v11012_v5 = vld [vmem:[#allocation13 + $0x124] ss:$16 sps:$4 sm:$0xff]   ;;  %v505_v8 = vpack.c.bf16 %v501_v4, %v500_v3  ;;  %v10990_v14 = vld [vmem:[#allocation13 + $0x240] ss:$16 sps:$4 sm:$0xff]  }
 0x13e   :  { %v10986_v9 = vld [vmem:[#allocation13 + $0x224] ss:$16 sps:$4 sm:$0xff]   ;;  %v504_v17 = vld [vmem:[#allocation2 + $0x22] sm:$0xf] }
 0x13f   :  { %1747 = vmatpush1.bf16.msra.mxu1 %v10981_v43  ;;  %v503_v11 = vld [vmem:[#allocation2 + $0x1a] sm:$0xff]  ;;  %v10996_v18 = vld [vmem:[#allocation13 + $0x260] ss:$16 sps:$4 sm:$0xff]   ;;  %v507_v21 = vpack.c.bf16 %v504_v17, %v504_v17  ;;  %721 = vst.msk [vmem:[#allocation3 + $0x45] ss:$8 sm:$0x3] %vm716_vm3, %v12548_v1 }
 0x140   :  { %1748 = vmatprep.subr.bf16.mxu1 %v10982_v46  ;;  %v10992_v13 = vld [vmem:[#allocation13 + $0x244] ss:$16 sps:$4 sm:$0xff]   ;;  %v506_v15 = vpack.c.bf16 %v503_v11, %v502_v10  ;;  %v11002_v20 = vld [vmem:[#allocation13 + $0x280] ss:$16 sps:$4 sm:$0xff]  }
 0x141   :  { %9419 = vmatmul.mubr.msk.bf16.gmra.mrb[8].mxu0 %vm264_vm1, %v292_v35  ;;  %v10998_v16 = vld [vmem:[#allocation13 + $0x264] ss:$16 sps:$4 sm:$0xff]   ;;  %v11008_v23 = vld [vmem:[#allocation13 + $0x2a0] ss:$16 sps:$4 sm:$0xff]  }
 0x142   :  { %471 = vmatprep.mubr.bf16.mxu0 %v12547_v0  ;;  %v11004_v19 = vld [vmem:[#allocation13 + $0x284] ss:$16 sps:$4 sm:$0xff]   ;;  %v11014_v25 = vld [vmem:[#allocation13 + $0x2c0] ss:$16 sps:$4 sm:$0xff]  }
 0x143   :  { %1749 = vmatpush1.bf16.msra.mxu1 %v10987_v50  ;;  %v11010_v22 = vld [vmem:[#allocation13 + $0x2a4] ss:$16 sps:$4 sm:$0xff]   ;;  %v11020_v27 = vld [vmem:[#allocation13 + $0x2e0] ss:$16 sps:$4 sm:$0xff]  }
 0x144   :  { %1750 = vmatprep.subr.bf16.mxu1 %v10988_v51  ;;  %v11016_v24 = vld [vmem:[#allocation13 + $0x2c4] ss:$16 sps:$4 sm:$0xff]   ;;  %v11023_v29 = vld [vmem:[#allocation13 + $0x140] ss:$16 sps:$4 sm:$0xff]  }
 0x145   :  { %v11022_v26 = vld [vmem:[#allocation13 + $0x2e4] ss:$16 sps:$4 sm:$0xff]   ;;  %v11026_v30 = vld [vmem:[#allocation13 + $0x300] ss:$16 sps:$4 sm:$0xff]  }
 0x146   :  { %v11028_v28 = vld [vmem:[#allocation13 + $0x304] ss:$16 sps:$4 sm:$0xff]   ;;  %v11029_v32 = vld [vmem:[#allocation13 + $0x160] ss:$16 sps:$4 sm:$0xff]  }
 0x147   :  { %1751 = vmatpush1.bf16.msra.mxu1 %v10993_v54  ;;  %v11024_v31 = vld [vmem:[#allocation13 + $0x164] ss:$16 sps:$4 sm:$0xff]   ;;  %v11032_v33 = vld [vmem:[#allocation13 + $0x320] ss:$16 sps:$4 sm:$0xff]  }
 0x148   :  { %1752 = vmatprep.subr.bf16.mxu1 %v10994_v57  ;;  %v11034_v34 = vld [vmem:[#allocation13 + $0x324] ss:$16 sps:$4 sm:$0xff]   ;;  %v11035_v37 = vld [vmem:[#allocation13 + $0x180] ss:$16 sps:$4 sm:$0xff]   ;;  %v11077_v57 = vld [vmem:[#allocation13 + $0x20c] ss:$16 sps:$4 sm:$0xff]  }
 0x149   :  { %9426 = vmatmul.mubr.msk.bf16.vlgmr.msra.gmra.mrb[0].mxu0 %vm264_vm1, %v276_v42  ;;  %v11030_v35 = vld [vmem:[#allocation13 + $0x184] ss:$16 sps:$4 sm:$0xff]   ;;  %v11038_v38 = vld [vmem:[#allocation13 + $0x340] ss:$16 sps:$4 sm:$0xff]  }
 0x14a   :  { %555 = vmatpush1.bf16.msra.mxu0 %v10958_v44  ;;  %481 = vmatprep.mubr.bf16.mxu0 %v12547_v0  ;;  %v11040_v36 = vld [vmem:[#allocation13 + $0x344] ss:$16 sps:$4 sm:$0xff]   ;;  %v11041_v42 = vld [vmem:[#allocation13 + $0x1a0] ss:$16 sps:$4 sm:$0xff]  }
 0x14b   :  { %556 = vmatprep.subr.bf16.mxu0 %v10963_v45  ;;  %1753 = vmatpush1.bf16.msra.mxu1 %v10999_v58  ;;  %v11036_v40 = vld [vmem:[#allocation13 + $0x1a4] ss:$16 sps:$4 sm:$0xff]   ;;  %v11044_v43 = vld [vmem:[#allocation13 + $0x360] ss:$16 sps:$4 sm:$0xff]   ;;  %v12914_v58 = vshrl.u32 %v637_v39, 7 }
 0x14c   :  { %1754 = vmatprep.subr.bf16.mxu1 %v11000_v60  ;;  %v11046_v41 = vld [vmem:[#allocation13 + $0x364] ss:$16 sps:$4 sm:$0xff]   ;;  %v11047_v46 = vld [vmem:[#allocation13 + $0x1c0] ss:$16 sps:$4 sm:$0xff]  }
 0x14d   :  { %v11042_v44 = vld [vmem:[#allocation13 + $0x1c4] ss:$16 sps:$4 sm:$0xff]   ;;  %v11050_v47 = vld [vmem:[#allocation13 + $0x380] ss:$16 sps:$4 sm:$0xff]   ;;  %v12917_v60 = vsub.s32 0, %v12914_v58 }
 0x14e   :  { %557 = vmatpush1.bf16.msra.mxu0 %v10961_v48  ;;  %v11052_v45 = vld [vmem:[#allocation13 + $0x384] ss:$16 sps:$4 sm:$0xff]   ;;  %v11053_v49 = vld [vmem:[#allocation13 + $0x1e0] ss:$16 sps:$4 sm:$0xff]  }
 0x14f   :  { %558 = vmatprep.subr.bf16.mxu0 %v10966_v52  ;;  %1755 = vmatpush1.bf16.msra.mxu1 %v11005_v61  ;;  %v11048_v48 = vld [vmem:[#allocation13 + $0x1e4] ss:$16 sps:$4 sm:$0xff]   ;;  %v11057_v51 = vld [vmem:[#allocation13 + $0x3a0] ss:$16 sps:$4 sm:$0xff]   ;;  %v657_v61 = vld [vmem:[#allocation11] sm:$0x3] }
 0x150   :  { %1756 = vmatprep.subr.bf16.mxu1 %v11006_v62  ;;  %v11059_v50 = vld [vmem:[#allocation13 + $0x3a4] ss:$16 sps:$4 sm:$0xff]   ;;  %v11063_v54 = vld [vmem:[#allocation13 + $0x3c0] ss:$16 sps:$4 sm:$0xff]   ;;  %v12920_v62 = vsub.s32 1, %v12914_v58 }
 0x151   :  { %9427 = vmatmul.mubr.msk.bf16.gmra.mrb[4].mxu0 %vm264_vm1, %v277_v55  ;;  %v11056_v52 = vld [vmem:[#allocation13 + $0x404] ss:$16 sps:$4 sm:$0xff]   ;;  %2546 = vst.msk [vmem:[#allocation4] ss:$8 sm:$0xf] %vm2544_vm7, %v12548_v1 }
 0x152   :  { %491 = vmatprep.mubr.bf16.mxu0 %v12547_v0  ;;  %559 = vmatpush1.bf16.msra.mxu0 %v10964_v53  ;;  %v11065_v53 = vld [vmem:[#allocation13 + $0x3c4] ss:$16 sps:$4 sm:$0xff]   ;;  %v12926_v3 = vrot.slane %v635_v59, %v12920_v62  ;;  %2549 = vst.msk [vmem:[#allocation4 + $0x85] ss:$8 sm:$0xf] %vm2544_vm7, %v12548_v1 }
 0x153   :  { %1298 = vmatprep.subr.bf16.mxu0 %v10980_v56  ;;  %1757 = vmatpush1.bf16.msra.mxu1 %v11011_v2  ;;  %v11071_v55 = vld [vmem:[#allocation13 + $0x3e4] ss:$16 sps:$4 sm:$0xff]   ;;  %v11069_v56 = vld [vmem:[#allocation13 + $0x3e0] ss:$16 sps:$4 sm:$0xff]  }
 0x154   :  { %1758 = vmatprep.subr.bf16.mxu1 %v11012_v5  ;;  %v12929_v5 = vrot.slane %v657_v61, %v12917_v60 }
 0x157   :  { %1759 = vmatpush1.bf16.msra.mxu1 %v11017_v6 }
 0x159   :  { %9428 = vmatmul.mubr.msk.bf16.gmra.mrb[8].mxu0 %vm264_vm1, %v278_v63  ;;  %v12923_v63 = vrot.slane %v635_v59, %v12917_v60 }
 0x15a   :  { %586 = vmatprep.mubr.bf16.mxu0 %v12547_v0 }
 0x161   :  { %9435 = vmatmul.mubr.msk.bf16.vlgmr.msra.gmra.mrb[0].mxu0 %vm264_vm1, %v505_v8  ;;  %v12932_v8 = vrot.slane %v657_v61, %v12920_v62 }
 0x162   :  { %596 = vmatprep.mubr.bf16.mxu0 %v12547_v0  ;;  %1299 = vmatpush1.bf16.msra.mxu0 %v10978_v7 }
 0x163   :  { %1300 = vmatprep.subr.bf16.mxu0 %v10986_v9 }
 0x166   :  { %1301 = vmatpush1.bf16.msra.mxu0 %v10984_v12 }
 0x167   :  { %1302 = vmatprep.subr.bf16.mxu0 %v10992_v13 }
 0x169   :  { %9436 = vmatmul.mubr.msk.bf16.gmra.mrb[4].mxu0 %vm264_vm1, %v506_v15 }
 0x16a   :  { %606 = vmatprep.mubr.bf16.mxu0 %v12547_v0  ;;  %1303 = vmatpush1.bf16.msra.mxu0 %v10990_v14  ;;  %v11018_v0 = vld [vmem:[#allocation13 + $0x144] ss:$16 sps:$4 sm:$0xff]  }
 0x16b   :  { %1304 = vmatprep.subr.bf16.mxu0 %v10998_v16  ;;  %1760 = vmatprep.subr.bf16.mxu1 %v11018_v0 }
 0x16c   :  { %1761 = vmatpush1.bf16.msra.mxu1 %v11023_v29 }
 0x16d   :  { %1762 = vmatprep.subr.bf16.mxu1 %v11024_v31 }
 0x16e   :  { %1305 = vmatpush1.bf16.msra.mxu0 %v10996_v18 }
 0x16f   :  { %1306 = vmatprep.subr.bf16.mxu0 %v11004_v19 }
 0x170   :  { %1763 = vmatpush1.bf16.msra.mxu1 %v11029_v32 }
 0x171   :  { %9437 = vmatmul.mubr.msk.bf16.gmra.mrb[8].mxu0 %vm264_vm1, %v507_v21  ;;  %1764 = vmatprep.subr.bf16.mxu1 %v11030_v35 }
 0x172   :  { %1307 = vmatpush1.bf16.msra.mxu0 %v11002_v20 }
 0x173   :  { %1308 = vmatprep.subr.bf16.mxu0 %v11010_v22 }
 0x174   :  { %1765 = vmatpush1.bf16.msra.mxu1 %v11035_v37 }
 0x175   :  { %1766 = vmatprep.subr.bf16.mxu1 %v11036_v40 }
 0x176   :  { %1309 = vmatpush1.bf16.msra.mxu0 %v11008_v23 }
 0x177   :  { %1310 = vmatprep.subr.bf16.mxu0 %v11016_v24 }
 0x178   :  { %1767 = vmatpush1.bf16.msra.mxu1 %v11041_v42 }
 0x179   :  { %1768 = vmatprep.subr.bf16.mxu1 %v11042_v44 }
 0x17a   :  { %1311 = vmatpush1.bf16.msra.mxu0 %v11014_v25 }
 0x17b   :  { %1312 = vmatprep.subr.bf16.mxu0 %v11022_v26 }
 0x17c   :  { %1769 = vmatpush1.bf16.msra.mxu1 %v11047_v46 }
 0x17d   :  { %1770 = vmatprep.subr.bf16.mxu1 %v11048_v48 }
 0x17e   :  { %1313 = vmatpush1.bf16.msra.mxu0 %v11020_v27 }
 0x17f   :  { %1314 = vmatprep.subr.bf16.mxu0 %v11028_v28 }
 0x180   :  { %1771 = vmatpush1.bf16.msra.mxu1 %v11053_v49 }
 0x181   :  { %2278 = vmatprep.subr.bf16.mxu1 %v11056_v52 }
 0x182   :  { %1315 = vmatpush1.bf16.msra.mxu0 %v11026_v30 }
 0x183   :  { %1316 = vmatprep.subr.bf16.mxu0 %v11034_v34 }
 0x186   :  { %1317 = vmatpush1.bf16.msra.mxu0 %v11032_v33 }
 0x187   :  { %1318 = vmatprep.subr.bf16.mxu0 %v11040_v36 }
 0x18a   :  { %1319 = vmatpush1.bf16.msra.mxu0 %v11038_v38 }
 0x18b   :  { %1320 = vmatprep.subr.bf16.mxu0 %v11046_v41 }
 0x18e   :  { %1321 = vmatpush1.bf16.msra.mxu0 %v11044_v43 }
 0x18f   :  { %1322 = vmatprep.subr.bf16.mxu0 %v11052_v45 }
 0x192   :  { %1323 = vmatpush1.bf16.msra.mxu0 %v11050_v47 }
 0x193   :  { %1324 = vmatprep.subr.bf16.mxu0 %v11059_v50 }
 0x196   :  { %1325 = vmatpush1.bf16.msra.mxu0 %v11057_v51 }
 0x197   :  { %1326 = vmatprep.subr.bf16.mxu0 %v11065_v53 }
 0x19a   :  { %1327 = vmatpush1.bf16.msra.mxu0 %v11063_v54 }
 0x19b   :  { %1328 = vmatprep.subr.bf16.mxu0 %v11071_v55 }
 0x19e   :  { %1329 = vmatpush1.bf16.msra.mxu0 %v11069_v56 }
 0x19f   :  { %1359 = vmatprep.subr.bf16.mxu0 %v11077_v57 }
 0x1ab   :  { %v12934_v10 = vpop.permute.xlu0 %681  ;;  %v12949_v31 = vpop.permute.xlu1 %691 }
 0x1af   :  { %v12945_v24 = vpop.permute.xlu0 %686  ;;  %v12967_v51 = vpop.permute.xlu1 %696 }
 0x234   :  { %v588_v2 = vpop.f32.mrb[0].mxu0 }
 0x235   :  { %v625_v4 = vmax.f32 %v588_v2, 0.0  ;;  %v590_v6 = vpop.f32.mrb[1].mxu0 }
 0x236   :  { %v626_v7 = vmax.f32 %v590_v6, 0.0  ;;  %v592_v9 = vpop.f32.mrb[2].mxu0 }
 0x237   :  { %v647_v11 = vmul.f32 %v12923_v63, %v625_v4  ;;  %v627_v12 = vmax.f32 %v592_v9, 0.0  ;;  %v594_v13 = vpop.f32.mrb[3].mxu0 }
 0x238   :  { %v648_v14 = vmul.f32 %v12926_v3, %v626_v7  ;;  %v628_v15 = vmax.f32 %v594_v13, 0.0 }
 0x239   :  { %v669_v16 = vadd.f32 %v12929_v5, %v647_v11  ;;  %v649_v17 = vmul.f32 %v12923_v63, %v627_v12 }
 0x23a   :  { %v670_v18 = vadd.f32 %v12932_v8, %v648_v14  ;;  %v650_v19 = vmul.f32 %v12926_v3, %v628_v15 }
 0x23b   :  { %v671_v20 = vadd.f32 %v12929_v5, %v649_v17  ;;  %v704_v21 = vmul.f32 %v12934_v10, %v669_v16 }
 0x23c   :  { %v672_v22 = vadd.f32 %v12932_v8, %v650_v19  ;;  %v598_v23 = vpop.f32.mrb[4].mxu0  ;;  %v705_v25 = vmul.f32 %v12934_v10, %v670_v18 }
 0x23d   :  { %v734_v26 = vrot.slane %v704_v21, 7  ;;  %v629_v27 = vmax.f32 %v598_v23, 0.0  ;;  %v600_v0 = vpop.f32.mrb[5].mxu0  ;;  %v706_v28 = vmul.f32 %v12945_v24, %v671_v20  ;;  %v11054_v20 = vld [vmem:[#allocation13 + $0x400] ss:$16 sps:$4 sm:$0xff]  }
 0x23e   :  { %v630_v29 = vmax.f32 %v600_v0, 0.0  ;;  %v602_v30 = vpop.f32.mrb[6].mxu0  ;;  %v707_v32 = vmul.f32 %v12945_v24, %v672_v22  ;;  %v735_v33 = vrot.slane %v705_v25, 7  ;;  %v11062_v25 = vld [vmem:[#allocation13 + $0x424] ss:$16 sps:$4 sm:$0xff]  }
 0x23f   :  { %762 = vst [vmem:[#allocation3] sm:$0xfe] %v734_v26  ;;  %v651_v34 = vmul.f32 %v12923_v63, %v629_v27  ;;  %v631_v35 = vmax.f32 %v602_v30, 0.0  ;;  %v604_v36 = vpop.f32.mrb[7].mxu0  ;;  %v736_v37 = vrot.slane %v706_v28, 7 }
 0x240   :  { %v652_v38 = vmul.f32 %v12926_v3, %v630_v29  ;;  %v632_v40 = vmax.f32 %v604_v36, 0.0  ;;  %v738_v41 = vrot.slane %v707_v32, 7  ;;  %763 = vst [vmem:[#allocation3 + $0x8] sm:$0xfe] %v735_v33  ;;  %v11060_v28 = vld [vmem:[#allocation13 + $0x420] ss:$16 sps:$4 sm:$0xff]  }
 0x241   :  { %v673_v42 = vadd.f32 %v12929_v5, %v651_v34  ;;  %v653_v43 = vmul.f32 %v12923_v63, %v631_v35  ;;  %v12957_v44 = vsel %vm733_vm4, %v734_v26, %v736_v37  ;;  %v12985_v26 = vpop.permute.xlu0 %701  ;;  %v11068_v32 = vld [vmem:[#allocation13 + $0x444] ss:$16 sps:$4 sm:$0xff]  }
 0x242   :  { %v674_v45 = vadd.f32 %v12932_v8, %v652_v38  ;;  %v654_v46 = vmul.f32 %v12926_v3, %v632_v40  ;;  %v12962_v47 = vsel %vm733_vm4, %v735_v33, %v738_v41 }
 0x243   :  { %v675_v48 = vadd.f32 %v12929_v5, %v653_v43  ;;  %v708_v49 = vmul.f32 %v12949_v31, %v673_v42  ;;  %v11066_v43 = vld [vmem:[#allocation13 + $0x440] ss:$16 sps:$4 sm:$0xff]  }
 0x244   :  { %v676_v50 = vadd.f32 %v12932_v8, %v654_v46  ;;  %v608_v52 = vpop.f32.mrb[8].mxu0  ;;  %v709_v53 = vmul.f32 %v12949_v31, %v674_v45  ;;  %v11074_v46 = vld [vmem:[#allocation13 + $0x464] ss:$16 sps:$4 sm:$0xff]  }
 0x245   :  { %v633_v54 = vmax.f32 %v608_v52, 0.0  ;;  %v710_v55 = vmul.f32 %v12967_v51, %v675_v48  ;;  %v740_v56 = vrot.slane %v708_v49, 7  ;;  %v610_v57 = vpop.f32.mrb[9].mxu0 }
 0x246   :  { %v634_v59 = vmax.f32 %v610_v57, 0.0  ;;  %v711_v61 = vmul.f32 %v12967_v51, %v676_v50  ;;  %v742_v2 = vrot.slane %v709_v53, 7  ;;  %v612_v4 = vpop.f32.mrb[10].mxu0  ;;  %v772_v6 = vld [vmem:[#allocation3] sm:$0xff] }
 0x247   :  { %v852_v7 = vld [vmem:[#allocation3] sm:$0xfe]  ;;  %v655_v9 = vmul.f32 %v12923_v63, %v633_v54  ;;  %v741_v11 = vsel %vm733_vm4, %v736_v37, %v740_v56  ;;  %v744_v12 = vrot.slane %v710_v55, 7  ;;  %v613_v13 = vpop.f32.mrb[11].mxu0  ;;  %v773_v14 = vld [vmem:[#allocation3 + $0x8] sm:$0xff]  ;;  %v12983_v23 = vpack.c.bf16 %v12957_v44, %v772_v6 }
 0x248   :  { %v853_v15 = vld [vmem:[#allocation3 + $0x8] sm:$0xfe]  ;;  %v656_v16 = vmul.f32 %v12926_v3, %v634_v59  ;;  %v743_v17 = vsel %vm733_vm4, %v738_v41, %v742_v2  ;;  %v746_v18 = vrot.slane %v711_v61, 7  ;;  %v12977_v19 = vpack.c.bf16 %v12962_v47, %v773_v14  ;;  %v11075_v50 = vld [vmem:[#allocation13 + $0x208] ss:$16 sps:$4 sm:$0xff]  }
 0x249   :  { %v677_v21 = vadd.f32 %v12929_v5, %v655_v9  ;;  %v745_v22 = vsel %vm733_vm4, %v740_v56, %v744_v12  ;;  %v857_v63 = vpack.c.bf16 %v12962_v47, %v853_v15  ;;  %v856_v0 = vpack.c.bf16 %v12957_v44, %v852_v7  ;;  %v11083_v55 = vld [vmem:[#allocation13 + $0x22c] ss:$16 sps:$4 sm:$0xff]   ;;  %v11072_v61 = vld [vmem:[#allocation13 + $0x460] ss:$16 sps:$4 sm:$0xff]   ;;  %v11081_v4 = vld [vmem:[#allocation13 + $0x228] ss:$16 sps:$4 sm:$0xff]  }
 0x24a   :  { %v678_v3 = vadd.f32 %v12932_v8, %v656_v16  ;;  %v747_v27 = vsel %vm733_vm4, %v742_v2, %v746_v18  ;;  %1772 = vmatprep.mubr.bf16.mxu1 %v12977_v19  ;;  %v12997_v36 = vpack.c.bf16 %v745_v22, %v741_v11  ;;  %v1863_v56 = vld [vmem:[#allocation3 + $0x8] sm:$0xfc]  ;;  %v11080_v6 = vld [vmem:[#allocation13 + $0x484] ss:$16 sps:$4 sm:$0xff]  }
 0x24b   :  { %v712_v5 = vmul.f32 %v12985_v26, %v677_v21  ;;  %v941_v29 = vshll.u32 %v857_v63, 16  ;;  %1773 = vmatmul.mubr.bf16.vlgmr.msra.gmra.mrb[0].mxu1 %v12983_v23  ;;  %v12993_v30 = vpack.c.bf16 %v747_v27, %v743_v17  ;;  %v939_v34 = vshrl.u32 %v857_v63, 16  ;;  %v11089_v9 = vld [vmem:[#allocation13 + $0x24c] ss:$16 sps:$4 sm:$0xff]   ;;  %v11078_v11 = vld [vmem:[#allocation13 + $0x480] ss:$16 sps:$4 sm:$0xff]  }
 0x24c   :  { %v713_v33 = vmul.f32 %v12985_v26, %v678_v3  ;;  %v929_v8 = vshll.u32 %v856_v0, 16  ;;  %2279 = vmatpush1.bf16.msra.mxu1 %v11054_v20  ;;  %v927_v41 = vshrl.u32 %v856_v0, 16  ;;  %v934_v52 = vshll.u32 %v12997_v36, 16  ;;  %v11087_v17 = vld [vmem:[#allocation13 + $0x248] ss:$16 sps:$4 sm:$0xff]  }
 0x24d   :  { %v748_v35 = vrot.slane %v712_v5, 7  ;;  %2280 = vmatprep.subr.bf16.mxu1 %v11062_v25  ;;  %1782 = vmatprep.mubr.bf16.mxu1 %v12993_v30  ;;  %v943_v37 = vrot.slane %v941_v29, 1  ;;  %v946_v38 = vshll.u32 %v12993_v30, 16  ;;  %v1867_v7 = vpack.c.bf16 %v12962_v47, %v1863_v56  ;;  %v11086_v22 = vld [vmem:[#allocation13 + $0x4a4] ss:$16 sps:$4 sm:$0xff]  }
 0x24e   :  { %v750_v40 = vrot.slane %v713_v33, 7  ;;  %v931_v42 = vrot.slane %v929_v8, 1  ;;  %v936_v59 = vrot.slane %v934_v52, 1  ;;  %v1946_v15 = vrot.slane %v12993_v30, 1  ;;  %v11095_v47 = vld [vmem:[#allocation13 + $0x26c] ss:$16 sps:$4 sm:$0xff]  }
 0x24f   :  { %v749_v45 = vsel %vm733_vm4, %v744_v12, %v748_v35  ;;  %v944_v48 = vor.u32 %v943_v37, %v939_v34  ;;  %v948_v49 = vrot.slane %v946_v38, 1  ;;  %v1945_v25 = vrot.slane %v1867_v7, 1  ;;  %v11084_v34 = vld [vmem:[#allocation13 + $0x4a0] ss:$16 sps:$4 sm:$0xff]   ;;  %v11092_v37 = vld [vmem:[#allocation13 + $0x4c4] ss:$16 sps:$4 sm:$0xff]  }
 0x250   :  { %770 = vst [vmem:[#allocation3 + $0x40] sm:$0x1f] %v749_v45  ;;  %v751_v53 = vsel %vm733_vm4, %v746_v18, %v750_v40  ;;  %2281 = vmatpush1.bf16.msra.mxu1 %v11060_v28  ;;  %v932_v54 = vor.u32 %v931_v42, %v927_v41  ;;  %v958_v27 = vshrl.u32 %v12993_v30, 16  ;;  %v950_v5 = vshrl.u32 %v12997_v36, 16  ;;  %v11090_v41 = vld [vmem:[#allocation13 + $0x4c0] ss:$16 sps:$4 sm:$0xff]  }
 0x251   :  { %771 = vst [vmem:[#allocation3 + $0x48] sm:$0x1f] %v751_v53  ;;  %2282 = vmatprep.subr.bf16.mxu1 %v11068_v32  ;;  %v13004_v57 = vsel %vm925_vm5, %v944_v48, %v948_v49  ;;  %v13024_v28 = vsel %vm1941_vm6, %v1945_v25, %v1946_v15  ;;  %v11093_v42 = vld [vmem:[#allocation13 + $0x268] ss:$16 sps:$4 sm:$0xff]   ;;  %v11104_v53 = vld [vmem:[#allocation13 + $0x504] ss:$16 sps:$4 sm:$0xff]  }
 0x252   :  { %1330 = vmatprep.mubr.bf16.mxu0 %v13004_v57  ;;  %v13009_v2 = vsel %vm925_vm5, %v932_v54, %v936_v59  ;;  %v960_v32 = vor.u32 %v958_v27, %v948_v49  ;;  %v952_v35 = vor.u32 %v950_v5, %v936_v59  ;;  %v11099_v48 = vld [vmem:[#allocation13 + $0x288] ss:$16 sps:$4 sm:$0xff]   ;;  %v11107_v49 = vld [vmem:[#allocation13 + $0x2ac] ss:$16 sps:$4 sm:$0xff]   ;;  %v11134_v25 = vld [vmem:[#allocation13 + $0x5a4] ss:$16 sps:$4 sm:$0xff]  }
 0x253   :  { %1783 = vmatmul.mubr.bf16.gmra.mrb[4].mxu1 %v12997_v36  ;;  %1331 = vmatmul.mubr.bf16.vlgmr.msra.gmra.mrb[12].mxu0 %v13009_v2  ;;  %v11105_v56 = vld [vmem:[#allocation13 + $0x2a8] ss:$16 sps:$4 sm:$0xff]   ;;  %v11113_v59 = vld [vmem:[#allocation13 + $0x2cc] ss:$16 sps:$4 sm:$0xff]   ;;  %v11140_v5 = vld [vmem:[#allocation13 + $0x5c4] ss:$16 sps:$4 sm:$0xff]  }
 0x254   :  { %2283 = vmatpush1.bf16.msra.mxu1 %v11066_v43  ;;  %1360 = vmatpush1.bf16.msra.mxu0 %v11075_v50  ;;  %v11101_v43 = vld [vmem:[#allocation13 + $0x28c] ss:$16 sps:$4 sm:$0xff]   ;;  %v11096_v50 = vld [vmem:[#allocation13 + $0x4e0] ss:$16 sps:$4 sm:$0xff]  }
 0x255   :  { %2284 = vmatprep.subr.bf16.mxu1 %v11074_v46  ;;  %1361 = vmatprep.subr.bf16.mxu0 %v11083_v55  ;;  %v11098_v46 = vld [vmem:[#allocation13 + $0x4e4] ss:$16 sps:$4 sm:$0xff]   ;;  %v11102_v55 = vld [vmem:[#allocation13 + $0x500] ss:$16 sps:$4 sm:$0xff]   ;;  %v11119_v7 = vld [vmem:[#allocation13 + $0x2ec] ss:$16 sps:$4 sm:$0xff]  }
 0x256   :  { %v11143_v27 = vld [vmem:[#allocation13 + $0x36c] ss:$16 sps:$4 sm:$0xff]  }
 0x257   :  { %v780_v12 = vld [vmem:[#allocation3 + $0x40] sm:$0xf] }
 0x258   :  { %v854_v13 = vld [vmem:[#allocation3 + $0x40] sm:$0x1f]  ;;  %2285 = vmatpush1.bf16.msra.mxu1 %v11072_v61  ;;  %v781_v14 = vld [vmem:[#allocation3 + $0x48] sm:$0xf]  ;;  %1362 = vmatpush1.bf16.msra.mxu0 %v11081_v4  ;;  %v13016_v63 = vpack.c.bf16 %v780_v12, %v780_v12  ;;  %v11108_v4 = vld [vmem:[#allocation13 + $0x520] ss:$16 sps:$4 sm:$0xff]  }
 0x259   :  { %v855_v16 = vld [vmem:[#allocation3 + $0x48] sm:$0x1f]  ;;  %v858_v18 = vpack.c.bf16 %v854_v13, %v854_v13  ;;  %v13014_v20 = vpack.c.bf16 %v781_v14, %v781_v14  ;;  %2286 = vmatprep.subr.bf16.mxu1 %v11080_v6  ;;  %1363 = vmatprep.subr.bf16.mxu0 %v11089_v9  ;;  %v11110_v61 = vld [vmem:[#allocation13 + $0x524] ss:$16 sps:$4 sm:$0xff]   ;;  %v11111_v6 = vld [vmem:[#allocation13 + $0x2c8] ss:$16 sps:$4 sm:$0xff]  }
 0x25a   :  { %v859_v21 = vpack.c.bf16 %v855_v16, %v855_v16  ;;  %v11116_v9 = vld [vmem:[#allocation13 + $0x544] ss:$16 sps:$4 sm:$0xff]   ;;  %v11117_v12 = vld [vmem:[#allocation13 + $0x2e8] ss:$16 sps:$4 sm:$0xff]   ;;  %v11125_v13 = vld [vmem:[#allocation13 + $0x30c] ss:$16 sps:$4 sm:$0xff]  }
 0x25b   :  { %v954_v3 = vshll.u32 %v858_v18, 16  ;;  %1792 = vmatprep.mubr.bf16.mxu1 %v13014_v20  ;;  %v966_v52 = vshrl.u32 %v858_v18, 16  ;;  %v11122_v14 = vld [vmem:[#allocation13 + $0x564] ss:$16 sps:$4 sm:$0xff]   ;;  %v11120_v16 = vld [vmem:[#allocation13 + $0x560] ss:$16 sps:$4 sm:$0xff]  }
 0x25c   :  { %v962_v0 = vshll.u32 %v859_v21, 16  ;;  %1793 = vmatmul.mubr.bf16.gmra.mrb[8].mxu1 %v13016_v63  ;;  %v969_v8 = vshrl.u32 %v859_v21, 16  ;;  %1364 = vmatpush1.bf16.msra.mxu0 %v11087_v17  ;;  %v11131_v17 = vld [vmem:[#allocation13 + $0x32c] ss:$16 sps:$4 sm:$0xff]   ;;  %v11128_v18 = vld [vmem:[#allocation13 + $0x584] ss:$16 sps:$4 sm:$0xff]  }
 0x25d   :  { %v956_v29 = vrot.slane %v954_v3, 1  ;;  %2287 = vmatpush1.bf16.msra.mxu1 %v11078_v11  ;;  %2310 = vmatprep.mubr.bf16.mxu1 %v13024_v28  ;;  %v11114_v11 = vld [vmem:[#allocation13 + $0x540] ss:$16 sps:$4 sm:$0xff]   ;;  %v11129_v21 = vld [vmem:[#allocation13 + $0x328] ss:$16 sps:$4 sm:$0xff]  }
 0x25e   :  { %v964_v33 = vrot.slane %v962_v0, 1  ;;  %2288 = vmatprep.subr.bf16.mxu1 %v11086_v22  ;;  %1365 = vmatprep.subr.bf16.mxu0 %v11095_v47  ;;  %v11137_v22 = vld [vmem:[#allocation13 + $0x34c] ss:$16 sps:$4 sm:$0xff]   ;;  %v11126_v47 = vld [vmem:[#allocation13 + $0x580] ss:$16 sps:$4 sm:$0xff]  }
 0x25f   :  { %v13035_v45 = vsel %vm925_vm5, %v952_v35, %v956_v29  ;;  %v13039_v54 = vor.u32 %v966_v52, %v956_v29  ;;  %v11135_v3 = vld [vmem:[#allocation13 + $0x348] ss:$16 sps:$4 sm:$0xff]   ;;  %v11132_v0 = vld [vmem:[#allocation13 + $0x5a0] ss:$16 sps:$4 sm:$0xff]   ;;  %v11146_v35 = vld [vmem:[#allocation13 + $0x5e4] ss:$16 sps:$4 sm:$0xff]  }
 0x260   :  { %v13029_v38 = vsel %vm925_vm5, %v960_v32, %v964_v33  ;;  %v13031_v40 = vor.u32 %v969_v8, %v964_v33  ;;  %1366 = vmatpush1.bf16.msra.mxu0 %v11093_v42  ;;  %v11141_v29 = vld [vmem:[#allocation13 + $0x368] ss:$16 sps:$4 sm:$0xff]   ;;  %v11149_v32 = vld [vmem:[#allocation13 + $0x38c] ss:$16 sps:$4 sm:$0xff]   ;;  %v11138_v33 = vld [vmem:[#allocation13 + $0x5c0] ss:$16 sps:$4 sm:$0xff]  }
 0x261   :  { %1340 = vmatprep.mubr.bf16.mxu0 %v13029_v38  ;;  %2289 = vmatpush1.bf16.msra.mxu1 %v11084_v34  ;;  %v1865_v34 = vld [vmem:[#allocation3 + $0x48] sm:$0x3f]  ;;  %v1862_v8 = vld [vmem:[#allocation3] sm:$0xfc] }
 0x262   :  { %1341 = vmatmul.mubr.bf16.gmra.mrb[16].mxu0 %v13035_v45  ;;  %2290 = vmatprep.subr.bf16.mxu1 %v11092_v37  ;;  %v11147_v37 = vld [vmem:[#allocation13 + $0x388] ss:$16 sps:$4 sm:$0xff]   ;;  %v1869_v42 = vpack.c.bf16 %v1865_v34, %v1865_v34  ;;  %v11155_v52 = vld [vmem:[#allocation13 + $0x3cc] ss:$16 sps:$4 sm:$0xff]  }
 0x263   :  { %1350 = vmatprep.mubr.bf16.mxu0 %v13031_v40  ;;  %1367 = vmatprep.subr.bf16.mxu0 %v11101_v43  ;;  %v1866_v43 = vpack.c.bf16 %v12957_v44, %v1862_v8  ;;  %v11197_v34 = vld [vmem:[#allocation13 + $0x18c] ss:$16 sps:$4 sm:$0xff]  }
 0x264   :  { %1368 = vmatpush1.bf16.msra.mxu0 %v11099_v48  ;;  %v1943_v48 = vrot.slane %v12997_v36, 1  ;;  %v11263_v8 = vld [vmem:[#allocation17 + $0x634] ss:$24 sps:$4 sm:$0xff]  }
 0x265   :  { %2291 = vmatpush1.bf16.msra.mxu1 %v11090_v41  ;;  %1369 = vmatprep.subr.bf16.mxu0 %v11107_v49  ;;  %v11152_v41 = vld [vmem:[#allocation13 + $0x3ac] ss:$16 sps:$4 sm:$0xff]   ;;  %v11150_v49 = vld [vmem:[#allocation13 + $0x3a8] ss:$16 sps:$4 sm:$0xff]  }
 0x266   :  { %2292 = vmatprep.subr.bf16.mxu1 %v11098_v46  ;;  %v11144_v46 = vld [vmem:[#allocation13 + $0x5e0] ss:$16 sps:$4 sm:$0xff]  }
 0x268   :  { %1370 = vmatpush1.bf16.msra.mxu0 %v11105_v56 }
 0x269   :  { %2293 = vmatpush1.bf16.msra.mxu1 %v11096_v50  ;;  %1371 = vmatprep.subr.bf16.mxu0 %v11113_v59  ;;  %v13045_v50 = vrot.slane %v1869_v42, 1  ;;  %v11153_v59 = vld [vmem:[#allocation13 + $0x3c8] ss:$16 sps:$4 sm:$0xff]   ;;  %v11200_v42 = vld [vmem:[#allocation13 + $0x1ac] ss:$16 sps:$4 sm:$0xff]  }
 0x26a   :  { %1351 = vmatmul.mubr.bf16.gmra.mrb[20].mxu0 %v13039_v54  ;;  %2294 = vmatprep.subr.bf16.mxu1 %v11104_v53  ;;  %v1864_v53 = vld [vmem:[#allocation3 + $0x40] sm:$0x3f] }
 0x26b   :  { %1391 = vmatprep.mubr.bf16.mxu0 %v13004_v57  ;;  %v11123_v57 = vld [vmem:[#allocation13 + $0x308] ss:$16 sps:$4 sm:$0xff]   ;;  %v1868_v44 = vpack.c.bf16 %v1864_v53, %v1864_v53 }
 0x26c   :  { %1372 = vmatpush1.bf16.msra.mxu0 %v11111_v6  ;;  %v11201_v53 = vld [vmem:[#allocation13 + $0x1c8] ss:$16 sps:$4 sm:$0xff]  }
 0x26d   :  { %2295 = vmatpush1.bf16.msra.mxu1 %v11102_v55  ;;  %1373 = vmatprep.subr.bf16.mxu0 %v11119_v7  ;;  %v1942_v55 = vrot.slane %v1866_v43, 1  ;;  %v13058_v6 = vrot.slane %v1868_v44, 1  ;;  %v11156_v7 = vld [vmem:[#allocation13 + $0x3e8] ss:$16 sps:$4 sm:$0xff]  }
 0x26e   :  { %2296 = vmatprep.subr.bf16.mxu1 %v11110_v61  ;;  %v13055_v61 = vsel %vm1941_vm6, %v1946_v15, %v13045_v50  ;;  %v11164_v15 = vld [vmem:[#allocation13 + $0x2c] ss:$16 sps:$4 sm:$0xff]   ;;  %v11267_v43 = vld [vmem:[#allocation17 + $0x660] ss:$24 sps:$4 sm:$0xff]  }
 0x26f   :  { %v13048_v56 = vsel %vm1941_vm6, %v1942_v55, %v1943_v48  ;;  %v11281_v55 = vld [vmem:[#allocation17 + $0x6c4] ss:$24 sps:$4 sm:$0xff]   ;;  %v11279_v44 = vld [vmem:[#allocation17 + $0x6c0] ss:$24 sps:$4 sm:$0xff]  }
 0x270   :  { %1374 = vmatpush1.bf16.msra.mxu0 %v11117_v12  ;;  %v11159_v12 = vld [vmem:[#allocation13 + $0x8] ss:$16 sps:$4 sm:$0xff]  }
 0x271   :  { %2297 = vmatpush1.bf16.msra.mxu1 %v11108_v4  ;;  %1375 = vmatprep.subr.bf16.mxu0 %v11125_v13  ;;  %v11158_v4 = vld [vmem:[#allocation13 + $0x3ec] ss:$16 sps:$4 sm:$0xff]   ;;  %v11162_v13 = vld [vmem:[#allocation13 + $0x28] ss:$16 sps:$4 sm:$0xff]  }
 0x272   :  { %2298 = vmatprep.subr.bf16.mxu1 %v11116_v9  ;;  %v11161_v9 = vld [vmem:[#allocation13 + $0xc] ss:$16 sps:$4 sm:$0xff]  }
 0x274   :  { %1376 = vmatpush1.bf16.msra.mxu0 %v11123_v57  ;;  %v11170_v57 = vld [vmem:[#allocation13 + $0x6c] ss:$16 sps:$4 sm:$0xff]  }
 0x275   :  { %2299 = vmatpush1.bf16.msra.mxu1 %v11114_v11  ;;  %1377 = vmatprep.subr.bf16.mxu0 %v11131_v17  ;;  %v13062_v11 = vsel %vm1941_vm6, %v1943_v48, %v13058_v6  ;;  %v11168_v17 = vld [vmem:[#allocation13 + $0x68] ss:$16 sps:$4 sm:$0xff]   ;;  %v11275_v48 = vld [vmem:[#allocation17 + $0x694] ss:$24 sps:$4 sm:$0xff]  }
 0x276   :  { %2300 = vmatprep.subr.bf16.mxu1 %v11122_v14  ;;  %v11167_v14 = vld [vmem:[#allocation13 + $0x4c] ss:$16 sps:$4 sm:$0xff]  }
 0x278   :  { %1378 = vmatpush1.bf16.msra.mxu0 %v11129_v21  ;;  %v11174_v21 = vld [vmem:[#allocation13 + $0xa8] ss:$16 sps:$4 sm:$0xff]  }
 0x279   :  { %2301 = vmatpush1.bf16.msra.mxu1 %v11120_v16  ;;  %1379 = vmatprep.subr.bf16.mxu0 %v11137_v22  ;;  %v11165_v16 = vld [vmem:[#allocation13 + $0x48] ss:$16 sps:$4 sm:$0xff]   ;;  %v11179_v22 = vld [vmem:[#allocation13 + $0xcc] ss:$16 sps:$4 sm:$0xff]  }
 0x27a   :  { %2302 = vmatprep.subr.bf16.mxu1 %v11128_v18  ;;  %v11176_v18 = vld [vmem:[#allocation13 + $0xac] ss:$16 sps:$4 sm:$0xff]  }
 0x27c   :  { %1380 = vmatpush1.bf16.msra.mxu0 %v11135_v3  ;;  %v11183_v3 = vld [vmem:[#allocation13 + $0x108] ss:$16 sps:$4 sm:$0xff]  }
 0x27d   :  { %2303 = vmatpush1.bf16.msra.mxu1 %v11126_v47  ;;  %1381 = vmatprep.subr.bf16.mxu0 %v11143_v27  ;;  %v11180_v47 = vld [vmem:[#allocation13 + $0xe8] ss:$16 sps:$4 sm:$0xff]   ;;  %v11188_v27 = vld [vmem:[#allocation13 + $0x12c] ss:$16 sps:$4 sm:$0xff]  }
 0x27e   :  { %2304 = vmatprep.subr.bf16.mxu1 %v11134_v25  ;;  %v11185_v25 = vld [vmem:[#allocation13 + $0x10c] ss:$16 sps:$4 sm:$0xff]  }
 0x280   :  { %1382 = vmatpush1.bf16.msra.mxu0 %v11141_v29  ;;  %v11192_v29 = vld [vmem:[#allocation13 + $0x168] ss:$16 sps:$4 sm:$0xff]  }
 0x281   :  { %2305 = vmatpush1.bf16.msra.mxu1 %v11132_v0  ;;  %1383 = vmatprep.subr.bf16.mxu0 %v11149_v32  ;;  %v11191_v0 = vld [vmem:[#allocation13 + $0x14c] ss:$16 sps:$4 sm:$0xff]   ;;  %v11255_v32 = vld [vmem:[#allocation17 + $0x600] ss:$24 sps:$4 sm:$0xff]  }
 0x282   :  { %2306 = vmatprep.subr.bf16.mxu1 %v11140_v5  ;;  %v11194_v5 = vld [vmem:[#allocation13 + $0x16c] ss:$16 sps:$4 sm:$0xff]  }
 0x284   :  { %1384 = vmatpush1.bf16.msra.mxu0 %v11147_v37  ;;  %v11195_v37 = vld [vmem:[#allocation13 + $0x188] ss:$16 sps:$4 sm:$0xff]  }
 0x285   :  { %2307 = vmatpush1.bf16.msra.mxu1 %v11138_v33  ;;  %1385 = vmatprep.subr.bf16.mxu0 %v11152_v41  ;;  %v11257_v33 = vld [vmem:[#allocation17 + $0x604] ss:$24 sps:$4 sm:$0xff]  }
 0x286   :  { %2308 = vmatprep.subr.bf16.mxu1 %v11146_v35  ;;  %v11261_v35 = vld [vmem:[#allocation17 + $0x630] ss:$24 sps:$4 sm:$0xff]   ;;  %v11269_v41 = vld [vmem:[#allocation17 + $0x664] ss:$24 sps:$4 sm:$0xff]  }
 0x288   :  { %1386 = vmatpush1.bf16.msra.mxu0 %v11150_v49  ;;  %v11203_v49 = vld [vmem:[#allocation13 + $0x1cc] ss:$16 sps:$4 sm:$0xff]  }
 0x289   :  { %2309 = vmatpush1.bf16.msra.mxu1 %v11144_v46  ;;  %1387 = vmatprep.subr.bf16.mxu0 %v11155_v52  ;;  %v11198_v46 = vld [vmem:[#allocation13 + $0x1a8] ss:$16 sps:$4 sm:$0xff]  }
 0x28a   :  { %4144 = vmatprep.subr.bf16.mxu1 %v11257_v33  ;;  %v11273_v52 = vld [vmem:[#allocation17 + $0x690] ss:$24 sps:$4 sm:$0xff]   ;;  %v11327_v33 = vld [vmem:[#allocation17 + $0x840] ss:$24 sps:$4 sm:$0xff]  }
 0x28c   :  { %2311 = vmatmul.mubr.bf16.vlgmr.msra.gmra.mrb[0].mxu1 %v13048_v56  ;;  %1388 = vmatpush1.bf16.msra.mxu0 %v11153_v59  ;;  %v11206_v59 = vld [vmem:[#allocation13 + $0x1ec] ss:$16 sps:$4 sm:$0xff]  }
 0x28d   :  { %2320 = vmatprep.mubr.bf16.mxu1 %v13055_v61  ;;  %1389 = vmatprep.subr.bf16.mxu0 %v11158_v4  ;;  %v11204_v4 = vld [vmem:[#allocation13 + $0x1e8] ss:$16 sps:$4 sm:$0xff]  }
 0x28e   :  { %4145 = vmatpush1.bf16.msra.mxu1 %v11255_v32  ;;  %v11329_v32 = vld [vmem:[#allocation17 + $0x844] ss:$24 sps:$4 sm:$0xff]  }
 0x28f   :  { %4146 = vmatprep.subr.bf16.mxu1 %v11263_v8  ;;  %v11236_v8 = vld [vmem:[#allocation13 + $0x52c] ss:$16 sps:$4 sm:$0xff]  }
 0x290   :  { %1390 = vmatpush1.bf16.msra.mxu0 %v11156_v7  ;;  %v11287_v7 = vld [vmem:[#allocation17 + $0x6f4] ss:$24 sps:$4 sm:$0xff]  }
 0x291   :  { %1801 = vmatprep.subr.bf16.mxu0 %v11161_v9  ;;  %v11209_v9 = vld [vmem:[#allocation13 + $0x40c] ss:$16 sps:$4 sm:$0xff]  }
 0x292   :  { %4147 = vmatpush1.bf16.msra.mxu1 %v11261_v35  ;;  %v11335_v35 = vld [vmem:[#allocation17 + $0x874] ss:$24 sps:$4 sm:$0xff]  }
 0x293   :  { %1392 = vmatmul.mubr.bf16.vlgmr.msra.gmra.mrb[24].mxu0 %v13009_v2  ;;  %v11173_v2 = vld [vmem:[#allocation13 + $0x8c] ss:$16 sps:$4 sm:$0xff]   ;;  %4148 = vmatprep.subr.bf16.mxu1 %v11269_v41  ;;  %v11234_v41 = vld [vmem:[#allocation13 + $0x528] ss:$16 sps:$4 sm:$0xff]  }
 0x294   :  { %2321 = vmatmul.mubr.bf16.gmra.mrb[4].mxu1 %v13062_v11  ;;  %1401 = vmatprep.mubr.bf16.mxu0 %v13029_v38  ;;  %v11171_v38 = vld [vmem:[#allocation13 + $0x88] ss:$16 sps:$4 sm:$0xff]  }
 0x295   :  { %2330 = vmatprep.mubr.bf16.mxu1 %v13045_v50  ;;  %1802 = vmatpush1.bf16.msra.mxu0 %v11159_v12  ;;  %v11285_v12 = vld [vmem:[#allocation17 + $0x6f0] ss:$24 sps:$4 sm:$0xff]  }
 0x296   :  { %1803 = vmatprep.subr.bf16.mxu0 %v11164_v15  ;;  %4149 = vmatpush1.bf16.msra.mxu1 %v11267_v43  ;;  %v11207_v15 = vld [vmem:[#allocation13 + $0x408] ss:$16 sps:$4 sm:$0xff]   ;;  %v11341_v43 = vld [vmem:[#allocation17 + $0x8a4] ss:$24 sps:$4 sm:$0xff]  }
 0x297   :  { %4150 = vmatprep.subr.bf16.mxu1 %v11275_v48  ;;  %v11237_v48 = vld [vmem:[#allocation13 + $0x548] ss:$16 sps:$4 sm:$0xff]  }
 0x299   :  { %1804 = vmatpush1.bf16.msra.mxu0 %v11162_v13  ;;  %v11212_v13 = vld [vmem:[#allocation13 + $0x42c] ss:$16 sps:$4 sm:$0xff]  }
 0x29a   :  { %1805 = vmatprep.subr.bf16.mxu0 %v11167_v14  ;;  %4151 = vmatpush1.bf16.msra.mxu1 %v11273_v52  ;;  %v11210_v14 = vld [vmem:[#allocation13 + $0x428] ss:$16 sps:$4 sm:$0xff]   ;;  %v11347_v52 = vld [vmem:[#allocation17 + $0x8d4] ss:$24 sps:$4 sm:$0xff]  }
 0x29b   :  { %1402 = vmatmul.mubr.bf16.gmra.mrb[28].mxu0 %v13035_v45  ;;  %v11177_v45 = vld [vmem:[#allocation13 + $0xc8] ss:$16 sps:$4 sm:$0xff]   ;;  %4152 = vmatprep.subr.bf16.mxu1 %v11281_v55 }
 0x29c   :  { %2331 = vmatmul.mubr.bf16.gmra.mrb[8].mxu1 %v13058_v6  ;;  %1411 = vmatprep.mubr.bf16.mxu0 %v13031_v40  ;;  %v11182_v40 = vld [vmem:[#allocation13 + $0xec] ss:$16 sps:$4 sm:$0xff]   ;;  %v11240_v55 = vld [vmem:[#allocation13 + $0x568] ss:$16 sps:$4 sm:$0xff]  }
 0x29d   :  { %1806 = vmatpush1.bf16.msra.mxu0 %v11165_v16  ;;  %v11215_v16 = vld [vmem:[#allocation13 + $0x44c] ss:$16 sps:$4 sm:$0xff]  }
 0x29e   :  { %1807 = vmatprep.subr.bf16.mxu0 %v11170_v57  ;;  %4153 = vmatpush1.bf16.msra.mxu1 %v11279_v44  ;;  %v11293_v57 = vld [vmem:[#allocation17 + $0x724] ss:$24 sps:$4 sm:$0xff]   ;;  %v11243_v44 = vld [vmem:[#allocation13 + $0x588] ss:$16 sps:$4 sm:$0xff]  }
 0x29f   :  { %4154 = vmatprep.subr.bf16.mxu1 %v11287_v7  ;;  %v11246_v7 = vld [vmem:[#allocation13 + $0x5a8] ss:$16 sps:$4 sm:$0xff]  }
 0x2a1   :  { %1808 = vmatpush1.bf16.msra.mxu0 %v11168_v17  ;;  %v11291_v17 = vld [vmem:[#allocation17 + $0x720] ss:$24 sps:$4 sm:$0xff]  }
 0x2a2   :  { %1809 = vmatprep.subr.bf16.mxu0 %v11173_v2  ;;  %4155 = vmatpush1.bf16.msra.mxu1 %v11285_v12  ;;  %v11213_v2 = vld [vmem:[#allocation13 + $0x448] ss:$16 sps:$4 sm:$0xff]  }
 0x2a3   :  { %1412 = vmatmul.mubr.bf16.gmra.mrb[32].mxu0 %v13039_v54  ;;  %v11186_v54 = vld [vmem:[#allocation13 + $0x128] ss:$16 sps:$4 sm:$0xff]   ;;  %4156 = vmatprep.subr.bf16.mxu1 %v11293_v57  ;;  %v11266_v57 = vld [vmem:[#allocation17 + $0x63c] ss:$24 sps:$4 sm:$0xff]  }
 0x2a4   :  { %1833 = vmatprep.mubr.bf16.mxu0 %v12977_v19  ;;  %v11189_v19 = vld [vmem:[#allocation13 + $0x148] ss:$16 sps:$4 sm:$0xff]  }
 0x2a5   :  { %1810 = vmatpush1.bf16.msra.mxu0 %v11171_v38  ;;  %v11218_v38 = vld [vmem:[#allocation13 + $0x46c] ss:$16 sps:$4 sm:$0xff]   ;;  %v11249_v12 = vld [vmem:[#allocation13 + $0x5c8] ss:$16 sps:$4 sm:$0xff]  }
 0x2a6   :  { %1811 = vmatprep.subr.bf16.mxu0 %v11176_v18  ;;  %4157 = vmatpush1.bf16.msra.mxu1 %v11291_v17  ;;  %v11299_v18 = vld [vmem:[#allocation17 + $0x754] ss:$24 sps:$4 sm:$0xff]   ;;  %v11353_v17 = vld [vmem:[#allocation17 + $0x904] ss:$24 sps:$4 sm:$0xff]  }
 0x2a7   :  { %4158 = vmatprep.subr.bf16.mxu1 %v11299_v18  ;;  %v11270_v18 = vld [vmem:[#allocation17 + $0x668] ss:$24 sps:$4 sm:$0xff]  }
 0x2a9   :  { %1812 = vmatpush1.bf16.msra.mxu0 %v11174_v21  ;;  %v11297_v21 = vld [vmem:[#allocation17 + $0x750] ss:$24 sps:$4 sm:$0xff]  }
 0x2aa   :  { %1813 = vmatprep.subr.bf16.mxu0 %v11179_v22  ;;  %4159 = vmatpush1.bf16.msra.mxu1 %v11297_v21  ;;  %v11305_v22 = vld [vmem:[#allocation17 + $0x784] ss:$24 sps:$4 sm:$0xff]  }
 0x2ab   :  { %4160 = vmatprep.subr.bf16.mxu1 %v11305_v22  ;;  %v11278_v21 = vld [vmem:[#allocation17 + $0x69c] ss:$24 sps:$4 sm:$0xff]  }
 0x2ad   :  { %1814 = vmatpush1.bf16.msra.mxu0 %v11177_v45  ;;  %v11303_v45 = vld [vmem:[#allocation17 + $0x780] ss:$24 sps:$4 sm:$0xff]  }
 0x2ae   :  { %1815 = vmatprep.subr.bf16.mxu0 %v11182_v40  ;;  %v11219_v40 = vld [vmem:[#allocation13 + $0x488] ss:$16 sps:$4 sm:$0xff]   ;;  %4161 = vmatpush1.bf16.msra.mxu1 %v11303_v45 }
 0x2af   :  { %v11288_v45 = vld [vmem:[#allocation17 + $0x6f8] ss:$24 sps:$4 sm:$0xff]  }
 0x2b1   :  { %1816 = vmatpush1.bf16.msra.mxu0 %v11180_v47  ;;  %v11224_v47 = vld [vmem:[#allocation13 + $0x4ac] ss:$16 sps:$4 sm:$0xff]  }
 0x2b2   :  { %1817 = vmatprep.subr.bf16.mxu0 %v11185_v25  ;;  %v11311_v25 = vld [vmem:[#allocation17 + $0x7b4] ss:$24 sps:$4 sm:$0xff]  }
 0x2b3   :  { %4162 = vmatprep.subr.bf16.mxu1 %v11311_v25 }
 0x2b5   :  { %1818 = vmatpush1.bf16.msra.mxu0 %v11183_v3  ;;  %v11227_v3 = vld [vmem:[#allocation13 + $0x4cc] ss:$16 sps:$4 sm:$0xff]  }
 0x2b6   :  { %1819 = vmatprep.subr.bf16.mxu0 %v11188_v27  ;;  %v11317_v27 = vld [vmem:[#allocation17 + $0x7e4] ss:$24 sps:$4 sm:$0xff]  }
 0x2b9   :  { %1820 = vmatpush1.bf16.msra.mxu0 %v11186_v54  ;;  %v11315_v54 = vld [vmem:[#allocation17 + $0x7e0] ss:$24 sps:$4 sm:$0xff]  }
 0x2ba   :  { %1821 = vmatprep.subr.bf16.mxu0 %v11191_v0  ;;  %v11225_v0 = vld [vmem:[#allocation13 + $0x4c8] ss:$16 sps:$4 sm:$0xff]  }
 0x2bd   :  { %1822 = vmatpush1.bf16.msra.mxu0 %v11189_v19  ;;  %v11230_v19 = vld [vmem:[#allocation13 + $0x4ec] ss:$16 sps:$4 sm:$0xff]  }
 0x2be   :  { %1823 = vmatprep.subr.bf16.mxu0 %v11194_v5  ;;  %v11323_v5 = vld [vmem:[#allocation17 + $0x814] ss:$24 sps:$4 sm:$0xff]  }
 0x2c1   :  { %1824 = vmatpush1.bf16.msra.mxu0 %v11192_v29  ;;  %v11321_v29 = vld [vmem:[#allocation17 + $0x810] ss:$24 sps:$4 sm:$0xff]  }
 0x2c2   :  { %1825 = vmatprep.subr.bf16.mxu0 %v11197_v34  ;;  %v11231_v34 = vld [vmem:[#allocation13 + $0x508] ss:$16 sps:$4 sm:$0xff]  }
 0x2c5   :  { %1826 = vmatpush1.bf16.msra.mxu0 %v11195_v37  ;;  %v11333_v37 = vld [vmem:[#allocation17 + $0x870] ss:$24 sps:$4 sm:$0xff]  }
 0x2c6   :  { %1827 = vmatprep.subr.bf16.mxu0 %v11200_v42  ;;  %v11239_v42 = vld [vmem:[#allocation13 + $0x54c] ss:$16 sps:$4 sm:$0xff]  }
 0x2c9   :  { %1828 = vmatpush1.bf16.msra.mxu0 %v11198_v46  ;;  %v11339_v46 = vld [vmem:[#allocation17 + $0x8a0] ss:$24 sps:$4 sm:$0xff]  }
 0x2ca   :  { %1829 = vmatprep.subr.bf16.mxu0 %v11203_v49  ;;  %v11242_v49 = vld [vmem:[#allocation13 + $0x56c] ss:$16 sps:$4 sm:$0xff]  }
 0x2cd   :  { %1830 = vmatpush1.bf16.msra.mxu0 %v11201_v53  ;;  %v11345_v53 = vld [vmem:[#allocation17 + $0x8d0] ss:$24 sps:$4 sm:$0xff]  }
 0x2ce   :  { %1831 = vmatprep.subr.bf16.mxu0 %v11206_v59  ;;  %v11245_v59 = vld [vmem:[#allocation13 + $0x58c] ss:$16 sps:$4 sm:$0xff]  }
 0x2d1   :  { %1832 = vmatpush1.bf16.msra.mxu0 %v11204_v4  ;;  %v11248_v4 = vld [vmem:[#allocation13 + $0x5ac] ss:$16 sps:$4 sm:$0xff]  }
 0x2d2   :  { %2339 = vmatprep.subr.bf16.mxu0 %v11209_v9  ;;  %v11251_v9 = vld [vmem:[#allocation13 + $0x5cc] ss:$16 sps:$4 sm:$0xff]  }
 0x2d4   :  { %1834 = vmatmul.mubr.bf16.vlgmr.msra.gmra.mrb[24].mxu0 %v12983_v23  ;;  %v11216_v23 = vld [vmem:[#allocation13 + $0x468] ss:$16 sps:$4 sm:$0xff]  }
 0x2d5   :  { %1843 = vmatprep.mubr.bf16.mxu0 %v12993_v30  ;;  %2340 = vmatpush1.bf16.msra.mxu0 %v11207_v15  ;;  %v11221_v30 = vld [vmem:[#allocation13 + $0x48c] ss:$16 sps:$4 sm:$0xff]  }
 0x2d6   :  { %2341 = vmatprep.subr.bf16.mxu0 %v11212_v13  ;;  %v11254_v15 = vld [vmem:[#allocation13 + $0x5ec] ss:$16 sps:$4 sm:$0xff]   ;;  %v11252_v13 = vld [vmem:[#allocation13 + $0x5e8] ss:$16 sps:$4 sm:$0xff]  }
 0x2d9   :  { %2342 = vmatpush1.bf16.msra.mxu0 %v11210_v14  ;;  %v11260_v14 = vld [vmem:[#allocation17 + $0x60c] ss:$24 sps:$4 sm:$0xff]  }
 0x2da   :  { %2343 = vmatprep.subr.bf16.mxu0 %v11215_v16  ;;  %v11258_v16 = vld [vmem:[#allocation17 + $0x608] ss:$24 sps:$4 sm:$0xff]  }
 0x2dc   :  { %1844 = vmatmul.mubr.bf16.gmra.mrb[28].mxu0 %v12997_v36  ;;  %v11309_v36 = vld [vmem:[#allocation17 + $0x7b0] ss:$24 sps:$4 sm:$0xff]  }
 0x2dd   :  { %1853 = vmatprep.mubr.bf16.mxu0 %v13014_v20  ;;  %2344 = vmatpush1.bf16.msra.mxu0 %v11213_v2  ;;  %v11222_v20 = vld [vmem:[#allocation13 + $0x4a8] ss:$16 sps:$4 sm:$0xff]  }
 0x2de   :  { %2345 = vmatprep.subr.bf16.mxu0 %v11218_v38  ;;  %4163 = vmatpush1.bf16.msra.mxu1 %v11309_v36  ;;  %v11264_v2 = vld [vmem:[#allocation17 + $0x638] ss:$24 sps:$4 sm:$0xff]   ;;  %v11272_v38 = vld [vmem:[#allocation17 + $0x66c] ss:$24 sps:$4 sm:$0xff]   ;;  %v11302_v36 = vld [vmem:[#allocation17 + $0x75c] ss:$24 sps:$4 sm:$0xff]  }
 0x2df   :  { %4164 = vmatprep.subr.bf16.mxu1 %v11317_v27 }
 0x2e1   :  { %2346 = vmatpush1.bf16.msra.mxu0 %v11216_v23  ;;  %v11276_v23 = vld [vmem:[#allocation17 + $0x698] ss:$24 sps:$4 sm:$0xff]  }
 0x2e2   :  { %2347 = vmatprep.subr.bf16.mxu0 %v11221_v30  ;;  %4165 = vmatpush1.bf16.msra.mxu1 %v11315_v54  ;;  %v11282_v30 = vld [vmem:[#allocation17 + $0x6c8] ss:$24 sps:$4 sm:$0xff]   ;;  %v11314_v54 = vld [vmem:[#allocation17 + $0x7bc] ss:$24 sps:$4 sm:$0xff]  }
 0x2e3   :  { %4166 = vmatprep.subr.bf16.mxu1 %v11323_v5 }
 0x2e4   :  { %1854 = vmatmul.mubr.bf16.gmra.mrb[32].mxu0 %v13016_v63  ;;  %v11228_v63 = vld [vmem:[#allocation13 + $0x4e8] ss:$16 sps:$4 sm:$0xff]  }
 0x2e5   :  { %2348 = vmatpush1.bf16.msra.mxu0 %v11219_v40  ;;  %2371 = vmatprep.mubr.bf16.mxu0 %v13024_v28  ;;  %v11233_v28 = vld [vmem:[#allocation13 + $0x50c] ss:$16 sps:$4 sm:$0xff]  }
 0x2e6   :  { %2349 = vmatprep.subr.bf16.mxu0 %v11224_v47  ;;  %4167 = vmatpush1.bf16.msra.mxu1 %v11321_v29  ;;  %v11296_v47 = vld [vmem:[#allocation17 + $0x72c] ss:$24 sps:$4 sm:$0xff]   ;;  %v11312_v29 = vld [vmem:[#allocation17 + $0x7b8] ss:$24 sps:$4 sm:$0xff]  }
 0x2e7   :  { %4168 = vmatprep.subr.bf16.mxu1 %v11329_v32 }
 0x2e9   :  { %2350 = vmatpush1.bf16.msra.mxu0 %v11222_v20  ;;  %v11300_v20 = vld [vmem:[#allocation17 + $0x758] ss:$24 sps:$4 sm:$0xff]  }
 0x2ea   :  { %2351 = vmatprep.subr.bf16.mxu0 %v11227_v3  ;;  %4169 = vmatpush1.bf16.msra.mxu1 %v11327_v33  ;;  %v11308_v3 = vld [vmem:[#allocation17 + $0x78c] ss:$24 sps:$4 sm:$0xff]   ;;  %v11326_v33 = vld [vmem:[#allocation17 + $0x81c] ss:$24 sps:$4 sm:$0xff]  }
 0x2eb   :  { %4170 = vmatprep.subr.bf16.mxu1 %v11335_v35 }
 0x2ed   :  { %2352 = vmatpush1.bf16.msra.mxu0 %v11225_v0 }
 0x2ee   :  { %2353 = vmatprep.subr.bf16.mxu0 %v11230_v19  ;;  %4171 = vmatpush1.bf16.msra.mxu1 %v11333_v37  ;;  %v11324_v37 = vld [vmem:[#allocation17 + $0x818] ss:$24 sps:$4 sm:$0xff]  }
 0x2ef   :  { %4172 = vmatprep.subr.bf16.mxu1 %v11341_v43  ;;  %v11338_v43 = vld [vmem:[#allocation17 + $0x87c] ss:$24 sps:$4 sm:$0xff]  }
 0x2f1   :  { %2354 = vmatpush1.bf16.msra.mxu0 %v11228_v63  ;;  %v11320_v63 = vld [vmem:[#allocation17 + $0x7ec] ss:$24 sps:$4 sm:$0xff]  }
 0x2f2   :  { %2355 = vmatprep.subr.bf16.mxu0 %v11233_v28  ;;  %4173 = vmatpush1.bf16.msra.mxu1 %v11339_v46  ;;  %v11318_v28 = vld [vmem:[#allocation17 + $0x7e8] ss:$24 sps:$4 sm:$0xff]   ;;  %v11336_v46 = vld [vmem:[#allocation17 + $0x878] ss:$24 sps:$4 sm:$0xff]  }
 0x2f3   :  { %4174 = vmatprep.subr.bf16.mxu1 %v11347_v52  ;;  %v11350_v52 = vld [vmem:[#allocation17 + $0x8dc] ss:$24 sps:$4 sm:$0xff]  }
 0x2f5   :  { %2356 = vmatpush1.bf16.msra.mxu0 %v11231_v34 }
 0x2f6   :  { %2357 = vmatprep.subr.bf16.mxu0 %v11236_v8  ;;  %4175 = vmatpush1.bf16.msra.mxu1 %v11345_v53  ;;  %v11348_v53 = vld [vmem:[#allocation17 + $0x8d8] ss:$24 sps:$4 sm:$0xff]  }
 0x2f7   :  { %4205 = vmatprep.subr.bf16.mxu1 %v11353_v17 }
 0x2f9   :  { %2358 = vmatpush1.bf16.msra.mxu0 %v11234_v41  ;;  %v11332_v41 = vld [vmem:[#allocation17 + $0x84c] ss:$24 sps:$4 sm:$0xff]  }
 0x2fa   :  { %2359 = vmatprep.subr.bf16.mxu0 %v11239_v42  ;;  %v11330_v42 = vld [vmem:[#allocation17 + $0x848] ss:$24 sps:$4 sm:$0xff]  }
 0x2fd   :  { %2360 = vmatpush1.bf16.msra.mxu0 %v11237_v48  ;;  %v11344_v48 = vld [vmem:[#allocation17 + $0x8ac] ss:$24 sps:$4 sm:$0xff]  }
 0x2fe   :  { %2361 = vmatprep.subr.bf16.mxu0 %v11242_v49  ;;  %v11342_v49 = vld [vmem:[#allocation17 + $0x8a8] ss:$24 sps:$4 sm:$0xff]  }
 0x301   :  { %2362 = vmatpush1.bf16.msra.mxu0 %v11240_v55  ;;  %v11356_v55 = vld [vmem:[#allocation17 + $0x90c] ss:$24 sps:$4 sm:$0xff]  }
 0x302   :  { %2363 = vmatprep.subr.bf16.mxu0 %v11245_v59  ;;  %v13103_v59 = vld [vmem:[#allocation14] sm:$0xf] }
 0x305   :  { %2364 = vmatpush1.bf16.msra.mxu0 %v11243_v44 }
 0x306   :  { %2365 = vmatprep.subr.bf16.mxu0 %v11248_v4  ;;  %v13105_v4 = vld [vmem:[#allocation16] sm:$0xf] }
 0x309   :  { %2366 = vmatpush1.bf16.msra.mxu0 %v11246_v7 }
 0x30a   :  { %2367 = vmatprep.subr.bf16.mxu0 %v11251_v9  ;;  %v13109_v9 = vrot.slane %v13103_v59, %v12917_v60 }
 0x30d   :  { %2368 = vmatpush1.bf16.msra.mxu0 %v11249_v12 }
 0x30e   :  { %2369 = vmatprep.subr.bf16.mxu0 %v11254_v15 }
 0x311   :  { %2370 = vmatpush1.bf16.msra.mxu0 %v11252_v13  ;;  %v13113_v13 = vrot.slane %v13103_v59, %v12920_v62 }
 0x312   :  { %4266 = vmatprep.subr.bf16.mxu0 %v11260_v14 }
 0x314   :  { %2372 = vmatmul.mubr.bf16.vlgmr.msra.gmra.mrb[24].mxu0 %v13048_v56  ;;  %v11284_v56 = vld [vmem:[#allocation17 + $0x6cc] ss:$24 sps:$4 sm:$0xff]  }
 0x315   :  { %2381 = vmatprep.mubr.bf16.mxu0 %v13055_v61  ;;  %4267 = vmatpush1.bf16.msra.mxu0 %v11258_v16  ;;  %v11290_v61 = vld [vmem:[#allocation17 + $0x6fc] ss:$24 sps:$4 sm:$0xff]  }
 0x316   :  { %4268 = vmatprep.subr.bf16.mxu0 %v11266_v57  ;;  %v13117_v57 = vrot.slane %v13105_v4, %v12917_v60 }
 0x319   :  { %4269 = vmatpush1.bf16.msra.mxu0 %v11264_v2 }
 0x31a   :  { %4270 = vmatprep.subr.bf16.mxu0 %v11272_v38 }
 0x31c   :  { %2382 = vmatmul.mubr.bf16.gmra.mrb[28].mxu0 %v13062_v11 }
 0x31d   :  { %2391 = vmatprep.mubr.bf16.mxu0 %v13045_v50  ;;  %4271 = vmatpush1.bf16.msra.mxu0 %v11270_v18  ;;  %v11294_v50 = vld [vmem:[#allocation17 + $0x728] ss:$24 sps:$4 sm:$0xff]   ;;  %v13122_v18 = vrot.slane %v13105_v4, %v12920_v62 }
 0x31e   :  { %4272 = vmatprep.subr.bf16.mxu0 %v11278_v21 }
 0x321   :  { %4273 = vmatpush1.bf16.msra.mxu0 %v11276_v23 }
 0x322   :  { %4274 = vmatprep.subr.bf16.mxu0 %v11284_v56 }
 0x324   :  { %2392 = vmatmul.mubr.bf16.gmra.mrb[32].mxu0 %v13058_v6  ;;  %v11306_v6 = vld [vmem:[#allocation17 + $0x788] ss:$24 sps:$4 sm:$0xff]  }
 0x325   :  { %4275 = vmatpush1.bf16.msra.mxu0 %v11282_v30 }
 0x326   :  { %v1332_v22 = vpop.f32.mrb[12].mxu0  ;;  %4276 = vmatprep.subr.bf16.mxu0 %v11290_v61 }
 0x327   :  { %v1334_v40 = vpop.f32.mrb[13].mxu0 }
 0x328   :  { %v13087_v25 = vpop.f32.mrb[14].mxu0 }
 0x329   :  { %v13089_v11 = vpop.f32.mrb[15].mxu0  ;;  %4277 = vmatpush1.bf16.msra.mxu0 %v11288_v45 }
 0x32a   :  { %4278 = vmatprep.subr.bf16.mxu0 %v11296_v47 }
 0x32d   :  { %4279 = vmatpush1.bf16.msra.mxu0 %v11294_v50 }
 0x32e   :  { %4280 = vmatprep.subr.bf16.mxu0 %v11302_v36 }
 0x331   :  { %4281 = vmatpush1.bf16.msra.mxu0 %v11300_v20 }
 0x332   :  { %4282 = vmatprep.subr.bf16.mxu0 %v11308_v3 }
 0x335   :  { %v13091_v27 = vpop.f32.mrb[16].mxu0  ;;  %4283 = vmatpush1.bf16.msra.mxu0 %v11306_v6 }
 0x336   :  { %v13093_v0 = vpop.f32.mrb[17].mxu0  ;;  %4284 = vmatprep.subr.bf16.mxu0 %v11314_v54 }
 0x337   :  { %v13095_v19 = vpop.f32.mrb[18].mxu0 }
 0x338   :  { %v13097_v5 = vpop.f32.mrb[19].mxu0 }
 0x339   :  { %4285 = vmatpush1.bf16.msra.mxu0 %v11312_v29 }
 0x33a   :  { %4286 = vmatprep.subr.bf16.mxu0 %v11320_v63 }
 0x33d   :  { %v13099_v32 = vpop.f32.mrb[20].mxu0  ;;  %4287 = vmatpush1.bf16.msra.mxu0 %v11318_v28 }
 0x33e   :  { %v13101_v34 = vpop.f32.mrb[21].mxu0  ;;  %4288 = vmatprep.subr.bf16.mxu0 %v11326_v33 }
 0x33f   :  { %v1356_v8 = vpop.f32.mrb[22].mxu0 }
 0x340   :  { %v1357_v35 = vpop.f32.mrb[23].mxu0 }
 0x341   :  { %4289 = vmatpush1.bf16.msra.mxu0 %v11324_v37 }
 0x342   :  { %4290 = vmatprep.subr.bf16.mxu0 %v11332_v41 }
 0x345   :  { %4291 = vmatpush1.bf16.msra.mxu0 %v11330_v42 }
 0x346   :  { %4292 = vmatprep.subr.bf16.mxu0 %v11338_v43 }
 0x349   :  { %4293 = vmatpush1.bf16.msra.mxu0 %v11336_v46 }
 0x34a   :  { %4294 = vmatprep.subr.bf16.mxu0 %v11344_v48 }
 0x34d   :  { %4295 = vmatpush1.bf16.msra.mxu0 %v11342_v49 }
 0x34e   :  { %4296 = vmatprep.subr.bf16.mxu0 %v11350_v52 }
 0x351   :  { %4297 = vmatpush1.bf16.msra.mxu0 %v11348_v53 }
 0x352   :  { %4327 = vmatprep.subr.bf16.mxu0 %v11356_v55 }
 0x35f   :  { %v2312_v44 = vpop.f32.mrb[0].mxu1 }
 0x360   :  { %v10659_v7 = vadd.f32 %v2312_v44, %v1332_v22  ;;  %v2314_v12 = vpop.f32.mrb[1].mxu1 }
 0x361   :  { %v10660_v15 = vadd.f32 %v2314_v12, %v1334_v40  ;;  %v2316_v14 = vpop.f32.mrb[2].mxu1 }
 0x362   :  { %v2420_v16 = vmax.f32 %v10659_v7, 0.0  ;;  %v10661_v17 = vadd.f32 %v2316_v14, %v13087_v25  ;;  %v2318_v2 = vpop.f32.mrb[3].mxu1 }
 0x363   :  { %v2421_v38 = vmax.f32 %v10660_v15, 0.0  ;;  %v10662_v21 = vadd.f32 %v2318_v2, %v13089_v11 }
 0x364   :  { %v2462_v23 = vmul.f32 %v13109_v9, %v2420_v16  ;;  %v2424_v56 = vmax.f32 %v10661_v17, 0.0 }
 0x365   :  { %v2463_v30 = vmul.f32 %v13113_v13, %v2421_v38  ;;  %v2425_v61 = vmax.f32 %v10662_v21, 0.0 }
 0x366   :  { %v2504_v22 = vadd.f32 %v13117_v57, %v2462_v23  ;;  %v2466_v45 = vmul.f32 %v13109_v9, %v2424_v56 }
 0x367   :  { %v2505_v40 = vadd.f32 %v13122_v18, %v2463_v30  ;;  %v2467_v47 = vmul.f32 %v13113_v13, %v2425_v61  ;;  %v2322_v25 = vpop.f32.mrb[4].mxu1 }
 0x368   :  { %v2524_v50 = vmul.f32 %v2504_v22, %v12934_v10  ;;  %v2508_v36 = vadd.f32 %v13117_v57, %v2466_v45  ;;  %v10663_v11 = vadd.f32 %v2322_v25, %v13091_v27  ;;  %v2324_v20 = vpop.f32.mrb[5].mxu1 }
 0x369   :  { %v2525_v3 = vmul.f32 %v2505_v40, %v12934_v10  ;;  %v2509_v6 = vadd.f32 %v13122_v18, %v2467_v47  ;;  %v10664_v54 = vadd.f32 %v2324_v20, %v13093_v0  ;;  %v2326_v29 = vpop.f32.mrb[6].mxu1 }
 0x36a   :  { %v2571_v63 = vrot.slane %v2524_v50, 7  ;;  %v2528_v28 = vmul.f32 %v2508_v36, %v12945_v24  ;;  %v2428_v33 = vmax.f32 %v10663_v11, 0.0  ;;  %v10665_v8 = vadd.f32 %v2326_v29, %v13095_v19  ;;  %v2328_v35 = vpop.f32.mrb[7].mxu1 }
 0x36b   :  { %v2572_v37 = vrot.slane %v2525_v3, 7  ;;  %v2529_v41 = vmul.f32 %v2509_v6, %v12945_v24  ;;  %v2429_v42 = vmax.f32 %v10664_v54, 0.0  ;;  %v10666_v27 = vadd.f32 %v2328_v35, %v13097_v5 }
 0x36c   :  { %2627 = vst [vmem:[#allocation4] sm:$0xfe] %v2571_v63  ;;  %v2575_v43 = vrot.slane %v2528_v28, 7  ;;  %v2470_v46 = vmul.f32 %v13109_v9, %v2428_v33  ;;  %v2432_v48 = vmax.f32 %v10665_v8, 0.0 }
 0x36d   :  { %2628 = vst [vmem:[#allocation4 + $0x8] sm:$0xfe] %v2572_v37  ;;  %v2577_v0 = vrot.slane %v2529_v41, 7  ;;  %v2471_v49 = vmul.f32 %v13113_v13, %v2429_v42  ;;  %v2433_v52 = vmax.f32 %v10666_v27, 0.0 }
 0x36e   :  { %v13144_v53 = vsel %vm733_vm4, %v2571_v63, %v2575_v43  ;;  %v2512_v19 = vadd.f32 %v13117_v57, %v2470_v46  ;;  %v2474_v55 = vmul.f32 %v13109_v9, %v2432_v48 }
 0x36f   :  { %2631 = vst [vmem:[#allocation4 + $0x20] sm:$0xff] %v13144_v53  ;;  %v13150_v5 = vsel %vm733_vm4, %v2572_v37, %v2577_v0  ;;  %v2513_v44 = vadd.f32 %v13122_v18, %v2471_v49  ;;  %v2475_v7 = vmul.f32 %v13113_v13, %v2433_v52  ;;  %v2332_v12 = vpop.f32.mrb[8].mxu1 }
 0x370   :  { %2632 = vst [vmem:[#allocation4 + $0x28] sm:$0xff] %v13150_v5  ;;  %v2532_v15 = vmul.f32 %v2512_v19, %v12949_v31  ;;  %v2516_v14 = vadd.f32 %v13117_v57, %v2474_v55  ;;  %v10667_v16 = vadd.f32 %v2332_v12, %v13099_v32  ;;  %v2334_v17 = vpop.f32.mrb[9].mxu1  ;;  %v11351_v12 = vld [vmem:[#allocation17 + $0x900] ss:$24 sps:$4 sm:$0xff]  }
 0x371   :  { %v2533_v2 = vmul.f32 %v2513_v44, %v12949_v31  ;;  %v2517_v38 = vadd.f32 %v13122_v18, %v2475_v7  ;;  %v10668_v21 = vadd.f32 %v2334_v17, %v13101_v34  ;;  %v2336_v23 = vpop.f32.mrb[10].mxu1  ;;  %v11362_v17 = vld [vmem:[#allocation17 + $0x93c] ss:$24 sps:$4 sm:$0xff]  }
 0x372   :  { %v2583_v56 = vrot.slane %v2532_v15, 7  ;;  %v2536_v30 = vmul.f32 %v2516_v14, %v12967_v51  ;;  %v2436_v61 = vmax.f32 %v10667_v16, 0.0  ;;  %v2337_v22 = vpop.f32.mrb[11].mxu1  ;;  %v11354_v15 = vld [vmem:[#allocation17 + $0x908] ss:$24 sps:$4 sm:$0xff]  }
 0x373   :  { %v2585_v45 = vrot.slane %v2533_v2, 7  ;;  %v2537_v40 = vmul.f32 %v2517_v38, %v12967_v51  ;;  %v2437_v47 = vmax.f32 %v10668_v21, 0.0  ;;  %v2871_v25 = vld [vmem:[#allocation4] sm:$0xfe]  ;;  %v11359_v16 = vld [vmem:[#allocation17 + $0x934] ss:$24 sps:$4 sm:$0xff]  }
 0x374   :  { %v2584_v32 = vsel %vm733_vm4, %v2575_v43, %v2583_v56  ;;  %v2591_v50 = vrot.slane %v2536_v30, 7  ;;  %v2478_v36 = vmul.f32 %v13109_v9, %v2436_v61  ;;  %v2872_v11 = vld [vmem:[#allocation4 + $0x8] sm:$0xfe]  ;;  %v2879_v20 = vpack.c.bf16 %v13144_v53, %v2871_v25  ;;  %v11360_v21 = vld [vmem:[#allocation17 + $0x938] ss:$24 sps:$4 sm:$0xff]  }
 0x375   :  { %v2586_v34 = vsel %vm733_vm4, %v2577_v0, %v2585_v45  ;;  %v2593_v3 = vrot.slane %v2537_v40, 7  ;;  %v2479_v6 = vmul.f32 %v13113_v13, %v2437_v47  ;;  %v2880_v54 = vpack.c.bf16 %v13150_v5, %v2872_v11  ;;  %v11357_v38 = vld [vmem:[#allocation17 + $0x930] ss:$24 sps:$4 sm:$0xff]   ;;  %v11365_v23 = vld [vmem:[#allocation17 + $0x964] ss:$24 sps:$4 sm:$0xff]  }
 0x376   :  { %v2592_v29 = vsel %vm733_vm4, %v2583_v56, %v2591_v50  ;;  %v2520_v63 = vadd.f32 %v13117_v57, %v2478_v36  ;;  %v3083_v28 = vshll.u32 %v2879_v20, 16  ;;  %v3081_v46 = vshrl.u32 %v2879_v20, 16  ;;  %v11368_v56 = vld [vmem:[#allocation17 + $0x96c] ss:$24 sps:$4 sm:$0xff]   ;;  %v11366_v40 = vld [vmem:[#allocation17 + $0x968] ss:$24 sps:$4 sm:$0xff]  }
 0x377   :  { %v2594_v33 = vsel %vm733_vm4, %v2585_v45, %v2593_v3  ;;  %v2521_v8 = vadd.f32 %v13122_v18, %v2479_v6  ;;  %v3095_v9 = vshll.u32 %v2880_v54, 16  ;;  %v13176_v41 = vpack.c.bf16 %v2592_v29, %v2584_v32  ;;  %v11363_v45 = vld [vmem:[#allocation17 + $0x960] ss:$24 sps:$4 sm:$0xff]   ;;  %v11371_v25 = vld [vmem:[#allocation17 + $0x994] ss:$24 sps:$4 sm:$0xff]  }
 0x378   :  { %v2540_v35 = vmul.f32 %v2520_v63, %v12985_v26  ;;  %v13174_v37 = vpack.c.bf16 %v2594_v33, %v2586_v34  ;;  %v3085_v42 = vrot.slane %v3083_v28, 1  ;;  %v3093_v27 = vshrl.u32 %v2880_v54, 16  ;;  %v11374_v32 = vld [vmem:[#allocation17 + $0x99c] ss:$24 sps:$4 sm:$0xff]   ;;  %v11369_v33 = vld [vmem:[#allocation17 + $0x990] ss:$24 sps:$4 sm:$0xff]  }
 0x379   :  { %v2541_v13 = vmul.f32 %v2521_v8, %v12985_v26  ;;  %v3097_v43 = vrot.slane %v3095_v9, 1  ;;  %v3088_v0 = vshll.u32 %v13176_v41, 16  ;;  %v3128_v20 = vshrl.u32 %v13176_v41, 16  ;;  %v11372_v8 = vld [vmem:[#allocation17 + $0x998] ss:$24 sps:$4 sm:$0xff]  }
 0x37a   :  { %v2599_v48 = vrot.slane %v2540_v35, 7  ;;  %v3100_v57 = vshll.u32 %v13174_v37, 16  ;;  %v3086_v52 = vor.u32 %v3085_v42, %v3081_v46  ;;  %v3136_v36 = vshrl.u32 %v13174_v37, 16  ;;  %v11377_v35 = vld [vmem:[#allocation17 + $0x9c4] ss:$24 sps:$4 sm:$0xff]  }
 0x37b   :  { %v2601_v49 = vrot.slane %v2541_v13, 7  ;;  %v3098_v18 = vor.u32 %v3097_v43, %v3093_v27  ;;  %v3090_v44 = vrot.slane %v3088_v0, 1  ;;  %v11380_v42 = vld [vmem:[#allocation17 + $0x9cc] ss:$24 sps:$4 sm:$0xff]   ;;  %v11375_v13 = vld [vmem:[#allocation17 + $0x9c0] ss:$24 sps:$4 sm:$0xff]  }
 0x37c   :  { %v2600_v19 = vsel %vm733_vm4, %v2591_v50, %v2599_v48  ;;  %v3102_v55 = vrot.slane %v3100_v57, 1  ;;  %v11378_v27 = vld [vmem:[#allocation17 + $0x9c8] ss:$24 sps:$4 sm:$0xff]   ;;  %v11383_v43 = vld [vmem:[#allocation17 + $0x9f4] ss:$24 sps:$4 sm:$0xff]  }
 0x37d   :  { %2643 = vst [vmem:[#allocation4 + $0x80] sm:$0x1f] %v2600_v19  ;;  %v2602_v7 = vsel %vm733_vm4, %v2593_v3, %v2601_v49  ;;  %v13189_v2 = vsel %vm925_vm5, %v3086_v52, %v3090_v44  ;;  %v3130_v29 = vor.u32 %v3128_v20, %v3090_v44  ;;  %v11386_v46 = vld [vmem:[#allocation17 + $0x9fc] ss:$24 sps:$4 sm:$0xff]   ;;  %v11381_v0 = vld [vmem:[#allocation17 + $0x9f0] ss:$24 sps:$4 sm:$0xff]  }
 0x37e   :  { %2644 = vst [vmem:[#allocation4 + $0x88] sm:$0x1f] %v2602_v7  ;;  %v13184_v14 = vsel %vm925_vm5, %v3098_v18, %v3102_v55  ;;  %v3138_v3 = vor.u32 %v3136_v36, %v3102_v55  ;;  %v11384_v49 = vld [vmem:[#allocation17 + $0x9f8] ss:$24 sps:$4 sm:$0xff]   ;;  %v11389_v18 = vld [vmem:[#allocation17 + $0xa24] ss:$24 sps:$4 sm:$0xff]  }
 0x37f   :  { %4176 = vmatprep.mubr.bf16.mxu1 %v13184_v14  ;;  %4298 = vmatprep.mubr.bf16.mxu0 %v13184_v14  ;;  %v11392_v52 = vld [vmem:[#allocation17 + $0xa2c] ss:$24 sps:$4 sm:$0xff]   ;;  %v11387_v19 = vld [vmem:[#allocation17 + $0xa20] ss:$24 sps:$4 sm:$0xff]   ;;  %v11398_v7 = vld [vmem:[#allocation17 + $0xa5c] ss:$24 sps:$4 sm:$0xff]  }
 0x380   :  { %4177 = vmatmul.mubr.bf16.vlgmr.msra.gmra.mrb[12].mxu1 %v13189_v2  ;;  %4299 = vmatmul.mubr.bf16.vlgmr.msra.gmra.mrb[36].mxu0 %v13189_v2  ;;  %v11390_v55 = vld [vmem:[#allocation17 + $0xa28] ss:$24 sps:$4 sm:$0xff]   ;;  %v11395_v44 = vld [vmem:[#allocation17 + $0xa54] ss:$24 sps:$4 sm:$0xff]   ;;  %v11420_v36 = vld [vmem:[#allocation17 + $0xb18] ss:$24 sps:$4 sm:$0xff]  }
 0x381   :  { %4206 = vmatpush1.bf16.msra.mxu1 %v11351_v12  ;;  %4328 = vmatpush1.bf16.msra.mxu0 %v11354_v15  ;;  %v11393_v12 = vld [vmem:[#allocation17 + $0xa50] ss:$24 sps:$4 sm:$0xff]   ;;  %v11428_v20 = vld [vmem:[#allocation17 + $0xb4c] ss:$24 sps:$4 sm:$0xff]  }
 0x382   :  { %4207 = vmatprep.subr.bf16.mxu1 %v11359_v16  ;;  %4329 = vmatprep.subr.bf16.mxu0 %v11362_v17  ;;  %v11396_v15 = vld [vmem:[#allocation17 + $0xa58] ss:$24 sps:$4 sm:$0xff]   ;;  %v11401_v16 = vld [vmem:[#allocation17 + $0xa84] ss:$24 sps:$4 sm:$0xff]  }
 0x383   :  { %v11404_v17 = vld [vmem:[#allocation17 + $0xa8c] ss:$24 sps:$4 sm:$0xff]  }
 0x384   :  { %v2875_v30 = vld [vmem:[#allocation4 + $0x80] sm:$0x1f] }
 0x385   :  { %v2876_v61 = vld [vmem:[#allocation4 + $0x88] sm:$0x1f]  ;;  %v2883_v22 = vpack.c.bf16 %v2875_v30, %v2875_v30  ;;  %4208 = vmatpush1.bf16.msra.mxu1 %v11357_v38  ;;  %4330 = vmatpush1.bf16.msra.mxu0 %v11360_v21  ;;  %v11399_v38 = vld [vmem:[#allocation17 + $0xa80] ss:$24 sps:$4 sm:$0xff]  }
 0x386   :  { %v2884_v47 = vpack.c.bf16 %v2876_v61, %v2876_v61  ;;  %4209 = vmatprep.subr.bf16.mxu1 %v11365_v23  ;;  %4331 = vmatprep.subr.bf16.mxu0 %v11368_v56  ;;  %v11402_v21 = vld [vmem:[#allocation17 + $0xa88] ss:$24 sps:$4 sm:$0xff]   ;;  %v11407_v23 = vld [vmem:[#allocation17 + $0xab4] ss:$24 sps:$4 sm:$0xff]   ;;  %v11408_v61 = vld [vmem:[#allocation17 + $0xab8] ss:$24 sps:$4 sm:$0xff]  }
 0x387   :  { %v3132_v50 = vshll.u32 %v2883_v22, 16  ;;  %v3160_v48 = vshrl.u32 %v2883_v22, 16  ;;  %v11410_v56 = vld [vmem:[#allocation17 + $0xabc] ss:$24 sps:$4 sm:$0xff]   ;;  %v11405_v30 = vld [vmem:[#allocation17 + $0xab0] ss:$24 sps:$4 sm:$0xff]  }
 0x388   :  { %v3140_v11 = vshll.u32 %v2884_v47, 16  ;;  %v3163_v54 = vshrl.u32 %v2884_v47, 16  ;;  %v11413_v22 = vld [vmem:[#allocation17 + $0xae4] ss:$24 sps:$4 sm:$0xff]   ;;  %v11414_v47 = vld [vmem:[#allocation17 + $0xae8] ss:$24 sps:$4 sm:$0xff]  }
 0x389   :  { %v3134_v34 = vrot.slane %v3132_v50, 1  ;;  %4210 = vmatpush1.bf16.msra.mxu1 %v11363_v45  ;;  %4332 = vmatpush1.bf16.msra.mxu0 %v11366_v40  ;;  %v11416_v45 = vld [vmem:[#allocation17 + $0xaec] ss:$24 sps:$4 sm:$0xff]   ;;  %v11411_v40 = vld [vmem:[#allocation17 + $0xae0] ss:$24 sps:$4 sm:$0xff]  }
 0x38a   :  { %v3142_v6 = vrot.slane %v3140_v11, 1  ;;  %4211 = vmatprep.subr.bf16.mxu1 %v11371_v25  ;;  %4333 = vmatprep.subr.bf16.mxu0 %v11374_v32  ;;  %v11419_v25 = vld [vmem:[#allocation17 + $0xb14] ss:$24 sps:$4 sm:$0xff]   ;;  %v11417_v50 = vld [vmem:[#allocation17 + $0xb10] ss:$24 sps:$4 sm:$0xff]  }
 0x38b   :  { %v13203_v9 = vsel %vm925_vm5, %v3130_v29, %v3134_v34  ;;  %v13209_v57 = vor.u32 %v3160_v48, %v3134_v34  ;;  %v11422_v32 = vld [vmem:[#allocation17 + $0xb1c] ss:$24 sps:$4 sm:$0xff]   ;;  %v11423_v34 = vld [vmem:[#allocation17 + $0xb40] ss:$24 sps:$4 sm:$0xff]   ;;  %v11429_v29 = vld [vmem:[#allocation17 + $0xb70] ss:$24 sps:$4 sm:$0xff]  }
 0x38c   :  { %v13196_v63 = vsel %vm925_vm5, %v3138_v3, %v3142_v6  ;;  %v13198_v28 = vor.u32 %v3163_v54, %v3142_v6  ;;  %v11425_v11 = vld [vmem:[#allocation17 + $0xb44] ss:$24 sps:$4 sm:$0xff]   ;;  %v11426_v3 = vld [vmem:[#allocation17 + $0xb48] ss:$24 sps:$4 sm:$0xff]   ;;  %v11431_v6 = vld [vmem:[#allocation17 + $0xb74] ss:$24 sps:$4 sm:$0xff]  }
 0x38d   :  { %4186 = vmatprep.mubr.bf16.mxu1 %v13196_v63  ;;  %4308 = vmatprep.mubr.bf16.mxu0 %v13196_v63  ;;  %v11434_v54 = vld [vmem:[#allocation17 + $0xb7c] ss:$24 sps:$4 sm:$0xff]   ;;  %v11444_v48 = vld [vmem:[#allocation17 + $0xbd8] ss:$24 sps:$4 sm:$0xff]  }
 0x38e   :  { %4187 = vmatmul.mubr.bf16.gmra.mrb[16].mxu1 %v13203_v9  ;;  %4309 = vmatmul.mubr.bf16.gmra.mrb[40].mxu0 %v13203_v9 }
 0x38f   :  { %4196 = vmatprep.mubr.bf16.mxu1 %v13198_v28  ;;  %4318 = vmatprep.mubr.bf16.mxu0 %v13198_v28 }
 0x390   :  { %4212 = vmatpush1.bf16.msra.mxu1 %v11369_v33  ;;  %4334 = vmatpush1.bf16.msra.mxu0 %v11372_v8  ;;  %v11432_v33 = vld [vmem:[#allocation17 + $0xb78] ss:$24 sps:$4 sm:$0xff]   ;;  %v11437_v8 = vld [vmem:[#allocation17 + $0xba4] ss:$24 sps:$4 sm:$0xff]  }
 0x391   :  { %4213 = vmatprep.subr.bf16.mxu1 %v11377_v35  ;;  %4335 = vmatprep.subr.bf16.mxu0 %v11380_v42  ;;  %v11440_v35 = vld [vmem:[#allocation17 + $0xbac] ss:$24 sps:$4 sm:$0xff]   ;;  %v11435_v42 = vld [vmem:[#allocation17 + $0xba0] ss:$24 sps:$4 sm:$0xff]  }
 0x394   :  { %4214 = vmatpush1.bf16.msra.mxu1 %v11375_v13  ;;  %4336 = vmatpush1.bf16.msra.mxu0 %v11378_v27  ;;  %v11438_v13 = vld [vmem:[#allocation17 + $0xba8] ss:$24 sps:$4 sm:$0xff]   ;;  %v11443_v27 = vld [vmem:[#allocation17 + $0xbd4] ss:$24 sps:$4 sm:$0xff]  }
 0x395   :  { %4215 = vmatprep.subr.bf16.mxu1 %v11383_v43  ;;  %4337 = vmatprep.subr.bf16.mxu0 %v11386_v46  ;;  %v11446_v43 = vld [vmem:[#allocation17 + $0xbdc] ss:$24 sps:$4 sm:$0xff]   ;;  %v11441_v46 = vld [vmem:[#allocation17 + $0xbd0] ss:$24 sps:$4 sm:$0xff]  }
 0x396   :  { %4197 = vmatmul.mubr.bf16.gmra.mrb[20].mxu1 %v13209_v57  ;;  %4319 = vmatmul.mubr.bf16.gmra.mrb[44].mxu0 %v13209_v57 }
 0x398   :  { %4216 = vmatpush1.bf16.msra.mxu1 %v11381_v0  ;;  %4338 = vmatpush1.bf16.msra.mxu0 %v11384_v49  ;;  %v11449_v0 = vld [vmem:[#allocation17 + $0x614] ss:$24 sps:$4 sm:$0xff]  }
 0x399   :  { %4217 = vmatprep.subr.bf16.mxu1 %v11389_v18  ;;  %4339 = vmatprep.subr.bf16.mxu0 %v11392_v52  ;;  %v11452_v49 = vld [vmem:[#allocation17 + $0xc] ss:$24 sps:$4 sm:$0xff]   ;;  %v13214_v18 = vsub.s32 2, %v12914_v58  ;;  %v13217_v52 = vsub.s32 3, %v12914_v58 }
 0x39c   :  { %4218 = vmatpush1.bf16.msra.mxu1 %v11387_v19  ;;  %4340 = vmatpush1.bf16.msra.mxu0 %v11390_v55  ;;  %v13221_v19 = vrot.slane %v13103_v59, %v13214_v18 }
 0x39d   :  { %4219 = vmatprep.subr.bf16.mxu1 %v11395_v44  ;;  %4341 = vmatprep.subr.bf16.mxu0 %v11398_v7  ;;  %v13225_v44 = vrot.slane %v13103_v59, %v13217_v52 }
 0x3a0   :  { %4220 = vmatpush1.bf16.msra.mxu1 %v11393_v12  ;;  %4342 = vmatpush1.bf16.msra.mxu0 %v11396_v15  ;;  %v13229_v12 = vrot.slane %v13105_v4, %v13214_v18 }
 0x3a1   :  { %4221 = vmatprep.subr.bf16.mxu1 %v11401_v16  ;;  %4343 = vmatprep.subr.bf16.mxu0 %v11404_v17  ;;  %v13233_v17 = vrot.slane %v13105_v4, %v13217_v52 }
 0x3a4   :  { %4222 = vmatpush1.bf16.msra.mxu1 %v11399_v38  ;;  %4344 = vmatpush1.bf16.msra.mxu0 %v11402_v21 }
 0x3a5   :  { %4223 = vmatprep.subr.bf16.mxu1 %v11407_v23  ;;  %4345 = vmatprep.subr.bf16.mxu0 %v11410_v56 }
 0x3a8   :  { %4224 = vmatpush1.bf16.msra.mxu1 %v11405_v30  ;;  %4346 = vmatpush1.bf16.msra.mxu0 %v11408_v61 }
 0x3a9   :  { %4225 = vmatprep.subr.bf16.mxu1 %v11413_v22  ;;  %4347 = vmatprep.subr.bf16.mxu0 %v11416_v45 }
 0x3ac   :  { %4226 = vmatpush1.bf16.msra.mxu1 %v11411_v40  ;;  %4348 = vmatpush1.bf16.msra.mxu0 %v11414_v47 }
 0x3ad   :  { %4227 = vmatprep.subr.bf16.mxu1 %v11419_v25  ;;  %4349 = vmatprep.subr.bf16.mxu0 %v11422_v32 }
 0x3b0   :  { %4228 = vmatpush1.bf16.msra.mxu1 %v11417_v50  ;;  %4350 = vmatpush1.bf16.msra.mxu0 %v11420_v36 }
 0x3b1   :  { %4229 = vmatprep.subr.bf16.mxu1 %v11425_v11  ;;  %4351 = vmatprep.subr.bf16.mxu0 %v11428_v20 }
 0x3b4   :  { %4230 = vmatpush1.bf16.msra.mxu1 %v11423_v34  ;;  %4352 = vmatpush1.bf16.msra.mxu0 %v11426_v3 }
 0x3b5   :  { %4231 = vmatprep.subr.bf16.mxu1 %v11431_v6  ;;  %4353 = vmatprep.subr.bf16.mxu0 %v11434_v54 }
 0x3b8   :  { %4232 = vmatpush1.bf16.msra.mxu1 %v11429_v29  ;;  %4354 = vmatpush1.bf16.msra.mxu0 %v11432_v33 }
 0x3b9   :  { %4233 = vmatprep.subr.bf16.mxu1 %v11437_v8  ;;  %4355 = vmatprep.subr.bf16.mxu0 %v11440_v35 }
 0x3bc   :  { %4234 = vmatpush1.bf16.msra.mxu1 %v11435_v42  ;;  %4356 = vmatpush1.bf16.msra.mxu0 %v11438_v13 }
 0x3bd   :  { %4235 = vmatprep.subr.bf16.mxu1 %v11443_v27  ;;  %4357 = vmatprep.subr.bf16.mxu0 %v11446_v43 }
 0x3c0   :  { %4236 = vmatpush1.bf16.msra.mxu1 %v11441_v46  ;;  %4358 = vmatpush1.bf16.msra.mxu0 %v11444_v48 }
 0x3c1   :  { %4388 = vmatprep.subr.bf16.mxu1 %v11449_v0  ;;  %5592 = vmatprep.subr.bf16.mxu0 %v11452_v49 }
 0x3e7   :  { %v2373_v55 = vpop.f32.mrb[24].mxu0 }
 0x3e8   :  { %v2422_v7 = vmax.f32 %v2373_v55, 0.0  ;;  %v2375_v15 = vpop.f32.mrb[25].mxu0 }
 0x3e9   :  { %v2423_v16 = vmax.f32 %v2375_v15, 0.0  ;;  %v2377_v38 = vpop.f32.mrb[26].mxu0 }
 0x3ea   :  { %v2464_v21 = vmul.f32 %v13221_v19, %v2422_v7  ;;  %v2426_v23 = vmax.f32 %v2377_v38, 0.0  ;;  %v2379_v56 = vpop.f32.mrb[27].mxu0 }
 0x3eb   :  { %v2465_v30 = vmul.f32 %v13225_v44, %v2423_v16  ;;  %v2427_v59 = vmax.f32 %v2379_v56, 0.0 }
 0x3ec   :  { %v2506_v61 = vadd.f32 %v13229_v12, %v2464_v21  ;;  %v2468_v22 = vmul.f32 %v13221_v19, %v2426_v23 }
 0x3ed   :  { %v2507_v45 = vadd.f32 %v13233_v17, %v2465_v30  ;;  %v2469_v40 = vmul.f32 %v13225_v44, %v2427_v59 }
 0x3ee   :  { %v2526_v47 = vmul.f32 %v2506_v61, %v12934_v10  ;;  %v2510_v4 = vadd.f32 %v13229_v12, %v2468_v22 }
 0x3ef   :  { %v2527_v25 = vmul.f32 %v2507_v45, %v12934_v10  ;;  %v2511_v32 = vadd.f32 %v13233_v17, %v2469_v40  ;;  %v2383_v50 = vpop.f32.mrb[28].mxu0 }
 0x3f0   :  { %v2573_v36 = vrot.slane %v2526_v47, 7  ;;  %v2530_v11 = vmul.f32 %v2510_v4, %v12945_v24  ;;  %v2430_v20 = vmax.f32 %v2383_v50, 0.0  ;;  %v2385_v34 = vpop.f32.mrb[29].mxu0 }
 0x3f1   :  { %v2574_v3 = vrot.slane %v2527_v25, 7  ;;  %v2531_v6 = vmul.f32 %v2511_v32, %v12945_v24  ;;  %v2431_v54 = vmax.f32 %v2385_v34, 0.0  ;;  %v2387_v29 = vpop.f32.mrb[30].mxu0 }
 0x3f2   :  { %2629 = vst [vmem:[#allocation4 + $0x10] sm:$0xfe] %v2573_v36  ;;  %v2579_v33 = vrot.slane %v2530_v11, 7  ;;  %v2472_v8 = vmul.f32 %v13221_v19, %v2430_v20  ;;  %v2434_v35 = vmax.f32 %v2387_v29, 0.0  ;;  %v2389_v42 = vpop.f32.mrb[31].mxu0 }
 0x3f3   :  { %2630 = vst [vmem:[#allocation4 + $0x18] sm:$0xfe] %v2574_v3  ;;  %v2581_v13 = vrot.slane %v2531_v6, 7  ;;  %v2473_v27 = vmul.f32 %v13225_v44, %v2431_v54  ;;  %v2435_v43 = vmax.f32 %v2389_v42, 0.0 }
 0x3f4   :  { %v13250_v46 = vsel %vm733_vm4, %v2573_v36, %v2579_v33  ;;  %v2514_v48 = vadd.f32 %v13229_v12, %v2472_v8  ;;  %v2476_v0 = vmul.f32 %v13221_v19, %v2434_v35 }
 0x3f5   :  { %2633 = vst [vmem:[#allocation4 + $0x30] sm:$0xff] %v13250_v46  ;;  %v13256_v49 = vsel %vm733_vm4, %v2574_v3, %v2581_v13  ;;  %v2515_v55 = vadd.f32 %v13233_v17, %v2473_v27  ;;  %v2477_v7 = vmul.f32 %v13225_v44, %v2435_v43 }
 0x3f6   :  { %2634 = vst [vmem:[#allocation4 + $0x38] sm:$0xff] %v13256_v49  ;;  %v2534_v15 = vmul.f32 %v2514_v48, %v12949_v31  ;;  %v2518_v16 = vadd.f32 %v13229_v12, %v2476_v0 }
 0x3f7   :  { %v2535_v38 = vmul.f32 %v2515_v55, %v12949_v31  ;;  %v2519_v21 = vadd.f32 %v13233_v17, %v2477_v7  ;;  %v2393_v23 = vpop.f32.mrb[32].mxu0 }
 0x3f8   :  { %v2587_v56 = vrot.slane %v2534_v15, 7  ;;  %v2538_v30 = vmul.f32 %v2518_v16, %v12967_v51  ;;  %v2438_v59 = vmax.f32 %v2393_v23, 0.0  ;;  %v2395_v61 = vpop.f32.mrb[33].mxu0 }
 0x3f9   :  { %v2589_v22 = vrot.slane %v2535_v38, 7  ;;  %v2539_v45 = vmul.f32 %v2519_v21, %v12967_v51  ;;  %v2439_v40 = vmax.f32 %v2395_v61, 0.0  ;;  %v2397_v47 = vpop.f32.mrb[34].mxu0  ;;  %v2873_v4 = vld [vmem:[#allocation4 + $0x10] sm:$0xfe] }
 0x3fa   :  { %v2588_v25 = vsel %vm733_vm4, %v2579_v33, %v2587_v56  ;;  %v2595_v32 = vrot.slane %v2538_v30, 7  ;;  %v2480_v50 = vmul.f32 %v13221_v19, %v2438_v59  ;;  %v2398_v36 = vpop.f32.mrb[35].mxu0  ;;  %v2874_v11 = vld [vmem:[#allocation4 + $0x18] sm:$0xfe]  ;;  %v2881_v20 = vpack.c.bf16 %v13250_v46, %v2873_v4  ;;  %v11447_v61 = vld [vmem:[#allocation17 + $0x610] ss:$24 sps:$4 sm:$0xff]  }
 0x3fb   :  { %v2590_v34 = vsel %vm733_vm4, %v2581_v13, %v2589_v22  ;;  %v2597_v3 = vrot.slane %v2539_v45, 7  ;;  %v2481_v6 = vmul.f32 %v13225_v44, %v2439_v40  ;;  %v2882_v54 = vpack.c.bf16 %v13256_v49, %v2874_v11  ;;  %v11455_v40 = vld [vmem:[#allocation17 + $0x644] ss:$24 sps:$4 sm:$0xff]  }
 0x3fc   :  { %v2596_v29 = vsel %vm733_vm4, %v2587_v56, %v2595_v32  ;;  %v2522_v8 = vadd.f32 %v13229_v12, %v2480_v50  ;;  %v3107_v35 = vshll.u32 %v2881_v20, 16  ;;  %v3105_v7 = vshrl.u32 %v2881_v20, 16  ;;  %v11458_v47 = vld [vmem:[#allocation17 + $0x3c] ss:$24 sps:$4 sm:$0xff]   ;;  %v11464_v36 = vld [vmem:[#allocation17 + $0x6c] ss:$24 sps:$4 sm:$0xff]  }
 0x3fd   :  { %v2598_v33 = vsel %vm733_vm4, %v2589_v22, %v2597_v3  ;;  %v2523_v19 = vadd.f32 %v13233_v17, %v2481_v6  ;;  %v3119_v42 = vshll.u32 %v2882_v54, 16  ;;  %v13280_v13 = vpack.c.bf16 %v2596_v29, %v2588_v25  ;;  %v11450_v22 = vld [vmem:[#allocation17 + $0x8] ss:$24 sps:$4 sm:$0xff]   ;;  %v11461_v50 = vld [vmem:[#allocation17 + $0x674] ss:$24 sps:$4 sm:$0xff]  }
 0x3fe   :  { %v2542_v27 = vmul.f32 %v2522_v8, %v12985_v26  ;;  %v13278_v43 = vpack.c.bf16 %v2598_v33, %v2590_v34  ;;  %v3109_v48 = vrot.slane %v3107_v35, 1  ;;  %v3117_v0 = vshrl.u32 %v2882_v54, 16  ;;  %v11453_v25 = vld [vmem:[#allocation17 + $0x640] ss:$24 sps:$4 sm:$0xff]   ;;  %v11459_v34 = vld [vmem:[#allocation17 + $0x670] ss:$24 sps:$4 sm:$0xff]  }
 0x3ff   :  { %v2543_v44 = vmul.f32 %v2523_v19, %v12985_v26  ;;  %v3121_v55 = vrot.slane %v3119_v42, 1  ;;  %v3112_v16 = vshll.u32 %v13280_v13, 16  ;;  %v11467_v29 = vld [vmem:[#allocation17 + $0x6a4] ss:$24 sps:$4 sm:$0xff]   ;;  %v3144_v42 = vshrl.u32 %v13280_v13, 16 }
 0x400   :  { %v2603_v15 = vrot.slane %v2542_v27, 7  ;;  %v3124_v12 = vshll.u32 %v13278_v43, 16  ;;  %v3110_v21 = vor.u32 %v3109_v48, %v3105_v7  ;;  %v11470_v8 = vld [vmem:[#allocation17 + $0x9c] ss:$24 sps:$4 sm:$0xff]   ;;  %v3152_v33 = vshrl.u32 %v13278_v43, 16 }
 0x401   :  { %v2605_v38 = vrot.slane %v2543_v44, 7  ;;  %v3122_v17 = vor.u32 %v3121_v55, %v3117_v0  ;;  %v3114_v30 = vrot.slane %v3112_v16, 1  ;;  %v11468_v16 = vld [vmem:[#allocation17 + $0x98] ss:$24 sps:$4 sm:$0xff]  }
 0x402   :  { %v2604_v23 = vsel %vm733_vm4, %v2595_v32, %v2603_v15  ;;  %v3126_v56 = vrot.slane %v3124_v12, 1  ;;  %v11456_v32 = vld [vmem:[#allocation17 + $0x38] ss:$24 sps:$4 sm:$0xff]  }
 0x403   :  { %2645 = vst [vmem:[#allocation4 + $0x90] sm:$0x1f] %v2604_v23  ;;  %v2606_v59 = vsel %vm733_vm4, %v2597_v3, %v2605_v38  ;;  %v13293_v4 = vsel %vm925_vm5, %v3110_v21, %v3114_v30  ;;  %v11462_v3 = vld [vmem:[#allocation17 + $0x68] ss:$24 sps:$4 sm:$0xff]   ;;  %v3146_v55 = vor.u32 %v3144_v42, %v3114_v30  ;;  %v11476_v21 = vld [vmem:[#allocation17 + $0xcc] ss:$24 sps:$4 sm:$0xff]  }
 0x404   :  { %2646 = vst [vmem:[#allocation4 + $0x98] sm:$0x1f] %v2606_v59  ;;  %v13288_v45 = vsel %vm925_vm5, %v3122_v17, %v3126_v56  ;;  %v3154_v48 = vor.u32 %v3152_v33, %v3126_v56  ;;  %v11465_v12 = vld [vmem:[#allocation17 + $0x6a0] ss:$24 sps:$4 sm:$0xff]   ;;  %v11473_v17 = vld [vmem:[#allocation17 + $0x6d4] ss:$24 sps:$4 sm:$0xff]  }
 0x405   :  { %4237 = vmatprep.mubr.bf16.mxu1 %v13288_v45  ;;  %4359 = vmatprep.mubr.bf16.mxu0 %v13288_v45  ;;  %v11471_v23 = vld [vmem:[#allocation17 + $0x6d0] ss:$24 sps:$4 sm:$0xff]   ;;  %v11479_v30 = vld [vmem:[#allocation17 + $0x704] ss:$24 sps:$4 sm:$0xff]  }
 0x406   :  { %4238 = vmatmul.mubr.bf16.vlgmr.msra.gmra.mrb[12].mxu1 %v13293_v4  ;;  %4360 = vmatmul.mubr.bf16.vlgmr.msra.gmra.mrb[36].mxu0 %v13293_v4  ;;  %v11474_v56 = vld [vmem:[#allocation17 + $0xc8] ss:$24 sps:$4 sm:$0xff]   ;;  %v11482_v59 = vld [vmem:[#allocation17 + $0xfc] ss:$24 sps:$4 sm:$0xff]   ;;  %v11504_v42 = vld [vmem:[#allocation17 + $0x1b8] ss:$24 sps:$4 sm:$0xff]  }
 0x407   :  { %4389 = vmatpush1.bf16.msra.mxu1 %v11447_v61  ;;  %5593 = vmatpush1.bf16.msra.mxu0 %v11450_v22  ;;  %v2648_v22 = vld [vmem:[#allocation4 + $0x8] sm:$0xff]  ;;  %v11506_v33 = vld [vmem:[#allocation17 + $0x1bc] ss:$24 sps:$4 sm:$0xff]  }
 0x408   :  { %4390 = vmatprep.subr.bf16.mxu1 %v11455_v40  ;;  %5594 = vmatprep.subr.bf16.mxu0 %v11458_v47  ;;  %v11477_v47 = vld [vmem:[#allocation17 + $0x700] ss:$24 sps:$4 sm:$0xff]  }
 0x40a   :  { %v2877_v11 = vld [vmem:[#allocation4 + $0x90] sm:$0x1f] }
 0x40b   :  { %4391 = vmatpush1.bf16.msra.mxu1 %v11453_v25  ;;  %5595 = vmatpush1.bf16.msra.mxu0 %v11456_v32  ;;  %v2878_v20 = vld [vmem:[#allocation4 + $0x98] sm:$0x1f]  ;;  %v2885_v6 = vpack.c.bf16 %v2877_v11, %v2877_v11  ;;  %v13316_v32 = vpack.c.bf16 %v13150_v5, %v2648_v22  ;;  %v11483_v11 = vld [vmem:[#allocation17 + $0x730] ss:$24 sps:$4 sm:$0xff]   ;;  %v11491_v5 = vld [vmem:[#allocation17 + $0x764] ss:$24 sps:$4 sm:$0xff]  }
 0x40c   :  { %v2886_v54 = vpack.c.bf16 %v2878_v20, %v2878_v20  ;;  %4392 = vmatprep.subr.bf16.mxu1 %v11461_v50  ;;  %5596 = vmatprep.subr.bf16.mxu0 %v11464_v36  ;;  %v11480_v25 = vld [vmem:[#allocation17 + $0xf8] ss:$24 sps:$4 sm:$0xff]   ;;  %v11485_v50 = vld [vmem:[#allocation17 + $0x734] ss:$24 sps:$4 sm:$0xff]   ;;  %v11486_v20 = vld [vmem:[#allocation17 + $0x128] ss:$24 sps:$4 sm:$0xff]  }
 0x40d   :  { %v3148_v35 = vshll.u32 %v2885_v6, 16  ;;  %v3166_v61 = vshrl.u32 %v2885_v6, 16  ;;  %v11488_v36 = vld [vmem:[#allocation17 + $0x12c] ss:$24 sps:$4 sm:$0xff]   ;;  %v11492_v6 = vld [vmem:[#allocation17 + $0x158] ss:$24 sps:$4 sm:$0xff]  }
 0x40e   :  { %v3156_v19 = vshll.u32 %v2886_v54, 16  ;;  %v3169_v0 = vshrl.u32 %v2886_v54, 16  ;;  %v11497_v54 = vld [vmem:[#allocation17 + $0x794] ss:$24 sps:$4 sm:$0xff]   ;;  %v11525_v22 = vld [vmem:[#allocation17 + $0x880] ss:$24 sps:$4 sm:$0xff]  }
 0x40f   :  { %v3150_v27 = vrot.slane %v3148_v35, 1  ;;  %4393 = vmatpush1.bf16.msra.mxu1 %v11459_v34  ;;  %5597 = vmatpush1.bf16.msra.mxu0 %v11462_v3  ;;  %v11494_v34 = vld [vmem:[#allocation17 + $0x15c] ss:$24 sps:$4 sm:$0xff]   ;;  %v11489_v3 = vld [vmem:[#allocation17 + $0x760] ss:$24 sps:$4 sm:$0xff]  }
 0x410   :  { %v3158_v44 = vrot.slane %v3156_v19, 1  ;;  %4394 = vmatprep.subr.bf16.mxu1 %v11467_v29  ;;  %5598 = vmatprep.subr.bf16.mxu0 %v11470_v8  ;;  %v11500_v29 = vld [vmem:[#allocation17 + $0x18c] ss:$24 sps:$4 sm:$0xff]   ;;  %v11498_v8 = vld [vmem:[#allocation17 + $0x188] ss:$24 sps:$4 sm:$0xff]  }
 0x411   :  { %v13307_v38 = vsel %vm925_vm5, %v3146_v55, %v3150_v27  ;;  %v13313_v40 = vor.u32 %v3166_v61, %v3150_v27  ;;  %v11503_v35 = vld [vmem:[#allocation17 + $0x7c4] ss:$24 sps:$4 sm:$0xff]   ;;  %v11501_v19 = vld [vmem:[#allocation17 + $0x7c0] ss:$24 sps:$4 sm:$0xff]   ;;  %v11509_v27 = vld [vmem:[#allocation17 + $0x7f4] ss:$24 sps:$4 sm:$0xff]  }
 0x412   :  { %v13300_v7 = vsel %vm925_vm5, %v3154_v48, %v3158_v44  ;;  %v13302_v15 = vor.u32 %v3169_v0, %v3158_v44  ;;  %v11512_v48 = vld [vmem:[#allocation17 + $0x1ec] ss:$24 sps:$4 sm:$0xff]   ;;  %v11507_v44 = vld [vmem:[#allocation17 + $0x7f0] ss:$24 sps:$4 sm:$0xff]   ;;  %v11530_v61 = vld [vmem:[#allocation17 + $0x27c] ss:$24 sps:$4 sm:$0xff]  }
 0x413   :  { %4247 = vmatprep.mubr.bf16.mxu1 %v13300_v7  ;;  %4369 = vmatprep.mubr.bf16.mxu0 %v13300_v7  ;;  %v11510_v0 = vld [vmem:[#allocation17 + $0x1e8] ss:$24 sps:$4 sm:$0xff]   ;;  %v11515_v55 = vld [vmem:[#allocation17 + $0x824] ss:$24 sps:$4 sm:$0xff]  }
 0x414   :  { %4248 = vmatmul.mubr.bf16.gmra.mrb[16].mxu1 %v13307_v38  ;;  %4370 = vmatmul.mubr.bf16.gmra.mrb[40].mxu0 %v13307_v38 }
 0x415   :  { %4257 = vmatprep.mubr.bf16.mxu1 %v13302_v15  ;;  %4379 = vmatprep.mubr.bf16.mxu0 %v13302_v15 }
 0x416   :  { %4395 = vmatpush1.bf16.msra.mxu1 %v11465_v12  ;;  %5599 = vmatpush1.bf16.msra.mxu0 %v11468_v16  ;;  %v11518_v12 = vld [vmem:[#allocation17 + $0x21c] ss:$24 sps:$4 sm:$0xff]   ;;  %v11513_v16 = vld [vmem:[#allocation17 + $0x820] ss:$24 sps:$4 sm:$0xff]  }
 0x417   :  { %4396 = vmatprep.subr.bf16.mxu1 %v11473_v17  ;;  %5600 = vmatprep.subr.bf16.mxu0 %v11476_v21  ;;  %v11516_v17 = vld [vmem:[#allocation17 + $0x218] ss:$24 sps:$4 sm:$0xff]   ;;  %v11521_v21 = vld [vmem:[#allocation17 + $0x854] ss:$24 sps:$4 sm:$0xff]  }
 0x41a   :  { %4397 = vmatpush1.bf16.msra.mxu1 %v11471_v23  ;;  %5601 = vmatpush1.bf16.msra.mxu0 %v11474_v56  ;;  %v11524_v23 = vld [vmem:[#allocation17 + $0x24c] ss:$24 sps:$4 sm:$0xff]   ;;  %v11519_v56 = vld [vmem:[#allocation17 + $0x850] ss:$24 sps:$4 sm:$0xff]  }
 0x41b   :  { %4398 = vmatprep.subr.bf16.mxu1 %v11479_v30  ;;  %5602 = vmatprep.subr.bf16.mxu0 %v11482_v59  ;;  %v11522_v30 = vld [vmem:[#allocation17 + $0x248] ss:$24 sps:$4 sm:$0xff]   ;;  %v11527_v59 = vld [vmem:[#allocation17 + $0x884] ss:$24 sps:$4 sm:$0xff]  }
 0x41c   :  { %4258 = vmatmul.mubr.bf16.gmra.mrb[20].mxu1 %v13313_v40  ;;  %4380 = vmatmul.mubr.bf16.gmra.mrb[44].mxu0 %v13313_v40 }
 0x41d   :  { %4420 = vmatprep.mubr.bf16.mxu1 %v13184_v14  ;;  %5624 = vmatprep.mubr.bf16.mxu0 %v13316_v32  ;;  %v11495_v14 = vld [vmem:[#allocation17 + $0x790] ss:$24 sps:$4 sm:$0xff]  }
 0x41e   :  { %4399 = vmatpush1.bf16.msra.mxu1 %v11477_v47  ;;  %5603 = vmatpush1.bf16.msra.mxu0 %v11480_v25  ;;  %v11528_v47 = vld [vmem:[#allocation17 + $0x278] ss:$24 sps:$4 sm:$0xff]   ;;  %v11533_v25 = vld [vmem:[#allocation17 + $0x8b4] ss:$24 sps:$4 sm:$0xff]  }
 0x41f   :  { %4400 = vmatprep.subr.bf16.mxu1 %v11485_v50  ;;  %5604 = vmatprep.subr.bf16.mxu0 %v11488_v36  ;;  %v11536_v50 = vld [vmem:[#allocation17 + $0x2ac] ss:$24 sps:$4 sm:$0xff]   ;;  %v11531_v36 = vld [vmem:[#allocation17 + $0x8b0] ss:$24 sps:$4 sm:$0xff]  }
 0x422   :  { %4401 = vmatpush1.bf16.msra.mxu1 %v11483_v11  ;;  %5605 = vmatpush1.bf16.msra.mxu0 %v11486_v20  ;;  %v11534_v11 = vld [vmem:[#allocation17 + $0x2a8] ss:$24 sps:$4 sm:$0xff]   ;;  %v11539_v20 = vld [vmem:[#allocation17 + $0x8e4] ss:$24 sps:$4 sm:$0xff]  }
 0x423   :  { %4402 = vmatprep.subr.bf16.mxu1 %v11491_v5  ;;  %5606 = vmatprep.subr.bf16.mxu0 %v11494_v34  ;;  %v11542_v5 = vld [vmem:[#allocation17 + $0x2dc] ss:$24 sps:$4 sm:$0xff]   ;;  %v11537_v34 = vld [vmem:[#allocation17 + $0x8e0] ss:$24 sps:$4 sm:$0xff]  }
 0x426   :  { %4403 = vmatpush1.bf16.msra.mxu1 %v11489_v3  ;;  %5607 = vmatpush1.bf16.msra.mxu0 %v11492_v6  ;;  %v11540_v3 = vld [vmem:[#allocation17 + $0x2d8] ss:$24 sps:$4 sm:$0xff]   ;;  %v11545_v6 = vld [vmem:[#allocation17 + $0x914] ss:$24 sps:$4 sm:$0xff]  }
 0x427   :  { %4404 = vmatprep.subr.bf16.mxu1 %v11497_v54  ;;  %5608 = vmatprep.subr.bf16.mxu0 %v11500_v29  ;;  %v11548_v54 = vld [vmem:[#allocation17 + $0x30c] ss:$24 sps:$4 sm:$0xff]   ;;  %v2647_v29 = vld [vmem:[#allocation4] sm:$0xff] }
 0x42a   :  { %4405 = vmatpush1.bf16.msra.mxu1 %v11495_v14  ;;  %5609 = vmatpush1.bf16.msra.mxu0 %v11498_v8  ;;  %v11543_v14 = vld [vmem:[#allocation17 + $0x910] ss:$24 sps:$4 sm:$0xff]   ;;  %v13323_v8 = vpack.c.bf16 %v13144_v53, %v2647_v29  ;;  %v11560_v53 = vld [vmem:[#allocation17 + $0x36c] ss:$24 sps:$4 sm:$0xff]  }
 0x42b   :  { %4406 = vmatprep.subr.bf16.mxu1 %v11503_v35  ;;  %5610 = vmatprep.subr.bf16.mxu0 %v11506_v33  ;;  %v11546_v35 = vld [vmem:[#allocation17 + $0x308] ss:$24 sps:$4 sm:$0xff]   ;;  %v11551_v33 = vld [vmem:[#allocation17 + $0x944] ss:$24 sps:$4 sm:$0xff]  }
 0x42c   :  { %v11594_v29 = vld [vmem:[#allocation17 + $0x488] ss:$24 sps:$4 sm:$0xff]  }
 0x42e   :  { %4407 = vmatpush1.bf16.msra.mxu1 %v11501_v19  ;;  %5611 = vmatpush1.bf16.msra.mxu0 %v11504_v42  ;;  %v11554_v19 = vld [vmem:[#allocation17 + $0x33c] ss:$24 sps:$4 sm:$0xff]   ;;  %v11549_v42 = vld [vmem:[#allocation17 + $0x940] ss:$24 sps:$4 sm:$0xff]  }
 0x42f   :  { %4408 = vmatprep.subr.bf16.mxu1 %v11509_v27  ;;  %5612 = vmatprep.subr.bf16.mxu0 %v11512_v48  ;;  %v11552_v27 = vld [vmem:[#allocation17 + $0x338] ss:$24 sps:$4 sm:$0xff]   ;;  %v11557_v48 = vld [vmem:[#allocation17 + $0x974] ss:$24 sps:$4 sm:$0xff]  }
 0x432   :  { %4409 = vmatpush1.bf16.msra.mxu1 %v11507_v44  ;;  %5613 = vmatpush1.bf16.msra.mxu0 %v11510_v0  ;;  %v11555_v44 = vld [vmem:[#allocation17 + $0x970] ss:$24 sps:$4 sm:$0xff]   ;;  %v2664_v0 = vld [vmem:[#allocation4 + $0x88] sm:$0xf] }
 0x433   :  { %4410 = vmatprep.subr.bf16.mxu1 %v11515_v55  ;;  %5614 = vmatprep.subr.bf16.mxu0 %v11518_v12  ;;  %v11563_v55 = vld [vmem:[#allocation17 + $0x9a4] ss:$24 sps:$4 sm:$0xff]  }
 0x434   :  { %v11566_v12 = vld [vmem:[#allocation17 + $0x39c] ss:$24 sps:$4 sm:$0xff]  }
 0x436   :  { %4411 = vmatpush1.bf16.msra.mxu1 %v11513_v16  ;;  %5615 = vmatpush1.bf16.msra.mxu0 %v11516_v17  ;;  %v11561_v16 = vld [vmem:[#allocation17 + $0x9a0] ss:$24 sps:$4 sm:$0xff]  }
 0x437   :  { %4412 = vmatprep.subr.bf16.mxu1 %v11521_v21  ;;  %5616 = vmatprep.subr.bf16.mxu0 %v11524_v23  ;;  %v11564_v17 = vld [vmem:[#allocation17 + $0x398] ss:$24 sps:$4 sm:$0xff]   ;;  %v11569_v21 = vld [vmem:[#allocation17 + $0x9d4] ss:$24 sps:$4 sm:$0xff]   ;;  %v2663_v23 = vld [vmem:[#allocation4 + $0x80] sm:$0xf] }
 0x43a   :  { %4413 = vmatpush1.bf16.msra.mxu1 %v11519_v56  ;;  %5617 = vmatpush1.bf16.msra.mxu0 %v11522_v30  ;;  %v11572_v56 = vld [vmem:[#allocation17 + $0x3cc] ss:$24 sps:$4 sm:$0xff]   ;;  %v11567_v30 = vld [vmem:[#allocation17 + $0x9d0] ss:$24 sps:$4 sm:$0xff]  }
 0x43b   :  { %4414 = vmatprep.subr.bf16.mxu1 %v11527_v59  ;;  %5618 = vmatprep.subr.bf16.mxu0 %v11530_v61  ;;  %v13335_v59 = vpack.c.bf16 %v2663_v23, %v2663_v23  ;;  %v11570_v61 = vld [vmem:[#allocation17 + $0x3c8] ss:$24 sps:$4 sm:$0xff]   ;;  %v11623_v23 = vld [vmem:[#allocation17 + $0xb84] ss:$24 sps:$4 sm:$0xff]  }
 0x43e   :  { %4415 = vmatpush1.bf16.msra.mxu1 %v11525_v22  ;;  %5619 = vmatpush1.bf16.msra.mxu0 %v11528_v47  ;;  %v11578_v22 = vld [vmem:[#allocation17 + $0x3fc] ss:$24 sps:$4 sm:$0xff]  }
 0x43f   :  { %4416 = vmatprep.subr.bf16.mxu1 %v11533_v25  ;;  %5620 = vmatprep.subr.bf16.mxu0 %v11536_v50  ;;  %v11573_v25 = vld [vmem:[#allocation17 + $0xa00] ss:$24 sps:$4 sm:$0xff]  }
 0x440   :  { %v11576_v50 = vld [vmem:[#allocation17 + $0x3f8] ss:$24 sps:$4 sm:$0xff]  }
 0x442   :  { %4417 = vmatpush1.bf16.msra.mxu1 %v11531_v36  ;;  %5621 = vmatpush1.bf16.msra.mxu0 %v11534_v11  ;;  %v11581_v36 = vld [vmem:[#allocation17 + $0xa34] ss:$24 sps:$4 sm:$0xff]  }
 0x443   :  { %4418 = vmatprep.subr.bf16.mxu1 %v11539_v20  ;;  %5622 = vmatprep.subr.bf16.mxu0 %v11542_v5  ;;  %v11584_v11 = vld [vmem:[#allocation17 + $0x42c] ss:$24 sps:$4 sm:$0xff]   ;;  %v11579_v20 = vld [vmem:[#allocation17 + $0xa30] ss:$24 sps:$4 sm:$0xff]  }
 0x444   :  { %v11587_v5 = vld [vmem:[#allocation17 + $0xa64] ss:$24 sps:$4 sm:$0xff]  }
 0x446   :  { %4419 = vmatpush1.bf16.msra.mxu1 %v11537_v34  ;;  %5623 = vmatpush1.bf16.msra.mxu0 %v11540_v3  ;;  %v11585_v34 = vld [vmem:[#allocation17 + $0xa60] ss:$24 sps:$4 sm:$0xff]   ;;  %v11593_v3 = vld [vmem:[#allocation17 + $0xa94] ss:$24 sps:$4 sm:$0xff]  }
 0x447   :  { %4449 = vmatprep.subr.bf16.mxu1 %v11545_v6  ;;  %5653 = vmatprep.subr.bf16.mxu0 %v11548_v54  ;;  %v11596_v6 = vld [vmem:[#allocation17 + $0x48c] ss:$24 sps:$4 sm:$0xff]   ;;  %v11591_v54 = vld [vmem:[#allocation17 + $0xa90] ss:$24 sps:$4 sm:$0xff]  }
 0x449   :  { %4421 = vmatmul.mubr.bf16.vlgmr.msra.gmra.mrb[24].mxu1 %v13189_v2  ;;  %5625 = vmatmul.mubr.bf16.vlgmr.msra.gmra.mrb[36].mxu0 %v13323_v8  ;;  %v11558_v2 = vld [vmem:[#allocation17 + $0x368] ss:$24 sps:$4 sm:$0xff]  }
 0x44a   :  { %4430 = vmatprep.mubr.bf16.mxu1 %v13196_v63  ;;  %4450 = vmatpush1.bf16.msra.mxu1 %v11543_v14  ;;  %v13331_v63 = vpack.c.bf16 %v2664_v0, %v2664_v0  ;;  %v11599_v14 = vld [vmem:[#allocation17 + $0xac4] ss:$24 sps:$4 sm:$0xff]  }
 0x44b   :  { %5634 = vmatprep.mubr.bf16.mxu0 %v13174_v37  ;;  %5654 = vmatpush1.bf16.msra.mxu0 %v11546_v35  ;;  %v11602_v35 = vld [vmem:[#allocation17 + $0x4bc] ss:$24 sps:$4 sm:$0xff]  }
 0x44c   :  { %4451 = vmatprep.subr.bf16.mxu1 %v11551_v33  ;;  %5655 = vmatprep.subr.bf16.mxu0 %v11554_v19  ;;  %v11597_v33 = vld [vmem:[#allocation17 + $0xac0] ss:$24 sps:$4 sm:$0xff]   ;;  %v11614_v0 = vld [vmem:[#allocation17 + $0x51c] ss:$24 sps:$4 sm:$0xff]  }
 0x44d   :  { %v11600_v19 = vld [vmem:[#allocation17 + $0x4b8] ss:$24 sps:$4 sm:$0xff]  }
 0x44e   :  { %4452 = vmatpush1.bf16.msra.mxu1 %v11549_v42  ;;  %v11605_v42 = vld [vmem:[#allocation17 + $0xaf4] ss:$24 sps:$4 sm:$0xff]  }
 0x44f   :  { %5656 = vmatpush1.bf16.msra.mxu0 %v11552_v27  ;;  %4453 = vmatprep.subr.bf16.mxu1 %v11557_v48  ;;  %v11608_v27 = vld [vmem:[#allocation17 + $0x4ec] ss:$24 sps:$4 sm:$0xff]   ;;  %v11603_v48 = vld [vmem:[#allocation17 + $0xaf0] ss:$24 sps:$4 sm:$0xff]  }
 0x450   :  { %5657 = vmatprep.subr.bf16.mxu0 %v11560_v53  ;;  %v11606_v53 = vld [vmem:[#allocation17 + $0x4e8] ss:$24 sps:$4 sm:$0xff]  }
 0x451   :  { %4431 = vmatmul.mubr.bf16.gmra.mrb[28].mxu1 %v13203_v9  ;;  %5635 = vmatmul.mubr.bf16.gmra.mrb[40].mxu0 %v13176_v41  ;;  %v2650_v9 = vld [vmem:[#allocation4 + $0x18] sm:$0xff] }
 0x452   :  { %4440 = vmatprep.mubr.bf16.mxu1 %v13198_v28  ;;  %4454 = vmatpush1.bf16.msra.mxu1 %v11555_v44  ;;  %v11575_v28 = vld [vmem:[#allocation17 + $0xa04] ss:$24 sps:$4 sm:$0xff]   ;;  %v13340_v47 = vpack.c.bf16 %v13256_v49, %v2650_v9  ;;  %v11624_v9 = vld [vmem:[#allocation17 + $0x578] ss:$24 sps:$4 sm:$0xff]  }
 0x453   :  { %5644 = vmatprep.mubr.bf16.mxu0 %v13331_v63  ;;  %5658 = vmatpush1.bf16.msra.mxu0 %v11558_v2  ;;  %v11590_v49 = vld [vmem:[#allocation17 + $0x45c] ss:$24 sps:$4 sm:$0xff]   ;;  %v11609_v2 = vld [vmem:[#allocation17 + $0xb20] ss:$24 sps:$4 sm:$0xff]  }
 0x454   :  { %4455 = vmatprep.subr.bf16.mxu1 %v11563_v55  ;;  %5659 = vmatprep.subr.bf16.mxu0 %v11566_v12  ;;  %v11611_v44 = vld [vmem:[#allocation17 + $0xb24] ss:$24 sps:$4 sm:$0xff]   ;;  %v11612_v55 = vld [vmem:[#allocation17 + $0x518] ss:$24 sps:$4 sm:$0xff]   ;;  %v11617_v12 = vld [vmem:[#allocation17 + $0xb54] ss:$24 sps:$4 sm:$0xff]  }
 0x456   :  { %4456 = vmatpush1.bf16.msra.mxu1 %v11561_v16  ;;  %v11620_v16 = vld [vmem:[#allocation17 + $0x54c] ss:$24 sps:$4 sm:$0xff]  }
 0x457   :  { %5660 = vmatpush1.bf16.msra.mxu0 %v11564_v17  ;;  %4457 = vmatprep.subr.bf16.mxu1 %v11569_v21  ;;  %v11615_v17 = vld [vmem:[#allocation17 + $0xb50] ss:$24 sps:$4 sm:$0xff]  }
 0x458   :  { %5661 = vmatprep.subr.bf16.mxu0 %v11572_v56  ;;  %v11618_v21 = vld [vmem:[#allocation17 + $0x548] ss:$24 sps:$4 sm:$0xff]   ;;  %v11626_v56 = vld [vmem:[#allocation17 + $0x57c] ss:$24 sps:$4 sm:$0xff]  }
 0x459   :  { %4441 = vmatmul.mubr.bf16.gmra.mrb[32].mxu1 %v13209_v57  ;;  %5645 = vmatmul.mubr.bf16.gmra.mrb[44].mxu0 %v13335_v59  ;;  %v11582_v57 = vld [vmem:[#allocation17 + $0x428] ss:$24 sps:$4 sm:$0xff]  }
 0x45a   :  { %4458 = vmatpush1.bf16.msra.mxu1 %v11567_v30  ;;  %4481 = vmatprep.mubr.bf16.mxu1 %v13288_v45  ;;  %v11588_v45 = vld [vmem:[#allocation17 + $0x458] ss:$24 sps:$4 sm:$0xff]  }
 0x45b   :  { %5662 = vmatpush1.bf16.msra.mxu0 %v11570_v61  ;;  %5685 = vmatprep.mubr.bf16.mxu0 %v13340_v47  ;;  %v11621_v30 = vld [vmem:[#allocation17 + $0xb80] ss:$24 sps:$4 sm:$0xff]   ;;  %v11629_v61 = vld [vmem:[#allocation17 + $0xbb4] ss:$24 sps:$4 sm:$0xff]  }
 0x45c   :  { %4459 = vmatprep.subr.bf16.mxu1 %v11575_v28  ;;  %5663 = vmatprep.subr.bf16.mxu0 %v11578_v22  ;;  %v11632_v28 = vld [vmem:[#allocation17 + $0x5ac] ss:$24 sps:$4 sm:$0xff]   ;;  %v11627_v22 = vld [vmem:[#allocation17 + $0xbb0] ss:$24 sps:$4 sm:$0xff]  }
 0x45e   :  { %4460 = vmatpush1.bf16.msra.mxu1 %v11573_v25  ;;  %v11630_v25 = vld [vmem:[#allocation17 + $0x5a8] ss:$24 sps:$4 sm:$0xff]  }
 0x45f   :  { %5664 = vmatpush1.bf16.msra.mxu0 %v11576_v50  ;;  %4461 = vmatprep.subr.bf16.mxu1 %v11581_v36  ;;  %v11635_v50 = vld [vmem:[#allocation17 + $0xbe4] ss:$24 sps:$4 sm:$0xff]  }
 0x460   :  { %5665 = vmatprep.subr.bf16.mxu0 %v11584_v11  ;;  %v11638_v36 = vld [vmem:[#allocation17 + $0x5dc] ss:$24 sps:$4 sm:$0xff]   ;;  %v11633_v11 = vld [vmem:[#allocation17 + $0xbe0] ss:$24 sps:$4 sm:$0xff]  }
 0x462   :  { %4462 = vmatpush1.bf16.msra.mxu1 %v11579_v20  ;;  %v11636_v20 = vld [vmem:[#allocation17 + $0x5d8] ss:$24 sps:$4 sm:$0xff]  }
 0x463   :  { %5666 = vmatpush1.bf16.msra.mxu0 %v11582_v57  ;;  %4463 = vmatprep.subr.bf16.mxu1 %v11587_v5  ;;  %v11641_v57 = vld [vmem:[#allocation17 + $0x4] ss:$24 sps:$4 sm:$0xff]  }
 0x464   :  { %5667 = vmatprep.subr.bf16.mxu0 %v11590_v49  ;;  %v11644_v5 = vld [vmem:[#allocation17 + $0xc0c] ss:$24 sps:$4 sm:$0xff]  }
 0x465   :  { %v2649_v49 = vld [vmem:[#allocation4 + $0x10] sm:$0xff] }
 0x466   :  { %4464 = vmatpush1.bf16.msra.mxu1 %v11585_v34  ;;  %v11639_v34 = vld [vmem:[#allocation17] ss:$24 sps:$4 sm:$0xff]  }
 0x467   :  { %5668 = vmatpush1.bf16.msra.mxu0 %v11588_v45  ;;  %4465 = vmatprep.subr.bf16.mxu1 %v11593_v3  ;;  %v13345_v45 = vpack.c.bf16 %v13250_v46, %v2649_v49  ;;  %v11642_v3 = vld [vmem:[#allocation17 + $0xc08] ss:$24 sps:$4 sm:$0xff]   ;;  %v11656_v46 = vld [vmem:[#allocation17 + $0xc6c] ss:$24 sps:$4 sm:$0xff]  }
 0x468   :  { %5669 = vmatprep.subr.bf16.mxu0 %v11596_v6  ;;  %v11647_v6 = vld [vmem:[#allocation17 + $0x34] ss:$24 sps:$4 sm:$0xff]  }
 0x469   :  { %v11692_v49 = vld [vmem:[#allocation17 + $0xd8c] ss:$24 sps:$4 sm:$0xff]  }
 0x46a   :  { %4466 = vmatpush1.bf16.msra.mxu1 %v11591_v54  ;;  %v11650_v54 = vld [vmem:[#allocation17 + $0xc3c] ss:$24 sps:$4 sm:$0xff]  }
 0x46b   :  { %5670 = vmatpush1.bf16.msra.mxu0 %v11594_v29  ;;  %4467 = vmatprep.subr.bf16.mxu1 %v11599_v14  ;;  %v11645_v29 = vld [vmem:[#allocation17 + $0x30] ss:$24 sps:$4 sm:$0xff]  }
 0x46c   :  { %5671 = vmatprep.subr.bf16.mxu0 %v11602_v35  ;;  %v11648_v14 = vld [vmem:[#allocation17 + $0xc38] ss:$24 sps:$4 sm:$0xff]   ;;  %v11653_v35 = vld [vmem:[#allocation17 + $0x64] ss:$24 sps:$4 sm:$0xff]  }
 0x46e   :  { %4468 = vmatpush1.bf16.msra.mxu1 %v11597_v33  ;;  %v2666_v33 = vld [vmem:[#allocation4 + $0x98] sm:$0xf] }
 0x46f   :  { %5672 = vmatpush1.bf16.msra.mxu0 %v11600_v19  ;;  %4469 = vmatprep.subr.bf16.mxu1 %v11605_v42  ;;  %v11651_v19 = vld [vmem:[#allocation17 + $0x60] ss:$24 sps:$4 sm:$0xff]   ;;  %v11659_v42 = vld [vmem:[#allocation17 + $0x94] ss:$24 sps:$4 sm:$0xff]  }
 0x470   :  { %5673 = vmatprep.subr.bf16.mxu0 %v11608_v27  ;;  %v11662_v27 = vld [vmem:[#allocation17 + $0xc9c] ss:$24 sps:$4 sm:$0xff]  }
 0x472   :  { %4470 = vmatpush1.bf16.msra.mxu1 %v11603_v48  ;;  %v5837_v48 = vld [vmem:[#allocation4 + $0x8] sm:$0xfc] }
 0x473   :  { %5674 = vmatpush1.bf16.msra.mxu0 %v11606_v53  ;;  %4471 = vmatprep.subr.bf16.mxu1 %v11611_v44  ;;  %v11657_v53 = vld [vmem:[#allocation17 + $0x90] ss:$24 sps:$4 sm:$0xff]  }
 0x474   :  { %5675 = vmatprep.subr.bf16.mxu0 %v11614_v0  ;;  %v11660_v44 = vld [vmem:[#allocation17 + $0xc98] ss:$24 sps:$4 sm:$0xff]   ;;  %v11665_v0 = vld [vmem:[#allocation17 + $0xc4] ss:$24 sps:$4 sm:$0xff]  }
 0x476   :  { %4472 = vmatpush1.bf16.msra.mxu1 %v11609_v2  ;;  %v12151_v2 = vld [vmem:[#allocation4 + $0x28] sm:$0xff] }
 0x477   :  { %5676 = vmatpush1.bf16.msra.mxu0 %v11612_v55  ;;  %4473 = vmatprep.subr.bf16.mxu1 %v11617_v12  ;;  %v5845_v55 = vpack.c.bf16 %v12151_v2, %v5837_v48  ;;  %v11668_v12 = vld [vmem:[#allocation17 + $0xccc] ss:$24 sps:$4 sm:$0xff]   ;;  %v11708_v48 = vld [vmem:[#allocation17 + $0xe18] ss:$24 sps:$4 sm:$0xff]   ;;  %v11714_v2 = vld [vmem:[#allocation17 + $0xe48] ss:$24 sps:$4 sm:$0xff]  }
 0x478   :  { %5677 = vmatprep.subr.bf16.mxu0 %v11620_v16  ;;  %v6061_v16 = vrot.slane %v13174_v37, 1 }
 0x47a   :  { %4474 = vmatpush1.bf16.msra.mxu1 %v11615_v17  ;;  %v11663_v17 = vld [vmem:[#allocation17 + $0xc0] ss:$24 sps:$4 sm:$0xff]  }
 0x47b   :  { %5678 = vmatpush1.bf16.msra.mxu0 %v11618_v21  ;;  %4475 = vmatprep.subr.bf16.mxu1 %v11623_v23  ;;  %v11666_v21 = vld [vmem:[#allocation17 + $0xcc8] ss:$24 sps:$4 sm:$0xff]   ;;  %v6060_v23 = vrot.slane %v5845_v55, 1  ;;  %v11719_v55 = vld [vmem:[#allocation17 + $0x274] ss:$24 sps:$4 sm:$0xff]  }
 0x47c   :  { %5679 = vmatprep.subr.bf16.mxu0 %v11626_v56  ;;  %v11671_v56 = vld [vmem:[#allocation17 + $0xf4] ss:$24 sps:$4 sm:$0xff]  }
 0x47e   :  { %4476 = vmatpush1.bf16.msra.mxu1 %v11621_v30  ;;  %v11674_v30 = vld [vmem:[#allocation17 + $0xcfc] ss:$24 sps:$4 sm:$0xff]  }
 0x47f   :  { %5680 = vmatpush1.bf16.msra.mxu0 %v11624_v9  ;;  %4477 = vmatprep.subr.bf16.mxu1 %v11629_v61  ;;  %v13366_v9 = vsel %vm1941_vm6, %v6060_v23, %v6061_v16  ;;  %v11669_v61 = vld [vmem:[#allocation17 + $0xf0] ss:$24 sps:$4 sm:$0xff]   ;;  %v11728_v23 = vld [vmem:[#allocation17 + $0xeac] ss:$24 sps:$4 sm:$0xff]  }
 0x480   :  { %5681 = vmatprep.subr.bf16.mxu0 %v11632_v28  ;;  %v11672_v28 = vld [vmem:[#allocation17 + $0xcf8] ss:$24 sps:$4 sm:$0xff]  }
 0x482   :  { %4478 = vmatpush1.bf16.msra.mxu1 %v11627_v22  ;;  %v11677_v22 = vld [vmem:[#allocation17 + $0x124] ss:$24 sps:$4 sm:$0xff]  }
 0x483   :  { %5682 = vmatpush1.bf16.msra.mxu0 %v11630_v25  ;;  %4479 = vmatprep.subr.bf16.mxu1 %v11635_v50  ;;  %v11675_v25 = vld [vmem:[#allocation17 + $0x120] ss:$24 sps:$4 sm:$0xff]  }
 0x484   :  { %5683 = vmatprep.subr.bf16.mxu0 %v11638_v36  ;;  %v11678_v50 = vld [vmem:[#allocation17 + $0xd28] ss:$24 sps:$4 sm:$0xff]   ;;  %v11683_v36 = vld [vmem:[#allocation17 + $0x154] ss:$24 sps:$4 sm:$0xff]  }
 0x486   :  { %4480 = vmatpush1.bf16.msra.mxu1 %v11633_v11  ;;  %v11686_v11 = vld [vmem:[#allocation17 + $0xd5c] ss:$24 sps:$4 sm:$0xff]  }
 0x487   :  { %5684 = vmatpush1.bf16.msra.mxu0 %v11636_v20  ;;  %5470 = vmatprep.subr.bf16.mxu1 %v11641_v57  ;;  %v11681_v20 = vld [vmem:[#allocation17 + $0x150] ss:$24 sps:$4 sm:$0xff]  }
 0x488   :  { %7171 = vmatprep.subr.bf16.mxu0 %v11644_v5  ;;  %v11684_v57 = vld [vmem:[#allocation17 + $0xd58] ss:$24 sps:$4 sm:$0xff]   ;;  %v11689_v5 = vld [vmem:[#allocation17 + $0x184] ss:$24 sps:$4 sm:$0xff]  }
 0x489   :  { %4482 = vmatmul.mubr.bf16.vlgmr.msra.gmra.mrb[24].mxu1 %v13293_v4  ;;  %v11654_v4 = vld [vmem:[#allocation17 + $0xc68] ss:$24 sps:$4 sm:$0xff]  }
 0x48a   :  { %5686 = vmatmul.mubr.bf16.vlgmr.msra.gmra.mrb[36].mxu0 %v13345_v45  ;;  %4491 = vmatprep.mubr.bf16.mxu1 %v13300_v7  ;;  %v13352_v7 = vpack.c.bf16 %v2666_v33, %v2666_v33  ;;  %v11699_v33 = vld [vmem:[#allocation17 + $0x1e0] ss:$24 sps:$4 sm:$0xff]  }
 0x48b   :  { %5471 = vmatpush1.bf16.msra.mxu1 %v11639_v34  ;;  %5695 = vmatprep.mubr.bf16.mxu0 %v13278_v43  ;;  %v11687_v34 = vld [vmem:[#allocation17 + $0x180] ss:$24 sps:$4 sm:$0xff]  }
 0x48c   :  { %7172 = vmatpush1.bf16.msra.mxu0 %v11642_v3  ;;  %5472 = vmatprep.subr.bf16.mxu1 %v11647_v6  ;;  %v11690_v3 = vld [vmem:[#allocation17 + $0xd88] ss:$24 sps:$4 sm:$0xff]   ;;  %v11695_v6 = vld [vmem:[#allocation17 + $0x1b4] ss:$24 sps:$4 sm:$0xff]  }
 0x48d   :  { %7173 = vmatprep.subr.bf16.mxu0 %v11650_v54  ;;  %v11698_v54 = vld [vmem:[#allocation17 + $0xdbc] ss:$24 sps:$4 sm:$0xff]  }
 0x48f   :  { %5473 = vmatpush1.bf16.msra.mxu1 %v11645_v29  ;;  %v11693_v29 = vld [vmem:[#allocation17 + $0x1b0] ss:$24 sps:$4 sm:$0xff]  }
 0x490   :  { %7174 = vmatpush1.bf16.msra.mxu0 %v11648_v14  ;;  %5474 = vmatprep.subr.bf16.mxu1 %v11653_v35  ;;  %v11696_v14 = vld [vmem:[#allocation17 + $0xdb8] ss:$24 sps:$4 sm:$0xff]   ;;  %v11701_v35 = vld [vmem:[#allocation17 + $0x1e4] ss:$24 sps:$4 sm:$0xff]  }
 0x491   :  { %4492 = vmatmul.mubr.bf16.gmra.mrb[28].mxu1 %v13307_v38  ;;  %7175 = vmatprep.subr.bf16.mxu0 %v11656_v46  ;;  %v2665_v38 = vld [vmem:[#allocation4 + $0x90] sm:$0xf] }
 0x492   :  { %5696 = vmatmul.mubr.bf16.gmra.mrb[40].mxu0 %v13280_v13  ;;  %4501 = vmatprep.mubr.bf16.mxu1 %v13302_v15  ;;  %v13358_v15 = vpack.c.bf16 %v2665_v38, %v2665_v38  ;;  %v11704_v46 = vld [vmem:[#allocation17 + $0xdec] ss:$24 sps:$4 sm:$0xff]   ;;  %v11722_v38 = vld [vmem:[#allocation17 + $0xe7c] ss:$24 sps:$4 sm:$0xff]  }
 0x493   :  { %5475 = vmatpush1.bf16.msra.mxu1 %v11651_v19  ;;  %5705 = vmatprep.mubr.bf16.mxu0 %v13352_v7  ;;  %v11702_v19 = vld [vmem:[#allocation17 + $0xde8] ss:$24 sps:$4 sm:$0xff]  }
 0x494   :  { %7176 = vmatpush1.bf16.msra.mxu0 %v11654_v4  ;;  %5476 = vmatprep.subr.bf16.mxu1 %v11659_v42  ;;  %v11707_v4 = vld [vmem:[#allocation17 + $0x214] ss:$24 sps:$4 sm:$0xff]  }
 0x495   :  { %7177 = vmatprep.subr.bf16.mxu0 %v11662_v27  ;;  %v11710_v42 = vld [vmem:[#allocation17 + $0xe1c] ss:$24 sps:$4 sm:$0xff]   ;;  %v11705_v27 = vld [vmem:[#allocation17 + $0x210] ss:$24 sps:$4 sm:$0xff]  }
 0x497   :  { %5477 = vmatpush1.bf16.msra.mxu1 %v11657_v53  ;;  %v11713_v53 = vld [vmem:[#allocation17 + $0x244] ss:$24 sps:$4 sm:$0xff]  }
 0x498   :  { %7178 = vmatpush1.bf16.msra.mxu0 %v11660_v44  ;;  %5478 = vmatprep.subr.bf16.mxu1 %v11665_v0  ;;  %v11716_v44 = vld [vmem:[#allocation17 + $0xe4c] ss:$24 sps:$4 sm:$0xff]   ;;  %v11711_v0 = vld [vmem:[#allocation17 + $0x240] ss:$24 sps:$4 sm:$0xff]  }
 0x499   :  { %4502 = vmatmul.mubr.bf16.gmra.mrb[32].mxu1 %v13313_v40  ;;  %7179 = vmatprep.subr.bf16.mxu0 %v11668_v12  ;;  %v11680_v40 = vld [vmem:[#allocation17 + $0xd2c] ss:$24 sps:$4 sm:$0xff]   ;;  %v11717_v12 = vld [vmem:[#allocation17 + $0x270] ss:$24 sps:$4 sm:$0xff]  }
 0x49a   :  { %5706 = vmatmul.mubr.bf16.gmra.mrb[44].mxu0 %v13358_v15  ;;  %5502 = vmatprep.mubr.bf16.mxu1 %v13316_v32 }
 0x49b   :  { %5479 = vmatpush1.bf16.msra.mxu1 %v11663_v17  ;;  %7203 = vmatprep.mubr.bf16.mxu0 %v13366_v9  ;;  %v11720_v17 = vld [vmem:[#allocation17 + $0xe78] ss:$24 sps:$4 sm:$0xff]  }
 0x49c   :  { %7180 = vmatpush1.bf16.msra.mxu0 %v11666_v21  ;;  %5480 = vmatprep.subr.bf16.mxu1 %v11671_v56  ;;  %v11725_v21 = vld [vmem:[#allocation17 + $0x2a4] ss:$24 sps:$4 sm:$0xff]   ;;  %v11723_v56 = vld [vmem:[#allocation17 + $0x2a0] ss:$24 sps:$4 sm:$0xff]  }
 0x49d   :  { %7181 = vmatprep.subr.bf16.mxu0 %v11674_v30  ;;  %v11726_v30 = vld [vmem:[#allocation17 + $0xea8] ss:$24 sps:$4 sm:$0xff]  }
 0x49f   :  { %5481 = vmatpush1.bf16.msra.mxu1 %v11669_v61  ;;  %v11731_v61 = vld [vmem:[#allocation17 + $0x2d4] ss:$24 sps:$4 sm:$0xff]  }
 0x4a0   :  { %7182 = vmatpush1.bf16.msra.mxu0 %v11672_v28  ;;  %5482 = vmatprep.subr.bf16.mxu1 %v11677_v22  ;;  %v5841_v28 = vld [vmem:[#allocation4 + $0x88] sm:$0x3f]  ;;  %v11734_v22 = vld [vmem:[#allocation17 + $0xedc] ss:$24 sps:$4 sm:$0xff]  }
 0x4a1   :  { %7183 = vmatprep.subr.bf16.mxu0 %v11680_v40  ;;  %v5836_v40 = vld [vmem:[#allocation4] sm:$0xfc] }
 0x4a3   :  { %5483 = vmatpush1.bf16.msra.mxu1 %v11675_v25  ;;  %v11729_v25 = vld [vmem:[#allocation17 + $0x2d0] ss:$24 sps:$4 sm:$0xff]  }
 0x4a4   :  { %7184 = vmatpush1.bf16.msra.mxu0 %v11678_v50  ;;  %5484 = vmatprep.subr.bf16.mxu1 %v11683_v36  ;;  %v5849_v50 = vpack.c.bf16 %v5841_v28, %v5841_v28  ;;  %v11732_v36 = vld [vmem:[#allocation17 + $0xed8] ss:$24 sps:$4 sm:$0xff]  }
 0x4a5   :  { %7185 = vmatprep.subr.bf16.mxu0 %v11686_v11  ;;  %v11737_v11 = vld [vmem:[#allocation17 + $0x304] ss:$24 sps:$4 sm:$0xff]   ;;  %v11759_v28 = vld [vmem:[#allocation17 + $0x3c0] ss:$24 sps:$4 sm:$0xff]  }
 0x4a7   :  { %5485 = vmatpush1.bf16.msra.mxu1 %v11681_v20  ;;  %v12152_v20 = vld [vmem:[#allocation4 + $0x20] sm:$0xff] }
 0x4a8   :  { %7186 = vmatpush1.bf16.msra.mxu0 %v11684_v57  ;;  %5486 = vmatprep.subr.bf16.mxu1 %v11689_v5  ;;  %v5844_v57 = vpack.c.bf16 %v12152_v20, %v5836_v40  ;;  %v11740_v5 = vld [vmem:[#allocation17 + $0xf0c] ss:$24 sps:$4 sm:$0xff]   ;;  %v11768_v20 = vld [vmem:[#allocation17 + $0xff8] ss:$24 sps:$4 sm:$0xff]  }
 0x4a9   :  { %7187 = vmatprep.subr.bf16.mxu0 %v11692_v49  ;;  %v6058_v49 = vrot.slane %v13176_v41, 1 }
 0x4ab   :  { %5487 = vmatpush1.bf16.msra.mxu1 %v11687_v34  ;;  %v13370_v34 = vrot.slane %v5849_v50, 1  ;;  %v11770_v50 = vld [vmem:[#allocation17 + $0xffc] ss:$24 sps:$4 sm:$0xff]  }
 0x4ac   :  { %7188 = vmatpush1.bf16.msra.mxu0 %v11690_v3  ;;  %5488 = vmatprep.subr.bf16.mxu1 %v11695_v6  ;;  %v5840_v3 = vld [vmem:[#allocation4 + $0x80] sm:$0x3f] }
 0x4ad   :  { %7189 = vmatprep.subr.bf16.mxu0 %v11698_v54  ;;  %v11735_v6 = vld [vmem:[#allocation17 + $0x300] ss:$24 sps:$4 sm:$0xff]   ;;  %v6057_v54 = vrot.slane %v5844_v57, 1  ;;  %v11773_v57 = vld [vmem:[#allocation17 + $0x424] ss:$24 sps:$4 sm:$0xff]  }
 0x4af   :  { %5489 = vmatpush1.bf16.msra.mxu1 %v11693_v29  ;;  %v11738_v29 = vld [vmem:[#allocation17 + $0xf08] ss:$24 sps:$4 sm:$0xff]  }
 0x4b0   :  { %7190 = vmatpush1.bf16.msra.mxu0 %v11696_v14  ;;  %5490 = vmatprep.subr.bf16.mxu1 %v11701_v35  ;;  %v11743_v14 = vld [vmem:[#allocation17 + $0x334] ss:$24 sps:$4 sm:$0xff]   ;;  %v13374_v35 = vsel %vm1941_vm6, %v6057_v54, %v6058_v49 }
 0x4b1   :  { %7191 = vmatprep.subr.bf16.mxu0 %v11704_v46  ;;  %v11746_v46 = vld [vmem:[#allocation17 + $0xf3c] ss:$24 sps:$4 sm:$0xff]  }
 0x4b2   :  { %v11782_v54 = vld [vmem:[#allocation17 + $0x105c] ss:$24 sps:$4 sm:$0xff]  }
 0x4b3   :  { %5491 = vmatpush1.bf16.msra.mxu1 %v11699_v33  ;;  %v5848_v33 = vpack.c.bf16 %v5840_v3, %v5840_v3  ;;  %v11774_v3 = vld [vmem:[#allocation17 + $0x1028] ss:$24 sps:$4 sm:$0xff]  }
 0x4b4   :  { %7192 = vmatpush1.bf16.msra.mxu0 %v11702_v19  ;;  %5492 = vmatprep.subr.bf16.mxu1 %v11707_v4  ;;  %v13382_v19 = vsel %vm1941_vm6, %v6061_v16, %v13370_v34  ;;  %v11741_v4 = vld [vmem:[#allocation17 + $0x330] ss:$24 sps:$4 sm:$0xff]  }
 0x4b5   :  { %7193 = vmatprep.subr.bf16.mxu0 %v11710_v42  ;;  %v11744_v42 = vld [vmem:[#allocation17 + $0xf38] ss:$24 sps:$4 sm:$0xff]  }
 0x4b7   :  { %5493 = vmatpush1.bf16.msra.mxu1 %v11705_v27  ;;  %v11749_v27 = vld [vmem:[#allocation17 + $0x364] ss:$24 sps:$4 sm:$0xff]  }
 0x4b8   :  { %7194 = vmatpush1.bf16.msra.mxu0 %v11708_v48  ;;  %5494 = vmatprep.subr.bf16.mxu1 %v11713_v53  ;;  %v13385_v48 = vrot.slane %v5848_v33, 1  ;;  %v11752_v53 = vld [vmem:[#allocation17 + $0xf6c] ss:$24 sps:$4 sm:$0xff]  }
 0x4b9   :  { %7195 = vmatprep.subr.bf16.mxu0 %v11716_v44  ;;  %v11747_v44 = vld [vmem:[#allocation17 + $0x360] ss:$24 sps:$4 sm:$0xff]   ;;  %v11788_v33 = vld [vmem:[#allocation17 + $0x108c] ss:$24 sps:$4 sm:$0xff]  }
 0x4ba   :  { %v13390_v16 = vsel %vm1941_vm6, %v6058_v49, %v13385_v48  ;;  %v11771_v49 = vld [vmem:[#allocation17 + $0x420] ss:$24 sps:$4 sm:$0xff]  }
 0x4bb   :  { %5495 = vmatpush1.bf16.msra.mxu1 %v11711_v0  ;;  %v11750_v0 = vld [vmem:[#allocation17 + $0xf68] ss:$24 sps:$4 sm:$0xff]  }
 0x4bc   :  { %7196 = vmatpush1.bf16.msra.mxu0 %v11714_v2  ;;  %5496 = vmatprep.subr.bf16.mxu1 %v11719_v55  ;;  %v11755_v2 = vld [vmem:[#allocation17 + $0x394] ss:$24 sps:$4 sm:$0xff]  }
 0x4bd   :  { %7197 = vmatprep.subr.bf16.mxu0 %v11722_v38  ;;  %v11758_v55 = vld [vmem:[#allocation17 + $0xf9c] ss:$24 sps:$4 sm:$0xff]  }
 0x4be   :  { %v5839_v38 = vld [vmem:[#allocation4 + $0x18] sm:$0xfc] }
 0x4bf   :  { %5497 = vmatpush1.bf16.msra.mxu1 %v11717_v12  ;;  %v11753_v12 = vld [vmem:[#allocation17 + $0x390] ss:$24 sps:$4 sm:$0xff]  }
 0x4c0   :  { %7198 = vmatpush1.bf16.msra.mxu0 %v11720_v17  ;;  %5498 = vmatprep.subr.bf16.mxu1 %v11725_v21  ;;  %v11756_v17 = vld [vmem:[#allocation17 + $0xf98] ss:$24 sps:$4 sm:$0xff]   ;;  %v11761_v21 = vld [vmem:[#allocation17 + $0x3c4] ss:$24 sps:$4 sm:$0xff]  }
 0x4c1   :  { %7199 = vmatprep.subr.bf16.mxu0 %v11728_v23  ;;  %v12153_v23 = vld [vmem:[#allocation4 + $0x38] sm:$0xff] }
 0x4c3   :  { %5499 = vmatpush1.bf16.msra.mxu1 %v11723_v56  ;;  %v5847_v56 = vpack.c.bf16 %v12153_v23, %v5839_v38  ;;  %v11795_v38 = vld [vmem:[#allocation17 + $0x4e0] ss:$24 sps:$4 sm:$0xff]   ;;  %v11801_v23 = vld [vmem:[#allocation17 + $0x510] ss:$24 sps:$4 sm:$0xff]  }
 0x4c4   :  { %7200 = vmatpush1.bf16.msra.mxu0 %v11726_v30  ;;  %5500 = vmatprep.subr.bf16.mxu1 %v11731_v61  ;;  %v11764_v30 = vld [vmem:[#allocation17 + $0xfcc] ss:$24 sps:$4 sm:$0xff]   ;;  %v6067_v61 = vrot.slane %v13278_v43, 1 }
 0x4c5   :  { %7201 = vmatprep.subr.bf16.mxu0 %v11734_v22  ;;  %v11762_v22 = vld [vmem:[#allocation17 + $0xfc8] ss:$24 sps:$4 sm:$0xff]   ;;  %v6066_v40 = vrot.slane %v5847_v56, 1  ;;  %v11804_v56 = vld [vmem:[#allocation17 + $0x1118] ss:$24 sps:$4 sm:$0xff]  }
 0x4c7   :  { %5501 = vmatpush1.bf16.msra.mxu1 %v11729_v25  ;;  %v11767_v25 = vld [vmem:[#allocation17 + $0x3f4] ss:$24 sps:$4 sm:$0xff]  }
 0x4c8   :  { %7202 = vmatpush1.bf16.msra.mxu0 %v11732_v36  ;;  %5531 = vmatprep.subr.bf16.mxu1 %v11737_v11  ;;  %v13402_v36 = vsel %vm1941_vm6, %v6066_v40, %v6067_v61  ;;  %v11765_v11 = vld [vmem:[#allocation17 + $0x3f0] ss:$24 sps:$4 sm:$0xff]  }
 0x4c9   :  { %7232 = vmatprep.subr.bf16.mxu0 %v11740_v5  ;;  %v11776_v5 = vld [vmem:[#allocation17 + $0x102c] ss:$24 sps:$4 sm:$0xff]   ;;  %v11810_v40 = vld [vmem:[#allocation17 + $0x1148] ss:$24 sps:$4 sm:$0xff]  }
 0x4ca   :  { %5503 = vmatmul.mubr.bf16.vlgmr.msra.gmra.mrb[12].mxu1 %v13323_v8 }
 0x4cb   :  { %7204 = vmatmul.mubr.bf16.vlgmr.msra.gmra.mrb[36].mxu0 %v13374_v35  ;;  %5512 = vmatprep.mubr.bf16.mxu1 %v13174_v37 }
 0x4cc   :  { %5532 = vmatpush1.bf16.msra.mxu1 %v11735_v6  ;;  %7213 = vmatprep.mubr.bf16.mxu0 %v13382_v19  ;;  %v11779_v6 = vld [vmem:[#allocation17 + $0x454] ss:$24 sps:$4 sm:$0xff]  }
 0x4cd   :  { %7233 = vmatpush1.bf16.msra.mxu0 %v11738_v29  ;;  %5533 = vmatprep.subr.bf16.mxu1 %v11743_v14  ;;  %v11777_v29 = vld [vmem:[#allocation17 + $0x450] ss:$24 sps:$4 sm:$0xff]  }
 0x4ce   :  { %7234 = vmatprep.subr.bf16.mxu0 %v11746_v46  ;;  %v11780_v14 = vld [vmem:[#allocation17 + $0x1058] ss:$24 sps:$4 sm:$0xff]   ;;  %v11785_v46 = vld [vmem:[#allocation17 + $0x484] ss:$24 sps:$4 sm:$0xff]  }
 0x4d0   :  { %5534 = vmatpush1.bf16.msra.mxu1 %v11741_v4  ;;  %v11783_v4 = vld [vmem:[#allocation17 + $0x480] ss:$24 sps:$4 sm:$0xff]  }
 0x4d1   :  { %7235 = vmatpush1.bf16.msra.mxu0 %v11744_v42  ;;  %5535 = vmatprep.subr.bf16.mxu1 %v11749_v27  ;;  %v11786_v42 = vld [vmem:[#allocation17 + $0x1088] ss:$24 sps:$4 sm:$0xff]   ;;  %v11791_v27 = vld [vmem:[#allocation17 + $0x4b4] ss:$24 sps:$4 sm:$0xff]  }
 0x4d2   :  { %5513 = vmatmul.mubr.bf16.gmra.mrb[16].mxu1 %v13176_v41  ;;  %7236 = vmatprep.subr.bf16.mxu0 %v11752_v53  ;;  %v11794_v53 = vld [vmem:[#allocation17 + $0x10bc] ss:$24 sps:$4 sm:$0xff]  }
 0x4d3   :  { %7214 = vmatmul.mubr.bf16.gmra.mrb[40].mxu0 %v13390_v16  ;;  %5522 = vmatprep.mubr.bf16.mxu1 %v13331_v63 }
 0x4d4   :  { %5536 = vmatpush1.bf16.msra.mxu1 %v11747_v44  ;;  %7223 = vmatprep.mubr.bf16.mxu0 %v13370_v34  ;;  %v11789_v44 = vld [vmem:[#allocation17 + $0x4b0] ss:$24 sps:$4 sm:$0xff]  }
 0x4d5   :  { %7237 = vmatpush1.bf16.msra.mxu0 %v11750_v0  ;;  %5537 = vmatprep.subr.bf16.mxu1 %v11755_v2  ;;  %v11792_v0 = vld [vmem:[#allocation17 + $0x10b8] ss:$24 sps:$4 sm:$0xff]   ;;  %v11797_v2 = vld [vmem:[#allocation17 + $0x4e4] ss:$24 sps:$4 sm:$0xff]  }
 0x4d6   :  { %7238 = vmatprep.subr.bf16.mxu0 %v11758_v55  ;;  %v11800_v55 = vld [vmem:[#allocation17 + $0x10ec] ss:$24 sps:$4 sm:$0xff]  }
 0x4d8   :  { %5538 = vmatpush1.bf16.msra.mxu1 %v11753_v12  ;;  %v11798_v12 = vld [vmem:[#allocation17 + $0x10e8] ss:$24 sps:$4 sm:$0xff]  }
 0x4d9   :  { %7239 = vmatpush1.bf16.msra.mxu0 %v11756_v17  ;;  %5539 = vmatprep.subr.bf16.mxu1 %v11761_v21  ;;  %v11803_v17 = vld [vmem:[#allocation17 + $0x514] ss:$24 sps:$4 sm:$0xff]  }
 0x4da   :  { %5523 = vmatmul.mubr.bf16.gmra.mrb[20].mxu1 %v13335_v59  ;;  %7240 = vmatprep.subr.bf16.mxu0 %v11764_v30  ;;  %v11806_v21 = vld [vmem:[#allocation17 + $0x111c] ss:$24 sps:$4 sm:$0xff]  }
 0x4db   :  { %7224 = vmatmul.mubr.bf16.gmra.mrb[44].mxu0 %v13385_v48  ;;  %5563 = vmatprep.mubr.bf16.mxu1 %v13340_v47  ;;  %v11809_v30 = vld [vmem:[#allocation17 + $0x544] ss:$24 sps:$4 sm:$0xff]  }
 0x4dc   :  { %5540 = vmatpush1.bf16.msra.mxu1 %v11759_v28  ;;  %7264 = vmatprep.mubr.bf16.mxu0 %v13402_v36  ;;  %v11812_v28 = vld [vmem:[#allocation17 + $0x114c] ss:$24 sps:$4 sm:$0xff]  }
 0x4dd   :  { %7241 = vmatpush1.bf16.msra.mxu0 %v11762_v22  ;;  %5541 = vmatprep.subr.bf16.mxu1 %v11767_v25  ;;  %v11807_v22 = vld [vmem:[#allocation17 + $0x540] ss:$24 sps:$4 sm:$0xff]   ;;  %v11815_v25 = vld [vmem:[#allocation17 + $0x574] ss:$24 sps:$4 sm:$0xff]  }
 0x4de   :  { %7242 = vmatprep.subr.bf16.mxu0 %v11770_v50  ;;  %v11818_v50 = vld [vmem:[#allocation17 + $0x117c] ss:$24 sps:$4 sm:$0xff]  }
 0x4e0   :  { %5542 = vmatpush1.bf16.msra.mxu1 %v11765_v11  ;;  %v11813_v11 = vld [vmem:[#allocation17 + $0x570] ss:$24 sps:$4 sm:$0xff]  }
 0x4e1   :  { %7243 = vmatpush1.bf16.msra.mxu0 %v11768_v20  ;;  %5543 = vmatprep.subr.bf16.mxu1 %v11773_v57  ;;  %v11816_v20 = vld [vmem:[#allocation17 + $0x1178] ss:$24 sps:$4 sm:$0xff]   ;;  %v11821_v57 = vld [vmem:[#allocation17 + $0x5a4] ss:$24 sps:$4 sm:$0xff]  }
 0x4e2   :  { %7244 = vmatprep.subr.bf16.mxu0 %v11776_v5  ;;  %v11824_v5 = vld [vmem:[#allocation17 + $0x11ac] ss:$24 sps:$4 sm:$0xff]  }
 0x4e4   :  { %5544 = vmatpush1.bf16.msra.mxu1 %v11771_v49  ;;  %v11819_v49 = vld [vmem:[#allocation17 + $0x5a0] ss:$24 sps:$4 sm:$0xff]  }
 0x4e5   :  { %7245 = vmatpush1.bf16.msra.mxu0 %v11774_v3  ;;  %5545 = vmatprep.subr.bf16.mxu1 %v11779_v6  ;;  %v11822_v3 = vld [vmem:[#allocation17 + $0x11a8] ss:$24 sps:$4 sm:$0xff]   ;;  %v11827_v6 = vld [vmem:[#allocation17 + $0x5d4] ss:$24 sps:$4 sm:$0xff]  }
 0x4e6   :  { %7246 = vmatprep.subr.bf16.mxu0 %v11782_v54  ;;  %v5843_v54 = vld [vmem:[#allocation4 + $0x98] sm:$0x3f] }
 0x4e8   :  { %5546 = vmatpush1.bf16.msra.mxu1 %v11777_v29  ;;  %v11830_v29 = vld [vmem:[#allocation17 + $0x11dc] ss:$24 sps:$4 sm:$0xff]  }
 0x4e9   :  { %7247 = vmatpush1.bf16.msra.mxu0 %v11780_v14  ;;  %5547 = vmatprep.subr.bf16.mxu1 %v11785_v46  ;;  %v5838_v14 = vld [vmem:[#allocation4 + $0x10] sm:$0xfc] }
 0x4ea   :  { %7248 = vmatprep.subr.bf16.mxu0 %v11788_v33  ;;  %v11825_v46 = vld [vmem:[#allocation17 + $0x5d0] ss:$24 sps:$4 sm:$0xff]   ;;  %v5851_v33 = vpack.c.bf16 %v5843_v54, %v5843_v54  ;;  %v11857_v54 = vld [vmem:[#allocation17 + $0x194] ss:$24 sps:$4 sm:$0xff]  }
 0x4ec   :  { %5548 = vmatpush1.bf16.msra.mxu1 %v11783_v4  ;;  %v11828_v4 = vld [vmem:[#allocation17 + $0x11d8] ss:$24 sps:$4 sm:$0xff]  }
 0x4ed   :  { %7249 = vmatpush1.bf16.msra.mxu0 %v11786_v42  ;;  %5549 = vmatprep.subr.bf16.mxu1 %v11791_v27  ;;  %v11833_v42 = vld [vmem:[#allocation17 + $0x14] ss:$24 sps:$4 sm:$0xff]  }
 0x4ee   :  { %7250 = vmatprep.subr.bf16.mxu0 %v11794_v53  ;;  %v12154_v27 = vld [vmem:[#allocation4 + $0x30] sm:$0xff] }
 0x4ef   :  { %v5846_v53 = vpack.c.bf16 %v12154_v27, %v5838_v14  ;;  %v11860_v14 = vld [vmem:[#allocation17 + $0x1c4] ss:$24 sps:$4 sm:$0xff]   ;;  %v11869_v27 = vld [vmem:[#allocation17 + $0x254] ss:$24 sps:$4 sm:$0xff]  }
 0x4f0   :  { %5550 = vmatpush1.bf16.msra.mxu1 %v11789_v44  ;;  %v6064_v44 = vrot.slane %v13280_v13, 1 }
 0x4f1   :  { %7251 = vmatpush1.bf16.msra.mxu0 %v11792_v0  ;;  %5551 = vmatprep.subr.bf16.mxu1 %v11797_v2  ;;  %v13406_v0 = vrot.slane %v5851_v33, 1  ;;  %v5842_v2 = vld [vmem:[#allocation4 + $0x90] sm:$0x3f] }
 0x4f2   :  { %7252 = vmatprep.subr.bf16.mxu0 %v11800_v55  ;;  %v11831_v55 = vld [vmem:[#allocation17 + $0x10] ss:$24 sps:$4 sm:$0xff]  }
 0x4f3   :  { %v11861_v33 = vld [vmem:[#allocation17 + $0x1f0] ss:$24 sps:$4 sm:$0xff]  }
 0x4f4   :  { %5552 = vmatpush1.bf16.msra.mxu1 %v11795_v38  ;;  %v6063_v38 = vrot.slane %v5846_v53, 1  ;;  %v11867_v53 = vld [vmem:[#allocation17 + $0x250] ss:$24 sps:$4 sm:$0xff]  }
 0x4f5   :  { %7253 = vmatpush1.bf16.msra.mxu0 %v11798_v12  ;;  %5553 = vmatprep.subr.bf16.mxu1 %v11803_v17  ;;  %v11836_v12 = vld [vmem:[#allocation17 + $0x44] ss:$24 sps:$4 sm:$0xff]  }
 0x4f6   :  { %7254 = vmatprep.subr.bf16.mxu0 %v11806_v21  ;;  %v13410_v17 = vsel %vm1941_vm6, %v6063_v38, %v6064_v44  ;;  %v5850_v21 = vpack.c.bf16 %v5842_v2, %v5842_v2  ;;  %v11870_v2 = vld [vmem:[#allocation17 + $0x280] ss:$24 sps:$4 sm:$0xff]   ;;  %v11873_v38 = vld [vmem:[#allocation17 + $0x2b0] ss:$24 sps:$4 sm:$0xff]  }
 0x4f8   :  { %5554 = vmatpush1.bf16.msra.mxu1 %v11801_v23  ;;  %v13418_v23 = vsel %vm1941_vm6, %v6067_v61, %v13406_v0  ;;  %v11840_v61 = vld [vmem:[#allocation17 + $0xa0] ss:$24 sps:$4 sm:$0xff]  }
 0x4f9   :  { %7255 = vmatpush1.bf16.msra.mxu0 %v11804_v56  ;;  %5555 = vmatprep.subr.bf16.mxu1 %v11809_v30  ;;  %v11834_v56 = vld [vmem:[#allocation17 + $0x40] ss:$24 sps:$4 sm:$0xff]   ;;  %v11839_v30 = vld [vmem:[#allocation17 + $0x74] ss:$24 sps:$4 sm:$0xff]  }
 0x4fa   :  { %7256 = vmatprep.subr.bf16.mxu0 %v11812_v28  ;;  %v13421_v28 = vrot.slane %v5850_v21, 1  ;;  %v11876_v21 = vld [vmem:[#allocation17 + $0x2e0] ss:$24 sps:$4 sm:$0xff]  }
 0x4fc   :  { %5556 = vmatpush1.bf16.msra.mxu1 %v11807_v22  ;;  %v11837_v22 = vld [vmem:[#allocation17 + $0x70] ss:$24 sps:$4 sm:$0xff]  }
 0x4fd   :  { %7257 = vmatpush1.bf16.msra.mxu0 %v11810_v40  ;;  %5557 = vmatprep.subr.bf16.mxu1 %v11815_v25  ;;  %v11842_v40 = vld [vmem:[#allocation17 + $0xa4] ss:$24 sps:$4 sm:$0xff]   ;;  %v13426_v25 = vsel %vm1941_vm6, %v6064_v44, %v13421_v28 }
 0x4fe   :  { %7258 = vmatprep.subr.bf16.mxu0 %v11818_v50  ;;  %v11845_v50 = vld [vmem:[#allocation17 + $0xd4] ss:$24 sps:$4 sm:$0xff]   ;;  %v11872_v44 = vld [vmem:[#allocation17 + $0x284] ss:$24 sps:$4 sm:$0xff]  }
 0x500   :  { %5558 = vmatpush1.bf16.msra.mxu1 %v11813_v11  ;;  %v11843_v11 = vld [vmem:[#allocation17 + $0xd0] ss:$24 sps:$4 sm:$0xff]  }
 0x501   :  { %7259 = vmatpush1.bf16.msra.mxu0 %v11816_v20  ;;  %5559 = vmatprep.subr.bf16.mxu1 %v11821_v57  ;;  %v11848_v20 = vld [vmem:[#allocation17 + $0x104] ss:$24 sps:$4 sm:$0xff]   ;;  %v11846_v57 = vld [vmem:[#allocation17 + $0x100] ss:$24 sps:$4 sm:$0xff]  }
 0x502   :  { %7260 = vmatprep.subr.bf16.mxu0 %v11824_v5  ;;  %v11851_v5 = vld [vmem:[#allocation17 + $0x134] ss:$24 sps:$4 sm:$0xff]  }
 0x504   :  { %5560 = vmatpush1.bf16.msra.mxu1 %v11819_v49  ;;  %v11849_v49 = vld [vmem:[#allocation17 + $0x130] ss:$24 sps:$4 sm:$0xff]  }
 0x505   :  { %7261 = vmatpush1.bf16.msra.mxu0 %v11822_v3  ;;  %5561 = vmatprep.subr.bf16.mxu1 %v11827_v6  ;;  %v11854_v3 = vld [vmem:[#allocation17 + $0x164] ss:$24 sps:$4 sm:$0xff]   ;;  %v11852_v6 = vld [vmem:[#allocation17 + $0x160] ss:$24 sps:$4 sm:$0xff]  }
 0x506   :  { %7262 = vmatprep.subr.bf16.mxu0 %v11830_v29  ;;  %v11855_v29 = vld [vmem:[#allocation17 + $0x190] ss:$24 sps:$4 sm:$0xff]  }
 0x508   :  { %5562 = vmatpush1.bf16.msra.mxu1 %v11825_v46  ;;  %v11863_v46 = vld [vmem:[#allocation17 + $0x1f4] ss:$24 sps:$4 sm:$0xff]  }
 0x509   :  { %7263 = vmatpush1.bf16.msra.mxu0 %v11828_v4  ;;  %5714 = vmatprep.subr.bf16.mxu1 %v11833_v42  ;;  %v11866_v4 = vld [vmem:[#allocation17 + $0x224] ss:$24 sps:$4 sm:$0xff]   ;;  %v11864_v42 = vld [vmem:[#allocation17 + $0x220] ss:$24 sps:$4 sm:$0xff]  }
 0x50b   :  { %5564 = vmatmul.mubr.bf16.vlgmr.msra.gmra.mrb[12].mxu1 %v13345_v45 }
 0x50c   :  { %7265 = vmatmul.mubr.bf16.vlgmr.msra.gmra.mrb[36].mxu0 %v13410_v17  ;;  %5573 = vmatprep.mubr.bf16.mxu1 %v13278_v43 }
 0x50d   :  { %5715 = vmatpush1.bf16.msra.mxu1 %v11831_v55  ;;  %7274 = vmatprep.mubr.bf16.mxu0 %v13418_v23  ;;  %v11875_v55 = vld [vmem:[#allocation17 + $0x2b4] ss:$24 sps:$4 sm:$0xff]  }
 0x50e   :  { %5716 = vmatprep.subr.bf16.mxu1 %v11836_v12  ;;  %v11878_v12 = vld [vmem:[#allocation17 + $0x2e4] ss:$24 sps:$4 sm:$0xff]  }
 0x511   :  { %5717 = vmatpush1.bf16.msra.mxu1 %v11834_v56  ;;  %v11881_v56 = vld [vmem:[#allocation17 + $0x314] ss:$24 sps:$4 sm:$0xff]  }
 0x512   :  { %5718 = vmatprep.subr.bf16.mxu1 %v11839_v30  ;;  %v11879_v30 = vld [vmem:[#allocation17 + $0x310] ss:$24 sps:$4 sm:$0xff]  }
 0x513   :  { %5574 = vmatmul.mubr.bf16.gmra.mrb[16].mxu1 %v13280_v13 }
 0x514   :  { %7275 = vmatmul.mubr.bf16.gmra.mrb[40].mxu0 %v13426_v25  ;;  %5583 = vmatprep.mubr.bf16.mxu1 %v13352_v7 }
 0x515   :  { %5719 = vmatpush1.bf16.msra.mxu1 %v11837_v22  ;;  %7284 = vmatprep.mubr.bf16.mxu0 %v13406_v0  ;;  %v11884_v22 = vld [vmem:[#allocation17 + $0x344] ss:$24 sps:$4 sm:$0xff]  }
 0x516   :  { %5720 = vmatprep.subr.bf16.mxu1 %v11842_v40  ;;  %v11882_v40 = vld [vmem:[#allocation17 + $0x340] ss:$24 sps:$4 sm:$0xff]  }
 0x519   :  { %5721 = vmatpush1.bf16.msra.mxu1 %v11840_v61  ;;  %v11887_v61 = vld [vmem:[#allocation17 + $0x374] ss:$24 sps:$4 sm:$0xff]  }
 0x51a   :  { %5722 = vmatprep.subr.bf16.mxu1 %v11845_v50  ;;  %v11885_v50 = vld [vmem:[#allocation17 + $0x370] ss:$24 sps:$4 sm:$0xff]  }
 0x51b   :  { %5584 = vmatmul.mubr.bf16.gmra.mrb[20].mxu1 %v13358_v15 }
 0x51c   :  { %7285 = vmatmul.mubr.bf16.gmra.mrb[44].mxu0 %v13421_v28  ;;  %5746 = vmatprep.mubr.bf16.mxu1 %v13316_v32  ;;  %v11858_v32 = vld [vmem:[#allocation17 + $0x1c0] ss:$24 sps:$4 sm:$0xff]  }
 0x51d   :  { %5723 = vmatpush1.bf16.msra.mxu1 %v11843_v11  ;;  %7717 = vmatprep.mubr.f32.mxu0 %v12548_v1  ;;  %v11890_v11 = vld [vmem:[#allocation17 + $0x3a4] ss:$24 sps:$4 sm:$0xff]  }
 0x51e   :  { %5724 = vmatprep.subr.bf16.mxu1 %v11848_v20  ;;  %v11888_v20 = vld [vmem:[#allocation17 + $0x3a0] ss:$24 sps:$4 sm:$0xff]  }
 0x521   :  { %5725 = vmatpush1.bf16.msra.mxu1 %v11846_v57  ;;  %v11893_v57 = vld [vmem:[#allocation17 + $0x3d4] ss:$24 sps:$4 sm:$0xff]  }
 0x522   :  { %5726 = vmatprep.subr.bf16.mxu1 %v11851_v5  ;;  %v11894_v5 = vld [vmem:[#allocation17 + $0x400] ss:$24 sps:$4 sm:$0xff]  }
 0x525   :  { %5727 = vmatpush1.bf16.msra.mxu1 %v11849_v49  ;;  %v11899_v49 = vld [vmem:[#allocation17 + $0x434] ss:$24 sps:$4 sm:$0xff]  }
 0x526   :  { %5728 = vmatprep.subr.bf16.mxu1 %v11854_v3  ;;  %v11900_v3 = vld [vmem:[#allocation17 + $0x460] ss:$24 sps:$4 sm:$0xff]  }
 0x529   :  { %5729 = vmatpush1.bf16.msra.mxu1 %v11852_v6  ;;  %v11905_v6 = vld [vmem:[#allocation17 + $0x494] ss:$24 sps:$4 sm:$0xff]  }
 0x52a   :  { %5730 = vmatprep.subr.bf16.mxu1 %v11857_v54  ;;  %v11903_v54 = vld [vmem:[#allocation17 + $0x490] ss:$24 sps:$4 sm:$0xff]  }
 0x52d   :  { %5731 = vmatpush1.bf16.msra.mxu1 %v11855_v29  ;;  %v11908_v29 = vld [vmem:[#allocation17 + $0x4c4] ss:$24 sps:$4 sm:$0xff]  }
 0x52e   :  { %5732 = vmatprep.subr.bf16.mxu1 %v11860_v14  ;;  %v11911_v14 = vld [vmem:[#allocation17 + $0x4f4] ss:$24 sps:$4 sm:$0xff]  }
 0x531   :  { %5733 = vmatpush1.bf16.msra.mxu1 %v11858_v32  ;;  %v11914_v32 = vld [vmem:[#allocation17 + $0x524] ss:$24 sps:$4 sm:$0xff]  }
 0x532   :  { %5734 = vmatprep.subr.bf16.mxu1 %v11863_v46  ;;  %v11912_v46 = vld [vmem:[#allocation17 + $0x520] ss:$24 sps:$4 sm:$0xff]  }
 0x535   :  { %5735 = vmatpush1.bf16.msra.mxu1 %v11861_v33  ;;  %v11917_v33 = vld [vmem:[#allocation17 + $0x554] ss:$24 sps:$4 sm:$0xff]  }
 0x536   :  { %5736 = vmatprep.subr.bf16.mxu1 %v11866_v4  ;;  %v11915_v4 = vld [vmem:[#allocation17 + $0x550] ss:$24 sps:$4 sm:$0xff]  }
 0x539   :  { %5737 = vmatpush1.bf16.msra.mxu1 %v11864_v42  ;;  %v11920_v42 = vld [vmem:[#allocation17 + $0x584] ss:$24 sps:$4 sm:$0xff]  }
 0x53a   :  { %5738 = vmatprep.subr.bf16.mxu1 %v11869_v27  ;;  %v11918_v27 = vld [vmem:[#allocation17 + $0x580] ss:$24 sps:$4 sm:$0xff]  }
 0x53d   :  { %5739 = vmatpush1.bf16.msra.mxu1 %v11867_v53  ;;  %v11923_v53 = vld [vmem:[#allocation17 + $0x5b4] ss:$24 sps:$4 sm:$0xff]  }
 0x53e   :  { %5740 = vmatprep.subr.bf16.mxu1 %v11872_v44  ;;  %v11921_v44 = vld [vmem:[#allocation17 + $0x5b0] ss:$24 sps:$4 sm:$0xff]  }
 0x541   :  { %5741 = vmatpush1.bf16.msra.mxu1 %v11870_v2  ;;  %v11926_v2 = vld [vmem:[#allocation17 + $0x5e4] ss:$24 sps:$4 sm:$0xff]  }
 0x542   :  { %5742 = vmatprep.subr.bf16.mxu1 %v11875_v55  ;;  %v11924_v55 = vld [vmem:[#allocation17 + $0x5e0] ss:$24 sps:$4 sm:$0xff]  }
 0x545   :  { %5743 = vmatpush1.bf16.msra.mxu1 %v11873_v38  ;;  %v11929_v38 = vld [vmem:[#allocation17 + $0xc04] ss:$24 sps:$4 sm:$0xff]  }
 0x546   :  { %5744 = vmatprep.subr.bf16.mxu1 %v11878_v12  ;;  %v11927_v12 = vld [vmem:[#allocation17 + $0xc00] ss:$24 sps:$4 sm:$0xff]  }
 0x549   :  { %5745 = vmatpush1.bf16.msra.mxu1 %v11876_v21  ;;  %v11932_v21 = vld [vmem:[#allocation17 + $0xc34] ss:$24 sps:$4 sm:$0xff]  }
 0x54a   :  { %5775 = vmatprep.subr.bf16.mxu1 %v11881_v56  ;;  %v11930_v56 = vld [vmem:[#allocation17 + $0xc30] ss:$24 sps:$4 sm:$0xff]  }
 0x54c   :  { %5747 = vmatmul.mubr.bf16.vlgmr.msra.gmra.mrb[24].mxu1 %v13323_v8  ;;  %v11891_v8 = vld [vmem:[#allocation17 + $0x3d0] ss:$24 sps:$4 sm:$0xff]  }
 0x54d   :  { %5756 = vmatprep.mubr.bf16.mxu1 %v13174_v37  ;;  %5776 = vmatpush1.bf16.msra.mxu1 %v11879_v30  ;;  %v11896_v37 = vld [vmem:[#allocation17 + $0x404] ss:$24 sps:$4 sm:$0xff]  }
 0x54e   :  { %5777 = vmatprep.subr.bf16.mxu1 %v11884_v22  ;;  %v11935_v30 = vld [vmem:[#allocation17 + $0xc64] ss:$24 sps:$4 sm:$0xff]   ;;  %v11933_v22 = vld [vmem:[#allocation17 + $0xc60] ss:$24 sps:$4 sm:$0xff]  }
 0x551   :  { %5778 = vmatpush1.bf16.msra.mxu1 %v11882_v40  ;;  %v11938_v40 = vld [vmem:[#allocation17 + $0xc94] ss:$24 sps:$4 sm:$0xff]  }
 0x552   :  { %5779 = vmatprep.subr.bf16.mxu1 %v11887_v61  ;;  %v11936_v61 = vld [vmem:[#allocation17 + $0xc90] ss:$24 sps:$4 sm:$0xff]  }
 0x554   :  { %5757 = vmatmul.mubr.bf16.gmra.mrb[28].mxu1 %v13176_v41  ;;  %v11897_v41 = vld [vmem:[#allocation17 + $0x430] ss:$24 sps:$4 sm:$0xff]  }
 0x555   :  { %5766 = vmatprep.mubr.bf16.mxu1 %v13331_v63  ;;  %5780 = vmatpush1.bf16.msra.mxu1 %v11885_v50  ;;  %v11902_v63 = vld [vmem:[#allocation17 + $0x464] ss:$24 sps:$4 sm:$0xff]  }
 0x556   :  { %5781 = vmatprep.subr.bf16.mxu1 %v11890_v11  ;;  %v11941_v50 = vld [vmem:[#allocation17 + $0xcc4] ss:$24 sps:$4 sm:$0xff]   ;;  %v11942_v11 = vld [vmem:[#allocation17 + $0xcf0] ss:$24 sps:$4 sm:$0xff]  }
 0x559   :  { %5782 = vmatpush1.bf16.msra.mxu1 %v11888_v20  ;;  %v11947_v20 = vld [vmem:[#allocation17 + $0xd24] ss:$24 sps:$4 sm:$0xff]  }
 0x55a   :  { %5783 = vmatprep.subr.bf16.mxu1 %v11893_v57  ;;  %v11948_v57 = vld [vmem:[#allocation17 + $0xd50] ss:$24 sps:$4 sm:$0xff]  }
 0x55c   :  { %5767 = vmatmul.mubr.bf16.gmra.mrb[32].mxu1 %v13335_v59  ;;  %v11906_v59 = vld [vmem:[#allocation17 + $0x4c0] ss:$24 sps:$4 sm:$0xff]  }
 0x55d   :  { %5784 = vmatpush1.bf16.msra.mxu1 %v11891_v8  ;;  %5807 = vmatprep.mubr.bf16.mxu1 %v13340_v47  ;;  %v11909_v47 = vld [vmem:[#allocation17 + $0x4f0] ss:$24 sps:$4 sm:$0xff]   ;;  %v11953_v8 = vld [vmem:[#allocation17 + $0xd84] ss:$24 sps:$4 sm:$0xff]  }
 0x55e   :  { %5785 = vmatprep.subr.bf16.mxu1 %v11896_v37  ;;  %v11951_v37 = vld [vmem:[#allocation17 + $0xd80] ss:$24 sps:$4 sm:$0xff]  }
 0x561   :  { %5786 = vmatpush1.bf16.msra.mxu1 %v11894_v5  ;;  %v11956_v5 = vld [vmem:[#allocation17 + $0xdb4] ss:$24 sps:$4 sm:$0xff]  }
 0x562   :  { %5787 = vmatprep.subr.bf16.mxu1 %v11899_v49  ;;  %v11959_v49 = vld [vmem:[#allocation17 + $0xde4] ss:$24 sps:$4 sm:$0xff]  }
 0x565   :  { %5788 = vmatpush1.bf16.msra.mxu1 %v11897_v41  ;;  %v11957_v41 = vld [vmem:[#allocation17 + $0xde0] ss:$24 sps:$4 sm:$0xff]  }
 0x566   :  { %5789 = vmatprep.subr.bf16.mxu1 %v11902_v63  ;;  %v11962_v63 = vld [vmem:[#allocation17 + $0xe14] ss:$24 sps:$4 sm:$0xff]  }
 0x569   :  { %5790 = vmatpush1.bf16.msra.mxu1 %v11900_v3  ;;  %v11960_v3 = vld [vmem:[#allocation17 + $0xe10] ss:$24 sps:$4 sm:$0xff]  }
 0x56a   :  { %5791 = vmatprep.subr.bf16.mxu1 %v11905_v6  ;;  %v11965_v6 = vld [vmem:[#allocation17 + $0xe44] ss:$24 sps:$4 sm:$0xff]  }
 0x56d   :  { %5792 = vmatpush1.bf16.msra.mxu1 %v11903_v54  ;;  %v11963_v54 = vld [vmem:[#allocation17 + $0xe40] ss:$24 sps:$4 sm:$0xff]  }
 0x56e   :  { %5793 = vmatprep.subr.bf16.mxu1 %v11908_v29  ;;  %v11968_v29 = vld [vmem:[#allocation17 + $0xe74] ss:$24 sps:$4 sm:$0xff]  }
 0x571   :  { %5794 = vmatpush1.bf16.msra.mxu1 %v11906_v59  ;;  %v11966_v59 = vld [vmem:[#allocation17 + $0xe70] ss:$24 sps:$4 sm:$0xff]  }
 0x572   :  { %5795 = vmatprep.subr.bf16.mxu1 %v11911_v14  ;;  %v11971_v14 = vld [vmem:[#allocation17 + $0xea4] ss:$24 sps:$4 sm:$0xff]  }
 0x575   :  { %5796 = vmatpush1.bf16.msra.mxu1 %v11909_v47  ;;  %v11969_v47 = vld [vmem:[#allocation17 + $0xea0] ss:$24 sps:$4 sm:$0xff]  }
 0x576   :  { %5797 = vmatprep.subr.bf16.mxu1 %v11914_v32  ;;  %v11974_v32 = vld [vmem:[#allocation17 + $0xed4] ss:$24 sps:$4 sm:$0xff]  }
 0x579   :  { %5798 = vmatpush1.bf16.msra.mxu1 %v11912_v46  ;;  %v11972_v46 = vld [vmem:[#allocation17 + $0xed0] ss:$24 sps:$4 sm:$0xff]  }
 0x57a   :  { %5799 = vmatprep.subr.bf16.mxu1 %v11917_v33  ;;  %v11977_v33 = vld [vmem:[#allocation17 + $0xf04] ss:$24 sps:$4 sm:$0xff]  }
 0x57d   :  { %5800 = vmatpush1.bf16.msra.mxu1 %v11915_v4  ;;  %v11975_v4 = vld [vmem:[#allocation17 + $0xf00] ss:$24 sps:$4 sm:$0xff]  }
 0x57e   :  { %5801 = vmatprep.subr.bf16.mxu1 %v11920_v42  ;;  %v11980_v42 = vld [vmem:[#allocation17 + $0xf34] ss:$24 sps:$4 sm:$0xff]  }
 0x581   :  { %5802 = vmatpush1.bf16.msra.mxu1 %v11918_v27  ;;  %v11978_v27 = vld [vmem:[#allocation17 + $0xf30] ss:$24 sps:$4 sm:$0xff]  }
 0x582   :  { %5803 = vmatprep.subr.bf16.mxu1 %v11923_v53  ;;  %v11983_v53 = vld [vmem:[#allocation17 + $0xf64] ss:$24 sps:$4 sm:$0xff]  }
 0x585   :  { %5804 = vmatpush1.bf16.msra.mxu1 %v11921_v44  ;;  %v11981_v44 = vld [vmem:[#allocation17 + $0xf60] ss:$24 sps:$4 sm:$0xff]  }
 0x586   :  { %5805 = vmatprep.subr.bf16.mxu1 %v11926_v2  ;;  %v11986_v2 = vld [vmem:[#allocation17 + $0xf94] ss:$24 sps:$4 sm:$0xff]  }
 0x589   :  { %5806 = vmatpush1.bf16.msra.mxu1 %v11924_v55  ;;  %v11984_v55 = vld [vmem:[#allocation17 + $0xf90] ss:$24 sps:$4 sm:$0xff]  }
 0x58a   :  { %7049 = vmatprep.subr.bf16.mxu1 %v11929_v38  ;;  %v11989_v38 = vld [vmem:[#allocation17 + $0xfc4] ss:$24 sps:$4 sm:$0xff]  }
 0x58c   :  { %5808 = vmatmul.mubr.bf16.vlgmr.msra.gmra.mrb[24].mxu1 %v13345_v45  ;;  %v11939_v45 = vld [vmem:[#allocation17 + $0xcc0] ss:$24 sps:$4 sm:$0xff]  }
 0x58d   :  { %5817 = vmatprep.mubr.bf16.mxu1 %v13278_v43  ;;  %7050 = vmatpush1.bf16.msra.mxu1 %v11927_v12  ;;  %v11944_v43 = vld [vmem:[#allocation17 + $0xcf4] ss:$24 sps:$4 sm:$0xff]   ;;  %v11987_v12 = vld [vmem:[#allocation17 + $0xfc0] ss:$24 sps:$4 sm:$0xff]  }
 0x58e   :  { %7051 = vmatprep.subr.bf16.mxu1 %v11932_v21  ;;  %v11992_v21 = vld [vmem:[#allocation17 + $0xff4] ss:$24 sps:$4 sm:$0xff]  }
 0x591   :  { %7052 = vmatpush1.bf16.msra.mxu1 %v11930_v56  ;;  %v13451_v56 = vld [vmem:[#allocation19] sm:$0x3f] }
 0x592   :  { %7053 = vmatprep.subr.bf16.mxu1 %v11935_v30  ;;  %v13455_v30 = vld [vmem:[#allocation20] sm:$0x3f] }
 0x594   :  { %5818 = vmatmul.mubr.bf16.gmra.mrb[28].mxu1 %v13280_v13  ;;  %v11945_v13 = vld [vmem:[#allocation17 + $0xd20] ss:$24 sps:$4 sm:$0xff]  }
 0x595   :  { %5827 = vmatprep.mubr.bf16.mxu1 %v13352_v7  ;;  %7054 = vmatpush1.bf16.msra.mxu1 %v11933_v22  ;;  %v11950_v7 = vld [vmem:[#allocation17 + $0xd54] ss:$24 sps:$4 sm:$0xff]   ;;  %v11990_v22 = vld [vmem:[#allocation17 + $0xff0] ss:$24 sps:$4 sm:$0xff]  }
 0x596   :  { %7055 = vmatprep.subr.bf16.mxu1 %v11938_v40  ;;  %v13459_v40 = vrot.slane %v13451_v56, %v13214_v18 }
 0x599   :  { %7056 = vmatpush1.bf16.msra.mxu1 %v11936_v61  ;;  %v11995_v61 = vld [vmem:[#allocation17 + $0x1024] ss:$24 sps:$4 sm:$0xff]  }
 0x59a   :  { %7057 = vmatprep.subr.bf16.mxu1 %v11941_v50 }
 0x59c   :  { %5828 = vmatmul.mubr.bf16.gmra.mrb[32].mxu1 %v13358_v15  ;;  %v11954_v15 = vld [vmem:[#allocation17 + $0xdb0] ss:$24 sps:$4 sm:$0xff]  }
 0x59d   :  { %7058 = vmatpush1.bf16.msra.mxu1 %v11939_v45  ;;  %7081 = vmatprep.mubr.bf16.mxu1 %v13366_v9  ;;  %v13463_v45 = vrot.slane %v13451_v56, %v13217_v52 }
 0x59e   :  { %7059 = vmatprep.subr.bf16.mxu1 %v11944_v43 }
 0x5a1   :  { %7060 = vmatpush1.bf16.msra.mxu1 %v11942_v11  ;;  %v13467_v11 = vrot.slane %v13455_v30, %v13214_v18 }
 0x5a2   :  { %7061 = vmatprep.subr.bf16.mxu1 %v11947_v20 }
 0x5a5   :  { %7062 = vmatpush1.bf16.msra.mxu1 %v11945_v13 }
 0x5a6   :  { %7063 = vmatprep.subr.bf16.mxu1 %v11950_v7  ;;  %v13471_v7 = vrot.slane %v13455_v30, %v13217_v52 }
 0x5a9   :  { %7064 = vmatpush1.bf16.msra.mxu1 %v11948_v57 }
 0x5aa   :  { %7065 = vmatprep.subr.bf16.mxu1 %v11953_v8  ;;  %v11993_v8 = vld [vmem:[#allocation17 + $0x1020] ss:$24 sps:$4 sm:$0xff]  }
 0x5ad   :  { %7066 = vmatpush1.bf16.msra.mxu1 %v11951_v37 }
 0x5ae   :  { %7067 = vmatprep.subr.bf16.mxu1 %v11956_v5 }
 0x5b1   :  { %7068 = vmatpush1.bf16.msra.mxu1 %v11954_v15 }
 0x5b2   :  { %7069 = vmatprep.subr.bf16.mxu1 %v11959_v49  ;;  %v11998_v49 = vld [vmem:[#allocation17 + $0x1054] ss:$24 sps:$4 sm:$0xff]  }
 0x5b5   :  { %7070 = vmatpush1.bf16.msra.mxu1 %v11957_v41 }
 0x5b6   :  { %7071 = vmatprep.subr.bf16.mxu1 %v11962_v63 }
 0x5b9   :  { %7072 = vmatpush1.bf16.msra.mxu1 %v11960_v3 }
 0x5ba   :  { %7073 = vmatprep.subr.bf16.mxu1 %v11965_v6 }
 0x5bd   :  { %7074 = vmatpush1.bf16.msra.mxu1 %v11963_v54  ;;  %v11996_v54 = vld [vmem:[#allocation17 + $0x1050] ss:$24 sps:$4 sm:$0xff]  }
 0x5be   :  { %7075 = vmatprep.subr.bf16.mxu1 %v11968_v29 }
 0x5c1   :  { %7076 = vmatpush1.bf16.msra.mxu1 %v11966_v59  ;;  %v12001_v59 = vld [vmem:[#allocation17 + $0x1084] ss:$24 sps:$4 sm:$0xff]  }
 0x5c2   :  { %7077 = vmatprep.subr.bf16.mxu1 %v11971_v14 }
 0x5c5   :  { %7078 = vmatpush1.bf16.msra.mxu1 %v11969_v47 }
 0x5c6   :  { %7079 = vmatprep.subr.bf16.mxu1 %v11974_v32 }
 0x5c9   :  { %7080 = vmatpush1.bf16.msra.mxu1 %v11972_v46 }
 0x5ca   :  { %7110 = vmatprep.subr.bf16.mxu1 %v11977_v33 }
 0x5cc   :  { %7082 = vmatmul.mubr.bf16.vlgmr.msra.gmra.mrb[12].mxu1 %v13374_v35 }
 0x5cd   :  { %7091 = vmatprep.mubr.bf16.mxu1 %v13382_v19  ;;  %7111 = vmatpush1.bf16.msra.mxu1 %v11975_v4 }
 0x5ce   :  { %7112 = vmatprep.subr.bf16.mxu1 %v11980_v42 }
 0x5d1   :  { %7113 = vmatpush1.bf16.msra.mxu1 %v11978_v27 }
 0x5d2   :  { %7114 = vmatprep.subr.bf16.mxu1 %v11983_v53  ;;  %v11999_v53 = vld [vmem:[#allocation17 + $0x1080] ss:$24 sps:$4 sm:$0xff]  }
 0x5d4   :  { %7092 = vmatmul.mubr.bf16.gmra.mrb[16].mxu1 %v13390_v16 }
 0x5d5   :  { %7101 = vmatprep.mubr.bf16.mxu1 %v13370_v34  ;;  %7115 = vmatpush1.bf16.msra.mxu1 %v11981_v44 }
 0x5d6   :  { %7116 = vmatprep.subr.bf16.mxu1 %v11986_v2 }
 0x5d9   :  { %7117 = vmatpush1.bf16.msra.mxu1 %v11984_v55 }
 0x5da   :  { %7118 = vmatprep.subr.bf16.mxu1 %v11989_v38 }
 0x5dc   :  { %7102 = vmatmul.mubr.bf16.gmra.mrb[20].mxu1 %v13385_v48 }
 0x5dd   :  { %7119 = vmatpush1.bf16.msra.mxu1 %v11987_v12  ;;  %7142 = vmatprep.mubr.bf16.mxu1 %v13402_v36 }
 0x5de   :  { %7120 = vmatprep.subr.bf16.mxu1 %v11992_v21  ;;  %v12004_v21 = vld [vmem:[#allocation17 + $0x10b4] ss:$24 sps:$4 sm:$0xff]  }
 0x5df   :  { %v7266_v50 = vpop.f32.mrb[36].mxu0 }
 0x5e0   :  { %v7447_v43 = vmax.f32 %v7266_v50, 0.0  ;;  %v7268_v20 = vpop.f32.mrb[37].mxu0 }
 0x5e1   :  { %v7448_v13 = vmax.f32 %v7268_v20, 0.0  ;;  %7121 = vmatpush1.bf16.msra.mxu1 %v11990_v22  ;;  %v7270_v57 = vpop.f32.mrb[38].mxu0 }
 0x5e2   :  { %v7509_v37 = vmul.f32 %v13459_v40, %v7447_v43  ;;  %v7453_v5 = vmax.f32 %v7270_v57, 0.0  ;;  %v7272_v15 = vpop.f32.mrb[39].mxu0  ;;  %7122 = vmatprep.subr.bf16.mxu1 %v11995_v61 }
 0x5e3   :  { %v7510_v41 = vmul.f32 %v13463_v45, %v7448_v13  ;;  %v7454_v63 = vmax.f32 %v7272_v15, 0.0  ;;  %v12007_v15 = vld [vmem:[#allocation17 + $0x10e4] ss:$24 sps:$4 sm:$0xff]  }
 0x5e4   :  { %v7571_v18 = vadd.f32 %v13467_v11, %v7509_v37  ;;  %v7515_v3 = vmul.f32 %v13459_v40, %v7453_v5  ;;  %v12002_v37 = vld [vmem:[#allocation17 + $0x10b0] ss:$24 sps:$4 sm:$0xff]  }
 0x5e5   :  { %v7572_v6 = vadd.f32 %v13471_v7, %v7510_v41  ;;  %v7516_v52 = vmul.f32 %v13463_v45, %v7454_v63  ;;  %7123 = vmatpush1.bf16.msra.mxu1 %v11993_v8 }
 0x5e6   :  { %v7577_v29 = vadd.f32 %v13467_v11, %v7515_v3  ;;  %7124 = vmatprep.subr.bf16.mxu1 %v11998_v49  ;;  %v13482_v32 = vmul.f32 %v7571_v18, %v12934_v10 }
 0x5e7   :  { %v7578_v14 = vadd.f32 %v13471_v7, %v7516_v52  ;;  %v7276_v47 = vpop.f32.mrb[40].mxu0  ;;  %v13488_v44 = vmul.f32 %v7572_v6, %v12934_v10  ;;  %v12005_v52 = vld [vmem:[#allocation17 + $0x10e0] ss:$24 sps:$4 sm:$0xff]  }
 0x5e8   :  { %v13485_v46 = vmul.f32 %v7577_v29, %v12945_v24  ;;  %v7459_v33 = vmax.f32 %v7276_v47, 0.0  ;;  %v7278_v4 = vpop.f32.mrb[41].mxu0 }
 0x5e9   :  { %v7460_v42 = vmax.f32 %v7278_v4, 0.0  ;;  %7125 = vmatpush1.bf16.msra.mxu1 %v11996_v54  ;;  %v7280_v27 = vpop.f32.mrb[42].mxu0  ;;  %v13491_v2 = vmul.f32 %v7578_v14, %v12945_v24  ;;  %v12010_v14 = vld [vmem:[#allocation17 + $0x1114] ss:$24 sps:$4 sm:$0xff]   ;;  %v12008_v4 = vld [vmem:[#allocation17 + $0x1110] ss:$24 sps:$4 sm:$0xff]  }
 0x5ea   :  { %v7521_v55 = vmul.f32 %v13459_v40, %v7459_v33  ;;  %v7465_v38 = vmax.f32 %v7280_v27, 0.0  ;;  %v7282_v12 = vpop.f32.mrb[43].mxu0  ;;  %7126 = vmatprep.subr.bf16.mxu1 %v12001_v59  ;;  %v10504_v22 = vpack.c.bf16 %v13485_v46, %v13482_v32  ;;  %v12011_v27 = vld [vmem:[#allocation17 + $0x1140] ss:$24 sps:$4 sm:$0xff]   ;;  %v7495_v32 = vsub.s32 4, %v12914_v58 }
 0x5eb   :  { %v7522_v61 = vmul.f32 %v13463_v45, %v7460_v42  ;;  %v7466_v50 = vmax.f32 %v7282_v12, 0.0  ;;  %v10502_v43 = vpack.c.bf16 %v13491_v2, %v13488_v44  ;;  %v12013_v42 = vld [vmem:[#allocation17 + $0x1144] ss:$24 sps:$4 sm:$0xff]   ;;  %v12017_v12 = vld [vmem:[#allocation17 + $0x11a0] ss:$24 sps:$4 sm:$0xff]  }
 0x5ec   :  { %v7583_v20 = vadd.f32 %v13467_v11, %v7521_v55  ;;  %v7527_v13 = vmul.f32 %v13459_v40, %v7465_v38  ;;  %v12014_v55 = vld [vmem:[#allocation17 + $0x1170] ss:$24 sps:$4 sm:$0xff]   ;;  %v12019_v38 = vld [vmem:[#allocation17 + $0x11a4] ss:$24 sps:$4 sm:$0xff]   ;;  %v7496_v46 = vrot.slane %v13451_v56, %v7495_v32 }
 0x5ed   :  { %v7584_v57 = vadd.f32 %v13471_v7, %v7522_v61  ;;  %v7528_v8 = vmul.f32 %v13463_v45, %v7466_v50  ;;  %7127 = vmatpush1.bf16.msra.mxu1 %v11999_v53  ;;  %v12016_v53 = vld [vmem:[#allocation17 + $0x1174] ss:$24 sps:$4 sm:$0xff]   ;;  %v12020_v61 = vld [vmem:[#allocation17 + $0x11d0] ss:$24 sps:$4 sm:$0xff]  }
 0x5ee   :  { %v7589_v5 = vadd.f32 %v13467_v11, %v7527_v13  ;;  %7128 = vmatprep.subr.bf16.mxu1 %v12004_v21  ;;  %v13508_v63 = vmul.f32 %v7583_v20, %v12949_v31  ;;  %v12022_v21 = vld [vmem:[#allocation17 + $0x11d4] ss:$24 sps:$4 sm:$0xff]   ;;  %v12023_v20 = vld [vmem:[#allocation17 + $0xc10] ss:$24 sps:$4 sm:$0xff]   ;;  %v12028_v13 = vld [vmem:[#allocation17 + $0xc44] ss:$24 sps:$4 sm:$0xff]  }
 0x5ef   :  { %v7590_v49 = vadd.f32 %v13471_v7, %v7528_v8  ;;  %v13505_v41 = vpop.f32.mrb[44].mxu0  ;;  %v13516_v54 = vmul.f32 %v7584_v57, %v12949_v31  ;;  %v12025_v50 = vld [vmem:[#allocation17 + $0xc14] ss:$24 sps:$4 sm:$0xff]   ;;  %v12026_v57 = vld [vmem:[#allocation17 + $0xc40] ss:$24 sps:$4 sm:$0xff]  }
 0x5f0   :  { %v13511_v18 = vmul.f32 %v7589_v5, %v12967_v51  ;;  %v13513_v3 = vpop.f32.mrb[45].mxu0  ;;  %v12031_v8 = vld [vmem:[#allocation17 + $0xc74] ss:$24 sps:$4 sm:$0xff]   ;;  %v12034_v5 = vld [vmem:[#allocation17 + $0xca4] ss:$24 sps:$4 sm:$0xff]  }
 0x5f1   :  { %7129 = vmatpush1.bf16.msra.mxu1 %v12002_v37  ;;  %v7290_v6 = vpop.f32.mrb[46].mxu0  ;;  %v13519_v29 = vmul.f32 %v7590_v49, %v12967_v51  ;;  %v12029_v37 = vld [vmem:[#allocation17 + $0xc70] ss:$24 sps:$4 sm:$0xff]   ;;  %v12037_v49 = vld [vmem:[#allocation17 + $0xcd4] ss:$24 sps:$4 sm:$0xff]  }
 0x5f2   :  { %v7291_v59 = vpop.f32.mrb[47].mxu0  ;;  %7130 = vmatprep.subr.bf16.mxu1 %v12007_v15  ;;  %v10508_v47 = vpack.c.bf16 %v13511_v18, %v13508_v63  ;;  %v12032_v15 = vld [vmem:[#allocation17 + $0xca0] ss:$24 sps:$4 sm:$0xff]   ;;  %v12035_v6 = vld [vmem:[#allocation17 + $0xcd0] ss:$24 sps:$4 sm:$0xff]  }
 0x5f3   :  { %v10506_v33 = vpack.c.bf16 %v13519_v29, %v13516_v54  ;;  %v12038_v59 = vld [vmem:[#allocation17 + $0xd00] ss:$24 sps:$4 sm:$0xff]  }
 0x5f5   :  { %7131 = vmatpush1.bf16.msra.mxu1 %v12005_v52  ;;  %v12040_v52 = vld [vmem:[#allocation17 + $0xd04] ss:$24 sps:$4 sm:$0xff]  }
 0x5f6   :  { %7132 = vmatprep.subr.bf16.mxu1 %v12010_v14  ;;  %v12043_v14 = vld [vmem:[#allocation17 + $0xd34] ss:$24 sps:$4 sm:$0xff]  }
 0x5f9   :  { %7133 = vmatpush1.bf16.msra.mxu1 %v12008_v4  ;;  %v12041_v4 = vld [vmem:[#allocation17 + $0xd30] ss:$24 sps:$4 sm:$0xff]  }
 0x5fa   :  { %7134 = vmatprep.subr.bf16.mxu1 %v12013_v42  ;;  %v12046_v42 = vld [vmem:[#allocation17 + $0xd64] ss:$24 sps:$4 sm:$0xff]  }
 0x5fd   :  { %7135 = vmatpush1.bf16.msra.mxu1 %v12011_v27  ;;  %v12044_v27 = vld [vmem:[#allocation17 + $0xd60] ss:$24 sps:$4 sm:$0xff]  }
 0x5fe   :  { %7136 = vmatprep.subr.bf16.mxu1 %v12016_v53  ;;  %v12049_v53 = vld [vmem:[#allocation17 + $0xd94] ss:$24 sps:$4 sm:$0xff]  }
 0x601   :  { %7137 = vmatpush1.bf16.msra.mxu1 %v12014_v55  ;;  %v12047_v55 = vld [vmem:[#allocation17 + $0xd90] ss:$24 sps:$4 sm:$0xff]  }
 0x602   :  { %7138 = vmatprep.subr.bf16.mxu1 %v12019_v38  ;;  %v12052_v38 = vld [vmem:[#allocation17 + $0xdc4] ss:$24 sps:$4 sm:$0xff]  }
 0x605   :  { %7139 = vmatpush1.bf16.msra.mxu1 %v12017_v12  ;;  %v12050_v12 = vld [vmem:[#allocation17 + $0xdc0] ss:$24 sps:$4 sm:$0xff]  }
 0x606   :  { %7140 = vmatprep.subr.bf16.mxu1 %v12022_v21  ;;  %v12055_v21 = vld [vmem:[#allocation17 + $0xdf4] ss:$24 sps:$4 sm:$0xff]  }
 0x609   :  { %7141 = vmatpush1.bf16.msra.mxu1 %v12020_v61  ;;  %v12058_v61 = vld [vmem:[#allocation17 + $0xe24] ss:$24 sps:$4 sm:$0xff]  }
 0x60a   :  { %7293 = vmatprep.subr.bf16.mxu1 %v12025_v50  ;;  %v12056_v50 = vld [vmem:[#allocation17 + $0xe20] ss:$24 sps:$4 sm:$0xff]  }
 0x60c   :  { %7143 = vmatmul.mubr.bf16.vlgmr.msra.gmra.mrb[12].mxu1 %v13410_v17 }
 0x60d   :  { %7152 = vmatprep.mubr.bf16.mxu1 %v13418_v23  ;;  %7294 = vmatpush1.bf16.msra.mxu1 %v12023_v20  ;;  %v12061_v20 = vld [vmem:[#allocation17 + $0xe54] ss:$24 sps:$4 sm:$0xff]  }
 0x60e   :  { %7295 = vmatprep.subr.bf16.mxu1 %v12028_v13  ;;  %v12059_v13 = vld [vmem:[#allocation17 + $0xe50] ss:$24 sps:$4 sm:$0xff]  }
 0x611   :  { %7296 = vmatpush1.bf16.msra.mxu1 %v12026_v57  ;;  %v12064_v57 = vld [vmem:[#allocation17 + $0xe84] ss:$24 sps:$4 sm:$0xff]  }
 0x612   :  { %7297 = vmatprep.subr.bf16.mxu1 %v12031_v8  ;;  %v12062_v8 = vld [vmem:[#allocation17 + $0xe80] ss:$24 sps:$4 sm:$0xff]  }
 0x614   :  { %7153 = vmatmul.mubr.bf16.gmra.mrb[16].mxu1 %v13426_v25 }
 0x615   :  { %7162 = vmatprep.mubr.bf16.mxu1 %v13406_v0  ;;  %7298 = vmatpush1.bf16.msra.mxu1 %v12029_v37  ;;  %v12067_v37 = vld [vmem:[#allocation17 + $0xeb4] ss:$24 sps:$4 sm:$0xff]  }
 0x616   :  { %7299 = vmatprep.subr.bf16.mxu1 %v12034_v5  ;;  %v12065_v5 = vld [vmem:[#allocation17 + $0xeb0] ss:$24 sps:$4 sm:$0xff]  }
 0x619   :  { %7300 = vmatpush1.bf16.msra.mxu1 %v12032_v15  ;;  %v12070_v15 = vld [vmem:[#allocation17 + $0xee4] ss:$24 sps:$4 sm:$0xff]  }
 0x61a   :  { %7301 = vmatprep.subr.bf16.mxu1 %v12037_v49  ;;  %v12068_v49 = vld [vmem:[#allocation17 + $0xee0] ss:$24 sps:$4 sm:$0xff]  }
 0x61c   :  { %7163 = vmatmul.mubr.bf16.gmra.mrb[20].mxu1 %v13421_v28 }
 0x61d   :  { %7302 = vmatpush1.bf16.msra.mxu1 %v12035_v6  ;;  %7325 = vmatprep.mubr.bf16.mxu1 %v13366_v9  ;;  %v12053_v9 = vld [vmem:[#allocation17 + $0xdf0] ss:$24 sps:$4 sm:$0xff]   ;;  %v12073_v6 = vld [vmem:[#allocation17 + $0xf14] ss:$24 sps:$4 sm:$0xff]  }
 0x61e   :  { %7303 = vmatprep.subr.bf16.mxu1 %v12040_v52  ;;  %v12071_v52 = vld [vmem:[#allocation17 + $0xf10] ss:$24 sps:$4 sm:$0xff]  }
 0x621   :  { %7304 = vmatpush1.bf16.msra.mxu1 %v12038_v59  ;;  %v12076_v59 = vld [vmem:[#allocation17 + $0xf44] ss:$24 sps:$4 sm:$0xff]  }
 0x622   :  { %7305 = vmatprep.subr.bf16.mxu1 %v12043_v14  ;;  %v12074_v14 = vld [vmem:[#allocation17 + $0xf40] ss:$24 sps:$4 sm:$0xff]  }
 0x625   :  { %7306 = vmatpush1.bf16.msra.mxu1 %v12041_v4  ;;  %v12079_v4 = vld [vmem:[#allocation17 + $0xf74] ss:$24 sps:$4 sm:$0xff]  }
 0x626   :  { %7307 = vmatprep.subr.bf16.mxu1 %v12046_v42  ;;  %v12077_v42 = vld [vmem:[#allocation17 + $0xf70] ss:$24 sps:$4 sm:$0xff]  }
 0x629   :  { %7308 = vmatpush1.bf16.msra.mxu1 %v12044_v27  ;;  %v12082_v27 = vld [vmem:[#allocation17 + $0xfa4] ss:$24 sps:$4 sm:$0xff]  }
 0x62a   :  { %7309 = vmatprep.subr.bf16.mxu1 %v12049_v53  ;;  %v12080_v53 = vld [vmem:[#allocation17 + $0xfa0] ss:$24 sps:$4 sm:$0xff]  }
 0x62d   :  { %7310 = vmatpush1.bf16.msra.mxu1 %v12047_v55  ;;  %v12085_v55 = vld [vmem:[#allocation17 + $0xfd4] ss:$24 sps:$4 sm:$0xff]  }
 0x62e   :  { %7311 = vmatprep.subr.bf16.mxu1 %v12052_v38  ;;  %v12086_v38 = vld [vmem:[#allocation17 + $0x1000] ss:$24 sps:$4 sm:$0xff]  }
 0x631   :  { %7312 = vmatpush1.bf16.msra.mxu1 %v12050_v12  ;;  %v12091_v12 = vld [vmem:[#allocation17 + $0x1034] ss:$24 sps:$4 sm:$0xff]  }
 0x632   :  { %7313 = vmatprep.subr.bf16.mxu1 %v12055_v21  ;;  %v12092_v21 = vld [vmem:[#allocation17 + $0x1060] ss:$24 sps:$4 sm:$0xff]  }
 0x635   :  { %7314 = vmatpush1.bf16.msra.mxu1 %v12053_v9  ;;  %v12097_v9 = vld [vmem:[#allocation17 + $0x1094] ss:$24 sps:$4 sm:$0xff]  }
 0x636   :  { %7315 = vmatprep.subr.bf16.mxu1 %v12058_v61  ;;  %v12095_v61 = vld [vmem:[#allocation17 + $0x1090] ss:$24 sps:$4 sm:$0xff]  }
 0x639   :  { %7316 = vmatpush1.bf16.msra.mxu1 %v12056_v50  ;;  %v12100_v50 = vld [vmem:[#allocation17 + $0x10c4] ss:$24 sps:$4 sm:$0xff]  }
 0x63a   :  { %7317 = vmatprep.subr.bf16.mxu1 %v12061_v20  ;;  %v12103_v20 = vld [vmem:[#allocation17 + $0x10f4] ss:$24 sps:$4 sm:$0xff]  }
 0x63d   :  { %7318 = vmatpush1.bf16.msra.mxu1 %v12059_v13  ;;  %v12106_v13 = vld [vmem:[#allocation17 + $0x1124] ss:$24 sps:$4 sm:$0xff]  }
 0x63e   :  { %7319 = vmatprep.subr.bf16.mxu1 %v12064_v57  ;;  %v12104_v57 = vld [vmem:[#allocation17 + $0x1120] ss:$24 sps:$4 sm:$0xff]  }
 0x641   :  { %7320 = vmatpush1.bf16.msra.mxu1 %v12062_v8  ;;  %v12109_v8 = vld [vmem:[#allocation17 + $0x1154] ss:$24 sps:$4 sm:$0xff]  }
 0x642   :  { %7321 = vmatprep.subr.bf16.mxu1 %v12067_v37  ;;  %v12107_v37 = vld [vmem:[#allocation17 + $0x1150] ss:$24 sps:$4 sm:$0xff]  }
 0x645   :  { %7322 = vmatpush1.bf16.msra.mxu1 %v12065_v5  ;;  %v12112_v5 = vld [vmem:[#allocation17 + $0x1184] ss:$24 sps:$4 sm:$0xff]  }
 0x646   :  { %7323 = vmatprep.subr.bf16.mxu1 %v12070_v15  ;;  %v12110_v15 = vld [vmem:[#allocation17 + $0x1180] ss:$24 sps:$4 sm:$0xff]  }
 0x649   :  { %7324 = vmatpush1.bf16.msra.mxu1 %v12068_v49  ;;  %v12115_v49 = vld [vmem:[#allocation17 + $0x11b4] ss:$24 sps:$4 sm:$0xff]  }
 0x64a   :  { %7354 = vmatprep.subr.bf16.mxu1 %v12073_v6  ;;  %v12113_v6 = vld [vmem:[#allocation17 + $0x11b0] ss:$24 sps:$4 sm:$0xff]  }
 0x64c   :  { %7326 = vmatmul.mubr.bf16.vlgmr.msra.gmra.mrb[24].mxu1 %v13374_v35  ;;  %v12083_v35 = vld [vmem:[#allocation17 + $0xfd0] ss:$24 sps:$4 sm:$0xff]  }
 0x64d   :  { %7335 = vmatprep.mubr.bf16.mxu1 %v13382_v19  ;;  %7355 = vmatpush1.bf16.msra.mxu1 %v12071_v52  ;;  %v12088_v19 = vld [vmem:[#allocation17 + $0x1004] ss:$24 sps:$4 sm:$0xff]  }
 0x64e   :  { %7356 = vmatprep.subr.bf16.mxu1 %v12076_v59  ;;  %v12118_v52 = vld [vmem:[#allocation17 + $0x11e4] ss:$24 sps:$4 sm:$0xff]   ;;  %v12116_v59 = vld [vmem:[#allocation17 + $0x11e0] ss:$24 sps:$4 sm:$0xff]  }
 0x651   :  { %7357 = vmatpush1.bf16.msra.mxu1 %v12074_v14  ;;  %v7480_v14 = vrot.slane %v13451_v56, %v12917_v60 }
 0x652   :  { %7358 = vmatprep.subr.bf16.mxu1 %v12079_v4 }
 0x654   :  { %7336 = vmatmul.mubr.bf16.gmra.mrb[28].mxu1 %v13390_v16  ;;  %v12089_v16 = vld [vmem:[#allocation17 + $0x1030] ss:$24 sps:$4 sm:$0xff]  }
 0x655   :  { %7345 = vmatprep.mubr.bf16.mxu1 %v13370_v34  ;;  %7359 = vmatpush1.bf16.msra.mxu1 %v12077_v42  ;;  %v12094_v34 = vld [vmem:[#allocation17 + $0x1064] ss:$24 sps:$4 sm:$0xff]   ;;  %v7484_v42 = vrot.slane %v13451_v56, %v12920_v62 }
 0x656   :  { %7360 = vmatprep.subr.bf16.mxu1 %v12082_v27 }
 0x659   :  { %7361 = vmatpush1.bf16.msra.mxu1 %v12080_v53  ;;  %v7542_v53 = vrot.slane %v13455_v30, %v12917_v60 }
 0x65a   :  { %7362 = vmatprep.subr.bf16.mxu1 %v12085_v55 }
 0x65c   :  { %7346 = vmatmul.mubr.bf16.gmra.mrb[32].mxu1 %v13385_v48  ;;  %v12098_v48 = vld [vmem:[#allocation17 + $0x10c0] ss:$24 sps:$4 sm:$0xff]  }
 0x65d   :  { %7363 = vmatpush1.bf16.msra.mxu1 %v12083_v35  ;;  %7386 = vmatprep.mubr.bf16.mxu1 %v13402_v36  ;;  %v12101_v36 = vld [vmem:[#allocation17 + $0x10f0] ss:$24 sps:$4 sm:$0xff]  }
 0x65e   :  { %7364 = vmatprep.subr.bf16.mxu1 %v12088_v19 }
 0x661   :  { %7365 = vmatpush1.bf16.msra.mxu1 %v12086_v38 }
 0x662   :  { %7366 = vmatprep.subr.bf16.mxu1 %v12091_v12 }
 0x665   :  { %7367 = vmatpush1.bf16.msra.mxu1 %v12089_v16 }
 0x666   :  { %7368 = vmatprep.subr.bf16.mxu1 %v12094_v34 }
 0x669   :  { %7369 = vmatpush1.bf16.msra.mxu1 %v12092_v21 }
 0x66a   :  { %7370 = vmatprep.subr.bf16.mxu1 %v12097_v9 }
 0x66d   :  { %7371 = vmatpush1.bf16.msra.mxu1 %v12095_v61 }
 0x66e   :  { %7372 = vmatprep.subr.bf16.mxu1 %v12100_v50 }
 0x671   :  { %7373 = vmatpush1.bf16.msra.mxu1 %v12098_v48 }
 0x672   :  { %7374 = vmatprep.subr.bf16.mxu1 %v12103_v20 }
 0x675   :  { %7375 = vmatpush1.bf16.msra.mxu1 %v12101_v36 }
 0x676   :  { %7376 = vmatprep.subr.bf16.mxu1 %v12106_v13 }
 0x679   :  { %7377 = vmatpush1.bf16.msra.mxu1 %v12104_v57 }
 0x67a   :  { %7378 = vmatprep.subr.bf16.mxu1 %v12109_v8 }
 0x67d   :  { %7379 = vmatpush1.bf16.msra.mxu1 %v12107_v37 }
 0x67e   :  { %7380 = vmatprep.subr.bf16.mxu1 %v12112_v5 }
 0x681   :  { %7381 = vmatpush1.bf16.msra.mxu1 %v12110_v15 }
 0x682   :  { %7382 = vmatprep.subr.bf16.mxu1 %v12115_v49 }
 0x685   :  { %7383 = vmatpush1.bf16.msra.mxu1 %v12113_v6 }
 0x686   :  { %7384 = vmatprep.subr.bf16.mxu1 %v12118_v52 }
 0x689   :  { %7385 = vmatpush1.bf16.msra.mxu1 %v12116_v59 }
 0x68c   :  { %7387 = vmatmul.mubr.bf16.vlgmr.msra.gmra.mrb[24].mxu1 %v13410_v17 }
 0x68d   :  { %7396 = vmatprep.mubr.bf16.mxu1 %v13418_v23  ;;  %v7546_v23 = vrot.slane %v13455_v30, %v12920_v62 }
 0x694   :  { %7397 = vmatmul.mubr.bf16.gmra.mrb[28].mxu1 %v13426_v25 }
 0x695   :  { %7406 = vmatprep.mubr.bf16.mxu1 %v13406_v0 }
 0x69c   :  { %7407 = vmatmul.mubr.bf16.gmra.mrb[32].mxu1 %v13421_v28 }
 0x6df   :  { %v7144_v4 = vpop.f32.mrb[12].mxu1 }
 0x6e0   :  { %v7445_v27 = vmax.f32 %v7144_v4, 0.0  ;;  %v7146_v17 = vpop.f32.mrb[13].mxu1 }
 0x6e1   :  { %v7446_v55 = vmax.f32 %v7146_v17, 0.0  ;;  %v7148_v25 = vpop.f32.mrb[14].mxu1 }
 0x6e2   :  { %v7507_v0 = vmul.f32 %v7480_v14, %v7445_v27  ;;  %v7451_v35 = vmax.f32 %v7148_v25, 0.0  ;;  %v7150_v28 = vpop.f32.mrb[15].mxu1 }
 0x6e3   :  { %v7508_v19 = vmul.f32 %v7484_v42, %v7446_v55  ;;  %v7452_v38 = vmax.f32 %v7150_v28, 0.0 }
 0x6e4   :  { %v7569_v12 = vadd.f32 %v7542_v53, %v7507_v0  ;;  %v7513_v16 = vmul.f32 %v7480_v14, %v7451_v35 }
 0x6e5   :  { %v7570_v34 = vadd.f32 %v7546_v23, %v7508_v19  ;;  %v7514_v21 = vmul.f32 %v7484_v42, %v7452_v38 }
 0x6e6   :  { %v7575_v9 = vadd.f32 %v7542_v53, %v7513_v16  ;;  %v7599_v48 = vmul.f32 %v7569_v12, %v12934_v10 }
 0x6e7   :  { %v7576_v61 = vadd.f32 %v7546_v23, %v7514_v21  ;;  %v7154_v50 = vpop.f32.mrb[16].mxu1  ;;  %v7600_v37 = vmul.f32 %v7570_v34, %v12934_v10 }
 0x6e8   :  { %v7605_v20 = vmul.f32 %v7575_v9, %v12945_v24  ;;  %v7457_v36 = vmax.f32 %v7154_v50, 0.0  ;;  %v7156_v13 = vpop.f32.mrb[17].mxu1 }
 0x6e9   :  { %v7458_v57 = vmax.f32 %v7156_v13, 0.0  ;;  %v7158_v8 = vpop.f32.mrb[18].mxu1  ;;  %v7606_v5 = vmul.f32 %v7576_v61, %v12945_v24  ;;  %v7472_v13 = vmax.f32 %v13513_v3, 0.0 }
 0x6ea   :  { %v7519_v15 = vmul.f32 %v7480_v14, %v7457_v36  ;;  %v7463_v49 = vmax.f32 %v7158_v8, 0.0  ;;  %v7160_v6 = vpop.f32.mrb[19].mxu1  ;;  %v10496_v52 = vpack.c.bf16 %v7605_v20, %v7599_v48 }
 0x6eb   :  { %v7520_v59 = vmul.f32 %v7484_v42, %v7458_v57  ;;  %v7464_v4 = vmax.f32 %v7160_v6, 0.0  ;;  %v10494_v27 = vpack.c.bf16 %v7606_v5, %v7600_v37 }
 0x6ec   :  { %v7581_v17 = vadd.f32 %v7542_v53, %v7519_v15  ;;  %v7525_v55 = vmul.f32 %v7480_v14, %v7463_v49  ;;  %v7471_v15 = vmax.f32 %v13505_v41, 0.0  ;;  %v7534_v49 = vmul.f32 %v13463_v45, %v7472_v13 }
 0x6ed   :  { %v7582_v25 = vadd.f32 %v7546_v23, %v7520_v59  ;;  %v7526_v0 = vmul.f32 %v7484_v42, %v7464_v4  ;;  %10495 = vmatprep.subr.bf16.mxu0 %v10494_v27 }
 0x6ee   :  { %v7587_v35 = vadd.f32 %v7542_v53, %v7525_v55  ;;  %10497 = vmatpush1.bf16.msra.mxu0 %v10496_v52  ;;  %v7611_v38 = vmul.f32 %v7581_v17, %v12949_v31  ;;  %v7533_v3 = vmul.f32 %v13459_v40, %v7471_v15 }
 0x6ef   :  { %v7588_v28 = vadd.f32 %v7546_v23, %v7526_v0  ;;  %v7164_v19 = vpop.f32.mrb[20].mxu1  ;;  %v7612_v61 = vmul.f32 %v7582_v25, %v12949_v31 }
 0x6f0   :  { %v7617_v12 = vmul.f32 %v7587_v35, %v12967_v51  ;;  %v7469_v16 = vmax.f32 %v7164_v19, 0.0  ;;  %v7166_v34 = vpop.f32.mrb[21].mxu1  ;;  %v7595_v40 = vadd.f32 %v13467_v11, %v7533_v3  ;;  %v7499_v11 = vsub.s32 5, %v12914_v58 }
 0x6f1   :  { %v7470_v21 = vmax.f32 %v7166_v34, 0.0  ;;  %v7168_v9 = vpop.f32.mrb[22].mxu1  ;;  %v7618_v50 = vmul.f32 %v7588_v28, %v12967_v51 }
 0x6f2   :  { %v7531_v48 = vmul.f32 %v7480_v14, %v7469_v16  ;;  %v7169_v20 = vpop.f32.mrb[23].mxu1  ;;  %v10500_v36 = vpack.c.bf16 %v7617_v12, %v7611_v38  ;;  %v13563_v14 = vld [vmem:[#allocation22] sm:$0x3]  ;;  %v7500_v2 = vrot.slane %v13451_v56, %v7499_v11  ;;  %v7562_v18 = vrot.slane %v13455_v30, %v7499_v11 }
 0x6f3   :  { %v7532_v57 = vmul.f32 %v7484_v42, %v7470_v21  ;;  %v10498_v8 = vpack.c.bf16 %v7618_v50, %v7612_v61  ;;  %v7596_v42 = vadd.f32 %v13471_v7, %v7534_v49  ;;  %v7625_v7 = vmul.f32 %v7595_v40, %v12985_v26 }
 0x6f4   :  { %v7593_v37 = vadd.f32 %v7542_v53, %v7531_v48 }
 0x6f5   :  { %v7594_v5 = vadd.f32 %v7546_v23, %v7532_v57  ;;  %10499 = vmatprep.subr.bf16.mxu0 %v10498_v8  ;;  %v7626_v45 = vmul.f32 %v7596_v42, %v12985_v26 }
 0x6f6   :  { %10501 = vmatpush1.bf16.msra.mxu0 %v10500_v36  ;;  %v7623_v52 = vmul.f32 %v7593_v37, %v12985_v26 }
 0x6f7   :  { %v7624_v6 = vmul.f32 %v7594_v5, %v12985_v26 }
 0x6f9   :  { %10206 = vmatprep.subr.msk.mxu0 %vm7634_vm8, %v7624_v6 }
 0x6fa   :  { %10207 = vmatpush1.msk.msra.mxu0 %vm7634_vm8, %v7623_v52 }
 0x6fb   :  { %10503 = vmatprep.subr.bf16.mxu0 %v10502_v43  ;;  %10208 = vmatmul.mubr.msk.f32.vlgmr.msra.gmra.mrb[48].mxu0 %vm7630_vm9, %v13563_v14  ;;  %v7558_v43 = vrot.slane %v13455_v30, %v7495_v32 }
 0x6fc   :  { %10505 = vmatpush1.bf16.msra.mxu0 %v10504_v22  ;;  %7788 = vmatprep.mubr.f32.mxu0 %v12548_v1 }
 0x6fd   :  { %10507 = vmatprep.subr.bf16.mxu0 %v10506_v33 }
 0x700   :  { %10509 = vmatpush1.bf16.msra.mxu0 %v10508_v47 }
 0x701   :  { %10209 = vmatprep.subr.msk.mxu0 %vm7634_vm8, %v7626_v45 }
 0x704   :  { %10210 = vmatpush1.msk.msra.mxu0 %vm7634_vm8, %v7625_v7 }
 0x705   :  { %10211 = vmatmul.mubr.msk.f32.vlgmr.msra.gmra.mrb[50].mxu0 %vm7630_vm9, %v13563_v14 }
 0x706   :  { %7859 = vmatprep.mubr.f32.mxu0 %v12548_v1 }
 0x75f   :  { %v7388_v44 = vpop.f32.mrb[24].mxu1 }
 0x760   :  { %v7449_v22 = vmax.f32 %v7388_v44, 0.0  ;;  %v7390_v41 = vpop.f32.mrb[25].mxu1 }
 0x761   :  { %v7450_v63 = vmax.f32 %v7390_v41, 0.0  ;;  %v7392_v54 = vpop.f32.mrb[26].mxu1  ;;  %v7882_v41 = vld [vmem:[%s14155_s12 + $0x80] sm:$0xff] }
 0x762   :  { %v7511_v29 = vmul.f32 %v7496_v46, %v7449_v22  ;;  %v7455_v47 = vmax.f32 %v7392_v54, 0.0  ;;  %v7394_v33 = vpop.f32.mrb[27].mxu1 }
 0x763   :  { %v7512_v53 = vmul.f32 %v7500_v2, %v7450_v63  ;;  %v7456_v23 = vmax.f32 %v7394_v33, 0.0  ;;  %v7883_v63 = vld [vmem:[%s14155_s12 + $0x88] sm:$0xff] }
 0x764   :  { %v7573_v59 = vadd.f32 %v7558_v43, %v7511_v29  ;;  %v7517_v4 = vmul.f32 %v7496_v46, %v7455_v47 }
 0x765   :  { %v7574_v27 = vadd.f32 %v7562_v18, %v7512_v53  ;;  %v7518_v17 = vmul.f32 %v7500_v2, %v7456_v23  ;;  %v7868_v53 = vld [vmem:[%s14155_s12 + $0x10] sm:$0xff]  ;;  %v7869_v23 = vld [vmem:[%s14155_s12 + $0x18] sm:$0xff] }
 0x766   :  { %v7579_v55 = vadd.f32 %v7558_v43, %v7517_v4  ;;  %v7603_v0 = vmul.f32 %v7573_v59, %v12934_v10  ;;  %v7886_v59 = vld [vmem:[%s14155_s12 + $0xa0] sm:$0xff]  ;;  %v10524_v4 = vpack.c.bf16 %v7869_v23, %v7868_v53  ;;  %v7921_v53 = vld [vmem:[%s14155_s12 + $0x1b8] sm:$0xff] }
 0x767   :  { %v7580_v25 = vadd.f32 %v7562_v18, %v7518_v17  ;;  %v7398_v56 = vpop.f32.mrb[28].mxu1  ;;  %v7604_v12 = vmul.f32 %v7574_v27, %v12934_v10  ;;  %v7870_v17 = vld [vmem:[%s14155_s12 + $0x20] sm:$0xff] }
 0x768   :  { %v7609_v35 = vmul.f32 %v7579_v55, %v12945_v24  ;;  %v7461_v28 = vmax.f32 %v7398_v56, 0.0  ;;  %v7400_v19 = vpop.f32.mrb[29].mxu1  ;;  %v7871_v55 = vld [vmem:[%s14155_s12 + $0x28] sm:$0xff] }
 0x769   :  { %v7462_v30 = vmax.f32 %v7400_v19, 0.0  ;;  %v7402_v38 = vpop.f32.mrb[30].mxu1  ;;  %v7610_v16 = vmul.f32 %v7580_v25, %v12945_v24  ;;  %v7888_v25 = vld [vmem:[%s14155_s12 + $0xb0] sm:$0xff]  ;;  %v10528_v56 = vpack.c.bf16 %v7871_v55, %v7870_v17  ;;  %v7890_v19 = vld [vmem:[%s14155_s12 + $0xc0] sm:$0xff]  ;;  %v7923_v17 = vld [vmem:[%s14155_s12 + $0x1c8] sm:$0xff] }
 0x76a   :  { %v7523_v34 = vmul.f32 %v7496_v46, %v7461_v28  ;;  %v7467_v21 = vmax.f32 %v7402_v38, 0.0  ;;  %v7404_v9 = vpop.f32.mrb[31].mxu1  ;;  %v10512_v61 = vpack.c.bf16 %v7609_v35, %v7603_v0  ;;  %v7872_v35 = vld [vmem:[%s14155_s12 + $0x30] sm:$0xff]  ;;  %v7873_v28 = vld [vmem:[%s14155_s12 + $0x38] sm:$0xff] }
 0x76b   :  { %v7524_v50 = vmul.f32 %v7500_v2, %v7462_v30  ;;  %v7468_v48 = vmax.f32 %v7404_v9, 0.0  ;;  %v10510_v20 = vpack.c.bf16 %v7610_v16, %v7604_v12  ;;  %v7891_v30 = vld [vmem:[%s14155_s12 + $0xc8] sm:$0xff]  ;;  %v10532_v38 = vpack.c.bf16 %v7873_v28, %v7872_v35  ;;  %v7874_v16 = vld [vmem:[%s14155_s12 + $0x40] sm:$0xff]  ;;  %v7893_v9 = vld [vmem:[%s14155_s12 + $0xd8] sm:$0xff] }
 0x76c   :  { %v7585_v36 = vadd.f32 %v7558_v43, %v7523_v34  ;;  %v7529_v13 = vmul.f32 %v7496_v46, %v7467_v21  ;;  %v10534_v12 = vpack.c.bf16 %v7891_v30, %v7890_v19  ;;  %v7875_v34 = vld [vmem:[%s14155_s12 + $0x48] sm:$0xff]  ;;  %v7892_v21 = vld [vmem:[%s14155_s12 + $0xd0] sm:$0xff]  ;;  %v7925_v19 = vld [vmem:[%s14155_s12 + $0x1d8] sm:$0xff] }
 0x76d   :  { %v7586_v57 = vadd.f32 %v7562_v18, %v7524_v50  ;;  %v7530_v8 = vmul.f32 %v7500_v2, %v7468_v48  ;;  %10511 = vmatprep.subr.bf16.mxu0 %v10510_v20  ;;  %v10538_v50 = vpack.c.bf16 %v7893_v9, %v7892_v21  ;;  %v7876_v48 = vld [vmem:[%s14155_s12 + $0x50] sm:$0xff]  ;;  %v7877_v20 = vld [vmem:[%s14155_s12 + $0x58] sm:$0xff]  ;;  %v7907_v35 = vld [vmem:[%s14155_s12 + $0x148] sm:$0xff] }
 0x76e   :  { %v7591_v37 = vadd.f32 %v7558_v43, %v7529_v13  ;;  %10513 = vmatpush1.bf16.msra.mxu0 %v10512_v61  ;;  %v7615_v10 = vmul.f32 %v7585_v36, %v12949_v31  ;;  %v10536_v61 = vpack.c.bf16 %v7875_v34, %v7874_v16  ;;  %v7894_v36 = vld [vmem:[%s14155_s12 + $0xe0] sm:$0xff]  ;;  %v7895_v13 = vld [vmem:[%s14155_s12 + $0xe8] sm:$0xff]  ;;  %v7924_v28 = vld [vmem:[%s14155_s12 + $0x1d0] sm:$0xff] }
 0x76f   :  { %v7592_v5 = vadd.f32 %v7562_v18, %v7530_v8  ;;  %v7408_v15 = vpop.f32.mrb[32].mxu1  ;;  %v7616_v42 = vmul.f32 %v7586_v57, %v12949_v31  ;;  %v7866_v31 = vld [vmem:[%s14155_s12] sm:$0xff]  ;;  %v10540_v57 = vpack.c.bf16 %v7877_v20, %v7876_v48  ;;  %v10542_v8 = vpack.c.bf16 %v7895_v13, %v7894_v36  ;;  %v7909_v16 = vld [vmem:[%s14155_s12 + $0x158] sm:$0xff]  ;;  %v7927_v21 = vld [vmem:[%s14155_s12 + $0x1e8] sm:$0xff] }
 0x770   :  { %v7621_v24 = vmul.f32 %v7591_v37, %v12967_v51  ;;  %v7473_v49 = vmax.f32 %v7408_v15, 0.0  ;;  %v7410_v6 = vpop.f32.mrb[33].mxu1  ;;  %v7878_v37 = vld [vmem:[%s14155_s12 + $0x60] sm:$0xff]  ;;  %v7896_v15 = vld [vmem:[%s14155_s12 + $0xf0] sm:$0xff]  ;;  %v7911_v48 = vld [vmem:[%s14155_s12 + $0x168] sm:$0xff] }
 0x771   :  { %v7474_v52 = vmax.f32 %v7410_v6, 0.0  ;;  %v7412_v3 = vpop.f32.mrb[34].mxu1  ;;  %v7622_v40 = vmul.f32 %v7592_v5, %v12967_v51  ;;  %v7867_v51 = vld [vmem:[%s14155_s12 + $0x8] sm:$0xff]  ;;  %v7880_v6 = vld [vmem:[%s14155_s12 + $0x70] sm:$0xff]  ;;  %v7926_v34 = vld [vmem:[%s14155_s12 + $0x1e0] sm:$0xff] }
 0x772   :  { %v7535_v45 = vmul.f32 %v7496_v46, %v7473_v49  ;;  %v7413_v7 = vpop.f32.mrb[35].mxu1  ;;  %v10516_v32 = vpack.c.bf16 %v7621_v24, %v7615_v10  ;;  %v7884_v46 = vld [vmem:[%s14155_s12 + $0x90] sm:$0xff]  ;;  %v10520_v47 = vpack.c.bf16 %v7867_v51, %v7866_v31  ;;  %v7879_v5 = vld [vmem:[%s14155_s12 + $0x68] sm:$0xff]  ;;  %v7897_v10 = vld [vmem:[%s14155_s12 + $0xf8] sm:$0xff] }
 0x773   :  { %v7536_v11 = vmul.f32 %v7500_v2, %v7474_v52  ;;  %v10514_v44 = vpack.c.bf16 %v7622_v40, %v7616_v42  ;;  %v7885_v2 = vld [vmem:[%s14155_s12 + $0x98] sm:$0xff]  ;;  %v10544_v24 = vpack.c.bf16 %v7879_v5, %v7878_v37  ;;  %v10546_v49 = vpack.c.bf16 %v7897_v10, %v7896_v15  ;;  %v7914_v3 = vld [vmem:[%s14155_s12 + $0x180] sm:$0xff]  ;;  %v7915_v42 = vld [vmem:[%s14155_s12 + $0x188] sm:$0xff] }
 0x774   :  { %v7597_v22 = vadd.f32 %v7558_v43, %v7535_v45  ;;  %v10522_v33 = vpack.c.bf16 %v7885_v2, %v7884_v46  ;;  %v7881_v52 = vld [vmem:[%s14155_s12 + $0x78] sm:$0xff]  ;;  %v10550_v45 = vpack.c.bf16 %v7915_v42, %v7914_v3  ;;  %v7898_v7 = vld [vmem:[%s14155_s12 + $0x100] sm:$0xff]  ;;  %v7900_v31 = vld [vmem:[%s14155_s12 + $0x110] sm:$0xff] }
 0x775   :  { %v7598_v54 = vadd.f32 %v7562_v18, %v7536_v11  ;;  %10515 = vmatprep.subr.bf16.mxu0 %v10514_v44  ;;  %v10518_v18 = vpack.c.bf16 %v7883_v63, %v7882_v41  ;;  %v10548_v40 = vpack.c.bf16 %v7881_v52, %v7880_v6  ;;  %v7916_v11 = vld [vmem:[%s14155_s12 + $0x190] sm:$0xff]  ;;  %v7917_v44 = vld [vmem:[%s14155_s12 + $0x198] sm:$0xff]  ;;  %v7918_v46 = vld [vmem:[%s14155_s12 + $0x1a0] sm:$0xff] }
 0x776   :  { %10517 = vmatpush1.bf16.msra.mxu0 %v10516_v32  ;;  %v7627_v29 = vmul.f32 %v7597_v22, %v12985_v26  ;;  %v7899_v32 = vld [vmem:[%s14155_s12 + $0x108] sm:$0xff]  ;;  %v7901_v51 = vld [vmem:[%s14155_s12 + $0x118] sm:$0xff]  ;;  %v7928_v20 = vld [vmem:[%s14155_s12 + $0x1f0] sm:$0xff] }
 0x777   :  { %v7628_v43 = vmul.f32 %v7598_v54, %v12985_v26  ;;  %v7887_v26 = vld [vmem:[%s14155_s12 + $0xa8] sm:$0xff]  ;;  %v10552_v41 = vpack.c.bf16 %v7899_v32, %v7898_v7  ;;  %v10554_v54 = vpack.c.bf16 %v7917_v44, %v7916_v11  ;;  %v7929_v36 = vld [vmem:[%s14155_s12 + $0x1f8] sm:$0xff]  ;;  %v7946_v5 = vld [vmem:[%s14155_s12 + $0x280] sm:$0xff] }
 0x778   :  { %v10526_v27 = vpack.c.bf16 %v7887_v26, %v7886_v59  ;;  %v7919_v2 = vld [vmem:[%s14155_s12 + $0x1a8] sm:$0xff]  ;;  %v7904_v26 = vld [vmem:[%s14155_s12 + $0x130] sm:$0xff]  ;;  %v7913_v37 = vld [vmem:[%s14155_s12 + $0x178] sm:$0xff] }
 0x779   :  { %10212 = vmatprep.subr.msk.mxu0 %vm7634_vm8, %v7628_v43  ;;  %v10556_v43 = vpack.c.bf16 %v7901_v51, %v7900_v31  ;;  %v7947_v15 = vld [vmem:[%s14155_s12 + $0x288] sm:$0xff]  ;;  %v7948_v52 = vld [vmem:[%s14155_s12 + $0x290] sm:$0xff]  ;;  %v7949_v3 = vld [vmem:[%s14155_s12 + $0x298] sm:$0xff] }
 0x77a   :  { %10213 = vmatpush1.msk.msra.mxu0 %vm7634_vm8, %v7627_v29  ;;  %v7902_v29 = vld [vmem:[%s14155_s12 + $0x120] sm:$0xff]  ;;  %v7931_v6 = vld [vmem:[%s14155_s12 + $0x208] sm:$0xff]  ;;  %v7933_v7 = vld [vmem:[%s14155_s12 + $0x218] sm:$0xff] }
 0x77b   :  { %10214 = vmatmul.mubr.msk.f32.vlgmr.msra.gmra.mrb[52].mxu0 %vm7630_vm9, %v13563_v14  ;;  %10519 = vmatprep.subr.bf16.mxu0 %v10518_v18  ;;  %v7889_v14 = vld [vmem:[%s14155_s12 + $0xb8] sm:$0xff]  ;;  %v10558_v18 = vpack.c.bf16 %v7919_v2, %v7918_v46  ;;  %v7950_v32 = vld [vmem:[%s14155_s12 + $0x2a0] sm:$0xff]  ;;  %v7951_v11 = vld [vmem:[%s14155_s12 + $0x2a8] sm:$0xff] }
 0x77c   :  { %10521 = vmatpush3.bf16.msra.mxu0 %v10520_v47  ;;  %v10530_v0 = vpack.c.bf16 %v7889_v14, %v7888_v25  ;;  %v7903_v47 = vld [vmem:[%s14155_s12 + $0x128] sm:$0xff]  ;;  %v7953_v31 = vld [vmem:[%s14155_s12 + $0x2b8] sm:$0xff]  ;;  %v7936_v2 = vld [vmem:[%s14155_s12 + $0x230] sm:$0xff] }
 0x77d   :  { %10523 = vmatprep.subr.bf16.mxu0 %v10522_v33  ;;  %v7920_v33 = vld [vmem:[%s14155_s12 + $0x1b0] sm:$0xff]  ;;  %v10560_v23 = vpack.c.bf16 %v7903_v47, %v7902_v29  ;;  %v7955_v29 = vld [vmem:[%s14155_s12 + $0x2c8] sm:$0xff] }
 0x77e   :  { %v10562_v59 = vpack.c.bf16 %v7921_v53, %v7920_v33  ;;  %v7938_v53 = vld [vmem:[%s14155_s12 + $0x240] sm:$0xff] }
 0x780   :  { %10525 = vmatpush3.bf16.msra.mxu0 %v10524_v4  ;;  %v7905_v4 = vld [vmem:[%s14155_s12 + $0x138] sm:$0xff] }
 0x781   :  { %10527 = vmatprep.subr.bf16.mxu0 %v10526_v27  ;;  %v7922_v27 = vld [vmem:[%s14155_s12 + $0x1c0] sm:$0xff]  ;;  %v10564_v14 = vpack.c.bf16 %v7905_v4, %v7904_v26  ;;  %v7957_v26 = vld [vmem:[%s14155_s12 + $0x2d8] sm:$0xff] }
 0x784   :  { %10529 = vmatpush3.bf16.msra.mxu0 %v10528_v56  ;;  %v10566_v56 = vpack.c.bf16 %v7923_v17, %v7922_v27  ;;  %v7940_v17 = vld [vmem:[%s14155_s12 + $0x250] sm:$0xff] }
 0x785   :  { %10531 = vmatprep.subr.bf16.mxu0 %v10530_v0  ;;  %v7906_v0 = vld [vmem:[%s14155_s12 + $0x140] sm:$0xff] }
 0x786   :  { %v10568_v30 = vpack.c.bf16 %v7907_v35, %v7906_v0  ;;  %v7942_v35 = vld [vmem:[%s14155_s12 + $0x260] sm:$0xff] }
 0x788   :  { %10533 = vmatpush3.bf16.msra.mxu0 %v10532_v38  ;;  %v10570_v38 = vpack.c.bf16 %v7925_v19, %v7924_v28  ;;  %v7943_v28 = vld [vmem:[%s14155_s12 + $0x268] sm:$0xff]  ;;  %v7960_v19 = vld [vmem:[%s14155_s12 + $0x2f0] sm:$0xff] }
 0x789   :  { %10535 = vmatprep.subr.bf16.mxu0 %v10534_v12  ;;  %v7908_v12 = vld [vmem:[%s14155_s12 + $0x150] sm:$0xff] }
 0x78a   :  { %v10572_v9 = vpack.c.bf16 %v7909_v16, %v7908_v12  ;;  %v7944_v16 = vld [vmem:[%s14155_s12 + $0x270] sm:$0xff] }
 0x78c   :  { %10537 = vmatpush3.bf16.msra.mxu0 %v10536_v61  ;;  %v10574_v61 = vpack.c.bf16 %v7927_v21, %v7926_v34  ;;  %v7945_v34 = vld [vmem:[%s14155_s12 + $0x278] sm:$0xff] }
 0x78d   :  { %10539 = vmatprep.subr.bf16.mxu0 %v10538_v50  ;;  %v7910_v50 = vld [vmem:[%s14155_s12 + $0x160] sm:$0xff]  ;;  %v10612_v21 = vpack.c.bf16 %v7945_v34, %v7944_v16 }
 0x78e   :  { %v10576_v13 = vpack.c.bf16 %v7911_v48, %v7910_v50  ;;  %v8173_v50 = vld [vmem:[%s14156_s13 + $0x8] sm:$0xff] }
 0x790   :  { %10541 = vmatpush3.bf16.msra.mxu0 %v10540_v57  ;;  %v10578_v57 = vpack.c.bf16 %v7929_v36, %v7928_v20 }
 0x791   :  { %10543 = vmatprep.subr.bf16.mxu0 %v10542_v8  ;;  %v7912_v8 = vld [vmem:[%s14155_s12 + $0x170] sm:$0xff] }
 0x792   :  { %v10580_v10 = vpack.c.bf16 %v7913_v37, %v7912_v8 }
 0x794   :  { %10545 = vmatpush3.bf16.msra.mxu0 %v10544_v24  ;;  %v10582_v24 = vpack.c.bf16 %v7947_v15, %v7946_v5 }
 0x795   :  { %10547 = vmatprep.subr.bf16.mxu0 %v10546_v49  ;;  %v7930_v49 = vld [vmem:[%s14155_s12 + $0x200] sm:$0xff] }
 0x796   :  { %v10584_v42 = vpack.c.bf16 %v7931_v6, %v7930_v49 }
 0x798   :  { %10549 = vmatpush3.bf16.msra.mxu0 %v10548_v40  ;;  %v10586_v40 = vpack.c.bf16 %v7949_v3, %v7948_v52 }
 0x799   :  { %10551 = vmatprep.subr.bf16.mxu0 %v10550_v45  ;;  %v7932_v45 = vld [vmem:[%s14155_s12 + $0x210] sm:$0xff] }
 0x79a   :  { %v10588_v44 = vpack.c.bf16 %v7933_v7, %v7932_v45 }
 0x7ce   :  { %v7719_v22 = vpop.f32.mrb[48].mxu0 }
 0x7cf   :  { %v7721_v63 = vpop.f32.mrb[49].mxu0 }
 0x7d0   :  { %8026 = vmatprep.mubr.f32.mxu0 %v7721_v63  ;;  %v7935_v63 = vld [vmem:[%s14155_s12 + $0x228] sm:$0xff] }
 0x7d1   :  { %8027 = vmatmul.mubr.f32.vlgmr.msra.gmra.mrb[54].mxu0 %v7719_v22  ;;  %v10590_v22 = vpack.c.bf16 %v7951_v11, %v7950_v32  ;;  %v10215_v11 = vld [vmem:[#allocation23] ss:$0 sm:$0xff] }
 0x7d2   :  { %10553 = vmatpush3.bf16.msra.mxu0 %v10552_v41  ;;  %v7934_v41 = vld [vmem:[%s14155_s12 + $0x220] sm:$0xff] }
 0x7d3   :  { %10555 = vmatprep.subr.bf16.mxu0 %v10554_v54  ;;  %v7952_v54 = vld [vmem:[%s14155_s12 + $0x2b0] sm:$0xff]  ;;  %v10592_v51 = vpack.c.bf16 %v7935_v63, %v7934_v41 }
 0x7d4   :  { %v10594_v46 = vpack.c.bf16 %v7953_v31, %v7952_v54  ;;  %v12551_v31 = vmov 1966171168  }
 0x7d6   :  { %10557 = vmatpush3.bf16.msra.mxu0 %v10556_v43  ;;  %v7937_v43 = vld [vmem:[%s14155_s12 + $0x238] sm:$0xff] }
 0x7d7   :  { %10559 = vmatprep.subr.bf16.mxu0 %v10558_v18  ;;  %v7954_v18 = vld [vmem:[%s14155_s12 + $0x2c0] sm:$0xff]  ;;  %v10596_v47 = vpack.c.bf16 %v7937_v43, %v7936_v2 }
 0x7d8   :  { %v7790_v55 = vpop.f32.mrb[50].mxu0  ;;  %v10598_v33 = vpack.c.bf16 %v7955_v29, %v7954_v18 }
 0x7d9   :  { %v7792_v25 = vpop.f32.mrb[51].mxu0 }
 0x7da   :  { %10561 = vmatpush3.bf16.msra.mxu0 %v10560_v23  ;;  %8096 = vmatprep.mubr.f32.mxu0 %v7792_v25  ;;  %v7939_v23 = vld [vmem:[%s14155_s12 + $0x248] sm:$0xff]  ;;  %v7958_v25 = vld [vmem:[%s14155_s12 + $0x2e0] sm:$0xff] }
 0x7db   :  { %10563 = vmatprep.subr.bf16.mxu0 %v10562_v59  ;;  %v7956_v59 = vld [vmem:[%s14155_s12 + $0x2d0] sm:$0xff]  ;;  %v10600_v4 = vpack.c.bf16 %v7939_v23, %v7938_v53 }
 0x7dc   :  { %v10602_v27 = vpack.c.bf16 %v7957_v26, %v7956_v59 }
 0x7de   :  { %10565 = vmatpush3.bf16.msra.mxu0 %v10564_v14  ;;  %v7959_v14 = vld [vmem:[%s14155_s12 + $0x2e8] sm:$0xff] }
 0x7df   :  { %10567 = vmatprep.subr.bf16.mxu0 %v10566_v56  ;;  %v10606_v0 = vpack.c.bf16 %v7959_v14, %v7958_v25 }
 0x7e2   :  { %10569 = vmatpush3.bf16.msra.mxu0 %v10568_v30  ;;  %v7961_v30 = vld [vmem:[%s14155_s12 + $0x2f8] sm:$0xff] }
 0x7e3   :  { %10571 = vmatprep.subr.bf16.mxu0 %v10570_v38  ;;  %v10608_v38 = vpack.c.bf16 %v7943_v28, %v7942_v35  ;;  %v10610_v12 = vpack.c.bf16 %v7961_v30, %v7960_v19 }
 0x7e6   :  { %10573 = vmatpush3.bf16.msra.mxu0 %v10572_v9  ;;  %v12549_v9 = vmov 0.0|0.0  }
 0x7e7   :  { %10575 = vmatprep.subr.bf16.mxu0 %v10574_v61  ;;  %v8172_v61 = vld [vmem:[%s14156_s13] sm:$0xff] }
 0x7e8   :  { %v10615_v20 = vpack.c.bf16 %v8173_v50, %v8172_v61 }
 0x7ea   :  { %10577 = vmatpush3.bf16.msra.mxu0 %v10576_v13  ;;  %v8174_v13 = vld [vmem:[%s14156_s13 + $0x10] sm:$0xff] }
 0x7eb   :  { %10579 = vmatprep.subr.bf16.mxu0 %v10578_v57  ;;  %v8175_v57 = vld [vmem:[%s14156_s13 + $0x18] sm:$0xff] }
 0x7ec   :  { %v10618_v8 = vpack.c.bf16 %v8175_v57, %v8174_v13 }
 0x7ee   :  { %10581 = vmatpush3.bf16.msra.mxu0 %v10580_v10  ;;  %v8176_v10 = vld [vmem:[%s14156_s13 + $0x20] sm:$0xff] }
 0x7ef   :  { %10583 = vmatprep.subr.bf16.mxu0 %v10582_v24  ;;  %v8177_v24 = vld [vmem:[%s14156_s13 + $0x28] sm:$0xff] }
 0x7f0   :  { %v10621_v49 = vpack.c.bf16 %v8177_v24, %v8176_v10  ;;  %v8361_v24 = vld [vmem:[#allocation25] sm:$0xff] }
 0x7f1   :  { %8097 = vmatmul.mubr.f32.vlgmr.msra.gmra.mrb[56].mxu0 %v7790_v55  ;;  %v7941_v55 = vld [vmem:[%s14155_s12 + $0x258] sm:$0xff]  ;;  %s9395_s12 = sshll.u32 %s12553_s0, 4  ;;  %s9396_s12 = int_to_ptr.vmem [resolvable:$true] %s9395_s12 }
 0x7f2   :  { %10585 = vmatpush3.bf16.msra.mxu0 %v10584_v42  ;;  %v10604_v56 = vpack.c.bf16 %v7941_v55, %v7940_v17  ;;  %s12485_s5 = scalar_lea.vmem %s9396_s12, 32  ;;  %p12490_p9 = scmp.lt.s32.totalorder %s9396_s12, %s9396_s12 }
 0x7f3   :  { %10587 = vmatprep.subr.bf16.mxu0 %v10586_v40  ;;  %p12486_p8 = scmp.ne.s32.totalorder %s9396_s12, %s12485_s5  ;;  %p12491_p10 = scmp.lt.s32.totalorder %s12485_s5, %s12485_s5 }
 0x7f5   :  { %p12492_p11 = por %p12491_p10, %p12490_p9 }
 0x7f6   :  { %10589 = vmatpush3.bf16.msra.mxu0 %v10588_v44 }
 0x7f7   :  { %10591 = vmatprep.subr.bf16.mxu0 %v10590_v22  ;;  %p12493_p12 = pnand %p12492_p11, %p12486_p8 }
 0x7fa   :  { %10593 = vmatpush3.bf16.msra.mxu0 %v10592_v51  ;;  %v8274_v51 = vunpack.c.l.s4 %v12551_v31 }
 0x7fb   :  { %10595 = vmatprep.subr.bf16.mxu0 %v10594_v46 }
 0x7fc   :  { %v8275_v46 = vunpack.c.0.s8 %v8274_v51 }
 0x7fe   :  { %10597 = vmatpush3.bf16.msra.mxu0 %v10596_v47  ;;  %v13930_v2 = vsub.s32 %v8275_v46, %v12914_v58 }
 0x7ff   :  { %10599 = vmatprep.subr.bf16.mxu0 %v10598_v33 }
 0x802   :  { %10601 = vmatpush3.bf16.msra.mxu0 %v10600_v4 }
 0x803   :  { %10603 = vmatprep.subr.bf16.mxu0 %v10602_v27 }
 0x806   :  { %10605 = vmatpush3.bf16.msra.mxu0 %v10604_v56 }
 0x807   :  { %10607 = vmatprep.subr.bf16.mxu0 %v10606_v0 }
 0x80a   :  { %10609 = vmatpush3.bf16.msra.mxu0 %v10608_v38 }
 0x80b   :  { %10611 = vmatprep.subr.bf16.mxu0 %v10610_v12 }
 0x80e   :  { %10613 = vmatpush3.bf16.msra.mxu0 %v10612_v21 }
 0x80f   :  { %10614 = vmatprep.subr.bf16.mxu0 %v12549_v9 }
 0x84e   :  { %v7861_v48 = vpop.f32.mrb[52].mxu0 }
 0x84f   :  { %v7863_v36 = vpop.f32.mrb[53].mxu0 }
 0x850   :  { %8166 = vmatprep.mubr.f32.mxu0 %v7863_v36 }
 0x851   :  { %8167 = vmatmul.mubr.f32.vlgmr.msra.gmra.mrb[58].mxu0 %v7861_v48 }
 0x852   :  { %10616 = vmatpush3.bf16.msra.mxu0 %v10615_v20  ;;  %10411 = vmatprep.mubr.msk.f32.mxu0 %vm12550_vm10, %v12548_v1 }
 0x853   :  { %10617 = vmatprep.subr.bf16.mxu0 %v12549_v9 }
 0x856   :  { %10619 = vmatpush3.bf16.msra.mxu0 %v10618_v8 }
 0x857   :  { %10620 = vmatprep.subr.bf16.mxu0 %v12549_v9 }
 0x85a   :  { %10622 = vmatpush3.bf16.msra.mxu0 %v10621_v49  ;;  %v8372_v49 = vand.u32 127, %v637_v39  ;;  %v10221_v39 = vld [vmem:[%s14156_s13 + $0x40] sm:$0xff] }
 0x85b   :  { %10414 = vmatprep.subr.mxu0 %v12548_v1 }
 0x8a4   :  { %v10283_v37 = vpop.f32.mrb[54].mxu0 }
 0x8a5   :  { %v10284_v5 = vpop.f32.mrb[55].mxu0 }
 0x8a6   :  { %v10285_v15 = vadd.f32 %v10284_v5, %v10283_v37 }
 0x8c4   :  { %v10318_v6 = vpop.f32.mrb[56].mxu0 }
 0x8c5   :  { %v10319_v52 = vpop.f32.mrb[57].mxu0 }
 0x8c6   :  { %v10320_v3 = vadd.f32 %v10319_v52, %v10318_v6  ;;  %v13952_v6 = vsub.s32 %v8372_v49, %v12914_v58  ;;  %v10219_v52 = vld [vmem:[%s14156_s13 + $0x30] sm:$0xff]  ;;  %v10222_v58 = vld [vmem:[%s14156_s13 + $0x48] sm:$0xff] }
 0x8c8   :  { %v8099_v42 = vadd.f32 %v10320_v3, %v10285_v15  ;;  %v10220_v3 = vld [vmem:[%s14156_s13 + $0x38] sm:$0xff] }
 0x924   :  { %v10353_v40 = vpop.f32.mrb[58].mxu0 }
 0x925   :  { %v10354_v45 = vpop.f32.mrb[59].mxu0 }
 0x926   :  { %v10355_v7 = vadd.f32 %v10354_v45, %v10353_v40 }
 0x928   :  { %v8169_v32 = vadd.f32 %v10355_v7, %v8099_v42 }
 0x92a   :  { %10412 = vmatmul.mubr.msk.f32.vlgmr.msra.gmra.mrb[60].mxu0 %vm264_vm1, %v8169_v32  ;;  %v10624_v32 = vpack.c.bf16 %v10220_v3, %v10219_v52 }
 0x92b   :  { %10416 = vmatprep.mubr.msk.f32.mxu0 %vm12550_vm10, %v12548_v1  ;;  %10415 = vmatpush3.msra.mxu0 %v8361_v24 }
 0x92c   :  { %10623 = vmatprep.subr.bf16.mxu0 %v12549_v9 }
 0x9fd   :  { %v8254_v44 = vpop.f32.mrb[60].mxu0 }
 0x9fe   :  { %v8255_v22 = vadd.f32 %v10215_v11, %v8254_v44  ;;  %v10413_v41 = vpop.f32.mrb[61].mxu0  ;;  %v10627_v44 = vpack.c.bf16 %v10222_v58, %v10221_v39 }
 0x9ff   :  { %v10224_v41 = vld [vmem:[%s14156_s13 + $0x58] sm:$0xff] }
 0xa00   :  { %v8268_v63 = vrot.slane %v8255_v22, %v12920_v62  ;;  %v8261_v54 = vrot.slane %v8255_v22, %v12917_v60  ;;  %v8279_v43 = vrot.slane %v8255_v22, %v13930_v2  ;;  %v10223_v22 = vld [vmem:[%s14156_s13 + $0x50] sm:$0xff] }
 0xa02   :  { %8270 = vbcast.lane.b32.xlu0 %v8268_v63, 256  ;;  %8263 = vbcast.lane.b32.xlu1 %v8261_v54, 256  ;;  %v8280_v18 = vcombine.high %v8279_v43, %v8279_v43  ;;  %v8287_v47 = vrot.slane %v8279_v43, %v13930_v2  ;;  %v10630_v63 = vpack.c.bf16 %v10224_v41, %v10223_v22  ;;  %v10217_v54 = vld [vmem:[#allocation26] ss:$0 sm:$0xff]  ;;  %v10225_v43 = vld [vmem:[#allocation23 + $0x1] ss:$0 sm:$0xff] }
 0xa03   :  { %v10231_v41 = vld [vmem:[%s14156_s13 + $0x70] sm:$0xff] }
 0xa04   :  { %v8294_v29 = vrot.slane %v8280_v18, %v13930_v2  ;;  %v8298_v53 = vrot.slane %v8287_v47, %v12917_v60 }
 0xa06   :  { %v8302_v33 = vrot.slane %v8294_v29, %v12917_v60 }
 0xa74   :  { %v8271_v23 = vpop.permute.xlu0 %8270  ;;  %v8264_v59 = vpop.permute.xlu1 %8263 }
 0xa75   :  { %v8306_v26 = vmul.f32 %v8302_v33, %v8271_v23  ;;  %v8305_v4 = vmul.f32 %v8298_v53, %v8264_v59 }
 0xa77   :  { %v8311_v27 = vsel %vm8307_vm11, %v8306_v26, -inf  ;;  %v8308_v17 = vsel %vm8307_vm11, %v8305_v4, -inf }
 0xa78   :  { %8312 = vmax.xlane.f32.xlu0 %v8311_v27  ;;  %8309 = vmax.xlane.f32.xlu1 %v8308_v17 }
 0xb05   :  { %v8313_v55 = vpop.xlane.xlu0 %8312  ;;  %v8310_v25 = vpop.xlane.xlu1 %8309 }
 0xb06   :  { %v8315_v14 = vsub.f32 %v8306_v26, %v8313_v55  ;;  %v8314_v56 = vsub.f32 %v8305_v4, %v8310_v25 }
 0xb08   :  { %v8318_v0 = vmul.f32 1.442695, %v8315_v14  ;;  %v8316_v35 = vmul.f32 1.442695, %v8314_v56 }
 0xb0a   :  { %12119 = vpow2.f32 %v8318_v0 }
 0xb0b   :  { %12121 = vpow2.f32 %v8316_v35 }
 0xb14   :  { %v12120_v28 = vpop.eup %12119 }
 0xb15   :  { %v12122_v19 = vpop.eup %12121  ;;  %8324 = vrot.lane.b32.xlu1 %v12120_v28, %s12552_s29 }
 0xb16   :  { %8322 = vrot.lane.b32.xlu0 %v12122_v19, %s12552_s29 }
 0xb87   :  { %v8325_v30 = vpop.permute.xlu1 %8324 }
 0xb88   :  { %v8323_v38 = vpop.permute.xlu0 %8322  ;;  %v8332_v12 = vsel %vm8328_vm12, %v8325_v30, 0.0 }
 0xb89   :  { %v8329_v16 = vsel %vm8328_vm12, %v8323_v38, 0.0  ;;  %8333 = vadd.xlane.f32.xlu0 %v8332_v12 }
 0xb8a   :  { %8330 = vadd.xlane.f32.xlu1 %v8329_v16 }
 0xb9b   :  { %8341 = vrot.lane.b32.xlu1 %v8302_v33, %s12552_s29 }
 0xb9f   :  { %8339 = vrot.lane.b32.xlu0 %v8298_v53, %s12552_s29 }
 0xc16   :  { %v8334_v34 = vpop.xlane.xlu0 %8333 }
 0xc17   :  { %12123 = vrcp.f32 %v8334_v34  ;;  %v8331_v21 = vpop.xlane.xlu1 %8330 }
 0xc18   :  { %12125 = vrcp.f32 %v8331_v21 }
 0xc1a   :  { %v8340_v13 = vpop.permute.xlu0 %8339 }
 0xc1b   :  { %v8342_v36 = vpop.permute.xlu1 %8341 }
 0xc21   :  { %v12124_v61 = vpop.eup %12123 }
 0xc22   :  { %v12126_v50 = vpop.eup %12125  ;;  %v8338_v48 = vmul.f32 %v12124_v61, %v12120_v28 }
 0xc23   :  { %v8336_v20 = vmul.f32 %v12126_v50, %v12122_v19 }
 0xc24   :  { %v8346_v57 = vmul.f32 %v8342_v36, %v8338_v48 }
 0xc25   :  { %v8345_v8 = vmul.f32 %v8340_v13, %v8336_v20 }
 0xc26   :  { %8351 = vrot.lane.b32.xlu0 %v8346_v57, %s12552_s29 }
 0xc27   :  { %8349 = vrot.lane.b32.xlu1 %v8345_v8, %s12552_s29 }
 0xc98   :  { %v8352_v37 = vpop.permute.xlu0 %8351 }
 0xc99   :  { %v8350_v5 = vpop.permute.xlu1 %8349  ;;  %v8358_v15 = vsel %vm8328_vm12, %v8352_v37, 0.0 }
 0xc9a   :  { %8359 = vadd.xlane.f32.xlu0 %v8358_v15  ;;  %v8355_v10 = vsel %vm8328_vm12, %v8350_v5, 0.0 }
 0xc9b   :  { %8356 = vadd.xlane.f32.xlu1 %v8355_v10 }
 0xd27   :  { %v8360_v42 = vpop.xlane.xlu0 %8359 }
 0xd28   :  { %v8380_v40 = vrot.slane %v8360_v42, %v13952_v6  ;;  %v8357_v45 = vpop.xlane.xlu1 %8356 }
 0xd29   :  { %v8376_v7 = vrot.slane %v8357_v45, %v13952_v6  ;;  %v8645_v45 = vld [vmem:[#allocation25 + $0x8] sm:$0xff] }
 0xd2b   :  { %v8382_v11 = vsel %vm8381_vm13, %v8380_v40, %v8376_v7  ;;  %v10229_v7 = vld [vmem:[%s14156_s13 + $0x60] sm:$0xff] }
 0xd2c   :  { %10417 = vmatmul.mubr.msk.f32.vlgmr.msra.gmra.mrb[62].mxu0 %vm8328_vm12, %v8382_v11 }
 0xd2d   :  { %10625 = vmatpush3.bf16.msra.mxu0 %v10624_v32  ;;  %10431 = vmatprep.mubr.msk.f32.mxu0 %vm12550_vm10, %v12548_v1  ;;  %v10230_v32 = vld [vmem:[%s14156_s13 + $0x68] sm:$0xff] }
 0xd2e   :  { %10626 = vmatprep.subr.bf16.mxu0 %v12549_v9  ;;  %v10633_v22 = vpack.c.bf16 %v10230_v32, %v10229_v7 }
 0xd31   :  { %10628 = vmatpush3.bf16.msra.mxu0 %v10627_v44 }
 0xd32   :  { %10629 = vmatprep.subr.bf16.mxu0 %v12549_v9 }
 0xd35   :  { %10631 = vmatpush3.bf16.msra.mxu0 %v10630_v63  ;;  %v10232_v63 = vld [vmem:[%s14156_s13 + $0x78] sm:$0xff] }
 0xd36   :  { %10434 = vmatprep.subr.mxu0 %v12548_v1 }
 0xdff   :  { %v8451_v31 = vpop.f32.mrb[62].mxu0 }
 0xe00   :  { %v8452_v51 = vadd.f32 %v10217_v54, %v8451_v31  ;;  %v10418_v46 = vpop.f32.mrb[63].mxu0  ;;  %v10636_v31 = vpack.c.bf16 %v10232_v63, %v10231_v41 }
 0xe01   :  { %v10234_v46 = vld [vmem:[%s14156_s13 + $0x88] sm:$0xff] }
 0xe02   :  { %10432 = vmatmul.mubr.msk.f32.vlgmr.msra.gmra.mrb[64].mxu0 %vm264_vm1, %v8452_v51  ;;  %v10233_v51 = vld [vmem:[%s14156_s13 + $0x80] sm:$0xff] }
 0xe03   :  { %10436 = vmatprep.mubr.msk.f32.mxu0 %vm12550_vm10, %v12548_v1  ;;  %10435 = vmatpush3.msra.mxu0 %v8645_v45 }
 0xe04   :  { %10632 = vmatprep.subr.bf16.mxu0 %v12549_v9 }
 0xed5   :  { %v8539_v18 = vpop.f32.mrb[64].mxu0 }
 0xed6   :  { %v8540_v29 = vadd.f32 %v10225_v43, %v8539_v18  ;;  %v10433_v47 = vpop.f32.mrb[65].mxu0  ;;  %v10639_v43 = vpack.c.bf16 %v10234_v46, %v10233_v51  ;;  %v10227_v18 = vld [vmem:[#allocation26 + $0x1] ss:$0 sm:$0xff]  ;;  %v10241_v46 = vld [vmem:[%s14156_s13 + $0xa0] sm:$0xff] }
 0xed8   :  { %v8553_v33 = vrot.slane %v8540_v29, %v12920_v62  ;;  %v8546_v53 = vrot.slane %v8540_v29, %v12917_v60  ;;  %v8564_v23 = vrot.slane %v8540_v29, %v13930_v2 }
 0xeda   :  { %8555 = vbcast.lane.b32.xlu1 %v8553_v33, 256  ;;  %8548 = vbcast.lane.b32.xlu0 %v8546_v53, 256  ;;  %v8565_v59 = vcombine.high %v8564_v23, %v8564_v23  ;;  %v8572_v4 = vrot.slane %v8564_v23, %v13930_v2  ;;  %v10235_v53 = vld [vmem:[#allocation23 + $0x2] ss:$0 sm:$0xff] }
 0xedc   :  { %v8579_v26 = vrot.slane %v8565_v59, %v13930_v2  ;;  %v8583_v17 = vrot.slane %v8572_v4, %v12917_v60 }
 0xede   :  { %v8587_v27 = vrot.slane %v8579_v26, %v12917_v60 }
 0xf4c   :  { %v8556_v55 = vpop.permute.xlu1 %8555  ;;  %v8549_v25 = vpop.permute.xlu0 %8548 }
 0xf4d   :  { %v8591_v14 = vmul.f32 %v8587_v27, %v8556_v55  ;;  %v8590_v56 = vmul.f32 %v8583_v17, %v8549_v25 }
 0xf4f   :  { %v8595_v0 = vsel %vm8307_vm11, %v8591_v14, -inf  ;;  %v8592_v35 = vsel %vm8307_vm11, %v8590_v56, -inf }
 0xf50   :  { %8596 = vmax.xlane.f32.xlu0 %v8595_v0  ;;  %8593 = vmax.xlane.f32.xlu1 %v8592_v35 }
 0xfdd   :  { %v8594_v28 = vpop.xlane.xlu1 %8593  ;;  %v8597_v19 = vpop.xlane.xlu0 %8596 }
 0xfde   :  { %v8598_v30 = vsub.f32 %v8590_v56, %v8594_v28  ;;  %v8599_v38 = vsub.f32 %v8591_v14, %v8597_v19 }
 0xfe0   :  { %v8600_v12 = vmul.f32 1.442695, %v8598_v30  ;;  %v8602_v16 = vmul.f32 1.442695, %v8599_v38 }
 0xfe2   :  { %12127 = vpow2.f32 %v8600_v12 }
 0xfe3   :  { %12129 = vpow2.f32 %v8602_v16 }
 0xfec   :  { %v12128_v34 = vpop.eup %12127 }
 0xfed   :  { %v12130_v21 = vpop.eup %12129  ;;  %8606 = vrot.lane.b32.xlu0 %v12128_v34, %s12552_s29 }
 0xfee   :  { %8608 = vrot.lane.b32.xlu1 %v12130_v21, %s12552_s29 }
0x105f   :  { %v8607_v61 = vpop.permute.xlu0 %8606 }
0x1060   :  { %v8609_v50 = vpop.permute.xlu1 %8608  ;;  %v8612_v48 = vsel %vm8328_vm12, %v8607_v61, 0.0 }
0x1061   :  { %v8615_v20 = vsel %vm8328_vm12, %v8609_v50, 0.0  ;;  %8613 = vadd.xlane.f32.xlu1 %v8612_v48 }
0x1062   :  { %8616 = vadd.xlane.f32.xlu0 %v8615_v20 }
0x1072   :  { %8624 = vrot.lane.b32.xlu1 %v8587_v27, %s12552_s29 }
0x1078   :  { %8622 = vrot.lane.b32.xlu0 %v8583_v17, %s12552_s29 }
0x10ee   :  { %v8614_v36 = vpop.xlane.xlu1 %8613 }
0x10ef   :  { %12131 = vrcp.f32 %v8614_v36  ;;  %v8617_v13 = vpop.xlane.xlu0 %8616 }
0x10f0   :  { %12133 = vrcp.f32 %v8617_v13 }
0x10f2   :  { %v8625_v10 = vpop.permute.xlu1 %8624 }
0x10f3   :  { %v8623_v15 = vpop.permute.xlu0 %8622 }
0x10f9   :  { %v12132_v57 = vpop.eup %12131 }
0x10fa   :  { %v12134_v8 = vpop.eup %12133  ;;  %v8619_v37 = vmul.f32 %v12132_v57, %v12128_v34 }
0x10fb   :  { %v8621_v5 = vmul.f32 %v12134_v8, %v12130_v21 }
0x10fc   :  { %v8628_v24 = vmul.f32 %v8623_v15, %v8619_v37 }
0x10fd   :  { %v8629_v49 = vmul.f32 %v8625_v10, %v8621_v5 }
0x10fe   :  { %8632 = vrot.lane.b32.xlu1 %v8628_v24, %s12552_s29 }
0x10ff   :  { %8634 = vrot.lane.b32.xlu0 %v8629_v49, %s12552_s29 }
0x1170   :  { %v8633_v52 = vpop.permute.xlu1 %8632 }
0x1171   :  { %v8635_v3 = vpop.permute.xlu0 %8634  ;;  %v8638_v42 = vsel %vm8328_vm12, %v8633_v52, 0.0 }
0x1172   :  { %8639 = vadd.xlane.f32.xlu1 %v8638_v42  ;;  %v8641_v40 = vsel %vm8328_vm12, %v8635_v3, 0.0 }
0x1173   :  { %8642 = vadd.xlane.f32.xlu0 %v8641_v40 }
0x11ff   :  { %v8640_v39 = vpop.xlane.xlu1 %8639 }
0x1200   :  { %v8659_v58 = vrot.slane %v8640_v39, %v13952_v6  ;;  %v8643_v11 = vpop.xlane.xlu0 %8642 }
0x1201   :  { %v8663_v44 = vrot.slane %v8643_v11, %v13952_v6  ;;  %v8927_v11 = vld [vmem:[#allocation25 + $0x10] sm:$0xff] }
0x1203   :  { %v8664_v54 = vsel %vm8381_vm13, %v8663_v44, %v8659_v58  ;;  %v10239_v44 = vld [vmem:[%s14156_s13 + $0x90] sm:$0xff] }
0x1204   :  { %10437 = vmatmul.mubr.msk.f32.vlgmr.msra.gmra.mrb[66].mxu0 %vm8328_vm12, %v8664_v54 }
0x1205   :  { %10634 = vmatpush3.bf16.msra.mxu0 %v10633_v22  ;;  %10451 = vmatprep.mubr.msk.f32.mxu0 %vm12550_vm10, %v12548_v1  ;;  %v10240_v22 = vld [vmem:[%s14156_s13 + $0x98] sm:$0xff] }
0x1206   :  { %10635 = vmatprep.subr.bf16.mxu0 %v12549_v9  ;;  %v10642_v51 = vpack.c.bf16 %v10240_v22, %v10239_v44  ;;  %v9209_v22 = vld [vmem:[#allocation25 + $0x18] sm:$0xff] }
0x1209   :  { %10637 = vmatpush3.bf16.msra.mxu0 %v10636_v31 }
0x120a   :  { %10638 = vmatprep.subr.bf16.mxu0 %v12549_v9 }
0x120d   :  { %10640 = vmatpush3.bf16.msra.mxu0 %v10639_v43  ;;  %v10242_v43 = vld [vmem:[%s14156_s13 + $0xa8] sm:$0xff] }
0x120e   :  { %10454 = vmatprep.subr.mxu0 %v12548_v1 }
0x12d7   :  { %v8733_v29 = vpop.f32.mrb[66].mxu0 }
0x12d8   :  { %v8734_v47 = vadd.f32 %v10227_v18, %v8733_v29  ;;  %v10438_v33 = vpop.f32.mrb[67].mxu0  ;;  %v10645_v29 = vpack.c.bf16 %v10242_v43, %v10241_v46 }
0x12d9   :  { %v10244_v33 = vld [vmem:[%s14156_s13 + $0xb8] sm:$0xff] }
0x12da   :  { %10452 = vmatmul.mubr.msk.f32.vlgmr.msra.gmra.mrb[68].mxu0 %vm264_vm1, %v8734_v47  ;;  %v10243_v47 = vld [vmem:[%s14156_s13 + $0xb0] sm:$0xff] }
0x12db   :  { %10456 = vmatprep.mubr.msk.f32.mxu0 %vm12550_vm10, %v12548_v1  ;;  %10455 = vmatpush3.msra.mxu0 %v8927_v11 }
0x12dc   :  { %10641 = vmatprep.subr.bf16.mxu0 %v12549_v9 }
0x13ad   :  { %v8821_v23 = vpop.f32.mrb[68].mxu0 }
0x13ae   :  { %v8822_v59 = vadd.f32 %v10235_v53, %v8821_v23  ;;  %v10453_v26 = vpop.f32.mrb[69].mxu0  ;;  %v10648_v53 = vpack.c.bf16 %v10244_v33, %v10243_v47  ;;  %v10237_v23 = vld [vmem:[#allocation26 + $0x2] ss:$0 sm:$0xff] }
0x13b0   :  { %v8835_v4 = vrot.slane %v8822_v59, %v12920_v62  ;;  %v8828_v27 = vrot.slane %v8822_v59, %v12917_v60  ;;  %v8846_v17 = vrot.slane %v8822_v59, %v13930_v2 }
0x13b2   :  { %8837 = vbcast.lane.b32.xlu1 %v8835_v4, 256  ;;  %8830 = vbcast.lane.b32.xlu0 %v8828_v27, 256  ;;  %v8847_v55 = vcombine.high %v8846_v17, %v8846_v17  ;;  %v8854_v14 = vrot.slane %v8846_v17, %v13930_v2  ;;  %v10245_v27 = vld [vmem:[#allocation23 + $0x3] ss:$0 sm:$0xff] }
0x13b4   :  { %v8861_v25 = vrot.slane %v8847_v55, %v13930_v2  ;;  %v8865_v0 = vrot.slane %v8854_v14, %v12917_v60 }
0x13b6   :  { %v8869_v56 = vrot.slane %v8861_v25, %v12917_v60 }
0x1424   :  { %v8838_v35 = vpop.permute.xlu1 %8837  ;;  %v8831_v28 = vpop.permute.xlu0 %8830 }
0x1425   :  { %v8873_v19 = vmul.f32 %v8869_v56, %v8838_v35  ;;  %v8872_v30 = vmul.f32 %v8865_v0, %v8831_v28 }
0x1427   :  { %v8877_v38 = vsel %vm8307_vm11, %v8873_v19, -inf  ;;  %v8874_v12 = vsel %vm8307_vm11, %v8872_v30, -inf }
0x1428   :  { %8878 = vmax.xlane.f32.xlu0 %v8877_v38  ;;  %8875 = vmax.xlane.f32.xlu1 %v8874_v12 }
0x14b5   :  { %v8876_v16 = vpop.xlane.xlu1 %8875  ;;  %v8879_v34 = vpop.xlane.xlu0 %8878 }
0x14b6   :  { %v8880_v21 = vsub.f32 %v8872_v30, %v8876_v16  ;;  %v8881_v61 = vsub.f32 %v8873_v19, %v8879_v34 }
0x14b8   :  { %v8882_v50 = vmul.f32 1.442695, %v8880_v21  ;;  %v8884_v48 = vmul.f32 1.442695, %v8881_v61 }
0x14ba   :  { %12135 = vpow2.f32 %v8882_v50 }
0x14bb   :  { %12137 = vpow2.f32 %v8884_v48 }
0x14c4   :  { %v12136_v20 = vpop.eup %12135 }
0x14c5   :  { %v12138_v36 = vpop.eup %12137  ;;  %8888 = vrot.lane.b32.xlu0 %v12136_v20, %s12552_s29 }
0x14c6   :  { %8890 = vrot.lane.b32.xlu1 %v12138_v36, %s12552_s29 }
0x1537   :  { %v8889_v13 = vpop.permute.xlu0 %8888 }
0x1538   :  { %v8891_v57 = vpop.permute.xlu1 %8890  ;;  %v8894_v8 = vsel %vm8328_vm12, %v8889_v13, 0.0 }
0x1539   :  { %v8897_v37 = vsel %vm8328_vm12, %v8891_v57, 0.0  ;;  %8895 = vadd.xlane.f32.xlu1 %v8894_v8 }
0x153a   :  { %8898 = vadd.xlane.f32.xlu0 %v8897_v37 }
0x154a   :  { %8906 = vrot.lane.b32.xlu1 %v8869_v56, %s12552_s29 }
0x1550   :  { %8904 = vrot.lane.b32.xlu0 %v8865_v0, %s12552_s29 }
0x15c6   :  { %v8896_v5 = vpop.xlane.xlu1 %8895 }
0x15c7   :  { %12139 = vrcp.f32 %v8896_v5  ;;  %v8899_v15 = vpop.xlane.xlu0 %8898 }
0x15c8   :  { %12141 = vrcp.f32 %v8899_v15 }
0x15ca   :  { %v8907_v42 = vpop.permute.xlu1 %8906 }
0x15cb   :  { %v8905_v3 = vpop.permute.xlu0 %8904 }
0x15d1   :  { %v12140_v10 = vpop.eup %12139 }
0x15d2   :  { %v12142_v24 = vpop.eup %12141  ;;  %v8901_v49 = vmul.f32 %v12140_v10, %v12136_v20 }
0x15d3   :  { %v8903_v52 = vmul.f32 %v12142_v24, %v12138_v36 }
0x15d4   :  { %v8910_v40 = vmul.f32 %v8905_v3, %v8901_v49 }
0x15d5   :  { %v8911_v45 = vmul.f32 %v8907_v42, %v8903_v52 }
0x15d6   :  { %8914 = vrot.lane.b32.xlu1 %v8910_v40, %s12552_s29 }
0x15d7   :  { %8916 = vrot.lane.b32.xlu0 %v8911_v45, %s12552_s29 }
0x1648   :  { %v8915_v7 = vpop.permute.xlu1 %8914 }
0x1649   :  { %v8917_v32 = vpop.permute.xlu0 %8916  ;;  %v8920_v39 = vsel %vm8328_vm12, %v8915_v7, 0.0 }
0x164a   :  { %8921 = vadd.xlane.f32.xlu1 %v8920_v39  ;;  %v8923_v58 = vsel %vm8328_vm12, %v8917_v32, 0.0 }
0x164b   :  { %8924 = vadd.xlane.f32.xlu0 %v8923_v58 }
0x16d7   :  { %v8922_v41 = vpop.xlane.xlu1 %8921 }
0x16d8   :  { %v8941_v63 = vrot.slane %v8922_v41, %v13952_v6  ;;  %v8925_v54 = vpop.xlane.xlu0 %8924  ;;  %v9301_v41 = vld [vmem:[%s14160_s17] sm:$0xff] }
0x16d9   :  { %v8945_v31 = vrot.slane %v8925_v54, %v13952_v6 }
0x16db   :  { %v8946_v18 = vsel %vm8381_vm13, %v8945_v31, %v8941_v63  ;;  %v9302_v63 = vld [vmem:[%s14160_s17 + $0x8] sm:$0xff] }
0x16dc   :  { %10457 = vmatmul.mubr.msk.f32.vlgmr.msra.gmra.mrb[70].mxu0 %vm8328_vm12, %v8946_v18  ;;  %v10651_v43 = vpack.c.bf16 %v9302_v63, %v9301_v41  ;;  %v9303_v18 = vld [vmem:[%s14160_s17 + $0x10] sm:$0xff] }
0x16dd   :  { %10643 = vmatpush3.bf16.msra.mxu0 %v10642_v51  ;;  %10471 = vmatprep.mubr.msk.f32.mxu0 %vm12550_vm10, %v12548_v1 }
0x16de   :  { %10644 = vmatprep.subr.bf16.mxu0 %v12549_v9 }
0x16e1   :  { %10646 = vmatpush3.bf16.msra.mxu0 %v10645_v29  ;;  %v9304_v29 = vld [vmem:[%s14160_s17 + $0x18] sm:$0xff] }
0x16e2   :  { %10647 = vmatprep.subr.bf16.mxu0 %v12549_v9  ;;  %v10654_v33 = vpack.c.bf16 %v9304_v29, %v9303_v18 }
0x16e5   :  { %10649 = vmatpush3.bf16.msra.mxu0 %v10648_v53  ;;  %v9306_v53 = vld [vmem:[%s14160_s17 + $0x28] sm:$0xff] }
0x16e6   :  { %10474 = vmatprep.subr.mxu0 %v12548_v1 }
0x17af   :  { %v9015_v59 = vpop.f32.mrb[70].mxu0 }
0x17b0   :  { %v9016_v26 = vadd.f32 %v10237_v23, %v9015_v59  ;;  %v10458_v4 = vpop.f32.mrb[71].mxu0  ;;  %v10247_v59 = vld [vmem:[#allocation26 + $0x3] ss:$0 sm:$0xff] }
0x17b2   :  { %10472 = vmatmul.mubr.msk.f32.vlgmr.msra.gmra.mrb[72].mxu0 %vm264_vm1, %v9016_v26 }
0x17b3   :  { %10476 = vmatprep.mubr.msk.f32.mxu0 %vm12550_vm10, %v12548_v1  ;;  %10475 = vmatpush3.msra.mxu0 %v9209_v22 }
0x17b4   :  { %10650 = vmatprep.subr.bf16.mxu0 %v12549_v9 }
0x1885   :  { %v9103_v17 = vpop.f32.mrb[72].mxu0 }
0x1886   :  { %v9104_v55 = vadd.f32 %v10245_v27, %v9103_v17  ;;  %v10473_v25 = vpop.f32.mrb[73].mxu0 }
0x1888   :  { %v9117_v14 = vrot.slane %v9104_v55, %v12920_v62  ;;  %v9110_v56 = vrot.slane %v9104_v55, %v12917_v60  ;;  %v9128_v0 = vrot.slane %v9104_v55, %v13930_v2 }
0x188a   :  { %9119 = vbcast.lane.b32.xlu1 %v9117_v14, 256  ;;  %9112 = vbcast.lane.b32.xlu0 %v9110_v56, 256  ;;  %v9129_v35 = vcombine.high %v9128_v0, %v9128_v0  ;;  %v9136_v19 = vrot.slane %v9128_v0, %v13930_v2 }
0x188c   :  { %v9143_v28 = vrot.slane %v9129_v35, %v13930_v2  ;;  %v9147_v38 = vrot.slane %v9136_v19, %v12917_v60 }
0x188e   :  { %v9151_v30 = vrot.slane %v9143_v28, %v12917_v60 }
0x18fc   :  { %v9120_v12 = vpop.permute.xlu1 %9119  ;;  %v9113_v16 = vpop.permute.xlu0 %9112 }
0x18fd   :  { %v9155_v34 = vmul.f32 %v9151_v30, %v9120_v12  ;;  %v9154_v21 = vmul.f32 %v9147_v38, %v9113_v16 }
0x18ff   :  { %v9159_v62 = vsel %vm8307_vm11, %v9155_v34, -inf  ;;  %v9156_v61 = vsel %vm8307_vm11, %v9154_v21, -inf }
0x1900   :  { %9160 = vmax.xlane.f32.xlu0 %v9159_v62  ;;  %9157 = vmax.xlane.f32.xlu1 %v9156_v61 }
0x198d   :  { %v9158_v50 = vpop.xlane.xlu1 %9157  ;;  %v9161_v48 = vpop.xlane.xlu0 %9160 }
0x198e   :  { %v9162_v20 = vsub.f32 %v9154_v21, %v9158_v50  ;;  %v9163_v36 = vsub.f32 %v9155_v34, %v9161_v48 }
0x1990   :  { %v9164_v13 = vmul.f32 1.442695, %v9162_v20  ;;  %v9166_v2 = vmul.f32 1.442695, %v9163_v36 }
0x1992   :  { %12143 = vpow2.f32 %v9164_v13 }
0x1993   :  { %12145 = vpow2.f32 %v9166_v2 }
0x199c   :  { %v12144_v57 = vpop.eup %12143 }
0x199d   :  { %v12146_v60 = vpop.eup %12145  ;;  %9170 = vrot.lane.b32.xlu0 %v12144_v57, %s12552_s29 }
0x199e   :  { %9172 = vrot.lane.b32.xlu1 %v12146_v60, %s12552_s29 }
0x1a0f   :  { %v9171_v8 = vpop.permute.xlu0 %9170 }
0x1a10   :  { %v9173_v37 = vpop.permute.xlu1 %9172  ;;  %v9176_v5 = vsel %vm8328_vm12, %v9171_v8, 0.0 }
0x1a11   :  { %v9179_v15 = vsel %vm8328_vm12, %v9173_v37, 0.0  ;;  %9177 = vadd.xlane.f32.xlu1 %v9176_v5 }
0x1a12   :  { %9180 = vadd.xlane.f32.xlu0 %v9179_v15 }
0x1a22   :  { %9188 = vrot.lane.b32.xlu1 %v9151_v30, %s12552_s29 }
0x1a28   :  { %9186 = vrot.lane.b32.xlu0 %v9147_v38, %s12552_s29 }
0x1a9e   :  { %v9178_v10 = vpop.xlane.xlu1 %9177 }
0x1a9f   :  { %12147 = vrcp.f32 %v9178_v10  ;;  %v9181_v24 = vpop.xlane.xlu0 %9180 }
0x1aa0   :  { %12149 = vrcp.f32 %v9181_v24 }
0x1aa2   :  { %v9189_v45 = vpop.permute.xlu1 %9188 }
0x1aa3   :  { %v9187_v40 = vpop.permute.xlu0 %9186 }
0x1aa9   :  { %v12148_v49 = vpop.eup %12147 }
0x1aaa   :  { %v12150_v52 = vpop.eup %12149  ;;  %v9183_v3 = vmul.f32 %v12148_v49, %v12144_v57 }
0x1aab   :  { %v9185_v42 = vmul.f32 %v12150_v52, %v12146_v60 }
0x1aac   :  { %v9192_v7 = vmul.f32 %v9187_v40, %v9183_v3 }
0x1aad   :  { %v9193_v32 = vmul.f32 %v9189_v45, %v9185_v42 }
0x1aae   :  { %9196 = vrot.lane.b32.xlu1 %v9192_v7, %s12552_s29 }
0x1aaf   :  { %9198 = vrot.lane.b32.xlu0 %v9193_v32, %s12552_s29 }
0x1b20   :  { %v9197_v39 = vpop.permute.xlu1 %9196 }
0x1b21   :  { %v9199_v58 = vpop.permute.xlu0 %9198  ;;  %v9202_v11 = vsel %vm8328_vm12, %v9197_v39, 0.0 }
0x1b22   :  { %9203 = vadd.xlane.f32.xlu1 %v9202_v11  ;;  %v9205_v44 = vsel %vm8328_vm12, %v9199_v58, 0.0 }
0x1b23   :  { %9206 = vadd.xlane.f32.xlu0 %v9205_v44 }
0x1baf   :  { %v9204_v54 = vpop.xlane.xlu1 %9203 }
0x1bb0   :  { %v9223_v31 = vrot.slane %v9204_v54, %v13952_v6  ;;  %v9207_v51 = vpop.xlane.xlu0 %9206 }
0x1bb1   :  { %v9227_v46 = vrot.slane %v9207_v51, %v13952_v6  ;;  %v9305_v6 = vld [vmem:[%s14160_s17 + $0x20] sm:$0xff] }
0x1bb2   :  { %v10657_v23 = vpack.c.bf16 %v9306_v53, %v9305_v6 }
0x1bb3   :  { %v9228_v47 = vsel %vm8381_vm13, %v9227_v46, %v9223_v31 }
0x1bb4   :  { %10477 = vmatmul.mubr.msk.f32.vlgmr.msra.gmra.mrb[74].mxu0 %vm8328_vm12, %v9228_v47 }
0x1bb5   :  { %10652 = vmatpush3.bf16.msra.mxu0 %v10651_v43  ;;  %10491 = vmatprep.mubr.msk.f32.mxu0 %vm12550_vm10, %v12548_v1  ;;  %v10249_v1 = vld [vmem:[#allocation28] ss:$0 sm:$0xff] }
0x1bb6   :  { %10653 = vmatprep.subr.bf16.mxu0 %v12549_v9 }
0x1bb9   :  { %10655 = vmatpush3.bf16.msra.mxu0 %v10654_v33 }
0x1bba   :  { %10656 = vmatprep.subr.bf16.mxu0 %v12549_v9 }
0x1bbd   :  { %10658 = vmatpush3.bf16.msra.mxu0 %v10657_v23 }
0x1c87   :  { %v9297_v26 = vpop.f32.mrb[74].mxu0 }
0x1c88   :  { %v9298_v4 = vadd.f32 %v10247_v59, %v9297_v26  ;;  %v10478_v27 = vpop.f32.mrb[75].mxu0 }
0x1c8a   :  { %10492 = vmatmul.mubr.msk.f32.vlgmr.msra.gmra.mrb[76].mxu0 %vm264_vm1, %v9298_v4 }
0x1d5d   :  { %v9383_v9 = vpop.f32.mrb[76].mxu0 }
0x1d5e   :  { %v9384_v17 = vadd.f32 %v10249_v1, %v9383_v9  ;;  %v10493_v55 = vpop.f32.mrb[77].mxu0 }
0x1d60   :  { %9388 = vst.msk [vmem:[#allocation29] sm:$0x3] %vm9387_vm14, %v9384_v17 }
0x1d61   :  { %12496 = shalt.err (!%p12493_p12)
}
0x1d62   :  { %s12497_s14 = scalar_lea.hbm %s14162_s19, 32 }
0x1d63   :  { %p12498_p13 = scmp.ne.s32.totalorder %s14162_s19, %s12497_s14  ;;  %p12501_p0 = scmp.lt.u32.totalorder %s12497_s14, %s14162_s19 }
0x1d65   :  { %p12503_p1 = pnand %p12501_p0, %p12498_p13 }
0x1d67   :  { %12506 = shalt.err (!%p12503_p1)
}
0x1d68   :  { %9398 = dma.vmem_to_hbm [thread:$0]  %s9396_s12, 32, %s14162_s19, [#allocation7]  }
0x1d69   :  { %12523 = dma.done.wait [#allocation7], 32  }
0x1d6a   :  { %12524 = vsyncadd [#allocation7], 4294967264 }
0x1d6b   :  { %9402 = vsyncpa [#allocation6], 1 }
0x1d6c   :  { %9403 = vsyncpa [#allocation9], 1 }
0x1d6d   :  { %9404 = vsyncpa [#allocation12], 1 }
0x1d6e   :  { %9405 = vsyncpa [#allocation15], 1 }
0x1d6f   :  { %9406 = vsyncpa [#allocation18], 1 }
0x1d70   :  { %9407 = vsyncpa [#allocation21], 1 }
0x1d71   :  { %9408 = vsyncpa [#allocation24], 1 }
0x1d72   :  { %9409 = vsyncpa [#allocation27], 1 }
0x1d73   :  { %9410 = vsyncpa [#allocation7], 1 }

</bundles_post_ra>
